<compile_context>
chip_gen: v7x
topology: tpu7x:2x2x1
jax: 0.10.0
libtpu: 0.0.40
codegen_flags: <defaults>
</compile_context>

<pallas_src>
import numpy as np
import jax
import jax.numpy as jnp
from jax.experimental import pallas as pl
from jax.experimental.pallas import tpu as pltpu


# ----------------------- module "parameters" (deterministic) -----------------------
SX = 1.1            # sigmax
SY = 1.1            # sigmay
WAVE_LENGTH1 = 0.1  # central frequency

# Optional (v6e/v7x): run the O(N^3) DFT matmuls with bf16 operands + f32 accumulation.
# Off by default: bf16 twiddle factors cost ~3 decimal digits on the DFT round trip, so
# enable only after tolerance-testing against the reference (per the performance review).
DFT_MATMUL_IN_BF16 = False


# ----------------------- filter construction (plain numpy glue) --------------------
def _mesh_range(size):
    rows, cols = size
    if cols % 2:
        x_values = np.arange(-(cols - 1) / 2.0, (cols - 1) / 2.0 + 1, dtype=np.float32)
    else:
        x_values = np.arange(-cols / 2.0, cols / 2.0, dtype=np.float32)
    if rows % 2:
        y_values = np.arange(-(rows - 1) / 2.0, (rows - 1) / 2.0 + 1, dtype=np.float32)
    else:
        y_values = np.arange(-rows / 2.0, rows / 2.0, dtype=np.float32)
    return np.meshgrid(x_values, y_values, indexing="ij")


def _gabor(cols, rows, f0, sx, sy, theta=0.0, offset=0.0):
    x, y = _mesh_range((cols, rows))
    x = np.fft.ifftshift(x)
    y = np.fft.ifftshift(y)
    rotx = x * np.cos(theta) + y * np.sin(theta)
    roty = -x * np.sin(theta) + y * np.cos(theta)
    g = (np.exp(-0.5 * (rotx ** 2 / sx ** 2 + roty ** 2 / sy ** 2)) / (2.0 * np.pi * sx * sy)
         * np.cos(2.0 * np.pi * f0 * rotx + offset))
    return g.astype(np.float32)


def _riesz_trans(cols, rows):
    u1, u2 = _mesh_range((rows, cols))
    u1 = np.fft.ifftshift(u1).astype(np.complex64)
    u2 = np.fft.ifftshift(u2).astype(np.complex64)
    qs = np.sqrt(u1 * u1 + u2 * u2)
    qs[0, 0] = 1.0
    h1 = (1j * u1 / qs).astype(np.complex64)
    h2 = (1j * u2 / qs).astype(np.complex64)
    return h1, h2


def _make_constants(H, W, G):
    """DFT matrix + frequency-domain filters.

    The filters are (a) pre-scaled by 1/N^2 so the inverse DFT can use plain conj(F) = (Fr, -Fi)
    (review item: drop Gr/Gi), (b) transposed (the kernel carries Xhat^T so that every matmul is a
    right-multiply on sublane-aligned row stacks) and (c) tiled G times along rows so one elementwise
    multiply covers the whole image group.
    """
    assert H == W, "Monogenic (like the torch reference broadcast) requires square images"
    N = H
    g = _gabor(cols=H, rows=W, f0=WAVE_LENGTH1, sx=SX, sy=SY)
    gf = np.fft.fft2(g).astype(np.complex64)        # FFT of the gabor filter
    h1, h2 = _riesz_trans(cols=H, rows=W)           # Riesz transfer functions
    inv_n2 = np.float32(1.0 / (N * N))
    k0 = gf * inv_n2
    k1 = (gf * h1) * inv_n2
    k2 = (gf * h2) * inv_n2

    # Symmetric forward DFT matrix F = Fr + i*Fi (fft2(x) = F @ x @ F); inverse uses conj(F) = Fr - i*Fi.
    kk = np.arange(N)
    ang = -2.0 * np.pi * np.outer(kk, kk) / N
    Fr = np.cos(ang).astype(np.float32)
    Fi = np.sin(ang).astype(np.float32)

    def tile_t(a):
        at = np.ascontiguousarray(np.asarray(a, np.float32).T)
        return np.tile(at, (G, 1))                  # (G*N, N)

    consts = (Fr, Fi,
              tile_t(k0.real), tile_t(k0.imag),
              tile_t(k1.real), tile_t(k1.imag),
              tile_t(k2.real), tile_t(k2.imag))
    return tuple(jnp.asarray(c) for c in consts)


# --------------------------------- kernel helpers ------------------------------------
def _atan_f32(v):
    """Cephes-style float32 arctangent; internal divisions use the (EUP) approx reciprocal."""
    t = jnp.abs(v)
    big = t > 2.414213562373095               # tan(3*pi/8)
    mid = (t > 0.41421356237309503) & (~big)  # tan(pi/8)
    xr = jnp.where(
        big, -pl.reciprocal(t, approx=True),
        jnp.where(mid, (t - 1.0) * pl.reciprocal(t + 1.0, approx=True), t))
    y0 = jnp.where(big, 1.5707963267948966, jnp.where(mid, 0.7853981633974483, 0.0))
    z = xr * xr
    p = ((8.05374449538e-2 * z - 1.38776856032e-1) * z + 1.99777106478e-1) * z - 3.33329491539e-1
    y = y0 + p * z * xr + xr
    return jnp.where(v < 0, -y, y)


def _scale_max_min(v):
    vmin = jnp.min(v, axis=(0, 1), keepdims=True)
    vmax = jnp.max(v, axis=(0, 1), keepdims=True)
    # Exact division on purpose: the arg-max pixel must come out as exactly 1.0 so the HSV
    # hue-category (hcat == 6) branch matches the torch reference; an approximate reciprocal
    # would land that pixel in a different hue sector.
    s = (v - vmin) / (vmax - vmin)
    # Same semantics as torch.nan_to_num(x, 1e-5): NaN -> 1e-5, +/-inf -> float32 max/min.
    return jnp.nan_to_num(s, nan=1e-5)


def _hsv_to_rgb_v1(h, c, m):
    """HSV -> RGB specialized for v == 1 (so c == s, m == 1 - s); same select table as torch."""
    dh = h * 6.0
    hcat = dh.astype(jnp.int32)               # trunc toward zero; dh >= 0 so this is floor
    fmodu = dh - 2.0 * jnp.floor(dh * 0.5)    # dh % 2
    x = c * (1.0 - jnp.abs(fmodu - 1.0))
    is0 = hcat == 0
    is1 = hcat == 1
    is2 = hcat == 2
    is3 = hcat == 3
    is4 = hcat == 4
    is5 = hcat == 5
    # hcat == 6 (h == 1.0 exactly) falls through every select -> (m, m, m), exactly as in torch.
    r = jnp.where(is0 | is5, c, jnp.where(is1 | is4, x, 0.0)) + m
    g = jnp.where(is1 | is2, c, jnp.where(is0 | is3, x, 0.0)) + m
    b = jnp.where(is3 | is4, c, jnp.where(is2 | is5, x, 0.0)) + m
    return r, g, b


# --------------------------------- Pallas kernel ------------------------------------
def _monogenic_kernel(x_ref, fr_ref, fi_ref,
                      k0r_ref, k0i_ref, k1r_ref, k1i_ref, k2r_ref, k2i_ref,
                      out_ref):
    G, C, N, _ = x_ref.shape

    Fr = fr_ref[...]
    Fi = fi_ref[...]

    def mm(a, b):
        if DFT_MATMUL_IN_BF16:
            a = a.astype(jnp.bfloat16)
            b = b.astype(jnp.bfloat16)
        return jnp.dot(a, b, preferred_element_type=jnp.float32)

    def blk_t(a, nblocks):
        # Transpose each (N, N) block of a row-stacked (nblocks*N, N) tensor (XLU work, off the MXU).
        if nblocks == 1:
            return a.T
        return jnp.concatenate([a[j * N:(j + 1) * N, :].T for j in range(nblocks)], axis=0)

    # ---- per-image channel mean, images row-stacked along the sublane axis: (G*N, N) ----
    inv_c = 1.0 / C

    def img_mean(b):
        acc = x_ref[b, 0].astype(jnp.float32)
        for c in range(1, C):
            acc = acc + x_ref[b, c].astype(jnp.float32)
        return acc * inv_c   # unrolled adds: identical codegen to jnp.mean, no exotic reductions

    if G > 1:
        xrows = jnp.concatenate([img_mean(b) for b in range(G)], axis=0)
    else:
        xrows = img_mean(0)

    # ---- forward DFT stage 1 (fused over images):  U_b = x_b @ F ----
    ur = mm(xrows, Fr)                       # (G*N, N)
    ui = mm(xrows, Fi)

    # Transpose each image block so the column transform is also a right-multiply.
    utr = blk_t(ur, G)
    uti = blk_t(ui, G)

    # ---- forward DFT stage 2 (fused over images):  Xhat_b^T = U_b^T @ F ----
    vtr = mm(utr, Fr) - mm(uti, Fi)          # (G*N, N)
    vti = mm(utr, Fi) + mm(uti, Fr)

    # ---- frequency-domain filtering (constants: transposed, 1/N^2-scaled, tiled over images) ----
    def filt(kr_ref, ki_ref):
        kr = kr_ref[...]
        ki = ki_ref[...]
        return vtr * kr - vti * ki, vtr * ki + vti * kr

    y0r, y0i = filt(k0r_ref, k0i_ref)
    y1r, y1i = filt(k1r_ref, k1i_ref)
    y2r, y2i = filt(k2r_ref, k2i_ref)
    ytr = jnp.concatenate([y0r, y1r, y2r], axis=0)   # (3*G*N, N), block j = filter*G + image
    yti = jnp.concatenate([y0i, y1i, y2i], axis=0)

    # ---- inverse DFT stage 1 (fused over filters+images):  W_{b,k}^T = Y_{b,k}^T @ conj(F) ----
    wtr = mm(ytr, Fr) + mm(yti, Fi)          # (3*G*N, N)
    wti = mm(yti, Fr) - mm(ytr, Fi)

    wr = blk_t(wtr, 3 * G)
    wi = blk_t(wti, 3 * G)

    # ---- inverse DFT stage 2 (fused):  R_{b,k} = Re(W_{b,k} @ conj(F)) ----
    rres = mm(wr, Fr) + mm(wi, Fi)           # (3*G*N, N) == ifft2(fft2(x_b) * K_k).real per block

    # ---- per-image epilogue ----
    for b in range(G):
        f = rres[b * N:(b + 1) * N, :]
        h1 = rres[(G + b) * N:(G + b + 1) * N, :]
        h2 = rres[(2 * G + b) * N:(2 * G + b + 1) * N, :]

        ori = _atan_f32(-h2 * pl.reciprocal(h1 + 1e-6, approx=True))   # atan(-h2 / (h1 + 1e-6))
        fr_amp = jnp.sqrt(h1 * h1 + h2 * h2) + 1e-6
        ft = _atan_f32(f * pl.reciprocal(fr_amp, approx=True))         # atan2(f, fr_amp), fr_amp > 0

        fts = _scale_max_min(ft)
        frs = _scale_max_min(fr_amp)
        oris = _scale_max_min(ori)

        c_sat = frs                # c = s * v with v == 1
        m_add = 1.0 - frs          # m = v - c
        r_o, g_o, b_o = _hsv_to_rgb_v1(oris, c_sat, m_add)   # "orientation" RGB
        r_v, g_v, b_v = _hsv_to_rgb_v1(fts, c_sat, m_add)    # "phase" RGB

        out_ref[b, 0] = r_o
        out_ref[b, 1] = g_o
        out_ref[b, 2] = b_o
        out_ref[b, 3] = r_v
        out_ref[b, 4] = g_v
        out_ref[b, 5] = b_v


# ----------------------------------- wrapper ----------------------------------------
def _pick_group(batch, n):
    """Images per grid step.  For small N this widens the matmuls and amortizes per-step overhead.

    Note: maximizing the group can leave a single grid step (e.g. B=2, N=16 -> G=2); on v7x that
    trades the second TensorCore for wider matmuls - acceptable here since the small-N regime is
    overhead-dominated (review item 4 explicitly targets it).
    """
    if n % 8 != 0:
        return 1
    best = 1
    for g in range(1, batch + 1):
        if batch % g == 0 and g * n <= 256 and g <= 8:
            best = g
    return best


def _monogenic_call(x, consts, G, *, buffered_constants):
    B, C, H, W = x.shape
    N = H
    grid = (B // G,)

    if buffered_constants:
        # Grid-invariant constants: single-buffer them (halves their VMEM footprint).
        def const_spec(shape):
            return pl.BlockSpec(shape, lambda b: (0, 0), pipeline_mode=pl.Buffered(1))
    else:
        def const_spec(shape):
            return pl.BlockSpec(shape, lambda b: (0, 0))

    in_specs = ([pl.BlockSpec((G, C, H, W), lambda b: (b, 0, 0, 0)),
                 const_spec((N, N)), const_spec((N, N))]
                + [const_spec((G * N, N)) for _ in range(6)])
    out_specs = pl.BlockSpec((G, 6, H, W), lambda b: (b, 0, 0, 0))

    # Rough VMEM budget (in/out double-buffered + constants + generous live-temp estimate).
    itemsize = 4
    block_bytes = (G * C * N * N + G * 6 * N * N) * itemsize * 2
    const_bytes = (2 * N * N + 6 * G * N * N) * itemsize
    live_bytes = 20 * 3 * G * N * max(N, 128) * itemsize
    vmem_limit = int(min(64 * 2 ** 20,
                         max(32 * 2 ** 20, 2 * (block_bytes + const_bytes + live_bytes))))

    cost = pl.CostEstimate(
        flops=int(46 * B * N ** 3 + 300 * B * N * N),
        transcendentals=int(6 * B * N * N),
        bytes_accessed=int((B * C * N * N + B * 6 * N * N) * itemsize + const_bytes),
    )

    return pl.pallas_call(
        _monogenic_kernel,
        out_shape=jax.ShapeDtypeStruct((B, 6, H, W), jnp.float32),
        grid_spec=pltpu.PrefetchScalarGridSpec(
            num_scalar_prefetch=0,
            grid=grid,
            in_specs=in_specs,
            out_specs=out_specs),
        compiler_params=pltpu.CompilerParams(
            dimension_semantics=("parallel",),
            vmem_limit_bytes=vmem_limit),
        cost_estimate=cost,
    )(x, *consts)


def monogenic_forward(x):
    """x: (B, C, H, W) float32 (NCHW) -> (B, 6, H, W) float32."""
    x = jnp.asarray(x, jnp.float32)
    B, C, H, W = x.shape
    G = _pick_group(B, H)
    consts = _make_constants(H, W, G)
    try:
        return _monogenic_call(x, consts, G, buffered_constants=True)
    except Exception:
        # Fallback if this JAX build rejects pipeline_mode=pl.Buffered(1) on constant operands.
        return _monogenic_call(x, consts, G, buffered_constants=False)


# ------------------------------------- main ------------------------------------------
if __name__ == "__main__":
    key = jax.random.PRNGKey(0)
    x = jax.random.normal(key, (2, 4, 16, 16), dtype=jnp.float32)
    out = monogenic_forward(x)
    out = jax.block_until_ready(out)
    assert out.shape == (2, 6, 16, 16), out.shape
    assert bool(jnp.all(jnp.isfinite(out)))
    print("KERNEL_OK")
</pallas_src>

<mosaic_0001>
module attributes {stable_mosaic.version = 11 : i64} {
  func.func @_monogenic_kernel(%arg0: i32, %arg1: memref<2x4x16x16xf32, #tpu.memory_space<vmem>>, %arg2: memref<16x16xf32, #tpu.memory_space<vmem>>, %arg3: memref<16x16xf32, #tpu.memory_space<vmem>>, %arg4: memref<32x16xf32, #tpu.memory_space<vmem>>, %arg5: memref<32x16xf32, #tpu.memory_space<vmem>>, %arg6: memref<32x16xf32, #tpu.memory_space<vmem>>, %arg7: memref<32x16xf32, #tpu.memory_space<vmem>>, %arg8: memref<32x16xf32, #tpu.memory_space<vmem>>, %arg9: memref<32x16xf32, #tpu.memory_space<vmem>>, %arg10: memref<2x6x16x16xf32, #tpu.memory_space<vmem>>) attributes {dimension_semantics = [#tpu.dimension_semantics<parallel>], iteration_bounds = array<i64: 1>, scalar_prefetch = 0 : i64, scratch_operands = 0 : i64, tpu.core_type = #tpu.core_type<tc>, window_params = [{transform_indices = @transform_0, window_bounds = array<i64: 2, 4, 16, 16>}, {pipeline_mode = #tpu.pipeline_mode<synchronous>, transform_indices = @transform_1, window_bounds = array<i64: 16, 16>}, {pipeline_mode = #tpu.pipeline_mode<synchronous>, transform_indices = @transform_2, window_bounds = array<i64: 16, 16>}, {pipeline_mode = #tpu.pipeline_mode<synchronous>, transform_indices = @transform_3, window_bounds = array<i64: 32, 16>}, {pipeline_mode = #tpu.pipeline_mode<synchronous>, transform_indices = @transform_4, window_bounds = array<i64: 32, 16>}, {pipeline_mode = #tpu.pipeline_mode<synchronous>, transform_indices = @transform_5, window_bounds = array<i64: 32, 16>}, {pipeline_mode = #tpu.pipeline_mode<synchronous>, transform_indices = @transform_6, window_bounds = array<i64: 32, 16>}, {pipeline_mode = #tpu.pipeline_mode<synchronous>, transform_indices = @transform_7, window_bounds = array<i64: 32, 16>}, {pipeline_mode = #tpu.pipeline_mode<synchronous>, transform_indices = @transform_8, window_bounds = array<i64: 32, 16>}, {transform_indices = @transform_9, window_bounds = array<i64: 2, 6, 16, 16>}]} {
    %c0 = arith.constant 0 : index
    %c0_0 = arith.constant 0 : index
    %0 = vector.load %arg2[%c0, %c0_0] : memref<16x16xf32, #tpu.memory_space<vmem>>, vector<16x16xf32>
    %c0_1 = arith.constant 0 : index
    %c0_2 = arith.constant 0 : index
    %1 = vector.load %arg3[%c0_1, %c0_2] : memref<16x16xf32, #tpu.memory_space<vmem>>, vector<16x16xf32>
    %c0_3 = arith.constant 0 : index
    %c0_4 = arith.constant 0 : index
    %c0_5 = arith.constant 0 : index
    %c0_6 = arith.constant 0 : index
    %2 = vector.load %arg1[%c0_3, %c0_4, %c0_5, %c0_6] : memref<2x4x16x16xf32, #tpu.memory_space<vmem>>, vector<1x1x16x16xf32>
    %3 = vector.shape_cast %2 : vector<1x1x16x16xf32> to vector<16x16xf32>
    %c0_7 = arith.constant 0 : index
    %c1 = arith.constant 1 : index
    %c0_8 = arith.constant 0 : index
    %c0_9 = arith.constant 0 : index
    %4 = vector.load %arg1[%c0_7, %c1, %c0_8, %c0_9] : memref<2x4x16x16xf32, #tpu.memory_space<vmem>>, vector<1x1x16x16xf32>
    %5 = vector.shape_cast %4 : vector<1x1x16x16xf32> to vector<16x16xf32>
    %6 = arith.addf %3, %5 : vector<16x16xf32>
    %c0_10 = arith.constant 0 : index
    %c2 = arith.constant 2 : index
    %c0_11 = arith.constant 0 : index
    %c0_12 = arith.constant 0 : index
    %7 = vector.load %arg1[%c0_10, %c2, %c0_11, %c0_12] : memref<2x4x16x16xf32, #tpu.memory_space<vmem>>, vector<1x1x16x16xf32>
    %8 = vector.shape_cast %7 : vector<1x1x16x16xf32> to vector<16x16xf32>
    %9 = arith.addf %6, %8 : vector<16x16xf32>
    %c0_13 = arith.constant 0 : index
    %c3 = arith.constant 3 : index
    %c0_14 = arith.constant 0 : index
    %c0_15 = arith.constant 0 : index
    %10 = vector.load %arg1[%c0_13, %c3, %c0_14, %c0_15] : memref<2x4x16x16xf32, #tpu.memory_space<vmem>>, vector<1x1x16x16xf32>
    %11 = vector.shape_cast %10 : vector<1x1x16x16xf32> to vector<16x16xf32>
    %12 = arith.addf %9, %11 : vector<16x16xf32>
    %cst = arith.constant 2.500000e-01 : f32
    %13 = vector.broadcast %cst : f32 to vector<16x16xf32>
    %14 = arith.mulf %12, %13 : vector<16x16xf32>
    %c1_16 = arith.constant 1 : index
    %c0_17 = arith.constant 0 : index
    %c0_18 = arith.constant 0 : index
    %c0_19 = arith.constant 0 : index
    %15 = vector.load %arg1[%c1_16, %c0_17, %c0_18, %c0_19] : memref<2x4x16x16xf32, #tpu.memory_space<vmem>>, vector<1x1x16x16xf32>
    %16 = vector.shape_cast %15 : vector<1x1x16x16xf32> to vector<16x16xf32>
    %c1_20 = arith.constant 1 : index
    %c1_21 = arith.constant 1 : index
    %c0_22 = arith.constant 0 : index
    %c0_23 = arith.constant 0 : index
    %17 = vector.load %arg1[%c1_20, %c1_21, %c0_22, %c0_23] : memref<2x4x16x16xf32, #tpu.memory_space<vmem>>, vector<1x1x16x16xf32>
    %18 = vector.shape_cast %17 : vector<1x1x16x16xf32> to vector<16x16xf32>
    %19 = arith.addf %16, %18 : vector<16x16xf32>
    %c1_24 = arith.constant 1 : index
    %c2_25 = arith.constant 2 : index
    %c0_26 = arith.constant 0 : index
    %c0_27 = arith.constant 0 : index
    %20 = vector.load %arg1[%c1_24, %c2_25, %c0_26, %c0_27] : memref<2x4x16x16xf32, #tpu.memory_space<vmem>>, vector<1x1x16x16xf32>
    %21 = vector.shape_cast %20 : vector<1x1x16x16xf32> to vector<16x16xf32>
    %22 = arith.addf %19, %21 : vector<16x16xf32>
    %c1_28 = arith.constant 1 : index
    %c3_29 = arith.constant 3 : index
    %c0_30 = arith.constant 0 : index
    %c0_31 = arith.constant 0 : index
    %23 = vector.load %arg1[%c1_28, %c3_29, %c0_30, %c0_31] : memref<2x4x16x16xf32, #tpu.memory_space<vmem>>, vector<1x1x16x16xf32>
    %24 = vector.shape_cast %23 : vector<1x1x16x16xf32> to vector<16x16xf32>
    %25 = arith.addf %22, %24 : vector<16x16xf32>
    %cst_32 = arith.constant 2.500000e-01 : f32
    %26 = vector.broadcast %cst_32 : f32 to vector<16x16xf32>
    %27 = arith.mulf %25, %26 : vector<16x16xf32>
    %28 = tpu.concatenate %14, %27 in 0 : vector<16x16xf32>, vector<16x16xf32> -> vector<32x16xf32>
    %cst_33 = arith.constant dense<0.000000e+00> : vector<32x16xf32>
    %29 = tpu.matmul %28, %0, %cst_33 {dimension_numbers = #tpu.dot_dimension_numbers<[1], [0], [0], [1], [0, 0, 1, 1], [], []>} : vector<32x16xf32>, vector<16x16xf32>, vector<32x16xf32> -> vector<32x16xf32>
    %cst_34 = arith.constant dense<0.000000e+00> : vector<32x16xf32>
    %30 = tpu.matmul %28, %1, %cst_34 {dimension_numbers = #tpu.dot_dimension_numbers<[1], [0], [0], [1], [0, 0, 1, 1], [], []>} : vector<32x16xf32>, vector<16x16xf32>, vector<32x16xf32> -> vector<32x16xf32>
    %31 = vector.extract_strided_slice %29 {offsets = [0, 0], sizes = [16, 16], strides = [1, 1]} : vector<32x16xf32> to vector<16x16xf32>
    %32 = tpu.transpose %31, [1, 0] : vector<16x16xf32> -> vector<16x16xf32>
    %33 = vector.extract_strided_slice %29 {offsets = [16, 0], sizes = [16, 16], strides = [1, 1]} : vector<32x16xf32> to vector<16x16xf32>
    %34 = tpu.transpose %33, [1, 0] : vector<16x16xf32> -> vector<16x16xf32>
    %35 = tpu.concatenate %32, %34 in 0 : vector<16x16xf32>, vector<16x16xf32> -> vector<32x16xf32>
    %36 = vector.extract_strided_slice %30 {offsets = [0, 0], sizes = [16, 16], strides = [1, 1]} : vector<32x16xf32> to vector<16x16xf32>
    %37 = tpu.transpose %36, [1, 0] : vector<16x16xf32> -> vector<16x16xf32>
    %38 = vector.extract_strided_slice %30 {offsets = [16, 0], sizes = [16, 16], strides = [1, 1]} : vector<32x16xf32> to vector<16x16xf32>
    %39 = tpu.transpose %38, [1, 0] : vector<16x16xf32> -> vector<16x16xf32>
    %40 = tpu.concatenate %37, %39 in 0 : vector<16x16xf32>, vector<16x16xf32> -> vector<32x16xf32>
    %cst_35 = arith.constant dense<0.000000e+00> : vector<32x16xf32>
    %41 = tpu.matmul %35, %0, %cst_35 {dimension_numbers = #tpu.dot_dimension_numbers<[1], [0], [0], [1], [0, 0, 1, 1], [], []>} : vector<32x16xf32>, vector<16x16xf32>, vector<32x16xf32> -> vector<32x16xf32>
    %cst_36 = arith.constant dense<0.000000e+00> : vector<32x16xf32>
    %42 = tpu.matmul %40, %1, %cst_36 {dimension_numbers = #tpu.dot_dimension_numbers<[1], [0], [0], [1], [0, 0, 1, 1], [], []>} : vector<32x16xf32>, vector<16x16xf32>, vector<32x16xf32> -> vector<32x16xf32>
    %43 = arith.subf %41, %42 : vector<32x16xf32>
    %cst_37 = arith.constant dense<0.000000e+00> : vector<32x16xf32>
    %44 = tpu.matmul %35, %1, %cst_37 {dimension_numbers = #tpu.dot_dimension_numbers<[1], [0], [0], [1], [0, 0, 1, 1], [], []>} : vector<32x16xf32>, vector<16x16xf32>, vector<32x16xf32> -> vector<32x16xf32>
    %cst_38 = arith.constant dense<0.000000e+00> : vector<32x16xf32>
    %45 = tpu.matmul %40, %0, %cst_38 {dimension_numbers = #tpu.dot_dimension_numbers<[1], [0], [0], [1], [0, 0, 1, 1], [], []>} : vector<32x16xf32>, vector<16x16xf32>, vector<32x16xf32> -> vector<32x16xf32>
    %46 = arith.addf %44, %45 : vector<32x16xf32>
    %c0_39 = arith.constant 0 : index
    %c0_40 = arith.constant 0 : index
    %47 = vector.load %arg4[%c0_39, %c0_40] : memref<32x16xf32, #tpu.memory_space<vmem>>, vector<32x16xf32>
    %c0_41 = arith.constant 0 : index
    %c0_42 = arith.constant 0 : index
    %48 = vector.load %arg5[%c0_41, %c0_42] : memref<32x16xf32, #tpu.memory_space<vmem>>, vector<32x16xf32>
    %49 = arith.mulf %43, %47 : vector<32x16xf32>
    %50 = arith.mulf %46, %48 : vector<32x16xf32>
    %51 = arith.subf %49, %50 : vector<32x16xf32>
    %52 = arith.mulf %43, %48 : vector<32x16xf32>
    %53 = arith.mulf %46, %47 : vector<32x16xf32>
    %54 = arith.addf %52, %53 : vector<32x16xf32>
    %c0_43 = arith.constant 0 : index
    %c0_44 = arith.constant 0 : index
    %55 = vector.load %arg6[%c0_43, %c0_44] : memref<32x16xf32, #tpu.memory_space<vmem>>, vector<32x16xf32>
    %c0_45 = arith.constant 0 : index
    %c0_46 = arith.constant 0 : index
    %56 = vector.load %arg7[%c0_45, %c0_46] : memref<32x16xf32, #tpu.memory_space<vmem>>, vector<32x16xf32>
    %57 = arith.mulf %43, %55 : vector<32x16xf32>
    %58 = arith.mulf %46, %56 : vector<32x16xf32>
    %59 = arith.subf %57, %58 : vector<32x16xf32>
    %60 = arith.mulf %43, %56 : vector<32x16xf32>
    %61 = arith.mulf %46, %55 : vector<32x16xf32>
    %62 = arith.addf %60, %61 : vector<32x16xf32>
    %c0_47 = arith.constant 0 : index
    %c0_48 = arith.constant 0 : index
    %63 = vector.load %arg8[%c0_47, %c0_48] : memref<32x16xf32, #tpu.memory_space<vmem>>, vector<32x16xf32>
    %c0_49 = arith.constant 0 : index
    %c0_50 = arith.constant 0 : index
    %64 = vector.load %arg9[%c0_49, %c0_50] : memref<32x16xf32, #tpu.memory_space<vmem>>, vector<32x16xf32>
    %65 = arith.mulf %43, %63 : vector<32x16xf32>
    %66 = arith.mulf %46, %64 : vector<32x16xf32>
    %67 = arith.subf %65, %66 : vector<32x16xf32>
    %68 = arith.mulf %43, %64 : vector<32x16xf32>
    %69 = arith.mulf %46, %63 : vector<32x16xf32>
    %70 = arith.addf %68, %69 : vector<32x16xf32>
    %71 = tpu.concatenate %51, %59, %67 in 0 : vector<32x16xf32>, vector<32x16xf32>, vector<32x16xf32> -> vector<96x16xf32>
    %72 = tpu.concatenate %54, %62, %70 in 0 : vector<32x16xf32>, vector<32x16xf32>, vector<32x16xf32> -> vector<96x16xf32>
    %cst_51 = arith.constant dense<0.000000e+00> : vector<96x16xf32>
    %73 = tpu.matmul %71, %0, %cst_51 {dimension_numbers = #tpu.dot_dimension_numbers<[1], [0], [0], [1], [0, 0, 1, 1], [], []>} : vector<96x16xf32>, vector<16x16xf32>, vector<96x16xf32> -> vector<96x16xf32>
    %cst_52 = arith.constant dense<0.000000e+00> : vector<96x16xf32>
    %74 = tpu.matmul %72, %1, %cst_52 {dimension_numbers = #tpu.dot_dimension_numbers<[1], [0], [0], [1], [0, 0, 1, 1], [], []>} : vector<96x16xf32>, vector<16x16xf32>, vector<96x16xf32> -> vector<96x16xf32>
    %75 = arith.addf %73, %74 : vector<96x16xf32>
    %cst_53 = arith.constant dense<0.000000e+00> : vector<96x16xf32>
    %76 = tpu.matmul %72, %0, %cst_53 {dimension_numbers = #tpu.dot_dimension_numbers<[1], [0], [0], [1], [0, 0, 1, 1], [], []>} : vector<96x16xf32>, vector<16x16xf32>, vector<96x16xf32> -> vector<96x16xf32>
    %cst_54 = arith.constant dense<0.000000e+00> : vector<96x16xf32>
    %77 = tpu.matmul %71, %1, %cst_54 {dimension_numbers = #tpu.dot_dimension_numbers<[1], [0], [0], [1], [0, 0, 1, 1], [], []>} : vector<96x16xf32>, vector<16x16xf32>, vector<96x16xf32> -> vector<96x16xf32>
    %78 = arith.subf %76, %77 : vector<96x16xf32>
    %79 = vector.extract_strided_slice %75 {offsets = [0, 0], sizes = [16, 16], strides = [1, 1]} : vector<96x16xf32> to vector<16x16xf32>
    %80 = tpu.transpose %79, [1, 0] : vector<16x16xf32> -> vector<16x16xf32>
    %81 = vector.extract_strided_slice %75 {offsets = [16, 0], sizes = [16, 16], strides = [1, 1]} : vector<96x16xf32> to vector<16x16xf32>
    %82 = tpu.transpose %81, [1, 0] : vector<16x16xf32> -> vector<16x16xf32>
    %83 = vector.extract_strided_slice %75 {offsets = [32, 0], sizes = [16, 16], strides = [1, 1]} : vector<96x16xf32> to vector<16x16xf32>
    %84 = tpu.transpose %83, [1, 0] : vector<16x16xf32> -> vector<16x16xf32>
    %85 = vector.extract_strided_slice %75 {offsets = [48, 0], sizes = [16, 16], strides = [1, 1]} : vector<96x16xf32> to vector<16x16xf32>
    %86 = tpu.transpose %85, [1, 0] : vector<16x16xf32> -> vector<16x16xf32>
    %87 = vector.extract_strided_slice %75 {offsets = [64, 0], sizes = [16, 16], strides = [1, 1]} : vector<96x16xf32> to vector<16x16xf32>
    %88 = tpu.transpose %87, [1, 0] : vector<16x16xf32> -> vector<16x16xf32>
    %89 = vector.extract_strided_slice %75 {offsets = [80, 0], sizes = [16, 16], strides = [1, 1]} : vector<96x16xf32> to vector<16x16xf32>
    %90 = tpu.transpose %89, [1, 0] : vector<16x16xf32> -> vector<16x16xf32>
    %91 = tpu.concatenate %80, %82, %84, %86, %88, %90 in 0 : vector<16x16xf32>, vector<16x16xf32>, vector<16x16xf32>, vector<16x16xf32>, vector<16x16xf32>, vector<16x16xf32> -> vector<96x16xf32>
    %92 = vector.extract_strided_slice %78 {offsets = [0, 0], sizes = [16, 16], strides = [1, 1]} : vector<96x16xf32> to vector<16x16xf32>
    %93 = tpu.transpose %92, [1, 0] : vector<16x16xf32> -> vector<16x16xf32>
    %94 = vector.extract_strided_slice %78 {offsets = [16, 0], sizes = [16, 16], strides = [1, 1]} : vector<96x16xf32> to vector<16x16xf32>
    %95 = tpu.transpose %94, [1, 0] : vector<16x16xf32> -> vector<16x16xf32>
    %96 = vector.extract_strided_slice %78 {offsets = [32, 0], sizes = [16, 16], strides = [1, 1]} : vector<96x16xf32> to vector<16x16xf32>
    %97 = tpu.transpose %96, [1, 0] : vector<16x16xf32> -> vector<16x16xf32>
    %98 = vector.extract_strided_slice %78 {offsets = [48, 0], sizes = [16, 16], strides = [1, 1]} : vector<96x16xf32> to vector<16x16xf32>
    %99 = tpu.transpose %98, [1, 0] : vector<16x16xf32> -> vector<16x16xf32>
    %100 = vector.extract_strided_slice %78 {offsets = [64, 0], sizes = [16, 16], strides = [1, 1]} : vector<96x16xf32> to vector<16x16xf32>
    %101 = tpu.transpose %100, [1, 0] : vector<16x16xf32> -> vector<16x16xf32>
    %102 = vector.extract_strided_slice %78 {offsets = [80, 0], sizes = [16, 16], strides = [1, 1]} : vector<96x16xf32> to vector<16x16xf32>
    %103 = tpu.transpose %102, [1, 0] : vector<16x16xf32> -> vector<16x16xf32>
    %104 = tpu.concatenate %93, %95, %97, %99, %101, %103 in 0 : vector<16x16xf32>, vector<16x16xf32>, vector<16x16xf32>, vector<16x16xf32>, vector<16x16xf32>, vector<16x16xf32> -> vector<96x16xf32>
    %cst_55 = arith.constant dense<0.000000e+00> : vector<96x16xf32>
    %105 = tpu.matmul %91, %0, %cst_55 {dimension_numbers = #tpu.dot_dimension_numbers<[1], [0], [0], [1], [0, 0, 1, 1], [], []>} : vector<96x16xf32>, vector<16x16xf32>, vector<96x16xf32> -> vector<96x16xf32>
    %cst_56 = arith.constant dense<0.000000e+00> : vector<96x16xf32>
    %106 = tpu.matmul %104, %1, %cst_56 {dimension_numbers = #tpu.dot_dimension_numbers<[1], [0], [0], [1], [0, 0, 1, 1], [], []>} : vector<96x16xf32>, vector<16x16xf32>, vector<96x16xf32> -> vector<96x16xf32>
    %107 = arith.addf %105, %106 : vector<96x16xf32>
    %108 = vector.extract_strided_slice %107 {offsets = [0, 0], sizes = [16, 16], strides = [1, 1]} : vector<96x16xf32> to vector<16x16xf32>
    %109 = vector.extract_strided_slice %107 {offsets = [32, 0], sizes = [16, 16], strides = [1, 1]} : vector<96x16xf32> to vector<16x16xf32>
    %110 = vector.extract_strided_slice %107 {offsets = [64, 0], sizes = [16, 16], strides = [1, 1]} : vector<96x16xf32> to vector<16x16xf32>
    %cst_57 = arith.constant 0.000000e+00 : f32
    %111 = vector.broadcast %cst_57 : f32 to vector<16x16xf32>
    %112 = arith.subf %111, %110 : vector<16x16xf32>
    %cst_58 = arith.constant 9.99999997E-7 : f32
    %113 = vector.broadcast %cst_58 : f32 to vector<16x16xf32>
    %114 = arith.addf %109, %113 : vector<16x16xf32>
    %115 = tpu.reciprocal %114 {approx = true} : vector<16x16xf32> -> vector<16x16xf32>
    %116 = arith.mulf %112, %115 : vector<16x16xf32>
    %117 = math.absf %116 : vector<16x16xf32>
    %cst_59 = arith.constant 2.41421366 : f32
    %118 = vector.broadcast %cst_59 : f32 to vector<16x16xf32>
    %119 = arith.cmpf ogt, %117, %118 : vector<16x16xf32>
    %cst_60 = arith.constant 0.414213568 : f32
    %120 = vector.broadcast %cst_60 : f32 to vector<16x16xf32>
    %121 = arith.cmpf ogt, %117, %120 : vector<16x16xf32>
    %cst_61 = arith.constant dense<true> : vector<16x16xi1>
    %122 = arith.xori %119, %cst_61 : vector<16x16xi1>
    %123 = arith.andi %121, %122 : vector<16x16xi1>
    %124 = tpu.reciprocal %117 {approx = true} : vector<16x16xf32> -> vector<16x16xf32>
    %cst_62 = arith.constant 0.000000e+00 : f32
    %125 = vector.broadcast %cst_62 : f32 to vector<16x16xf32>
    %126 = arith.subf %125, %124 : vector<16x16xf32>
    %cst_63 = arith.constant 1.000000e+00 : f32
    %127 = vector.broadcast %cst_63 : f32 to vector<16x16xf32>
    %128 = arith.subf %117, %127 : vector<16x16xf32>
    %cst_64 = arith.constant 1.000000e+00 : f32
    %129 = vector.broadcast %cst_64 : f32 to vector<16x16xf32>
    %130 = arith.addf %117, %129 : vector<16x16xf32>
    %131 = tpu.reciprocal %130 {approx = true} : vector<16x16xf32> -> vector<16x16xf32>
    %132 = arith.mulf %128, %131 : vector<16x16xf32>
    %133 = arith.select %123, %132, %117 : vector<16x16xi1>, vector<16x16xf32>
    %134 = arith.select %119, %126, %133 : vector<16x16xi1>, vector<16x16xf32>
    %cst_65 = arith.constant 0.785398185 : f32
    %cst_66 = arith.constant 0.000000e+00 : f32
    %135 = vector.broadcast %cst_65 : f32 to vector<16x16xf32>
    %136 = vector.broadcast %cst_66 : f32 to vector<16x16xf32>
    %137 = arith.select %123, %135, %136 : vector<16x16xi1>, vector<16x16xf32>
    %cst_67 = arith.constant 1.57079637 : f32
    %138 = vector.broadcast %cst_67 : f32 to vector<16x16xf32>
    %139 = arith.select %119, %138, %137 : vector<16x16xi1>, vector<16x16xf32>
    %140 = arith.mulf %134, %134 : vector<16x16xf32>
    %cst_68 = arith.constant 0.0805374458 : f32
    %141 = vector.broadcast %cst_68 : f32 to vector<16x16xf32>
    %142 = arith.mulf %141, %140 : vector<16x16xf32>
    %cst_69 = arith.constant 0.138776854 : f32
    %143 = vector.broadcast %cst_69 : f32 to vector<16x16xf32>
    %144 = arith.subf %142, %143 : vector<16x16xf32>
    %145 = arith.mulf %144, %140 : vector<16x16xf32>
    %cst_70 = arith.constant 0.199777111 : f32
    %146 = vector.broadcast %cst_70 : f32 to vector<16x16xf32>
    %147 = arith.addf %145, %146 : vector<16x16xf32>
    %148 = arith.mulf %147, %140 : vector<16x16xf32>
    %cst_71 = arith.constant 0.333329499 : f32
    %149 = vector.broadcast %cst_71 : f32 to vector<16x16xf32>
    %150 = arith.subf %148, %149 : vector<16x16xf32>
    %151 = arith.mulf %150, %140 : vector<16x16xf32>
    %152 = arith.mulf %151, %134 : vector<16x16xf32>
    %153 = arith.addf %139, %152 : vector<16x16xf32>
    %154 = arith.addf %153, %134 : vector<16x16xf32>
    %cst_72 = arith.constant 0.000000e+00 : f32
    %155 = vector.broadcast %cst_72 : f32 to vector<16x16xf32>
    %156 = arith.cmpf olt, %116, %155 : vector<16x16xf32>
    %cst_73 = arith.constant 0.000000e+00 : f32
    %157 = vector.broadcast %cst_73 : f32 to vector<16x16xf32>
    %158 = arith.subf %157, %154 : vector<16x16xf32>
    %159 = arith.select %156, %158, %154 : vector<16x16xi1>, vector<16x16xf32>
    %160 = arith.mulf %109, %109 : vector<16x16xf32>
    %161 = arith.mulf %110, %110 : vector<16x16xf32>
    %162 = arith.addf %160, %161 : vector<16x16xf32>
    %163 = math.sqrt %162 : vector<16x16xf32>
    %cst_74 = arith.constant 9.99999997E-7 : f32
    %164 = vector.broadcast %cst_74 : f32 to vector<16x16xf32>
    %165 = arith.addf %163, %164 : vector<16x16xf32>
    %166 = tpu.reciprocal %165 {approx = true} : vector<16x16xf32> -> vector<16x16xf32>
    %167 = arith.mulf %108, %166 : vector<16x16xf32>
    %168 = math.absf %167 : vector<16x16xf32>
    %cst_75 = arith.constant 2.41421366 : f32
    %169 = vector.broadcast %cst_75 : f32 to vector<16x16xf32>
    %170 = arith.cmpf ogt, %168, %169 : vector<16x16xf32>
    %cst_76 = arith.constant 0.414213568 : f32
    %171 = vector.broadcast %cst_76 : f32 to vector<16x16xf32>
    %172 = arith.cmpf ogt, %168, %171 : vector<16x16xf32>
    %cst_77 = arith.constant dense<true> : vector<16x16xi1>
    %173 = arith.xori %170, %cst_77 : vector<16x16xi1>
    %174 = arith.andi %172, %173 : vector<16x16xi1>
    %175 = tpu.reciprocal %168 {approx = true} : vector<16x16xf32> -> vector<16x16xf32>
    %cst_78 = arith.constant 0.000000e+00 : f32
    %176 = vector.broadcast %cst_78 : f32 to vector<16x16xf32>
    %177 = arith.subf %176, %175 : vector<16x16xf32>
    %cst_79 = arith.constant 1.000000e+00 : f32
    %178 = vector.broadcast %cst_79 : f32 to vector<16x16xf32>
    %179 = arith.subf %168, %178 : vector<16x16xf32>
    %cst_80 = arith.constant 1.000000e+00 : f32
    %180 = vector.broadcast %cst_80 : f32 to vector<16x16xf32>
    %181 = arith.addf %168, %180 : vector<16x16xf32>
    %182 = tpu.reciprocal %181 {approx = true} : vector<16x16xf32> -> vector<16x16xf32>
    %183 = arith.mulf %179, %182 : vector<16x16xf32>
    %184 = arith.select %174, %183, %168 : vector<16x16xi1>, vector<16x16xf32>
    %185 = arith.select %170, %177, %184 : vector<16x16xi1>, vector<16x16xf32>
    %cst_81 = arith.constant 0.785398185 : f32
    %cst_82 = arith.constant 0.000000e+00 : f32
    %186 = vector.broadcast %cst_81 : f32 to vector<16x16xf32>
    %187 = vector.broadcast %cst_82 : f32 to vector<16x16xf32>
    %188 = arith.select %174, %186, %187 : vector<16x16xi1>, vector<16x16xf32>
    %cst_83 = arith.constant 1.57079637 : f32
    %189 = vector.broadcast %cst_83 : f32 to vector<16x16xf32>
    %190 = arith.select %170, %189, %188 : vector<16x16xi1>, vector<16x16xf32>
    %191 = arith.mulf %185, %185 : vector<16x16xf32>
    %cst_84 = arith.constant 0.0805374458 : f32
    %192 = vector.broadcast %cst_84 : f32 to vector<16x16xf32>
    %193 = arith.mulf %192, %191 : vector<16x16xf32>
    %cst_85 = arith.constant 0.138776854 : f32
    %194 = vector.broadcast %cst_85 : f32 to vector<16x16xf32>
    %195 = arith.subf %193, %194 : vector<16x16xf32>
    %196 = arith.mulf %195, %191 : vector<16x16xf32>
    %cst_86 = arith.constant 0.199777111 : f32
    %197 = vector.broadcast %cst_86 : f32 to vector<16x16xf32>
    %198 = arith.addf %196, %197 : vector<16x16xf32>
    %199 = arith.mulf %198, %191 : vector<16x16xf32>
    %cst_87 = arith.constant 0.333329499 : f32
    %200 = vector.broadcast %cst_87 : f32 to vector<16x16xf32>
    %201 = arith.subf %199, %200 : vector<16x16xf32>
    %202 = arith.mulf %201, %191 : vector<16x16xf32>
    %203 = arith.mulf %202, %185 : vector<16x16xf32>
    %204 = arith.addf %190, %203 : vector<16x16xf32>
    %205 = arith.addf %204, %185 : vector<16x16xf32>
    %cst_88 = arith.constant 0.000000e+00 : f32
    %206 = vector.broadcast %cst_88 : f32 to vector<16x16xf32>
    %207 = arith.cmpf olt, %167, %206 : vector<16x16xf32>
    %cst_89 = arith.constant 0.000000e+00 : f32
    %208 = vector.broadcast %cst_89 : f32 to vector<16x16xf32>
    %209 = arith.subf %208, %205 : vector<16x16xf32>
    %210 = arith.select %207, %209, %205 : vector<16x16xi1>, vector<16x16xf32>
    %211 = vector.shape_cast %210 : vector<16x16xf32> to vector<1x16x16xf32>
    %cst_90 = arith.constant dense<0x7F800000> : vector<1xf32>
    %212 = vector.multi_reduction <minimumf>, %211, %cst_90 [1, 2] : vector<1x16x16xf32> to vector<1xf32>
    %213 = vector.shape_cast %212 : vector<1xf32> to vector<1x1x1xf32>
    %214 = vector.extract %213[0, 0, 0] : f32 from vector<1x1x1xf32>
    %215 = vector.broadcast %214 : f32 to vector<1x1xf32>
    %216 = vector.shape_cast %210 : vector<16x16xf32> to vector<1x16x16xf32>
    %cst_91 = arith.constant dense<0xFF800000> : vector<1xf32>
    %217 = vector.multi_reduction <maximumf>, %216, %cst_91 [1, 2] : vector<1x16x16xf32> to vector<1xf32>
    %218 = vector.shape_cast %217 : vector<1xf32> to vector<1x1x1xf32>
    %219 = vector.extract %218[0, 0, 0] : f32 from vector<1x1x1xf32>
    %220 = vector.broadcast %219 : f32 to vector<1x1xf32>
    %221 = vector.broadcast %215 : vector<1x1xf32> to vector<16x16xf32>
    %222 = arith.subf %210, %221 : vector<16x16xf32>
    %223 = arith.subf %220, %215 : vector<1x1xf32>
    %224 = vector.broadcast %223 : vector<1x1xf32> to vector<16x16xf32>
    %225 = arith.divf %222, %224 : vector<16x16xf32>
    %cst_92 = arith.constant 9.99999974E-6 : f32
    %226 = arith.cmpf one, %225, %225 : vector<16x16xf32>
    %227 = vector.broadcast %cst_92 : f32 to vector<16x16xf32>
    %228 = arith.select %226, %227, %225 : vector<16x16xi1>, vector<16x16xf32>
    %cst_93 = arith.constant 0x7F800000 : f32
    %229 = vector.broadcast %cst_93 : f32 to vector<16x16xf32>
    %230 = arith.cmpf oeq, %228, %229 : vector<16x16xf32>
    %cst_94 = arith.constant 3.40282347E+38 : f32
    %231 = vector.broadcast %cst_94 : f32 to vector<16x16xf32>
    %232 = arith.select %230, %231, %228 : vector<16x16xi1>, vector<16x16xf32>
    %cst_95 = arith.constant 0xFF800000 : f32
    %233 = vector.broadcast %cst_95 : f32 to vector<16x16xf32>
    %234 = arith.cmpf oeq, %232, %233 : vector<16x16xf32>
    %cst_96 = arith.constant -3.40282347E+38 : f32
    %235 = vector.broadcast %cst_96 : f32 to vector<16x16xf32>
    %236 = arith.select %234, %235, %232 : vector<16x16xi1>, vector<16x16xf32>
    %237 = vector.shape_cast %165 : vector<16x16xf32> to vector<1x16x16xf32>
    %cst_97 = arith.constant dense<0x7F800000> : vector<1xf32>
    %238 = vector.multi_reduction <minimumf>, %237, %cst_97 [1, 2] : vector<1x16x16xf32> to vector<1xf32>
    %239 = vector.shape_cast %238 : vector<1xf32> to vector<1x1x1xf32>
    %240 = vector.extract %239[0, 0, 0] : f32 from vector<1x1x1xf32>
    %241 = vector.broadcast %240 : f32 to vector<1x1xf32>
    %242 = vector.shape_cast %165 : vector<16x16xf32> to vector<1x16x16xf32>
    %cst_98 = arith.constant dense<0xFF800000> : vector<1xf32>
    %243 = vector.multi_reduction <maximumf>, %242, %cst_98 [1, 2] : vector<1x16x16xf32> to vector<1xf32>
    %244 = vector.shape_cast %243 : vector<1xf32> to vector<1x1x1xf32>
    %245 = vector.extract %244[0, 0, 0] : f32 from vector<1x1x1xf32>
    %246 = vector.broadcast %245 : f32 to vector<1x1xf32>
    %247 = vector.broadcast %241 : vector<1x1xf32> to vector<16x16xf32>
    %248 = arith.subf %165, %247 : vector<16x16xf32>
    %249 = arith.subf %246, %241 : vector<1x1xf32>
    %250 = vector.broadcast %249 : vector<1x1xf32> to vector<16x16xf32>
    %251 = arith.divf %248, %250 : vector<16x16xf32>
    %cst_99 = arith.constant 9.99999974E-6 : f32
    %252 = arith.cmpf one, %251, %251 : vector<16x16xf32>
    %253 = vector.broadcast %cst_99 : f32 to vector<16x16xf32>
    %254 = arith.select %252, %253, %251 : vector<16x16xi1>, vector<16x16xf32>
    %cst_100 = arith.constant 0x7F800000 : f32
    %255 = vector.broadcast %cst_100 : f32 to vector<16x16xf32>
    %256 = arith.cmpf oeq, %254, %255 : vector<16x16xf32>
    %cst_101 = arith.constant 3.40282347E+38 : f32
    %257 = vector.broadcast %cst_101 : f32 to vector<16x16xf32>
    %258 = arith.select %256, %257, %254 : vector<16x16xi1>, vector<16x16xf32>
    %cst_102 = arith.constant 0xFF800000 : f32
    %259 = vector.broadcast %cst_102 : f32 to vector<16x16xf32>
    %260 = arith.cmpf oeq, %258, %259 : vector<16x16xf32>
    %cst_103 = arith.constant -3.40282347E+38 : f32
    %261 = vector.broadcast %cst_103 : f32 to vector<16x16xf32>
    %262 = arith.select %260, %261, %258 : vector<16x16xi1>, vector<16x16xf32>
    %263 = vector.shape_cast %159 : vector<16x16xf32> to vector<1x16x16xf32>
    %cst_104 = arith.constant dense<0x7F800000> : vector<1xf32>
    %264 = vector.multi_reduction <minimumf>, %263, %cst_104 [1, 2] : vector<1x16x16xf32> to vector<1xf32>
    %265 = vector.shape_cast %264 : vector<1xf32> to vector<1x1x1xf32>
    %266 = vector.extract %265[0, 0, 0] : f32 from vector<1x1x1xf32>
    %267 = vector.broadcast %266 : f32 to vector<1x1xf32>
    %268 = vector.shape_cast %159 : vector<16x16xf32> to vector<1x16x16xf32>
    %cst_105 = arith.constant dense<0xFF800000> : vector<1xf32>
    %269 = vector.multi_reduction <maximumf>, %268, %cst_105 [1, 2] : vector<1x16x16xf32> to vector<1xf32>
    %270 = vector.shape_cast %269 : vector<1xf32> to vector<1x1x1xf32>
    %271 = vector.extract %270[0, 0, 0] : f32 from vector<1x1x1xf32>
    %272 = vector.broadcast %271 : f32 to vector<1x1xf32>
    %273 = vector.broadcast %267 : vector<1x1xf32> to vector<16x16xf32>
    %274 = arith.subf %159, %273 : vector<16x16xf32>
    %275 = arith.subf %272, %267 : vector<1x1xf32>
    %276 = vector.broadcast %275 : vector<1x1xf32> to vector<16x16xf32>
    %277 = arith.divf %274, %276 : vector<16x16xf32>
    %cst_106 = arith.constant 9.99999974E-6 : f32
    %278 = arith.cmpf one, %277, %277 : vector<16x16xf32>
    %279 = vector.broadcast %cst_106 : f32 to vector<16x16xf32>
    %280 = arith.select %278, %279, %277 : vector<16x16xi1>, vector<16x16xf32>
    %cst_107 = arith.constant 0x7F800000 : f32
    %281 = vector.broadcast %cst_107 : f32 to vector<16x16xf32>
    %282 = arith.cmpf oeq, %280, %281 : vector<16x16xf32>
    %cst_108 = arith.constant 3.40282347E+38 : f32
    %283 = vector.broadcast %cst_108 : f32 to vector<16x16xf32>
    %284 = arith.select %282, %283, %280 : vector<16x16xi1>, vector<16x16xf32>
    %cst_109 = arith.constant 0xFF800000 : f32
    %285 = vector.broadcast %cst_109 : f32 to vector<16x16xf32>
    %286 = arith.cmpf oeq, %284, %285 : vector<16x16xf32>
    %cst_110 = arith.constant -3.40282347E+38 : f32
    %287 = vector.broadcast %cst_110 : f32 to vector<16x16xf32>
    %288 = arith.select %286, %287, %284 : vector<16x16xi1>, vector<16x16xf32>
    %cst_111 = arith.constant 1.000000e+00 : f32
    %289 = vector.broadcast %cst_111 : f32 to vector<16x16xf32>
    %290 = arith.subf %289, %262 : vector<16x16xf32>
    %cst_112 = arith.constant 6.000000e+00 : f32
    %291 = vector.broadcast %cst_112 : f32 to vector<16x16xf32>
    %292 = arith.mulf %288, %291 : vector<16x16xf32>
    %293 = arith.fptosi %292 : vector<16x16xf32> to vector<16x16xi32>
    %cst_113 = arith.constant 5.000000e-01 : f32
    %294 = vector.broadcast %cst_113 : f32 to vector<16x16xf32>
    %295 = arith.mulf %292, %294 : vector<16x16xf32>
    %296 = math.floor %295 : vector<16x16xf32>
    %cst_114 = arith.constant 2.000000e+00 : f32
    %297 = vector.broadcast %cst_114 : f32 to vector<16x16xf32>
    %298 = arith.mulf %297, %296 : vector<16x16xf32>
    %299 = arith.subf %292, %298 : vector<16x16xf32>
    %cst_115 = arith.constant 1.000000e+00 : f32
    %300 = vector.broadcast %cst_115 : f32 to vector<16x16xf32>
    %301 = arith.subf %299, %300 : vector<16x16xf32>
    %302 = math.absf %301 : vector<16x16xf32>
    %cst_116 = arith.constant 1.000000e+00 : f32
    %303 = vector.broadcast %cst_116 : f32 to vector<16x16xf32>
    %304 = arith.subf %303, %302 : vector<16x16xf32>
    %305 = arith.mulf %262, %304 : vector<16x16xf32>
    %c0_i32 = arith.constant 0 : i32
    %306 = vector.broadcast %c0_i32 : i32 to vector<16x16xi32>
    %307 = arith.cmpi eq, %293, %306 : vector<16x16xi32>
    %c1_i32 = arith.constant 1 : i32
    %308 = vector.broadcast %c1_i32 : i32 to vector<16x16xi32>
    %309 = arith.cmpi eq, %293, %308 : vector<16x16xi32>
    %c2_i32 = arith.constant 2 : i32
    %310 = vector.broadcast %c2_i32 : i32 to vector<16x16xi32>
    %311 = arith.cmpi eq, %293, %310 : vector<16x16xi32>
    %c3_i32 = arith.constant 3 : i32
    %312 = vector.broadcast %c3_i32 : i32 to vector<16x16xi32>
    %313 = arith.cmpi eq, %293, %312 : vector<16x16xi32>
    %c4_i32 = arith.constant 4 : i32
    %314 = vector.broadcast %c4_i32 : i32 to vector<16x16xi32>
    %315 = arith.cmpi eq, %293, %314 : vector<16x16xi32>
    %c5_i32 = arith.constant 5 : i32
    %316 = vector.broadcast %c5_i32 : i32 to vector<16x16xi32>
    %317 = arith.cmpi eq, %293, %316 : vector<16x16xi32>
    %318 = arith.ori %307, %317 : vector<16x16xi1>
    %319 = arith.ori %309, %315 : vector<16x16xi1>
    %cst_117 = arith.constant 0.000000e+00 : f32
    %320 = vector.broadcast %cst_117 : f32 to vector<16x16xf32>
    %321 = arith.select %319, %305, %320 : vector<16x16xi1>, vector<16x16xf32>
    %322 = arith.select %318, %262, %321 : vector<16x16xi1>, vector<16x16xf32>
    %323 = arith.addf %322, %290 : vector<16x16xf32>
    %324 = arith.ori %309, %311 : vector<16x16xi1>
    %325 = arith.ori %307, %313 : vector<16x16xi1>
    %cst_118 = arith.constant 0.000000e+00 : f32
    %326 = vector.broadcast %cst_118 : f32 to vector<16x16xf32>
    %327 = arith.select %325, %305, %326 : vector<16x16xi1>, vector<16x16xf32>
    %328 = arith.select %324, %262, %327 : vector<16x16xi1>, vector<16x16xf32>
    %329 = arith.addf %328, %290 : vector<16x16xf32>
    %330 = arith.ori %313, %315 : vector<16x16xi1>
    %331 = arith.ori %311, %317 : vector<16x16xi1>
    %cst_119 = arith.constant 0.000000e+00 : f32
    %332 = vector.broadcast %cst_119 : f32 to vector<16x16xf32>
    %333 = arith.select %331, %305, %332 : vector<16x16xi1>, vector<16x16xf32>
    %334 = arith.select %330, %262, %333 : vector<16x16xi1>, vector<16x16xf32>
    %335 = arith.addf %334, %290 : vector<16x16xf32>
    %cst_120 = arith.constant 6.000000e+00 : f32
    %336 = vector.broadcast %cst_120 : f32 to vector<16x16xf32>
    %337 = arith.mulf %236, %336 : vector<16x16xf32>
    %338 = arith.fptosi %337 : vector<16x16xf32> to vector<16x16xi32>
    %cst_121 = arith.constant 5.000000e-01 : f32
    %339 = vector.broadcast %cst_121 : f32 to vector<16x16xf32>
    %340 = arith.mulf %337, %339 : vector<16x16xf32>
    %341 = math.floor %340 : vector<16x16xf32>
    %cst_122 = arith.constant 2.000000e+00 : f32
    %342 = vector.broadcast %cst_122 : f32 to vector<16x16xf32>
    %343 = arith.mulf %342, %341 : vector<16x16xf32>
    %344 = arith.subf %337, %343 : vector<16x16xf32>
    %cst_123 = arith.constant 1.000000e+00 : f32
    %345 = vector.broadcast %cst_123 : f32 to vector<16x16xf32>
    %346 = arith.subf %344, %345 : vector<16x16xf32>
    %347 = math.absf %346 : vector<16x16xf32>
    %cst_124 = arith.constant 1.000000e+00 : f32
    %348 = vector.broadcast %cst_124 : f32 to vector<16x16xf32>
    %349 = arith.subf %348, %347 : vector<16x16xf32>
    %350 = arith.mulf %262, %349 : vector<16x16xf32>
    %c0_i32_125 = arith.constant 0 : i32
    %351 = vector.broadcast %c0_i32_125 : i32 to vector<16x16xi32>
    %352 = arith.cmpi eq, %338, %351 : vector<16x16xi32>
    %c1_i32_126 = arith.constant 1 : i32
    %353 = vector.broadcast %c1_i32_126 : i32 to vector<16x16xi32>
    %354 = arith.cmpi eq, %338, %353 : vector<16x16xi32>
    %c2_i32_127 = arith.constant 2 : i32
    %355 = vector.broadcast %c2_i32_127 : i32 to vector<16x16xi32>
    %356 = arith.cmpi eq, %338, %355 : vector<16x16xi32>
    %c3_i32_128 = arith.constant 3 : i32
    %357 = vector.broadcast %c3_i32_128 : i32 to vector<16x16xi32>
    %358 = arith.cmpi eq, %338, %357 : vector<16x16xi32>
    %c4_i32_129 = arith.constant 4 : i32
    %359 = vector.broadcast %c4_i32_129 : i32 to vector<16x16xi32>
    %360 = arith.cmpi eq, %338, %359 : vector<16x16xi32>
    %c5_i32_130 = arith.constant 5 : i32
    %361 = vector.broadcast %c5_i32_130 : i32 to vector<16x16xi32>
    %362 = arith.cmpi eq, %338, %361 : vector<16x16xi32>
    %363 = arith.ori %352, %362 : vector<16x16xi1>
    %364 = arith.ori %354, %360 : vector<16x16xi1>
    %cst_131 = arith.constant 0.000000e+00 : f32
    %365 = vector.broadcast %cst_131 : f32 to vector<16x16xf32>
    %366 = arith.select %364, %350, %365 : vector<16x16xi1>, vector<16x16xf32>
    %367 = arith.select %363, %262, %366 : vector<16x16xi1>, vector<16x16xf32>
    %368 = arith.addf %367, %290 : vector<16x16xf32>
    %369 = arith.ori %354, %356 : vector<16x16xi1>
    %370 = arith.ori %352, %358 : vector<16x16xi1>
    %cst_132 = arith.constant 0.000000e+00 : f32
    %371 = vector.broadcast %cst_132 : f32 to vector<16x16xf32>
    %372 = arith.select %370, %350, %371 : vector<16x16xi1>, vector<16x16xf32>
    %373 = arith.select %369, %262, %372 : vector<16x16xi1>, vector<16x16xf32>
    %374 = arith.addf %373, %290 : vector<16x16xf32>
    %375 = arith.ori %358, %360 : vector<16x16xi1>
    %376 = arith.ori %356, %362 : vector<16x16xi1>
    %cst_133 = arith.constant 0.000000e+00 : f32
    %377 = vector.broadcast %cst_133 : f32 to vector<16x16xf32>
    %378 = arith.select %376, %350, %377 : vector<16x16xi1>, vector<16x16xf32>
    %379 = arith.select %375, %262, %378 : vector<16x16xi1>, vector<16x16xf32>
    %380 = arith.addf %379, %290 : vector<16x16xf32>
    %c0_134 = arith.constant 0 : index
    %c0_135 = arith.constant 0 : index
    %c0_136 = arith.constant 0 : index
    %c0_137 = arith.constant 0 : index
    %381 = vector.load %arg10[%c0_134, %c0_135, %c0_136, %c0_137] : memref<2x6x16x16xf32, #tpu.memory_space<vmem>>, vector<1x1x16x16xf32>
    %382 = vector.shape_cast %381 : vector<1x1x16x16xf32> to vector<16x16xf32>
    %383 = vector.shape_cast %323 : vector<16x16xf32> to vector<1x1x16x16xf32>
    tpu.vector_store %arg10[%c0_134, %c0_135, %c0_136, %c0_137], %383 {strides = array<i32>} : memref<2x6x16x16xf32, #tpu.memory_space<vmem>>, vector<1x1x16x16xf32>,
    %c0_138 = arith.constant 0 : index
    %c1_139 = arith.constant 1 : index
    %c0_140 = arith.constant 0 : index
    %c0_141 = arith.constant 0 : index
    %384 = vector.load %arg10[%c0_138, %c1_139, %c0_140, %c0_141] : memref<2x6x16x16xf32, #tpu.memory_space<vmem>>, vector<1x1x16x16xf32>
    %385 = vector.shape_cast %384 : vector<1x1x16x16xf32> to vector<16x16xf32>
    %386 = vector.shape_cast %329 : vector<16x16xf32> to vector<1x1x16x16xf32>
    tpu.vector_store %arg10[%c0_138, %c1_139, %c0_140, %c0_141], %386 {strides = array<i32>} : memref<2x6x16x16xf32, #tpu.memory_space<vmem>>, vector<1x1x16x16xf32>,
    %c0_142 = arith.constant 0 : index
    %c2_143 = arith.constant 2 : index
    %c0_144 = arith.constant 0 : index
    %c0_145 = arith.constant 0 : index
    %387 = vector.load %arg10[%c0_142, %c2_143, %c0_144, %c0_145] : memref<2x6x16x16xf32, #tpu.memory_space<vmem>>, vector<1x1x16x16xf32>
    %388 = vector.shape_cast %387 : vector<1x1x16x16xf32> to vector<16x16xf32>
    %389 = vector.shape_cast %335 : vector<16x16xf32> to vector<1x1x16x16xf32>
    tpu.vector_store %arg10[%c0_142, %c2_143, %c0_144, %c0_145], %389 {strides = array<i32>} : memref<2x6x16x16xf32, #tpu.memory_space<vmem>>, vector<1x1x16x16xf32>,
    %c0_146 = arith.constant 0 : index
    %c3_147 = arith.constant 3 : index
    %c0_148 = arith.constant 0 : index
    %c0_149 = arith.constant 0 : index
    %390 = vector.load %arg10[%c0_146, %c3_147, %c0_148, %c0_149] : memref<2x6x16x16xf32, #tpu.memory_space<vmem>>, vector<1x1x16x16xf32>
    %391 = vector.shape_cast %390 : vector<1x1x16x16xf32> to vector<16x16xf32>
    %392 = vector.shape_cast %368 : vector<16x16xf32> to vector<1x1x16x16xf32>
    tpu.vector_store %arg10[%c0_146, %c3_147, %c0_148, %c0_149], %392 {strides = array<i32>} : memref<2x6x16x16xf32, #tpu.memory_space<vmem>>, vector<1x1x16x16xf32>,
    %c0_150 = arith.constant 0 : index
    %c4 = arith.constant 4 : index
    %c0_151 = arith.constant 0 : index
    %c0_152 = arith.constant 0 : index
    %393 = vector.load %arg10[%c0_150, %c4, %c0_151, %c0_152] : memref<2x6x16x16xf32, #tpu.memory_space<vmem>>, vector<1x1x16x16xf32>
    %394 = vector.shape_cast %393 : vector<1x1x16x16xf32> to vector<16x16xf32>
    %395 = vector.shape_cast %374 : vector<16x16xf32> to vector<1x1x16x16xf32>
    tpu.vector_store %arg10[%c0_150, %c4, %c0_151, %c0_152], %395 {strides = array<i32>} : memref<2x6x16x16xf32, #tpu.memory_space<vmem>>, vector<1x1x16x16xf32>,
    %c0_153 = arith.constant 0 : index
    %c5 = arith.constant 5 : index
    %c0_154 = arith.constant 0 : index
    %c0_155 = arith.constant 0 : index
    %396 = vector.load %arg10[%c0_153, %c5, %c0_154, %c0_155] : memref<2x6x16x16xf32, #tpu.memory_space<vmem>>, vector<1x1x16x16xf32>
    %397 = vector.shape_cast %396 : vector<1x1x16x16xf32> to vector<16x16xf32>
    %398 = vector.shape_cast %380 : vector<16x16xf32> to vector<1x1x16x16xf32>
    tpu.vector_store %arg10[%c0_153, %c5, %c0_154, %c0_155], %398 {strides = array<i32>} : memref<2x6x16x16xf32, #tpu.memory_space<vmem>>, vector<1x1x16x16xf32>,
    %399 = vector.extract_strided_slice %107 {offsets = [16, 0], sizes = [16, 16], strides = [1, 1]} : vector<96x16xf32> to vector<16x16xf32>
    %400 = vector.extract_strided_slice %107 {offsets = [48, 0], sizes = [16, 16], strides = [1, 1]} : vector<96x16xf32> to vector<16x16xf32>
    %401 = vector.extract_strided_slice %107 {offsets = [80, 0], sizes = [16, 16], strides = [1, 1]} : vector<96x16xf32> to vector<16x16xf32>
    %cst_156 = arith.constant 0.000000e+00 : f32
    %402 = vector.broadcast %cst_156 : f32 to vector<16x16xf32>
    %403 = arith.subf %402, %401 : vector<16x16xf32>
    %cst_157 = arith.constant 9.99999997E-7 : f32
    %404 = vector.broadcast %cst_157 : f32 to vector<16x16xf32>
    %405 = arith.addf %400, %404 : vector<16x16xf32>
    %406 = tpu.reciprocal %405 {approx = true} : vector<16x16xf32> -> vector<16x16xf32>
    %407 = arith.mulf %403, %406 : vector<16x16xf32>
    %408 = math.absf %407 : vector<16x16xf32>
    %cst_158 = arith.constant 2.41421366 : f32
    %409 = vector.broadcast %cst_158 : f32 to vector<16x16xf32>
    %410 = arith.cmpf ogt, %408, %409 : vector<16x16xf32>
    %cst_159 = arith.constant 0.414213568 : f32
    %411 = vector.broadcast %cst_159 : f32 to vector<16x16xf32>
    %412 = arith.cmpf ogt, %408, %411 : vector<16x16xf32>
    %cst_160 = arith.constant dense<true> : vector<16x16xi1>
    %413 = arith.xori %410, %cst_160 : vector<16x16xi1>
    %414 = arith.andi %412, %413 : vector<16x16xi1>
    %415 = tpu.reciprocal %408 {approx = true} : vector<16x16xf32> -> vector<16x16xf32>
    %cst_161 = arith.constant 0.000000e+00 : f32
    %416 = vector.broadcast %cst_161 : f32 to vector<16x16xf32>
    %417 = arith.subf %416, %415 : vector<16x16xf32>
    %cst_162 = arith.constant 1.000000e+00 : f32
    %418 = vector.broadcast %cst_162 : f32 to vector<16x16xf32>
    %419 = arith.subf %408, %418 : vector<16x16xf32>
    %cst_163 = arith.constant 1.000000e+00 : f32
    %420 = vector.broadcast %cst_163 : f32 to vector<16x16xf32>
    %421 = arith.addf %408, %420 : vector<16x16xf32>
    %422 = tpu.reciprocal %421 {approx = true} : vector<16x16xf32> -> vector<16x16xf32>
    %423 = arith.mulf %419, %422 : vector<16x16xf32>
    %424 = arith.select %414, %423, %408 : vector<16x16xi1>, vector<16x16xf32>
    %425 = arith.select %410, %417, %424 : vector<16x16xi1>, vector<16x16xf32>
    %cst_164 = arith.constant 0.785398185 : f32
    %cst_165 = arith.constant 0.000000e+00 : f32
    %426 = vector.broadcast %cst_164 : f32 to vector<16x16xf32>
    %427 = vector.broadcast %cst_165 : f32 to vector<16x16xf32>
    %428 = arith.select %414, %426, %427 : vector<16x16xi1>, vector<16x16xf32>
    %cst_166 = arith.constant 1.57079637 : f32
    %429 = vector.broadcast %cst_166 : f32 to vector<16x16xf32>
    %430 = arith.select %410, %429, %428 : vector<16x16xi1>, vector<16x16xf32>
    %431 = arith.mulf %425, %425 : vector<16x16xf32>
    %cst_167 = arith.constant 0.0805374458 : f32
    %432 = vector.broadcast %cst_167 : f32 to vector<16x16xf32>
    %433 = arith.mulf %432, %431 : vector<16x16xf32>
    %cst_168 = arith.constant 0.138776854 : f32
    %434 = vector.broadcast %cst_168 : f32 to vector<16x16xf32>
    %435 = arith.subf %433, %434 : vector<16x16xf32>
    %436 = arith.mulf %435, %431 : vector<16x16xf32>
    %cst_169 = arith.constant 0.199777111 : f32
    %437 = vector.broadcast %cst_169 : f32 to vector<16x16xf32>
    %438 = arith.addf %436, %437 : vector<16x16xf32>
    %439 = arith.mulf %438, %431 : vector<16x16xf32>
    %cst_170 = arith.constant 0.333329499 : f32
    %440 = vector.broadcast %cst_170 : f32 to vector<16x16xf32>
    %441 = arith.subf %439, %440 : vector<16x16xf32>
    %442 = arith.mulf %441, %431 : vector<16x16xf32>
    %443 = arith.mulf %442, %425 : vector<16x16xf32>
    %444 = arith.addf %430, %443 : vector<16x16xf32>
    %445 = arith.addf %444, %425 : vector<16x16xf32>
    %cst_171 = arith.constant 0.000000e+00 : f32
    %446 = vector.broadcast %cst_171 : f32 to vector<16x16xf32>
    %447 = arith.cmpf olt, %407, %446 : vector<16x16xf32>
    %cst_172 = arith.constant 0.000000e+00 : f32
    %448 = vector.broadcast %cst_172 : f32 to vector<16x16xf32>
    %449 = arith.subf %448, %445 : vector<16x16xf32>
    %450 = arith.select %447, %449, %445 : vector<16x16xi1>, vector<16x16xf32>
    %451 = arith.mulf %400, %400 : vector<16x16xf32>
    %452 = arith.mulf %401, %401 : vector<16x16xf32>
    %453 = arith.addf %451, %452 : vector<16x16xf32>
    %454 = math.sqrt %453 : vector<16x16xf32>
    %cst_173 = arith.constant 9.99999997E-7 : f32
    %455 = vector.broadcast %cst_173 : f32 to vector<16x16xf32>
    %456 = arith.addf %454, %455 : vector<16x16xf32>
    %457 = tpu.reciprocal %456 {approx = true} : vector<16x16xf32> -> vector<16x16xf32>
    %458 = arith.mulf %399, %457 : vector<16x16xf32>
    %459 = math.absf %458 : vector<16x16xf32>
    %cst_174 = arith.constant 2.41421366 : f32
    %460 = vector.broadcast %cst_174 : f32 to vector<16x16xf32>
    %461 = arith.cmpf ogt, %459, %460 : vector<16x16xf32>
    %cst_175 = arith.constant 0.414213568 : f32
    %462 = vector.broadcast %cst_175 : f32 to vector<16x16xf32>
    %463 = arith.cmpf ogt, %459, %462 : vector<16x16xf32>
    %cst_176 = arith.constant dense<true> : vector<16x16xi1>
    %464 = arith.xori %461, %cst_176 : vector<16x16xi1>
    %465 = arith.andi %463, %464 : vector<16x16xi1>
    %466 = tpu.reciprocal %459 {approx = true} : vector<16x16xf32> -> vector<16x16xf32>
    %cst_177 = arith.constant 0.000000e+00 : f32
    %467 = vector.broadcast %cst_177 : f32 to vector<16x16xf32>
    %468 = arith.subf %467, %466 : vector<16x16xf32>
    %cst_178 = arith.constant 1.000000e+00 : f32
    %469 = vector.broadcast %cst_178 : f32 to vector<16x16xf32>
    %470 = arith.subf %459, %469 : vector<16x16xf32>
    %cst_179 = arith.constant 1.000000e+00 : f32
    %471 = vector.broadcast %cst_179 : f32 to vector<16x16xf32>
    %472 = arith.addf %459, %471 : vector<16x16xf32>
    %473 = tpu.reciprocal %472 {approx = true} : vector<16x16xf32> -> vector<16x16xf32>
    %474 = arith.mulf %470, %473 : vector<16x16xf32>
    %475 = arith.select %465, %474, %459 : vector<16x16xi1>, vector<16x16xf32>
    %476 = arith.select %461, %468, %475 : vector<16x16xi1>, vector<16x16xf32>
    %cst_180 = arith.constant 0.785398185 : f32
    %cst_181 = arith.constant 0.000000e+00 : f32
    %477 = vector.broadcast %cst_180 : f32 to vector<16x16xf32>
    %478 = vector.broadcast %cst_181 : f32 to vector<16x16xf32>
    %479 = arith.select %465, %477, %478 : vector<16x16xi1>, vector<16x16xf32>
    %cst_182 = arith.constant 1.57079637 : f32
    %480 = vector.broadcast %cst_182 : f32 to vector<16x16xf32>
    %481 = arith.select %461, %480, %479 : vector<16x16xi1>, vector<16x16xf32>
    %482 = arith.mulf %476, %476 : vector<16x16xf32>
    %cst_183 = arith.constant 0.0805374458 : f32
    %483 = vector.broadcast %cst_183 : f32 to vector<16x16xf32>
    %484 = arith.mulf %483, %482 : vector<16x16xf32>
    %cst_184 = arith.constant 0.138776854 : f32
    %485 = vector.broadcast %cst_184 : f32 to vector<16x16xf32>
    %486 = arith.subf %484, %485 : vector<16x16xf32>
    %487 = arith.mulf %486, %482 : vector<16x16xf32>
    %cst_185 = arith.constant 0.199777111 : f32
    %488 = vector.broadcast %cst_185 : f32 to vector<16x16xf32>
    %489 = arith.addf %487, %488 : vector<16x16xf32>
    %490 = arith.mulf %489, %482 : vector<16x16xf32>
    %cst_186 = arith.constant 0.333329499 : f32
    %491 = vector.broadcast %cst_186 : f32 to vector<16x16xf32>
    %492 = arith.subf %490, %491 : vector<16x16xf32>
    %493 = arith.mulf %492, %482 : vector<16x16xf32>
    %494 = arith.mulf %493, %476 : vector<16x16xf32>
    %495 = arith.addf %481, %494 : vector<16x16xf32>
    %496 = arith.addf %495, %476 : vector<16x16xf32>
    %cst_187 = arith.constant 0.000000e+00 : f32
    %497 = vector.broadcast %cst_187 : f32 to vector<16x16xf32>
    %498 = arith.cmpf olt, %458, %497 : vector<16x16xf32>
    %cst_188 = arith.constant 0.000000e+00 : f32
    %499 = vector.broadcast %cst_188 : f32 to vector<16x16xf32>
    %500 = arith.subf %499, %496 : vector<16x16xf32>
    %501 = arith.select %498, %500, %496 : vector<16x16xi1>, vector<16x16xf32>
    %502 = vector.shape_cast %501 : vector<16x16xf32> to vector<1x16x16xf32>
    %cst_189 = arith.constant dense<0x7F800000> : vector<1xf32>
    %503 = vector.multi_reduction <minimumf>, %502, %cst_189 [1, 2] : vector<1x16x16xf32> to vector<1xf32>
    %504 = vector.shape_cast %503 : vector<1xf32> to vector<1x1x1xf32>
    %505 = vector.extract %504[0, 0, 0] : f32 from vector<1x1x1xf32>
    %506 = vector.broadcast %505 : f32 to vector<1x1xf32>
    %507 = vector.shape_cast %501 : vector<16x16xf32> to vector<1x16x16xf32>
    %cst_190 = arith.constant dense<0xFF800000> : vector<1xf32>
    %508 = vector.multi_reduction <maximumf>, %507, %cst_190 [1, 2] : vector<1x16x16xf32> to vector<1xf32>
    %509 = vector.shape_cast %508 : vector<1xf32> to vector<1x1x1xf32>
    %510 = vector.extract %509[0, 0, 0] : f32 from vector<1x1x1xf32>
    %511 = vector.broadcast %510 : f32 to vector<1x1xf32>
    %512 = vector.broadcast %506 : vector<1x1xf32> to vector<16x16xf32>
    %513 = arith.subf %501, %512 : vector<16x16xf32>
    %514 = arith.subf %511, %506 : vector<1x1xf32>
    %515 = vector.broadcast %514 : vector<1x1xf32> to vector<16x16xf32>
    %516 = arith.divf %513, %515 : vector<16x16xf32>
    %cst_191 = arith.constant 9.99999974E-6 : f32
    %517 = arith.cmpf one, %516, %516 : vector<16x16xf32>
    %518 = vector.broadcast %cst_191 : f32 to vector<16x16xf32>
    %519 = arith.select %517, %518, %516 : vector<16x16xi1>, vector<16x16xf32>
    %cst_192 = arith.constant 0x7F800000 : f32
    %520 = vector.broadcast %cst_192 : f32 to vector<16x16xf32>
    %521 = arith.cmpf oeq, %519, %520 : vector<16x16xf32>
    %cst_193 = arith.constant 3.40282347E+38 : f32
    %522 = vector.broadcast %cst_193 : f32 to vector<16x16xf32>
    %523 = arith.select %521, %522, %519 : vector<16x16xi1>, vector<16x16xf32>
    %cst_194 = arith.constant 0xFF800000 : f32
    %524 = vector.broadcast %cst_194 : f32 to vector<16x16xf32>
    %525 = arith.cmpf oeq, %523, %524 : vector<16x16xf32>
    %cst_195 = arith.constant -3.40282347E+38 : f32
    %526 = vector.broadcast %cst_195 : f32 to vector<16x16xf32>
    %527 = arith.select %525, %526, %523 : vector<16x16xi1>, vector<16x16xf32>
    %528 = vector.shape_cast %456 : vector<16x16xf32> to vector<1x16x16xf32>
    %cst_196 = arith.constant dense<0x7F800000> : vector<1xf32>
    %529 = vector.multi_reduction <minimumf>, %528, %cst_196 [1, 2] : vector<1x16x16xf32> to vector<1xf32>
    %530 = vector.shape_cast %529 : vector<1xf32> to vector<1x1x1xf32>
    %531 = vector.extract %530[0, 0, 0] : f32 from vector<1x1x1xf32>
    %532 = vector.broadcast %531 : f32 to vector<1x1xf32>
    %533 = vector.shape_cast %456 : vector<16x16xf32> to vector<1x16x16xf32>
    %cst_197 = arith.constant dense<0xFF800000> : vector<1xf32>
    %534 = vector.multi_reduction <maximumf>, %533, %cst_197 [1, 2] : vector<1x16x16xf32> to vector<1xf32>
    %535 = vector.shape_cast %534 : vector<1xf32> to vector<1x1x1xf32>
    %536 = vector.extract %535[0, 0, 0] : f32 from vector<1x1x1xf32>
    %537 = vector.broadcast %536 : f32 to vector<1x1xf32>
    %538 = vector.broadcast %532 : vector<1x1xf32> to vector<16x16xf32>
    %539 = arith.subf %456, %538 : vector<16x16xf32>
    %540 = arith.subf %537, %532 : vector<1x1xf32>
    %541 = vector.broadcast %540 : vector<1x1xf32> to vector<16x16xf32>
    %542 = arith.divf %539, %541 : vector<16x16xf32>
    %cst_198 = arith.constant 9.99999974E-6 : f32
    %543 = arith.cmpf one, %542, %542 : vector<16x16xf32>
    %544 = vector.broadcast %cst_198 : f32 to vector<16x16xf32>
    %545 = arith.select %543, %544, %542 : vector<16x16xi1>, vector<16x16xf32>
    %cst_199 = arith.constant 0x7F800000 : f32
    %546 = vector.broadcast %cst_199 : f32 to vector<16x16xf32>
    %547 = arith.cmpf oeq, %545, %546 : vector<16x16xf32>
    %cst_200 = arith.constant 3.40282347E+38 : f32
    %548 = vector.broadcast %cst_200 : f32 to vector<16x16xf32>
    %549 = arith.select %547, %548, %545 : vector<16x16xi1>, vector<16x16xf32>
    %cst_201 = arith.constant 0xFF800000 : f32
    %550 = vector.broadcast %cst_201 : f32 to vector<16x16xf32>
    %551 = arith.cmpf oeq, %549, %550 : vector<16x16xf32>
    %cst_202 = arith.constant -3.40282347E+38 : f32
    %552 = vector.broadcast %cst_202 : f32 to vector<16x16xf32>
    %553 = arith.select %551, %552, %549 : vector<16x16xi1>, vector<16x16xf32>
    %554 = vector.shape_cast %450 : vector<16x16xf32> to vector<1x16x16xf32>
    %cst_203 = arith.constant dense<0x7F800000> : vector<1xf32>
    %555 = vector.multi_reduction <minimumf>, %554, %cst_203 [1, 2] : vector<1x16x16xf32> to vector<1xf32>
    %556 = vector.shape_cast %555 : vector<1xf32> to vector<1x1x1xf32>
    %557 = vector.extract %556[0, 0, 0] : f32 from vector<1x1x1xf32>
    %558 = vector.broadcast %557 : f32 to vector<1x1xf32>
    %559 = vector.shape_cast %450 : vector<16x16xf32> to vector<1x16x16xf32>
    %cst_204 = arith.constant dense<0xFF800000> : vector<1xf32>
    %560 = vector.multi_reduction <maximumf>, %559, %cst_204 [1, 2] : vector<1x16x16xf32> to vector<1xf32>
    %561 = vector.shape_cast %560 : vector<1xf32> to vector<1x1x1xf32>
    %562 = vector.extract %561[0, 0, 0] : f32 from vector<1x1x1xf32>
    %563 = vector.broadcast %562 : f32 to vector<1x1xf32>
    %564 = vector.broadcast %558 : vector<1x1xf32> to vector<16x16xf32>
    %565 = arith.subf %450, %564 : vector<16x16xf32>
    %566 = arith.subf %563, %558 : vector<1x1xf32>
    %567 = vector.broadcast %566 : vector<1x1xf32> to vector<16x16xf32>
    %568 = arith.divf %565, %567 : vector<16x16xf32>
    %cst_205 = arith.constant 9.99999974E-6 : f32
    %569 = arith.cmpf one, %568, %568 : vector<16x16xf32>
    %570 = vector.broadcast %cst_205 : f32 to vector<16x16xf32>
    %571 = arith.select %569, %570, %568 : vector<16x16xi1>, vector<16x16xf32>
    %cst_206 = arith.constant 0x7F800000 : f32
    %572 = vector.broadcast %cst_206 : f32 to vector<16x16xf32>
    %573 = arith.cmpf oeq, %571, %572 : vector<16x16xf32>
    %cst_207 = arith.constant 3.40282347E+38 : f32
    %574 = vector.broadcast %cst_207 : f32 to vector<16x16xf32>
    %575 = arith.select %573, %574, %571 : vector<16x16xi1>, vector<16x16xf32>
    %cst_208 = arith.constant 0xFF800000 : f32
    %576 = vector.broadcast %cst_208 : f32 to vector<16x16xf32>
    %577 = arith.cmpf oeq, %575, %576 : vector<16x16xf32>
    %cst_209 = arith.constant -3.40282347E+38 : f32
    %578 = vector.broadcast %cst_209 : f32 to vector<16x16xf32>
    %579 = arith.select %577, %578, %575 : vector<16x16xi1>, vector<16x16xf32>
    %cst_210 = arith.constant 1.000000e+00 : f32
    %580 = vector.broadcast %cst_210 : f32 to vector<16x16xf32>
    %581 = arith.subf %580, %553 : vector<16x16xf32>
    %cst_211 = arith.constant 6.000000e+00 : f32
    %582 = vector.broadcast %cst_211 : f32 to vector<16x16xf32>
    %583 = arith.mulf %579, %582 : vector<16x16xf32>
    %584 = arith.fptosi %583 : vector<16x16xf32> to vector<16x16xi32>
    %cst_212 = arith.constant 5.000000e-01 : f32
    %585 = vector.broadcast %cst_212 : f32 to vector<16x16xf32>
    %586 = arith.mulf %583, %585 : vector<16x16xf32>
    %587 = math.floor %586 : vector<16x16xf32>
    %cst_213 = arith.constant 2.000000e+00 : f32
    %588 = vector.broadcast %cst_213 : f32 to vector<16x16xf32>
    %589 = arith.mulf %588, %587 : vector<16x16xf32>
    %590 = arith.subf %583, %589 : vector<16x16xf32>
    %cst_214 = arith.constant 1.000000e+00 : f32
    %591 = vector.broadcast %cst_214 : f32 to vector<16x16xf32>
    %592 = arith.subf %590, %591 : vector<16x16xf32>
    %593 = math.absf %592 : vector<16x16xf32>
    %cst_215 = arith.constant 1.000000e+00 : f32
    %594 = vector.broadcast %cst_215 : f32 to vector<16x16xf32>
    %595 = arith.subf %594, %593 : vector<16x16xf32>
    %596 = arith.mulf %553, %595 : vector<16x16xf32>
    %c0_i32_216 = arith.constant 0 : i32
    %597 = vector.broadcast %c0_i32_216 : i32 to vector<16x16xi32>
    %598 = arith.cmpi eq, %584, %597 : vector<16x16xi32>
    %c1_i32_217 = arith.constant 1 : i32
    %599 = vector.broadcast %c1_i32_217 : i32 to vector<16x16xi32>
    %600 = arith.cmpi eq, %584, %599 : vector<16x16xi32>
    %c2_i32_218 = arith.constant 2 : i32
    %601 = vector.broadcast %c2_i32_218 : i32 to vector<16x16xi32>
    %602 = arith.cmpi eq, %584, %601 : vector<16x16xi32>
    %c3_i32_219 = arith.constant 3 : i32
    %603 = vector.broadcast %c3_i32_219 : i32 to vector<16x16xi32>
    %604 = arith.cmpi eq, %584, %603 : vector<16x16xi32>
    %c4_i32_220 = arith.constant 4 : i32
    %605 = vector.broadcast %c4_i32_220 : i32 to vector<16x16xi32>
    %606 = arith.cmpi eq, %584, %605 : vector<16x16xi32>
    %c5_i32_221 = arith.constant 5 : i32
    %607 = vector.broadcast %c5_i32_221 : i32 to vector<16x16xi32>
    %608 = arith.cmpi eq, %584, %607 : vector<16x16xi32>
    %609 = arith.ori %598, %608 : vector<16x16xi1>
    %610 = arith.ori %600, %606 : vector<16x16xi1>
    %cst_222 = arith.constant 0.000000e+00 : f32
    %611 = vector.broadcast %cst_222 : f32 to vector<16x16xf32>
    %612 = arith.select %610, %596, %611 : vector<16x16xi1>, vector<16x16xf32>
    %613 = arith.select %609, %553, %612 : vector<16x16xi1>, vector<16x16xf32>
    %614 = arith.addf %613, %581 : vector<16x16xf32>
    %615 = arith.ori %600, %602 : vector<16x16xi1>
    %616 = arith.ori %598, %604 : vector<16x16xi1>
    %cst_223 = arith.constant 0.000000e+00 : f32
    %617 = vector.broadcast %cst_223 : f32 to vector<16x16xf32>
    %618 = arith.select %616, %596, %617 : vector<16x16xi1>, vector<16x16xf32>
    %619 = arith.select %615, %553, %618 : vector<16x16xi1>, vector<16x16xf32>
    %620 = arith.addf %619, %581 : vector<16x16xf32>
    %621 = arith.ori %604, %606 : vector<16x16xi1>
    %622 = arith.ori %602, %608 : vector<16x16xi1>
    %cst_224 = arith.constant 0.000000e+00 : f32
    %623 = vector.broadcast %cst_224 : f32 to vector<16x16xf32>
    %624 = arith.select %622, %596, %623 : vector<16x16xi1>, vector<16x16xf32>
    %625 = arith.select %621, %553, %624 : vector<16x16xi1>, vector<16x16xf32>
    %626 = arith.addf %625, %581 : vector<16x16xf32>
    %cst_225 = arith.constant 6.000000e+00 : f32
    %627 = vector.broadcast %cst_225 : f32 to vector<16x16xf32>
    %628 = arith.mulf %527, %627 : vector<16x16xf32>
    %629 = arith.fptosi %628 : vector<16x16xf32> to vector<16x16xi32>
    %cst_226 = arith.constant 5.000000e-01 : f32
    %630 = vector.broadcast %cst_226 : f32 to vector<16x16xf32>
    %631 = arith.mulf %628, %630 : vector<16x16xf32>
    %632 = math.floor %631 : vector<16x16xf32>
    %cst_227 = arith.constant 2.000000e+00 : f32
    %633 = vector.broadcast %cst_227 : f32 to vector<16x16xf32>
    %634 = arith.mulf %633, %632 : vector<16x16xf32>
    %635 = arith.subf %628, %634 : vector<16x16xf32>
    %cst_228 = arith.constant 1.000000e+00 : f32
    %636 = vector.broadcast %cst_228 : f32 to vector<16x16xf32>
    %637 = arith.subf %635, %636 : vector<16x16xf32>
    %638 = math.absf %637 : vector<16x16xf32>
    %cst_229 = arith.constant 1.000000e+00 : f32
    %639 = vector.broadcast %cst_229 : f32 to vector<16x16xf32>
    %640 = arith.subf %639, %638 : vector<16x16xf32>
    %641 = arith.mulf %553, %640 : vector<16x16xf32>
    %c0_i32_230 = arith.constant 0 : i32
    %642 = vector.broadcast %c0_i32_230 : i32 to vector<16x16xi32>
    %643 = arith.cmpi eq, %629, %642 : vector<16x16xi32>
    %c1_i32_231 = arith.constant 1 : i32
    %644 = vector.broadcast %c1_i32_231 : i32 to vector<16x16xi32>
    %645 = arith.cmpi eq, %629, %644 : vector<16x16xi32>
    %c2_i32_232 = arith.constant 2 : i32
    %646 = vector.broadcast %c2_i32_232 : i32 to vector<16x16xi32>
    %647 = arith.cmpi eq, %629, %646 : vector<16x16xi32>
    %c3_i32_233 = arith.constant 3 : i32
    %648 = vector.broadcast %c3_i32_233 : i32 to vector<16x16xi32>
    %649 = arith.cmpi eq, %629, %648 : vector<16x16xi32>
    %c4_i32_234 = arith.constant 4 : i32
    %650 = vector.broadcast %c4_i32_234 : i32 to vector<16x16xi32>
    %651 = arith.cmpi eq, %629, %650 : vector<16x16xi32>
    %c5_i32_235 = arith.constant 5 : i32
    %652 = vector.broadcast %c5_i32_235 : i32 to vector<16x16xi32>
    %653 = arith.cmpi eq, %629, %652 : vector<16x16xi32>
    %654 = arith.ori %643, %653 : vector<16x16xi1>
    %655 = arith.ori %645, %651 : vector<16x16xi1>
    %cst_236 = arith.constant 0.000000e+00 : f32
    %656 = vector.broadcast %cst_236 : f32 to vector<16x16xf32>
    %657 = arith.select %655, %641, %656 : vector<16x16xi1>, vector<16x16xf32>
    %658 = arith.select %654, %553, %657 : vector<16x16xi1>, vector<16x16xf32>
    %659 = arith.addf %658, %581 : vector<16x16xf32>
    %660 = arith.ori %645, %647 : vector<16x16xi1>
    %661 = arith.ori %643, %649 : vector<16x16xi1>
    %cst_237 = arith.constant 0.000000e+00 : f32
    %662 = vector.broadcast %cst_237 : f32 to vector<16x16xf32>
    %663 = arith.select %661, %641, %662 : vector<16x16xi1>, vector<16x16xf32>
    %664 = arith.select %660, %553, %663 : vector<16x16xi1>, vector<16x16xf32>
    %665 = arith.addf %664, %581 : vector<16x16xf32>
    %666 = arith.ori %649, %651 : vector<16x16xi1>
    %667 = arith.ori %647, %653 : vector<16x16xi1>
    %cst_238 = arith.constant 0.000000e+00 : f32
    %668 = vector.broadcast %cst_238 : f32 to vector<16x16xf32>
    %669 = arith.select %667, %641, %668 : vector<16x16xi1>, vector<16x16xf32>
    %670 = arith.select %666, %553, %669 : vector<16x16xi1>, vector<16x16xf32>
    %671 = arith.addf %670, %581 : vector<16x16xf32>
    %c1_239 = arith.constant 1 : index
    %c0_240 = arith.constant 0 : index
    %c0_241 = arith.constant 0 : index
    %c0_242 = arith.constant 0 : index
    %672 = vector.load %arg10[%c1_239, %c0_240, %c0_241, %c0_242] : memref<2x6x16x16xf32, #tpu.memory_space<vmem>>, vector<1x1x16x16xf32>
    %673 = vector.shape_cast %672 : vector<1x1x16x16xf32> to vector<16x16xf32>
    %674 = vector.shape_cast %614 : vector<16x16xf32> to vector<1x1x16x16xf32>
    tpu.vector_store %arg10[%c1_239, %c0_240, %c0_241, %c0_242], %674 {strides = array<i32>} : memref<2x6x16x16xf32, #tpu.memory_space<vmem>>, vector<1x1x16x16xf32>,
    %c1_243 = arith.constant 1 : index
    %c1_244 = arith.constant 1 : index
    %c0_245 = arith.constant 0 : index
    %c0_246 = arith.constant 0 : index
    %675 = vector.load %arg10[%c1_243, %c1_244, %c0_245, %c0_246] : memref<2x6x16x16xf32, #tpu.memory_space<vmem>>, vector<1x1x16x16xf32>
    %676 = vector.shape_cast %675 : vector<1x1x16x16xf32> to vector<16x16xf32>
    %677 = vector.shape_cast %620 : vector<16x16xf32> to vector<1x1x16x16xf32>
    tpu.vector_store %arg10[%c1_243, %c1_244, %c0_245, %c0_246], %677 {strides = array<i32>} : memref<2x6x16x16xf32, #tpu.memory_space<vmem>>, vector<1x1x16x16xf32>,
    %c1_247 = arith.constant 1 : index
    %c2_248 = arith.constant 2 : index
    %c0_249 = arith.constant 0 : index
    %c0_250 = arith.constant 0 : index
    %678 = vector.load %arg10[%c1_247, %c2_248, %c0_249, %c0_250] : memref<2x6x16x16xf32, #tpu.memory_space<vmem>>, vector<1x1x16x16xf32>
    %679 = vector.shape_cast %678 : vector<1x1x16x16xf32> to vector<16x16xf32>
    %680 = vector.shape_cast %626 : vector<16x16xf32> to vector<1x1x16x16xf32>
    tpu.vector_store %arg10[%c1_247, %c2_248, %c0_249, %c0_250], %680 {strides = array<i32>} : memref<2x6x16x16xf32, #tpu.memory_space<vmem>>, vector<1x1x16x16xf32>,
    %c1_251 = arith.constant 1 : index
    %c3_252 = arith.constant 3 : index
    %c0_253 = arith.constant 0 : index
    %c0_254 = arith.constant 0 : index
    %681 = vector.load %arg10[%c1_251, %c3_252, %c0_253, %c0_254] : memref<2x6x16x16xf32, #tpu.memory_space<vmem>>, vector<1x1x16x16xf32>
    %682 = vector.shape_cast %681 : vector<1x1x16x16xf32> to vector<16x16xf32>
    %683 = vector.shape_cast %659 : vector<16x16xf32> to vector<1x1x16x16xf32>
    tpu.vector_store %arg10[%c1_251, %c3_252, %c0_253, %c0_254], %683 {strides = array<i32>} : memref<2x6x16x16xf32, #tpu.memory_space<vmem>>, vector<1x1x16x16xf32>,
    %c1_255 = arith.constant 1 : index
    %c4_256 = arith.constant 4 : index
    %c0_257 = arith.constant 0 : index
    %c0_258 = arith.constant 0 : index
    %684 = vector.load %arg10[%c1_255, %c4_256, %c0_257, %c0_258] : memref<2x6x16x16xf32, #tpu.memory_space<vmem>>, vector<1x1x16x16xf32>
    %685 = vector.shape_cast %684 : vector<1x1x16x16xf32> to vector<16x16xf32>
    %686 = vector.shape_cast %665 : vector<16x16xf32> to vector<1x1x16x16xf32>
    tpu.vector_store %arg10[%c1_255, %c4_256, %c0_257, %c0_258], %686 {strides = array<i32>} : memref<2x6x16x16xf32, #tpu.memory_space<vmem>>, vector<1x1x16x16xf32>,
    %c1_259 = arith.constant 1 : index
    %c5_260 = arith.constant 5 : index
    %c0_261 = arith.constant 0 : index
    %c0_262 = arith.constant 0 : index
    %687 = vector.load %arg10[%c1_259, %c5_260, %c0_261, %c0_262] : memref<2x6x16x16xf32, #tpu.memory_space<vmem>>, vector<1x1x16x16xf32>
    %688 = vector.shape_cast %687 : vector<1x1x16x16xf32> to vector<16x16xf32>
    %689 = vector.shape_cast %671 : vector<16x16xf32> to vector<1x1x16x16xf32>
    tpu.vector_store %arg10[%c1_259, %c5_260, %c0_261, %c0_262], %689 {strides = array<i32>} : memref<2x6x16x16xf32, #tpu.memory_space<vmem>>, vector<1x1x16x16xf32>,
    return
  }
  func.func @transform_0(%arg0: i32) -> (i32, i32, i32, i32) {
    %c0_i32 = arith.constant 0 : i32
    %c0_i32_0 = arith.constant 0 : i32
    %c0_i32_1 = arith.constant 0 : i32
    %c0_i32_2 = arith.constant 0 : i32
    return %arg0, %c0_i32, %c0_i32_0, %c0_i32_1 : i32, i32, i32, i32
  }
  func.func @transform_1(%arg0: i32) -> (i32, i32) {
    %c0_i32 = arith.constant 0 : i32
    %c0_i32_0 = arith.constant 0 : i32
    %c0_i32_1 = arith.constant 0 : i32
    return %c0_i32, %c0_i32_0 : i32, i32
  }
  func.func @transform_2(%arg0: i32) -> (i32, i32) {
    %c0_i32 = arith.constant 0 : i32
    %c0_i32_0 = arith.constant 0 : i32
    %c0_i32_1 = arith.constant 0 : i32
    return %c0_i32, %c0_i32_0 : i32, i32
  }
  func.func @transform_3(%arg0: i32) -> (i32, i32) {
    %c0_i32 = arith.constant 0 : i32
    %c0_i32_0 = arith.constant 0 : i32
    %c0_i32_1 = arith.constant 0 : i32
    return %c0_i32, %c0_i32_0 : i32, i32
  }
  func.func @transform_4(%arg0: i32) -> (i32, i32) {
    %c0_i32 = arith.constant 0 : i32
    %c0_i32_0 = arith.constant 0 : i32
    %c0_i32_1 = arith.constant 0 : i32
    return %c0_i32, %c0_i32_0 : i32, i32
  }
  func.func @transform_5(%arg0: i32) -> (i32, i32) {
    %c0_i32 = arith.constant 0 : i32
    %c0_i32_0 = arith.constant 0 : i32
    %c0_i32_1 = arith.constant 0 : i32
    return %c0_i32, %c0_i32_0 : i32, i32
  }
  func.func @transform_6(%arg0: i32) -> (i32, i32) {
    %c0_i32 = arith.constant 0 : i32
    %c0_i32_0 = arith.constant 0 : i32
    %c0_i32_1 = arith.constant 0 : i32
    return %c0_i32, %c0_i32_0 : i32, i32
  }
  func.func @transform_7(%arg0: i32) -> (i32, i32) {
    %c0_i32 = arith.constant 0 : i32
    %c0_i32_0 = arith.constant 0 : i32
    %c0_i32_1 = arith.constant 0 : i32
    return %c0_i32, %c0_i32_0 : i32, i32
  }
  func.func @transform_8(%arg0: i32) -> (i32, i32) {
    %c0_i32 = arith.constant 0 : i32
    %c0_i32_0 = arith.constant 0 : i32
    %c0_i32_1 = arith.constant 0 : i32
    return %c0_i32, %c0_i32_0 : i32, i32
  }
  func.func @transform_9(%arg0: i32) -> (i32, i32, i32, i32) {
    %c0_i32 = arith.constant 0 : i32
    %c0_i32_0 = arith.constant 0 : i32
    %c0_i32_1 = arith.constant 0 : i32
    %c0_i32_2 = arith.constant 0 : i32
    return %arg0, %c0_i32, %c0_i32_0, %c0_i32_1 : i32, i32, i32, i32
  }
}

module attributes {stable_mosaic.version = 11 : i64} {
  func.func @_monogenic_kernel(%arg0: i32, %arg1: memref<2x4x16x16xf32, #tpu.memory_space<vmem>>, %arg2: memref<16x16xf32, #tpu.memory_space<vmem>>, %arg3: memref<16x16xf32, #tpu.memory_space<vmem>>, %arg4: memref<32x16xf32, #tpu.memory_space<vmem>>, %arg5: memref<32x16xf32, #tpu.memory_space<vmem>>, %arg6: memref<32x16xf32, #tpu.memory_space<vmem>>, %arg7: memref<32x16xf32, #tpu.memory_space<vmem>>, %arg8: memref<32x16xf32, #tpu.memory_space<vmem>>, %arg9: memref<32x16xf32, #tpu.memory_space<vmem>>, %arg10: memref<2x6x16x16xf32, #tpu.memory_space<vmem>>) attributes {dimension_semantics = [#tpu.dimension_semantics<parallel>], iteration_bounds = array<i64: 1>, scalar_prefetch = 0 : i64, scratch_operands = 0 : i64, tpu.core_type = #tpu.core_type<tc>, window_params = [{transform_indices = @transform_0, window_bounds = array<i64: 2, 4, 16, 16>}, {pipeline_mode = #tpu.pipeline_mode<synchronous>, transform_indices = @transform_1, window_bounds = array<i64: 16, 16>}, {pipeline_mode = #tpu.pipeline_mode<synchronous>, transform_indices = @transform_2, window_bounds = array<i64: 16, 16>}, {pipeline_mode = #tpu.pipeline_mode<synchronous>, transform_indices = @transform_3, window_bounds = array<i64: 32, 16>}, {pipeline_mode = #tpu.pipeline_mode<synchronous>, transform_indices = @transform_4, window_bounds = array<i64: 32, 16>}, {pipeline_mode = #tpu.pipeline_mode<synchronous>, transform_indices = @transform_5, window_bounds = array<i64: 32, 16>}, {pipeline_mode = #tpu.pipeline_mode<synchronous>, transform_indices = @transform_6, window_bounds = array<i64: 32, 16>}, {pipeline_mode = #tpu.pipeline_mode<synchronous>, transform_indices = @transform_7, window_bounds = array<i64: 32, 16>}, {pipeline_mode = #tpu.pipeline_mode<synchronous>, transform_indices = @transform_8, window_bounds = array<i64: 32, 16>}, {transform_indices = @transform_9, window_bounds = array<i64: 2, 6, 16, 16>}]} {
    %c0 = arith.constant 0 : index
    %c0_0 = arith.constant 0 : index
    %0 = vector.load %arg2[%c0, %c0_0] : memref<16x16xf32, #tpu.memory_space<vmem>>, vector<16x16xf32>
    %c0_1 = arith.constant 0 : index
    %c0_2 = arith.constant 0 : index
    %1 = vector.load %arg3[%c0_1, %c0_2] : memref<16x16xf32, #tpu.memory_space<vmem>>, vector<16x16xf32>
    %c0_3 = arith.constant 0 : index
    %c0_4 = arith.constant 0 : index
    %c0_5 = arith.constant 0 : index
    %c0_6 = arith.constant 0 : index
    %2 = vector.load %arg1[%c0_3, %c0_4, %c0_5, %c0_6] : memref<2x4x16x16xf32, #tpu.memory_space<vmem>>, vector<1x1x16x16xf32>
    %3 = vector.shape_cast %2 : vector<1x1x16x16xf32> to vector<16x16xf32>
    %c0_7 = arith.constant 0 : index
    %c1 = arith.constant 1 : index
    %c0_8 = arith.constant 0 : index
    %c0_9 = arith.constant 0 : index
    %4 = vector.load %arg1[%c0_7, %c1, %c0_8, %c0_9] : memref<2x4x16x16xf32, #tpu.memory_space<vmem>>, vector<1x1x16x16xf32>
    %5 = vector.shape_cast %4 : vector<1x1x16x16xf32> to vector<16x16xf32>
    %6 = arith.addf %3, %5 : vector<16x16xf32>
    %c0_10 = arith.constant 0 : index
    %c2 = arith.constant 2 : index
    %c0_11 = arith.constant 0 : index
    %c0_12 = arith.constant 0 : index
    %7 = vector.load %arg1[%c0_10, %c2, %c0_11, %c0_12] : memref<2x4x16x16xf32, #tpu.memory_space<vmem>>, vector<1x1x16x16xf32>
    %8 = vector.shape_cast %7 : vector<1x1x16x16xf32> to vector<16x16xf32>
    %9 = arith.addf %6, %8 : vector<16x16xf32>
    %c0_13 = arith.constant 0 : index
    %c3 = arith.constant 3 : index
    %c0_14 = arith.constant 0 : index
    %c0_15 = arith.constant 0 : index
    %10 = vector.load %arg1[%c0_13, %c3, %c0_14, %c0_15] : memref<2x4x16x16xf32, #tpu.memory_space<vmem>>, vector<1x1x16x16xf32>
    %11 = vector.shape_cast %10 : vector<1x1x16x16xf32> to vector<16x16xf32>
    %12 = arith.addf %9, %11 : vector<16x16xf32>
    %cst = arith.constant 2.500000e-01 : f32
    %13 = vector.broadcast %cst : f32 to vector<16x16xf32>
    %14 = arith.mulf %12, %13 : vector<16x16xf32>
    %c1_16 = arith.constant 1 : index
    %c0_17 = arith.constant 0 : index
    %c0_18 = arith.constant 0 : index
    %c0_19 = arith.constant 0 : index
    %15 = vector.load %arg1[%c1_16, %c0_17, %c0_18, %c0_19] : memref<2x4x16x16xf32, #tpu.memory_space<vmem>>, vector<1x1x16x16xf32>
    %16 = vector.shape_cast %15 : vector<1x1x16x16xf32> to vector<16x16xf32>
    %c1_20 = arith.constant 1 : index
    %c1_21 = arith.constant 1 : index
    %c0_22 = arith.constant 0 : index
    %c0_23 = arith.constant 0 : index
    %17 = vector.load %arg1[%c1_20, %c1_21, %c0_22, %c0_23] : memref<2x4x16x16xf32, #tpu.memory_space<vmem>>, vector<1x1x16x16xf32>
    %18 = vector.shape_cast %17 : vector<1x1x16x16xf32> to vector<16x16xf32>
    %19 = arith.addf %16, %18 : vector<16x16xf32>
    %c1_24 = arith.constant 1 : index
    %c2_25 = arith.constant 2 : index
    %c0_26 = arith.constant 0 : index
    %c0_27 = arith.constant 0 : index
    %20 = vector.load %arg1[%c1_24, %c2_25, %c0_26, %c0_27] : memref<2x4x16x16xf32, #tpu.memory_space<vmem>>, vector<1x1x16x16xf32>
    %21 = vector.shape_cast %20 : vector<1x1x16x16xf32> to vector<16x16xf32>
    %22 = arith.addf %19, %21 : vector<16x16xf32>
    %c1_28 = arith.constant 1 : index
    %c3_29 = arith.constant 3 : index
    %c0_30 = arith.constant 0 : index
    %c0_31 = arith.constant 0 : index
    %23 = vector.load %arg1[%c1_28, %c3_29, %c0_30, %c0_31] : memref<2x4x16x16xf32, #tpu.memory_space<vmem>>, vector<1x1x16x16xf32>
    %24 = vector.shape_cast %23 : vector<1x1x16x16xf32> to vector<16x16xf32>
    %25 = arith.addf %22, %24 : vector<16x16xf32>
    %cst_32 = arith.constant 2.500000e-01 : f32
    %26 = vector.broadcast %cst_32 : f32 to vector<16x16xf32>
    %27 = arith.mulf %25, %26 : vector<16x16xf32>
    %28 = tpu.concatenate %14, %27 in 0 : vector<16x16xf32>, vector<16x16xf32> -> vector<32x16xf32>
    %cst_33 = arith.constant dense<0.000000e+00> : vector<32x16xf32>
    %29 = tpu.matmul %28, %0, %cst_33 {dimension_numbers = #tpu.dot_dimension_numbers<[1], [0], [0], [1], [0, 0, 1, 1], [], []>} : vector<32x16xf32>, vector<16x16xf32>, vector<32x16xf32> -> vector<32x16xf32>
    %cst_34 = arith.constant dense<0.000000e+00> : vector<32x16xf32>
    %30 = tpu.matmul %28, %1, %cst_34 {dimension_numbers = #tpu.dot_dimension_numbers<[1], [0], [0], [1], [0, 0, 1, 1], [], []>} : vector<32x16xf32>, vector<16x16xf32>, vector<32x16xf32> -> vector<32x16xf32>
    %31 = vector.extract_strided_slice %29 {offsets = [0, 0], sizes = [16, 16], strides = [1, 1]} : vector<32x16xf32> to vector<16x16xf32>
    %32 = tpu.transpose %31, [1, 0] : vector<16x16xf32> -> vector<16x16xf32>
    %33 = vector.extract_strided_slice %29 {offsets = [16, 0], sizes = [16, 16], strides = [1, 1]} : vector<32x16xf32> to vector<16x16xf32>
    %34 = tpu.transpose %33, [1, 0] : vector<16x16xf32> -> vector<16x16xf32>
    %35 = tpu.concatenate %32, %34 in 0 : vector<16x16xf32>, vector<16x16xf32> -> vector<32x16xf32>
    %36 = vector.extract_strided_slice %30 {offsets = [0, 0], sizes = [16, 16], strides = [1, 1]} : vector<32x16xf32> to vector<16x16xf32>
    %37 = tpu.transpose %36, [1, 0] : vector<16x16xf32> -> vector<16x16xf32>
    %38 = vector.extract_strided_slice %30 {offsets = [16, 0], sizes = [16, 16], strides = [1, 1]} : vector<32x16xf32> to vector<16x16xf32>
    %39 = tpu.transpose %38, [1, 0] : vector<16x16xf32> -> vector<16x16xf32>
    %40 = tpu.concatenate %37, %39 in 0 : vector<16x16xf32>, vector<16x16xf32> -> vector<32x16xf32>
    %cst_35 = arith.constant dense<0.000000e+00> : vector<32x16xf32>
    %41 = tpu.matmul %35, %0, %cst_35 {dimension_numbers = #tpu.dot_dimension_numbers<[1], [0], [0], [1], [0, 0, 1, 1], [], []>} : vector<32x16xf32>, vector<16x16xf32>, vector<32x16xf32> -> vector<32x16xf32>
    %cst_36 = arith.constant dense<0.000000e+00> : vector<32x16xf32>
    %42 = tpu.matmul %40, %1, %cst_36 {dimension_numbers = #tpu.dot_dimension_numbers<[1], [0], [0], [1], [0, 0, 1, 1], [], []>} : vector<32x16xf32>, vector<16x16xf32>, vector<32x16xf32> -> vector<32x16xf32>
    %43 = arith.subf %41, %42 : vector<32x16xf32>
    %cst_37 = arith.constant dense<0.000000e+00> : vector<32x16xf32>
    %44 = tpu.matmul %35, %1, %cst_37 {dimension_numbers = #tpu.dot_dimension_numbers<[1], [0], [0], [1], [0, 0, 1, 1], [], []>} : vector<32x16xf32>, vector<16x16xf32>, vector<32x16xf32> -> vector<32x16xf32>
    %cst_38 = arith.constant dense<0.000000e+00> : vector<32x16xf32>
    %45 = tpu.matmul %40, %0, %cst_38 {dimension_numbers = #tpu.dot_dimension_numbers<[1], [0], [0], [1], [0, 0, 1, 1], [], []>} : vector<32x16xf32>, vector<16x16xf32>, vector<32x16xf32> -> vector<32x16xf32>
    %46 = arith.addf %44, %45 : vector<32x16xf32>
    %c0_39 = arith.constant 0 : index
    %c0_40 = arith.constant 0 : index
    %47 = vector.load %arg4[%c0_39, %c0_40] : memref<32x16xf32, #tpu.memory_space<vmem>>, vector<32x16xf32>
    %c0_41 = arith.constant 0 : index
    %c0_42 = arith.constant 0 : index
    %48 = vector.load %arg5[%c0_41, %c0_42] : memref<32x16xf32, #tpu.memory_space<vmem>>, vector<32x16xf32>
    %49 = arith.mulf %43, %47 : vector<32x16xf32>
    %50 = arith.mulf %46, %48 : vector<32x16xf32>
    %51 = arith.subf %49, %50 : vector<32x16xf32>
    %52 = arith.mulf %43, %48 : vector<32x16xf32>
    %53 = arith.mulf %46, %47 : vector<32x16xf32>
    %54 = arith.addf %52, %53 : vector<32x16xf32>
    %c0_43 = arith.constant 0 : index
    %c0_44 = arith.constant 0 : index
    %55 = vector.load %arg6[%c0_43, %c0_44] : memref<32x16xf32, #tpu.memory_space<vmem>>, vector<32x16xf32>
    %c0_45 = arith.constant 0 : index
    %c0_46 = arith.constant 0 : index
    %56 = vector.load %arg7[%c0_45, %c0_46] : memref<32x16xf32, #tpu.memory_space<vmem>>, vector<32x16xf32>
    %57 = arith.mulf %43, %55 : vector<32x16xf32>
    %58 = arith.mulf %46, %56 : vector<32x16xf32>
    %59 = arith.subf %57, %58 : vector<32x16xf32>
    %60 = arith.mulf %43, %56 : vector<32x16xf32>
    %61 = arith.mulf %46, %55 : vector<32x16xf32>
    %62 = arith.addf %60, %61 : vector<32x16xf32>
    %c0_47 = arith.constant 0 : index
    %c0_48 = arith.constant 0 : index
    %63 = vector.load %arg8[%c0_47, %c0_48] : memref<32x16xf32, #tpu.memory_space<vmem>>, vector<32x16xf32>
    %c0_49 = arith.constant 0 : index
    %c0_50 = arith.constant 0 : index
    %64 = vector.load %arg9[%c0_49, %c0_50] : memref<32x16xf32, #tpu.memory_space<vmem>>, vector<32x16xf32>
    %65 = arith.mulf %43, %63 : vector<32x16xf32>
    %66 = arith.mulf %46, %64 : vector<32x16xf32>
    %67 = arith.subf %65, %66 : vector<32x16xf32>
    %68 = arith.mulf %43, %64 : vector<32x16xf32>
    %69 = arith.mulf %46, %63 : vector<32x16xf32>
    %70 = arith.addf %68, %69 : vector<32x16xf32>
    %71 = tpu.concatenate %51, %59, %67 in 0 : vector<32x16xf32>, vector<32x16xf32>, vector<32x16xf32> -> vector<96x16xf32>
    %72 = tpu.concatenate %54, %62, %70 in 0 : vector<32x16xf32>, vector<32x16xf32>, vector<32x16xf32> -> vector<96x16xf32>
    %cst_51 = arith.constant dense<0.000000e+00> : vector<96x16xf32>
    %73 = tpu.matmul %71, %0, %cst_51 {dimension_numbers = #tpu.dot_dimension_numbers<[1], [0], [0], [1], [0, 0, 1, 1], [], []>} : vector<96x16xf32>, vector<16x16xf32>, vector<96x16xf32> -> vector<96x16xf32>
    %cst_52 = arith.constant dense<0.000000e+00> : vector<96x16xf32>
    %74 = tpu.matmul %72, %1, %cst_52 {dimension_numbers = #tpu.dot_dimension_numbers<[1], [0], [0], [1], [0, 0, 1, 1], [], []>} : vector<96x16xf32>, vector<16x16xf32>, vector<96x16xf32> -> vector<96x16xf32>
    %75 = arith.addf %73, %74 : vector<96x16xf32>
    %cst_53 = arith.constant dense<0.000000e+00> : vector<96x16xf32>
    %76 = tpu.matmul %72, %0, %cst_53 {dimension_numbers = #tpu.dot_dimension_numbers<[1], [0], [0], [1], [0, 0, 1, 1], [], []>} : vector<96x16xf32>, vector<16x16xf32>, vector<96x16xf32> -> vector<96x16xf32>
    %cst_54 = arith.constant dense<0.000000e+00> : vector<96x16xf32>
    %77 = tpu.matmul %71, %1, %cst_54 {dimension_numbers = #tpu.dot_dimension_numbers<[1], [0], [0], [1], [0, 0, 1, 1], [], []>} : vector<96x16xf32>, vector<16x16xf32>, vector<96x16xf32> -> vector<96x16xf32>
    %78 = arith.subf %76, %77 : vector<96x16xf32>
    %79 = vector.extract_strided_slice %75 {offsets = [0, 0], sizes = [16, 16], strides = [1, 1]} : vector<96x16xf32> to vector<16x16xf32>
    %80 = tpu.transpose %79, [1, 0] : vector<16x16xf32> -> vector<16x16xf32>
    %81 = vector.extract_strided_slice %75 {offsets = [16, 0], sizes = [16, 16], strides = [1, 1]} : vector<96x16xf32> to vector<16x16xf32>
    %82 = tpu.transpose %81, [1, 0] : vector<16x16xf32> -> vector<16x16xf32>
    %83 = vector.extract_strided_slice %75 {offsets = [32, 0], sizes = [16, 16], strides = [1, 1]} : vector<96x16xf32> to vector<16x16xf32>
    %84 = tpu.transpose %83, [1, 0] : vector<16x16xf32> -> vector<16x16xf32>
    %85 = vector.extract_strided_slice %75 {offsets = [48, 0], sizes = [16, 16], strides = [1, 1]} : vector<96x16xf32> to vector<16x16xf32>
    %86 = tpu.transpose %85, [1, 0] : vector<16x16xf32> -> vector<16x16xf32>
    %87 = vector.extract_strided_slice %75 {offsets = [64, 0], sizes = [16, 16], strides = [1, 1]} : vector<96x16xf32> to vector<16x16xf32>
    %88 = tpu.transpose %87, [1, 0] : vector<16x16xf32> -> vector<16x16xf32>
    %89 = vector.extract_strided_slice %75 {offsets = [80, 0], sizes = [16, 16], strides = [1, 1]} : vector<96x16xf32> to vector<16x16xf32>
    %90 = tpu.transpose %89, [1, 0] : vector<16x16xf32> -> vector<16x16xf32>
    %91 = tpu.concatenate %80, %82, %84, %86, %88, %90 in 0 : vector<16x16xf32>, vector<16x16xf32>, vector<16x16xf32>, vector<16x16xf32>, vector<16x16xf32>, vector<16x16xf32> -> vector<96x16xf32>
    %92 = vector.extract_strided_slice %78 {offsets = [0, 0], sizes = [16, 16], strides = [1, 1]} : vector<96x16xf32> to vector<16x16xf32>
    %93 = tpu.transpose %92, [1, 0] : vector<16x16xf32> -> vector<16x16xf32>
    %94 = vector.extract_strided_slice %78 {offsets = [16, 0], sizes = [16, 16], strides = [1, 1]} : vector<96x16xf32> to vector<16x16xf32>
    %95 = tpu.transpose %94, [1, 0] : vector<16x16xf32> -> vector<16x16xf32>
    %96 = vector.extract_strided_slice %78 {offsets = [32, 0], sizes = [16, 16], strides = [1, 1]} : vector<96x16xf32> to vector<16x16xf32>
    %97 = tpu.transpose %96, [1, 0] : vector<16x16xf32> -> vector<16x16xf32>
    %98 = vector.extract_strided_slice %78 {offsets = [48, 0], sizes = [16, 16], strides = [1, 1]} : vector<96x16xf32> to vector<16x16xf32>
    %99 = tpu.transpose %98, [1, 0] : vector<16x16xf32> -> vector<16x16xf32>
    %100 = vector.extract_strided_slice %78 {offsets = [64, 0], sizes = [16, 16], strides = [1, 1]} : vector<96x16xf32> to vector<16x16xf32>
    %101 = tpu.transpose %100, [1, 0] : vector<16x16xf32> -> vector<16x16xf32>
    %102 = vector.extract_strided_slice %78 {offsets = [80, 0], sizes = [16, 16], strides = [1, 1]} : vector<96x16xf32> to vector<16x16xf32>
    %103 = tpu.transpose %102, [1, 0] : vector<16x16xf32> -> vector<16x16xf32>
    %104 = tpu.concatenate %93, %95, %97, %99, %101, %103 in 0 : vector<16x16xf32>, vector<16x16xf32>, vector<16x16xf32>, vector<16x16xf32>, vector<16x16xf32>, vector<16x16xf32> -> vector<96x16xf32>
    %cst_55 = arith.constant dense<0.000000e+00> : vector<96x16xf32>
    %105 = tpu.matmul %91, %0, %cst_55 {dimension_numbers = #tpu.dot_dimension_numbers<[1], [0], [0], [1], [0, 0, 1, 1], [], []>} : vector<96x16xf32>, vector<16x16xf32>, vector<96x16xf32> -> vector<96x16xf32>
    %cst_56 = arith.constant dense<0.000000e+00> : vector<96x16xf32>
    %106 = tpu.matmul %104, %1, %cst_56 {dimension_numbers = #tpu.dot_dimension_numbers<[1], [0], [0], [1], [0, 0, 1, 1], [], []>} : vector<96x16xf32>, vector<16x16xf32>, vector<96x16xf32> -> vector<96x16xf32>
    %107 = arith.addf %105, %106 : vector<96x16xf32>
    %108 = vector.extract_strided_slice %107 {offsets = [0, 0], sizes = [16, 16], strides = [1, 1]} : vector<96x16xf32> to vector<16x16xf32>
    %109 = vector.extract_strided_slice %107 {offsets = [32, 0], sizes = [16, 16], strides = [1, 1]} : vector<96x16xf32> to vector<16x16xf32>
    %110 = vector.extract_strided_slice %107 {offsets = [64, 0], sizes = [16, 16], strides = [1, 1]} : vector<96x16xf32> to vector<16x16xf32>
    %cst_57 = arith.constant 0.000000e+00 : f32
    %111 = vector.broadcast %cst_57 : f32 to vector<16x16xf32>
    %112 = arith.subf %111, %110 : vector<16x16xf32>
    %cst_58 = arith.constant 9.99999997E-7 : f32
    %113 = vector.broadcast %cst_58 : f32 to vector<16x16xf32>
    %114 = arith.addf %109, %113 : vector<16x16xf32>
    %115 = tpu.reciprocal %114 {approx = true} : vector<16x16xf32> -> vector<16x16xf32>
    %116 = arith.mulf %112, %115 : vector<16x16xf32>
    %117 = math.absf %116 : vector<16x16xf32>
    %cst_59 = arith.constant 2.41421366 : f32
    %118 = vector.broadcast %cst_59 : f32 to vector<16x16xf32>
    %119 = arith.cmpf ogt, %117, %118 : vector<16x16xf32>
    %cst_60 = arith.constant 0.414213568 : f32
    %120 = vector.broadcast %cst_60 : f32 to vector<16x16xf32>
    %121 = arith.cmpf ogt, %117, %120 : vector<16x16xf32>
    %cst_61 = arith.constant dense<true> : vector<16x16xi1>
    %122 = arith.xori %119, %cst_61 : vector<16x16xi1>
    %123 = arith.andi %121, %122 : vector<16x16xi1>
    %124 = tpu.reciprocal %117 {approx = true} : vector<16x16xf32> -> vector<16x16xf32>
    %cst_62 = arith.constant 0.000000e+00 : f32
    %125 = vector.broadcast %cst_62 : f32 to vector<16x16xf32>
    %126 = arith.subf %125, %124 : vector<16x16xf32>
    %cst_63 = arith.constant 1.000000e+00 : f32
    %127 = vector.broadcast %cst_63 : f32 to vector<16x16xf32>
    %128 = arith.subf %117, %127 : vector<16x16xf32>
    %cst_64 = arith.constant 1.000000e+00 : f32
    %129 = vector.broadcast %cst_64 : f32 to vector<16x16xf32>
    %130 = arith.addf %117, %129 : vector<16x16xf32>
    %131 = tpu.reciprocal %130 {approx = true} : vector<16x16xf32> -> vector<16x16xf32>
    %132 = arith.mulf %128, %131 : vector<16x16xf32>
    %133 = arith.select %123, %132, %117 : vector<16x16xi1>, vector<16x16xf32>
    %134 = arith.select %119, %126, %133 : vector<16x16xi1>, vector<16x16xf32>
    %cst_65 = arith.constant 0.785398185 : f32
    %cst_66 = arith.constant 0.000000e+00 : f32
    %135 = vector.broadcast %cst_65 : f32 to vector<16x16xf32>
    %136 = vector.broadcast %cst_66 : f32 to vector<16x16xf32>
    %137 = arith.select %123, %135, %136 : vector<16x16xi1>, vector<16x16xf32>
    %cst_67 = arith.constant 1.57079637 : f32
    %138 = vector.broadcast %cst_67 : f32 to vector<16x16xf32>
    %139 = arith.select %119, %138, %137 : vector<16x16xi1>, vector<16x16xf32>
    %140 = arith.mulf %134, %134 : vector<16x16xf32>
    %cst_68 = arith.constant 0.0805374458 : f32
    %141 = vector.broadcast %cst_68 : f32 to vector<16x16xf32>
    %142 = arith.mulf %141, %140 : vector<16x16xf32>
    %cst_69 = arith.constant 0.138776854 : f32
    %143 = vector.broadcast %cst_69 : f32 to vector<16x16xf32>
    %144 = arith.subf %142, %143 : vector<16x16xf32>
    %145 = arith.mulf %144, %140 : vector<16x16xf32>
    %cst_70 = arith.constant 0.199777111 : f32
    %146 = vector.broadcast %cst_70 : f32 to vector<16x16xf32>
    %147 = arith.addf %145, %146 : vector<16x16xf32>
    %148 = arith.mulf %147, %140 : vector<16x16xf32>
    %cst_71 = arith.constant 0.333329499 : f32
    %149 = vector.broadcast %cst_71 : f32 to vector<16x16xf32>
    %150 = arith.subf %148, %149 : vector<16x16xf32>
    %151 = arith.mulf %150, %140 : vector<16x16xf32>
    %152 = arith.mulf %151, %134 : vector<16x16xf32>
    %153 = arith.addf %139, %152 : vector<16x16xf32>
    %154 = arith.addf %153, %134 : vector<16x16xf32>
    %cst_72 = arith.constant 0.000000e+00 : f32
    %155 = vector.broadcast %cst_72 : f32 to vector<16x16xf32>
    %156 = arith.cmpf olt, %116, %155 : vector<16x16xf32>
    %cst_73 = arith.constant 0.000000e+00 : f32
    %157 = vector.broadcast %cst_73 : f32 to vector<16x16xf32>
    %158 = arith.subf %157, %154 : vector<16x16xf32>
    %159 = arith.select %156, %158, %154 : vector<16x16xi1>, vector<16x16xf32>
    %160 = arith.mulf %109, %109 : vector<16x16xf32>
    %161 = arith.mulf %110, %110 : vector<16x16xf32>
    %162 = arith.addf %160, %161 : vector<16x16xf32>
    %163 = math.sqrt %162 : vector<16x16xf32>
    %cst_74 = arith.constant 9.99999997E-7 : f32
    %164 = vector.broadcast %cst_74 : f32 to vector<16x16xf32>
    %165 = arith.addf %163, %164 : vector<16x16xf32>
    %166 = tpu.reciprocal %165 {approx = true} : vector<16x16xf32> -> vector<16x16xf32>
    %167 = arith.mulf %108, %166 : vector<16x16xf32>
    %168 = math.absf %167 : vector<16x16xf32>
    %cst_75 = arith.constant 2.41421366 : f32
    %169 = vector.broadcast %cst_75 : f32 to vector<16x16xf32>
    %170 = arith.cmpf ogt, %168, %169 : vector<16x16xf32>
    %cst_76 = arith.constant 0.414213568 : f32
    %171 = vector.broadcast %cst_76 : f32 to vector<16x16xf32>
    %172 = arith.cmpf ogt, %168, %171 : vector<16x16xf32>
    %cst_77 = arith.constant dense<true> : vector<16x16xi1>
    %173 = arith.xori %170, %cst_77 : vector<16x16xi1>
    %174 = arith.andi %172, %173 : vector<16x16xi1>
    %175 = tpu.reciprocal %168 {approx = true} : vector<16x16xf32> -> vector<16x16xf32>
    %cst_78 = arith.constant 0.000000e+00 : f32
    %176 = vector.broadcast %cst_78 : f32 to vector<16x16xf32>
    %177 = arith.subf %176, %175 : vector<16x16xf32>
    %cst_79 = arith.constant 1.000000e+00 : f32
    %178 = vector.broadcast %cst_79 : f32 to vector<16x16xf32>
    %179 = arith.subf %168, %178 : vector<16x16xf32>
    %cst_80 = arith.constant 1.000000e+00 : f32
    %180 = vector.broadcast %cst_80 : f32 to vector<16x16xf32>
    %181 = arith.addf %168, %180 : vector<16x16xf32>
    %182 = tpu.reciprocal %181 {approx = true} : vector<16x16xf32> -> vector<16x16xf32>
    %183 = arith.mulf %179, %182 : vector<16x16xf32>
    %184 = arith.select %174, %183, %168 : vector<16x16xi1>, vector<16x16xf32>
    %185 = arith.select %170, %177, %184 : vector<16x16xi1>, vector<16x16xf32>
    %cst_81 = arith.constant 0.785398185 : f32
    %cst_82 = arith.constant 0.000000e+00 : f32
    %186 = vector.broadcast %cst_81 : f32 to vector<16x16xf32>
    %187 = vector.broadcast %cst_82 : f32 to vector<16x16xf32>
    %188 = arith.select %174, %186, %187 : vector<16x16xi1>, vector<16x16xf32>
    %cst_83 = arith.constant 1.57079637 : f32
    %189 = vector.broadcast %cst_83 : f32 to vector<16x16xf32>
    %190 = arith.select %170, %189, %188 : vector<16x16xi1>, vector<16x16xf32>
    %191 = arith.mulf %185, %185 : vector<16x16xf32>
    %cst_84 = arith.constant 0.0805374458 : f32
    %192 = vector.broadcast %cst_84 : f32 to vector<16x16xf32>
    %193 = arith.mulf %192, %191 : vector<16x16xf32>
    %cst_85 = arith.constant 0.138776854 : f32
    %194 = vector.broadcast %cst_85 : f32 to vector<16x16xf32>
    %195 = arith.subf %193, %194 : vector<16x16xf32>
    %196 = arith.mulf %195, %191 : vector<16x16xf32>
    %cst_86 = arith.constant 0.199777111 : f32
    %197 = vector.broadcast %cst_86 : f32 to vector<16x16xf32>
    %198 = arith.addf %196, %197 : vector<16x16xf32>
    %199 = arith.mulf %198, %191 : vector<16x16xf32>
    %cst_87 = arith.constant 0.333329499 : f32
    %200 = vector.broadcast %cst_87 : f32 to vector<16x16xf32>
    %201 = arith.subf %199, %200 : vector<16x16xf32>
    %202 = arith.mulf %201, %191 : vector<16x16xf32>
    %203 = arith.mulf %202, %185 : vector<16x16xf32>
    %204 = arith.addf %190, %203 : vector<16x16xf32>
    %205 = arith.addf %204, %185 : vector<16x16xf32>
    %cst_88 = arith.constant 0.000000e+00 : f32
    %206 = vector.broadcast %cst_88 : f32 to vector<16x16xf32>
    %207 = arith.cmpf olt, %167, %206 : vector<16x16xf32>
    %cst_89 = arith.constant 0.000000e+00 : f32
    %208 = vector.broadcast %cst_89 : f32 to vector<16x16xf32>
    %209 = arith.subf %208, %205 : vector<16x16xf32>
    %210 = arith.select %207, %209, %205 : vector<16x16xi1>, vector<16x16xf32>
    %211 = vector.shape_cast %210 : vector<16x16xf32> to vector<1x16x16xf32>
    %cst_90 = arith.constant dense<0x7F800000> : vector<1xf32>
    %212 = vector.multi_reduction <minimumf>, %211, %cst_90 [1, 2] : vector<1x16x16xf32> to vector<1xf32>
    %213 = vector.shape_cast %212 : vector<1xf32> to vector<1x1x1xf32>
    %214 = vector.extract %213[0, 0, 0] : f32 from vector<1x1x1xf32>
    %215 = vector.broadcast %214 : f32 to vector<1x1xf32>
    %216 = vector.shape_cast %210 : vector<16x16xf32> to vector<1x16x16xf32>
    %cst_91 = arith.constant dense<0xFF800000> : vector<1xf32>
    %217 = vector.multi_reduction <maximumf>, %216, %cst_91 [1, 2] : vector<1x16x16xf32> to vector<1xf32>
    %218 = vector.shape_cast %217 : vector<1xf32> to vector<1x1x1xf32>
    %219 = vector.extract %218[0, 0, 0] : f32 from vector<1x1x1xf32>
    %220 = vector.broadcast %219 : f32 to vector<1x1xf32>
    %221 = vector.broadcast %215 : vector<1x1xf32> to vector<16x16xf32>
    %222 = arith.subf %210, %221 : vector<16x16xf32>
    %223 = arith.subf %220, %215 : vector<1x1xf32>
    %224 = vector.broadcast %223 : vector<1x1xf32> to vector<16x16xf32>
    %225 = arith.divf %222, %224 : vector<16x16xf32>
    %cst_92 = arith.constant 9.99999974E-6 : f32
    %226 = arith.cmpf one, %225, %225 : vector<16x16xf32>
    %227 = vector.broadcast %cst_92 : f32 to vector<16x16xf32>
    %228 = arith.select %226, %227, %225 : vector<16x16xi1>, vector<16x16xf32>
    %cst_93 = arith.constant 0x7F800000 : f32
    %229 = vector.broadcast %cst_93 : f32 to vector<16x16xf32>
    %230 = arith.cmpf oeq, %228, %229 : vector<16x16xf32>
    %cst_94 = arith.constant 3.40282347E+38 : f32
    %231 = vector.broadcast %cst_94 : f32 to vector<16x16xf32>
    %232 = arith.select %230, %231, %228 : vector<16x16xi1>, vector<16x16xf32>
    %cst_95 = arith.constant 0xFF800000 : f32
    %233 = vector.broadcast %cst_95 : f32 to vector<16x16xf32>
    %234 = arith.cmpf oeq, %232, %233 : vector<16x16xf32>
    %cst_96 = arith.constant -3.40282347E+38 : f32
    %235 = vector.broadcast %cst_96 : f32 to vector<16x16xf32>
    %236 = arith.select %234, %235, %232 : vector<16x16xi1>, vector<16x16xf32>
    %237 = vector.shape_cast %165 : vector<16x16xf32> to vector<1x16x16xf32>
    %cst_97 = arith.constant dense<0x7F800000> : vector<1xf32>
    %238 = vector.multi_reduction <minimumf>, %237, %cst_97 [1, 2] : vector<1x16x16xf32> to vector<1xf32>
    %239 = vector.shape_cast %238 : vector<1xf32> to vector<1x1x1xf32>
    %240 = vector.extract %239[0, 0, 0] : f32 from vector<1x1x1xf32>
    %241 = vector.broadcast %240 : f32 to vector<1x1xf32>
    %242 = vector.shape_cast %165 : vector<16x16xf32> to vector<1x16x16xf32>
    %cst_98 = arith.constant dense<0xFF800000> : vector<1xf32>
    %243 = vector.multi_reduction <maximumf>, %242, %cst_98 [1, 2] : vector<1x16x16xf32> to vector<1xf32>
    %244 = vector.shape_cast %243 : vector<1xf32> to vector<1x1x1xf32>
    %245 = vector.extract %244[0, 0, 0] : f32 from vector<1x1x1xf32>
    %246 = vector.broadcast %245 : f32 to vector<1x1xf32>
    %247 = vector.broadcast %241 : vector<1x1xf32> to vector<16x16xf32>
    %248 = arith.subf %165, %247 : vector<16x16xf32>
    %249 = arith.subf %246, %241 : vector<1x1xf32>
    %250 = vector.broadcast %249 : vector<1x1xf32> to vector<16x16xf32>
    %251 = arith.divf %248, %250 : vector<16x16xf32>
    %cst_99 = arith.constant 9.99999974E-6 : f32
    %252 = arith.cmpf one, %251, %251 : vector<16x16xf32>
    %253 = vector.broadcast %cst_99 : f32 to vector<16x16xf32>
    %254 = arith.select %252, %253, %251 : vector<16x16xi1>, vector<16x16xf32>
    %cst_100 = arith.constant 0x7F800000 : f32
    %255 = vector.broadcast %cst_100 : f32 to vector<16x16xf32>
    %256 = arith.cmpf oeq, %254, %255 : vector<16x16xf32>
    %cst_101 = arith.constant 3.40282347E+38 : f32
    %257 = vector.broadcast %cst_101 : f32 to vector<16x16xf32>
    %258 = arith.select %256, %257, %254 : vector<16x16xi1>, vector<16x16xf32>
    %cst_102 = arith.constant 0xFF800000 : f32
    %259 = vector.broadcast %cst_102 : f32 to vector<16x16xf32>
    %260 = arith.cmpf oeq, %258, %259 : vector<16x16xf32>
    %cst_103 = arith.constant -3.40282347E+38 : f32
    %261 = vector.broadcast %cst_103 : f32 to vector<16x16xf32>
    %262 = arith.select %260, %261, %258 : vector<16x16xi1>, vector<16x16xf32>
    %263 = vector.shape_cast %159 : vector<16x16xf32> to vector<1x16x16xf32>
    %cst_104 = arith.constant dense<0x7F800000> : vector<1xf32>
    %264 = vector.multi_reduction <minimumf>, %263, %cst_104 [1, 2] : vector<1x16x16xf32> to vector<1xf32>
    %265 = vector.shape_cast %264 : vector<1xf32> to vector<1x1x1xf32>
    %266 = vector.extract %265[0, 0, 0] : f32 from vector<1x1x1xf32>
    %267 = vector.broadcast %266 : f32 to vector<1x1xf32>
    %268 = vector.shape_cast %159 : vector<16x16xf32> to vector<1x16x16xf32>
    %cst_105 = arith.constant dense<0xFF800000> : vector<1xf32>
    %269 = vector.multi_reduction <maximumf>, %268, %cst_105 [1, 2] : vector<1x16x16xf32> to vector<1xf32>
    %270 = vector.shape_cast %269 : vector<1xf32> to vector<1x1x1xf32>
    %271 = vector.extract %270[0, 0, 0] : f32 from vector<1x1x1xf32>
    %272 = vector.broadcast %271 : f32 to vector<1x1xf32>
    %273 = vector.broadcast %267 : vector<1x1xf32> to vector<16x16xf32>
    %274 = arith.subf %159, %273 : vector<16x16xf32>
    %275 = arith.subf %272, %267 : vector<1x1xf32>
    %276 = vector.broadcast %275 : vector<1x1xf32> to vector<16x16xf32>
    %277 = arith.divf %274, %276 : vector<16x16xf32>
    %cst_106 = arith.constant 9.99999974E-6 : f32
    %278 = arith.cmpf one, %277, %277 : vector<16x16xf32>
    %279 = vector.broadcast %cst_106 : f32 to vector<16x16xf32>
    %280 = arith.select %278, %279, %277 : vector<16x16xi1>, vector<16x16xf32>
    %cst_107 = arith.constant 0x7F800000 : f32
    %281 = vector.broadcast %cst_107 : f32 to vector<16x16xf32>
    %282 = arith.cmpf oeq, %280, %281 : vector<16x16xf32>
    %cst_108 = arith.constant 3.40282347E+38 : f32
    %283 = vector.broadcast %cst_108 : f32 to vector<16x16xf32>
    %284 = arith.select %282, %283, %280 : vector<16x16xi1>, vector<16x16xf32>
    %cst_109 = arith.constant 0xFF800000 : f32
    %285 = vector.broadcast %cst_109 : f32 to vector<16x16xf32>
    %286 = arith.cmpf oeq, %284, %285 : vector<16x16xf32>
    %cst_110 = arith.constant -3.40282347E+38 : f32
    %287 = vector.broadcast %cst_110 : f32 to vector<16x16xf32>
    %288 = arith.select %286, %287, %284 : vector<16x16xi1>, vector<16x16xf32>
    %cst_111 = arith.constant 1.000000e+00 : f32
    %289 = vector.broadcast %cst_111 : f32 to vector<16x16xf32>
    %290 = arith.subf %289, %262 : vector<16x16xf32>
    %cst_112 = arith.constant 6.000000e+00 : f32
    %291 = vector.broadcast %cst_112 : f32 to vector<16x16xf32>
    %292 = arith.mulf %288, %291 : vector<16x16xf32>
    %293 = arith.fptosi %292 : vector<16x16xf32> to vector<16x16xi32>
    %cst_113 = arith.constant 5.000000e-01 : f32
    %294 = vector.broadcast %cst_113 : f32 to vector<16x16xf32>
    %295 = arith.mulf %292, %294 : vector<16x16xf32>
    %296 = math.floor %295 : vector<16x16xf32>
    %cst_114 = arith.constant 2.000000e+00 : f32
    %297 = vector.broadcast %cst_114 : f32 to vector<16x16xf32>
    %298 = arith.mulf %297, %296 : vector<16x16xf32>
    %299 = arith.subf %292, %298 : vector<16x16xf32>
    %cst_115 = arith.constant 1.000000e+00 : f32
    %300 = vector.broadcast %cst_115 : f32 to vector<16x16xf32>
    %301 = arith.subf %299, %300 : vector<16x16xf32>
    %302 = math.absf %301 : vector<16x16xf32>
    %cst_116 = arith.constant 1.000000e+00 : f32
    %303 = vector.broadcast %cst_116 : f32 to vector<16x16xf32>
    %304 = arith.subf %303, %302 : vector<16x16xf32>
    %305 = arith.mulf %262, %304 : vector<16x16xf32>
    %c0_i32 = arith.constant 0 : i32
    %306 = vector.broadcast %c0_i32 : i32 to vector<16x16xi32>
    %307 = arith.cmpi eq, %293, %306 : vector<16x16xi32>
    %c1_i32 = arith.constant 1 : i32
    %308 = vector.broadcast %c1_i32 : i32 to vector<16x16xi32>
    %309 = arith.cmpi eq, %293, %308 : vector<16x16xi32>
    %c2_i32 = arith.constant 2 : i32
    %310 = vector.broadcast %c2_i32 : i32 to vector<16x16xi32>
    %311 = arith.cmpi eq, %293, %310 : vector<16x16xi32>
    %c3_i32 = arith.constant 3 : i32
    %312 = vector.broadcast %c3_i32 : i32 to vector<16x16xi32>
    %313 = arith.cmpi eq, %293, %312 : vector<16x16xi32>
    %c4_i32 = arith.constant 4 : i32
    %314 = vector.broadcast %c4_i32 : i32 to vector<16x16xi32>
    %315 = arith.cmpi eq, %293, %314 : vector<16x16xi32>
    %c5_i32 = arith.constant 5 : i32
    %316 = vector.broadcast %c5_i32 : i32 to vector<16x16xi32>
    %317 = arith.cmpi eq, %293, %316 : vector<16x16xi32>
    %318 = arith.ori %307, %317 : vector<16x16xi1>
    %319 = arith.ori %309, %315 : vector<16x16xi1>
    %cst_117 = arith.constant 0.000000e+00 : f32
    %320 = vector.broadcast %cst_117 : f32 to vector<16x16xf32>
    %321 = arith.select %319, %305, %320 : vector<16x16xi1>, vector<16x16xf32>
    %322 = arith.select %318, %262, %321 : vector<16x16xi1>, vector<16x16xf32>
    %323 = arith.addf %322, %290 : vector<16x16xf32>
    %324 = arith.ori %309, %311 : vector<16x16xi1>
    %325 = arith.ori %307, %313 : vector<16x16xi1>
    %cst_118 = arith.constant 0.000000e+00 : f32
    %326 = vector.broadcast %cst_118 : f32 to vector<16x16xf32>
    %327 = arith.select %325, %305, %326 : vector<16x16xi1>, vector<16x16xf32>
    %328 = arith.select %324, %262, %327 : vector<16x16xi1>, vector<16x16xf32>
    %329 = arith.addf %328, %290 : vector<16x16xf32>
    %330 = arith.ori %313, %315 : vector<16x16xi1>
    %331 = arith.ori %311, %317 : vector<16x16xi1>
    %cst_119 = arith.constant 0.000000e+00 : f32
    %332 = vector.broadcast %cst_119 : f32 to vector<16x16xf32>
    %333 = arith.select %331, %305, %332 : vector<16x16xi1>, vector<16x16xf32>
    %334 = arith.select %330, %262, %333 : vector<16x16xi1>, vector<16x16xf32>
    %335 = arith.addf %334, %290 : vector<16x16xf32>
    %cst_120 = arith.constant 6.000000e+00 : f32
    %336 = vector.broadcast %cst_120 : f32 to vector<16x16xf32>
    %337 = arith.mulf %236, %336 : vector<16x16xf32>
    %338 = arith.fptosi %337 : vector<16x16xf32> to vector<16x16xi32>
    %cst_121 = arith.constant 5.000000e-01 : f32
    %339 = vector.broadcast %cst_121 : f32 to vector<16x16xf32>
    %340 = arith.mulf %337, %339 : vector<16x16xf32>
    %341 = math.floor %340 : vector<16x16xf32>
    %cst_122 = arith.constant 2.000000e+00 : f32
    %342 = vector.broadcast %cst_122 : f32 to vector<16x16xf32>
    %343 = arith.mulf %342, %341 : vector<16x16xf32>
    %344 = arith.subf %337, %343 : vector<16x16xf32>
    %cst_123 = arith.constant 1.000000e+00 : f32
    %345 = vector.broadcast %cst_123 : f32 to vector<16x16xf32>
    %346 = arith.subf %344, %345 : vector<16x16xf32>
    %347 = math.absf %346 : vector<16x16xf32>
    %cst_124 = arith.constant 1.000000e+00 : f32
    %348 = vector.broadcast %cst_124 : f32 to vector<16x16xf32>
    %349 = arith.subf %348, %347 : vector<16x16xf32>
    %350 = arith.mulf %262, %349 : vector<16x16xf32>
    %c0_i32_125 = arith.constant 0 : i32
    %351 = vector.broadcast %c0_i32_125 : i32 to vector<16x16xi32>
    %352 = arith.cmpi eq, %338, %351 : vector<16x16xi32>
    %c1_i32_126 = arith.constant 1 : i32
    %353 = vector.broadcast %c1_i32_126 : i32 to vector<16x16xi32>
    %354 = arith.cmpi eq, %338, %353 : vector<16x16xi32>
    %c2_i32_127 = arith.constant 2 : i32
    %355 = vector.broadcast %c2_i32_127 : i32 to vector<16x16xi32>
    %356 = arith.cmpi eq, %338, %355 : vector<16x16xi32>
    %c3_i32_128 = arith.constant 3 : i32
    %357 = vector.broadcast %c3_i32_128 : i32 to vector<16x16xi32>
    %358 = arith.cmpi eq, %338, %357 : vector<16x16xi32>
    %c4_i32_129 = arith.constant 4 : i32
    %359 = vector.broadcast %c4_i32_129 : i32 to vector<16x16xi32>
    %360 = arith.cmpi eq, %338, %359 : vector<16x16xi32>
    %c5_i32_130 = arith.constant 5 : i32
    %361 = vector.broadcast %c5_i32_130 : i32 to vector<16x16xi32>
    %362 = arith.cmpi eq, %338, %361 : vector<16x16xi32>
    %363 = arith.ori %352, %362 : vector<16x16xi1>
    %364 = arith.ori %354, %360 : vector<16x16xi1>
    %cst_131 = arith.constant 0.000000e+00 : f32
    %365 = vector.broadcast %cst_131 : f32 to vector<16x16xf32>
    %366 = arith.select %364, %350, %365 : vector<16x16xi1>, vector<16x16xf32>
    %367 = arith.select %363, %262, %366 : vector<16x16xi1>, vector<16x16xf32>
    %368 = arith.addf %367, %290 : vector<16x16xf32>
    %369 = arith.ori %354, %356 : vector<16x16xi1>
    %370 = arith.ori %352, %358 : vector<16x16xi1>
    %cst_132 = arith.constant 0.000000e+00 : f32
    %371 = vector.broadcast %cst_132 : f32 to vector<16x16xf32>
    %372 = arith.select %370, %350, %371 : vector<16x16xi1>, vector<16x16xf32>
    %373 = arith.select %369, %262, %372 : vector<16x16xi1>, vector<16x16xf32>
    %374 = arith.addf %373, %290 : vector<16x16xf32>
    %375 = arith.ori %358, %360 : vector<16x16xi1>
    %376 = arith.ori %356, %362 : vector<16x16xi1>
    %cst_133 = arith.constant 0.000000e+00 : f32
    %377 = vector.broadcast %cst_133 : f32 to vector<16x16xf32>
    %378 = arith.select %376, %350, %377 : vector<16x16xi1>, vector<16x16xf32>
    %379 = arith.select %375, %262, %378 : vector<16x16xi1>, vector<16x16xf32>
    %380 = arith.addf %379, %290 : vector<16x16xf32>
    %c0_134 = arith.constant 0 : index
    %c0_135 = arith.constant 0 : index
    %c0_136 = arith.constant 0 : index
    %c0_137 = arith.constant 0 : index
    %381 = vector.load %arg10[%c0_134, %c0_135, %c0_136, %c0_137] : memref<2x6x16x16xf32, #tpu.memory_space<vmem>>, vector<1x1x16x16xf32>
    %382 = vector.shape_cast %381 : vector<1x1x16x16xf32> to vector<16x16xf32>
    %383 = vector.shape_cast %323 : vector<16x16xf32> to vector<1x1x16x16xf32>
    tpu.vector_store %arg10[%c0_134, %c0_135, %c0_136, %c0_137], %383 {strides = array<i32>} : memref<2x6x16x16xf32, #tpu.memory_space<vmem>>, vector<1x1x16x16xf32>,
    %c0_138 = arith.constant 0 : index
    %c1_139 = arith.constant 1 : index
    %c0_140 = arith.constant 0 : index
    %c0_141 = arith.constant 0 : index
    %384 = vector.load %arg10[%c0_138, %c1_139, %c0_140, %c0_141] : memref<2x6x16x16xf32, #tpu.memory_space<vmem>>, vector<1x1x16x16xf32>
    %385 = vector.shape_cast %384 : vector<1x1x16x16xf32> to vector<16x16xf32>
    %386 = vector.shape_cast %329 : vector<16x16xf32> to vector<1x1x16x16xf32>
    tpu.vector_store %arg10[%c0_138, %c1_139, %c0_140, %c0_141], %386 {strides = array<i32>} : memref<2x6x16x16xf32, #tpu.memory_space<vmem>>, vector<1x1x16x16xf32>,
    %c0_142 = arith.constant 0 : index
    %c2_143 = arith.constant 2 : index
    %c0_144 = arith.constant 0 : index
    %c0_145 = arith.constant 0 : index
    %387 = vector.load %arg10[%c0_142, %c2_143, %c0_144, %c0_145] : memref<2x6x16x16xf32, #tpu.memory_space<vmem>>, vector<1x1x16x16xf32>
    %388 = vector.shape_cast %387 : vector<1x1x16x16xf32> to vector<16x16xf32>
    %389 = vector.shape_cast %335 : vector<16x16xf32> to vector<1x1x16x16xf32>
    tpu.vector_store %arg10[%c0_142, %c2_143, %c0_144, %c0_145], %389 {strides = array<i32>} : memref<2x6x16x16xf32, #tpu.memory_space<vmem>>, vector<1x1x16x16xf32>,
    %c0_146 = arith.constant 0 : index
    %c3_147 = arith.constant 3 : index
    %c0_148 = arith.constant 0 : index
    %c0_149 = arith.constant 0 : index
    %390 = vector.load %arg10[%c0_146, %c3_147, %c0_148, %c0_149] : memref<2x6x16x16xf32, #tpu.memory_space<vmem>>, vector<1x1x16x16xf32>
    %391 = vector.shape_cast %390 : vector<1x1x16x16xf32> to vector<16x16xf32>
    %392 = vector.shape_cast %368 : vector<16x16xf32> to vector<1x1x16x16xf32>
    tpu.vector_store %arg10[%c0_146, %c3_147, %c0_148, %c0_149], %392 {strides = array<i32>} : memref<2x6x16x16xf32, #tpu.memory_space<vmem>>, vector<1x1x16x16xf32>,
    %c0_150 = arith.constant 0 : index
    %c4 = arith.constant 4 : index
    %c0_151 = arith.constant 0 : index
    %c0_152 = arith.constant 0 : index
    %393 = vector.load %arg10[%c0_150, %c4, %c0_151, %c0_152] : memref<2x6x16x16xf32, #tpu.memory_space<vmem>>, vector<1x1x16x16xf32>
    %394 = vector.shape_cast %393 : vector<1x1x16x16xf32> to vector<16x16xf32>
    %395 = vector.shape_cast %374 : vector<16x16xf32> to vector<1x1x16x16xf32>
    tpu.vector_store %arg10[%c0_150, %c4, %c0_151, %c0_152], %395 {strides = array<i32>} : memref<2x6x16x16xf32, #tpu.memory_space<vmem>>, vector<1x1x16x16xf32>,
    %c0_153 = arith.constant 0 : index
    %c5 = arith.constant 5 : index
    %c0_154 = arith.constant 0 : index
    %c0_155 = arith.constant 0 : index
    %396 = vector.load %arg10[%c0_153, %c5, %c0_154, %c0_155] : memref<2x6x16x16xf32, #tpu.memory_space<vmem>>, vector<1x1x16x16xf32>
    %397 = vector.shape_cast %396 : vector<1x1x16x16xf32> to vector<16x16xf32>
    %398 = vector.shape_cast %380 : vector<16x16xf32> to vector<1x1x16x16xf32>
    tpu.vector_store %arg10[%c0_153, %c5, %c0_154, %c0_155], %398 {strides = array<i32>} : memref<2x6x16x16xf32, #tpu.memory_space<vmem>>, vector<1x1x16x16xf32>,
    %399 = vector.extract_strided_slice %107 {offsets = [16, 0], sizes = [16, 16], strides = [1, 1]} : vector<96x16xf32> to vector<16x16xf32>
    %400 = vector.extract_strided_slice %107 {offsets = [48, 0], sizes = [16, 16], strides = [1, 1]} : vector<96x16xf32> to vector<16x16xf32>
    %401 = vector.extract_strided_slice %107 {offsets = [80, 0], sizes = [16, 16], strides = [1, 1]} : vector<96x16xf32> to vector<16x16xf32>
    %cst_156 = arith.constant 0.000000e+00 : f32
    %402 = vector.broadcast %cst_156 : f32 to vector<16x16xf32>
    %403 = arith.subf %402, %401 : vector<16x16xf32>
    %cst_157 = arith.constant 9.99999997E-7 : f32
    %404 = vector.broadcast %cst_157 : f32 to vector<16x16xf32>
    %405 = arith.addf %400, %404 : vector<16x16xf32>
    %406 = tpu.reciprocal %405 {approx = true} : vector<16x16xf32> -> vector<16x16xf32>
    %407 = arith.mulf %403, %406 : vector<16x16xf32>
    %408 = math.absf %407 : vector<16x16xf32>
    %cst_158 = arith.constant 2.41421366 : f32
    %409 = vector.broadcast %cst_158 : f32 to vector<16x16xf32>
    %410 = arith.cmpf ogt, %408, %409 : vector<16x16xf32>
    %cst_159 = arith.constant 0.414213568 : f32
    %411 = vector.broadcast %cst_159 : f32 to vector<16x16xf32>
    %412 = arith.cmpf ogt, %408, %411 : vector<16x16xf32>
    %cst_160 = arith.constant dense<true> : vector<16x16xi1>
    %413 = arith.xori %410, %cst_160 : vector<16x16xi1>
    %414 = arith.andi %412, %413 : vector<16x16xi1>
    %415 = tpu.reciprocal %408 {approx = true} : vector<16x16xf32> -> vector<16x16xf32>
    %cst_161 = arith.constant 0.000000e+00 : f32
    %416 = vector.broadcast %cst_161 : f32 to vector<16x16xf32>
    %417 = arith.subf %416, %415 : vector<16x16xf32>
    %cst_162 = arith.constant 1.000000e+00 : f32
    %418 = vector.broadcast %cst_162 : f32 to vector<16x16xf32>
    %419 = arith.subf %408, %418 : vector<16x16xf32>
    %cst_163 = arith.constant 1.000000e+00 : f32
    %420 = vector.broadcast %cst_163 : f32 to vector<16x16xf32>
    %421 = arith.addf %408, %420 : vector<16x16xf32>
    %422 = tpu.reciprocal %421 {approx = true} : vector<16x16xf32> -> vector<16x16xf32>
    %423 = arith.mulf %419, %422 : vector<16x16xf32>
    %424 = arith.select %414, %423, %408 : vector<16x16xi1>, vector<16x16xf32>
    %425 = arith.select %410, %417, %424 : vector<16x16xi1>, vector<16x16xf32>
    %cst_164 = arith.constant 0.785398185 : f32
    %cst_165 = arith.constant 0.000000e+00 : f32
    %426 = vector.broadcast %cst_164 : f32 to vector<16x16xf32>
    %427 = vector.broadcast %cst_165 : f32 to vector<16x16xf32>
    %428 = arith.select %414, %426, %427 : vector<16x16xi1>, vector<16x16xf32>
    %cst_166 = arith.constant 1.57079637 : f32
    %429 = vector.broadcast %cst_166 : f32 to vector<16x16xf32>
    %430 = arith.select %410, %429, %428 : vector<16x16xi1>, vector<16x16xf32>
    %431 = arith.mulf %425, %425 : vector<16x16xf32>
    %cst_167 = arith.constant 0.0805374458 : f32
    %432 = vector.broadcast %cst_167 : f32 to vector<16x16xf32>
    %433 = arith.mulf %432, %431 : vector<16x16xf32>
    %cst_168 = arith.constant 0.138776854 : f32
    %434 = vector.broadcast %cst_168 : f32 to vector<16x16xf32>
    %435 = arith.subf %433, %434 : vector<16x16xf32>
    %436 = arith.mulf %435, %431 : vector<16x16xf32>
    %cst_169 = arith.constant 0.199777111 : f32
    %437 = vector.broadcast %cst_169 : f32 to vector<16x16xf32>
    %438 = arith.addf %436, %437 : vector<16x16xf32>
    %439 = arith.mulf %438, %431 : vector<16x16xf32>
    %cst_170 = arith.constant 0.333329499 : f32
    %440 = vector.broadcast %cst_170 : f32 to vector<16x16xf32>
    %441 = arith.subf %439, %440 : vector<16x16xf32>
    %442 = arith.mulf %441, %431 : vector<16x16xf32>
    %443 = arith.mulf %442, %425 : vector<16x16xf32>
    %444 = arith.addf %430, %443 : vector<16x16xf32>
    %445 = arith.addf %444, %425 : vector<16x16xf32>
    %cst_171 = arith.constant 0.000000e+00 : f32
    %446 = vector.broadcast %cst_171 : f32 to vector<16x16xf32>
    %447 = arith.cmpf olt, %407, %446 : vector<16x16xf32>
    %cst_172 = arith.constant 0.000000e+00 : f32
    %448 = vector.broadcast %cst_172 : f32 to vector<16x16xf32>
    %449 = arith.subf %448, %445 : vector<16x16xf32>
    %450 = arith.select %447, %449, %445 : vector<16x16xi1>, vector<16x16xf32>
    %451 = arith.mulf %400, %400 : vector<16x16xf32>
    %452 = arith.mulf %401, %401 : vector<16x16xf32>
    %453 = arith.addf %451, %452 : vector<16x16xf32>
    %454 = math.sqrt %453 : vector<16x16xf32>
    %cst_173 = arith.constant 9.99999997E-7 : f32
    %455 = vector.broadcast %cst_173 : f32 to vector<16x16xf32>
    %456 = arith.addf %454, %455 : vector<16x16xf32>
    %457 = tpu.reciprocal %456 {approx = true} : vector<16x16xf32> -> vector<16x16xf32>
    %458 = arith.mulf %399, %457 : vector<16x16xf32>
    %459 = math.absf %458 : vector<16x16xf32>
    %cst_174 = arith.constant 2.41421366 : f32
    %460 = vector.broadcast %cst_174 : f32 to vector<16x16xf32>
    %461 = arith.cmpf ogt, %459, %460 : vector<16x16xf32>
    %cst_175 = arith.constant 0.414213568 : f32
    %462 = vector.broadcast %cst_175 : f32 to vector<16x16xf32>
    %463 = arith.cmpf ogt, %459, %462 : vector<16x16xf32>
    %cst_176 = arith.constant dense<true> : vector<16x16xi1>
    %464 = arith.xori %461, %cst_176 : vector<16x16xi1>
    %465 = arith.andi %463, %464 : vector<16x16xi1>
    %466 = tpu.reciprocal %459 {approx = true} : vector<16x16xf32> -> vector<16x16xf32>
    %cst_177 = arith.constant 0.000000e+00 : f32
    %467 = vector.broadcast %cst_177 : f32 to vector<16x16xf32>
    %468 = arith.subf %467, %466 : vector<16x16xf32>
    %cst_178 = arith.constant 1.000000e+00 : f32
    %469 = vector.broadcast %cst_178 : f32 to vector<16x16xf32>
    %470 = arith.subf %459, %469 : vector<16x16xf32>
    %cst_179 = arith.constant 1.000000e+00 : f32
    %471 = vector.broadcast %cst_179 : f32 to vector<16x16xf32>
    %472 = arith.addf %459, %471 : vector<16x16xf32>
    %473 = tpu.reciprocal %472 {approx = true} : vector<16x16xf32> -> vector<16x16xf32>
    %474 = arith.mulf %470, %473 : vector<16x16xf32>
    %475 = arith.select %465, %474, %459 : vector<16x16xi1>, vector<16x16xf32>
    %476 = arith.select %461, %468, %475 : vector<16x16xi1>, vector<16x16xf32>
    %cst_180 = arith.constant 0.785398185 : f32
    %cst_181 = arith.constant 0.000000e+00 : f32
    %477 = vector.broadcast %cst_180 : f32 to vector<16x16xf32>
    %478 = vector.broadcast %cst_181 : f32 to vector<16x16xf32>
    %479 = arith.select %465, %477, %478 : vector<16x16xi1>, vector<16x16xf32>
    %cst_182 = arith.constant 1.57079637 : f32
    %480 = vector.broadcast %cst_182 : f32 to vector<16x16xf32>
    %481 = arith.select %461, %480, %479 : vector<16x16xi1>, vector<16x16xf32>
    %482 = arith.mulf %476, %476 : vector<16x16xf32>
    %cst_183 = arith.constant 0.0805374458 : f32
    %483 = vector.broadcast %cst_183 : f32 to vector<16x16xf32>
    %484 = arith.mulf %483, %482 : vector<16x16xf32>
    %cst_184 = arith.constant 0.138776854 : f32
    %485 = vector.broadcast %cst_184 : f32 to vector<16x16xf32>
    %486 = arith.subf %484, %485 : vector<16x16xf32>
    %487 = arith.mulf %486, %482 : vector<16x16xf32>
    %cst_185 = arith.constant 0.199777111 : f32
    %488 = vector.broadcast %cst_185 : f32 to vector<16x16xf32>
    %489 = arith.addf %487, %488 : vector<16x16xf32>
    %490 = arith.mulf %489, %482 : vector<16x16xf32>
    %cst_186 = arith.constant 0.333329499 : f32
    %491 = vector.broadcast %cst_186 : f32 to vector<16x16xf32>
    %492 = arith.subf %490, %491 : vector<16x16xf32>
    %493 = arith.mulf %492, %482 : vector<16x16xf32>
    %494 = arith.mulf %493, %476 : vector<16x16xf32>
    %495 = arith.addf %481, %494 : vector<16x16xf32>
    %496 = arith.addf %495, %476 : vector<16x16xf32>
    %cst_187 = arith.constant 0.000000e+00 : f32
    %497 = vector.broadcast %cst_187 : f32 to vector<16x16xf32>
    %498 = arith.cmpf olt, %458, %497 : vector<16x16xf32>
    %cst_188 = arith.constant 0.000000e+00 : f32
    %499 = vector.broadcast %cst_188 : f32 to vector<16x16xf32>
    %500 = arith.subf %499, %496 : vector<16x16xf32>
    %501 = arith.select %498, %500, %496 : vector<16x16xi1>, vector<16x16xf32>
    %502 = vector.shape_cast %501 : vector<16x16xf32> to vector<1x16x16xf32>
    %cst_189 = arith.constant dense<0x7F800000> : vector<1xf32>
    %503 = vector.multi_reduction <minimumf>, %502, %cst_189 [1, 2] : vector<1x16x16xf32> to vector<1xf32>
    %504 = vector.shape_cast %503 : vector<1xf32> to vector<1x1x1xf32>
    %505 = vector.extract %504[0, 0, 0] : f32 from vector<1x1x1xf32>
    %506 = vector.broadcast %505 : f32 to vector<1x1xf32>
    %507 = vector.shape_cast %501 : vector<16x16xf32> to vector<1x16x16xf32>
    %cst_190 = arith.constant dense<0xFF800000> : vector<1xf32>
    %508 = vector.multi_reduction <maximumf>, %507, %cst_190 [1, 2] : vector<1x16x16xf32> to vector<1xf32>
    %509 = vector.shape_cast %508 : vector<1xf32> to vector<1x1x1xf32>
    %510 = vector.extract %509[0, 0, 0] : f32 from vector<1x1x1xf32>
    %511 = vector.broadcast %510 : f32 to vector<1x1xf32>
    %512 = vector.broadcast %506 : vector<1x1xf32> to vector<16x16xf32>
    %513 = arith.subf %501, %512 : vector<16x16xf32>
    %514 = arith.subf %511, %506 : vector<1x1xf32>
    %515 = vector.broadcast %514 : vector<1x1xf32> to vector<16x16xf32>
    %516 = arith.divf %513, %515 : vector<16x16xf32>
    %cst_191 = arith.constant 9.99999974E-6 : f32
    %517 = arith.cmpf one, %516, %516 : vector<16x16xf32>
    %518 = vector.broadcast %cst_191 : f32 to vector<16x16xf32>
    %519 = arith.select %517, %518, %516 : vector<16x16xi1>, vector<16x16xf32>
    %cst_192 = arith.constant 0x7F800000 : f32
    %520 = vector.broadcast %cst_192 : f32 to vector<16x16xf32>
    %521 = arith.cmpf oeq, %519, %520 : vector<16x16xf32>
    %cst_193 = arith.constant 3.40282347E+38 : f32
    %522 = vector.broadcast %cst_193 : f32 to vector<16x16xf32>
    %523 = arith.select %521, %522, %519 : vector<16x16xi1>, vector<16x16xf32>
    %cst_194 = arith.constant 0xFF800000 : f32
    %524 = vector.broadcast %cst_194 : f32 to vector<16x16xf32>
    %525 = arith.cmpf oeq, %523, %524 : vector<16x16xf32>
    %cst_195 = arith.constant -3.40282347E+38 : f32
    %526 = vector.broadcast %cst_195 : f32 to vector<16x16xf32>
    %527 = arith.select %525, %526, %523 : vector<16x16xi1>, vector<16x16xf32>
    %528 = vector.shape_cast %456 : vector<16x16xf32> to vector<1x16x16xf32>
    %cst_196 = arith.constant dense<0x7F800000> : vector<1xf32>
    %529 = vector.multi_reduction <minimumf>, %528, %cst_196 [1, 2] : vector<1x16x16xf32> to vector<1xf32>
    %530 = vector.shape_cast %529 : vector<1xf32> to vector<1x1x1xf32>
    %531 = vector.extract %530[0, 0, 0] : f32 from vector<1x1x1xf32>
    %532 = vector.broadcast %531 : f32 to vector<1x1xf32>
    %533 = vector.shape_cast %456 : vector<16x16xf32> to vector<1x16x16xf32>
    %cst_197 = arith.constant dense<0xFF800000> : vector<1xf32>
    %534 = vector.multi_reduction <maximumf>, %533, %cst_197 [1, 2] : vector<1x16x16xf32> to vector<1xf32>
    %535 = vector.shape_cast %534 : vector<1xf32> to vector<1x1x1xf32>
    %536 = vector.extract %535[0, 0, 0] : f32 from vector<1x1x1xf32>
    %537 = vector.broadcast %536 : f32 to vector<1x1xf32>
    %538 = vector.broadcast %532 : vector<1x1xf32> to vector<16x16xf32>
    %539 = arith.subf %456, %538 : vector<16x16xf32>
    %540 = arith.subf %537, %532 : vector<1x1xf32>
    %541 = vector.broadcast %540 : vector<1x1xf32> to vector<16x16xf32>
    %542 = arith.divf %539, %541 : vector<16x16xf32>
    %cst_198 = arith.constant 9.99999974E-6 : f32
    %543 = arith.cmpf one, %542, %542 : vector<16x16xf32>
    %544 = vector.broadcast %cst_198 : f32 to vector<16x16xf32>
    %545 = arith.select %543, %544, %542 : vector<16x16xi1>, vector<16x16xf32>
    %cst_199 = arith.constant 0x7F800000 : f32
    %546 = vector.broadcast %cst_199 : f32 to vector<16x16xf32>
    %547 = arith.cmpf oeq, %545, %546 : vector<16x16xf32>
    %cst_200 = arith.constant 3.40282347E+38 : f32
    %548 = vector.broadcast %cst_200 : f32 to vector<16x16xf32>
    %549 = arith.select %547, %548, %545 : vector<16x16xi1>, vector<16x16xf32>
    %cst_201 = arith.constant 0xFF800000 : f32
    %550 = vector.broadcast %cst_201 : f32 to vector<16x16xf32>
    %551 = arith.cmpf oeq, %549, %550 : vector<16x16xf32>
    %cst_202 = arith.constant -3.40282347E+38 : f32
    %552 = vector.broadcast %cst_202 : f32 to vector<16x16xf32>
    %553 = arith.select %551, %552, %549 : vector<16x16xi1>, vector<16x16xf32>
    %554 = vector.shape_cast %450 : vector<16x16xf32> to vector<1x16x16xf32>
    %cst_203 = arith.constant dense<0x7F800000> : vector<1xf32>
    %555 = vector.multi_reduction <minimumf>, %554, %cst_203 [1, 2] : vector<1x16x16xf32> to vector<1xf32>
    %556 = vector.shape_cast %555 : vector<1xf32> to vector<1x1x1xf32>
    %557 = vector.extract %556[0, 0, 0] : f32 from vector<1x1x1xf32>
    %558 = vector.broadcast %557 : f32 to vector<1x1xf32>
    %559 = vector.shape_cast %450 : vector<16x16xf32> to vector<1x16x16xf32>
    %cst_204 = arith.constant dense<0xFF800000> : vector<1xf32>
    %560 = vector.multi_reduction <maximumf>, %559, %cst_204 [1, 2] : vector<1x16x16xf32> to vector<1xf32>
    %561 = vector.shape_cast %560 : vector<1xf32> to vector<1x1x1xf32>
    %562 = vector.extract %561[0, 0, 0] : f32 from vector<1x1x1xf32>
    %563 = vector.broadcast %562 : f32 to vector<1x1xf32>
    %564 = vector.broadcast %558 : vector<1x1xf32> to vector<16x16xf32>
    %565 = arith.subf %450, %564 : vector<16x16xf32>
    %566 = arith.subf %563, %558 : vector<1x1xf32>
    %567 = vector.broadcast %566 : vector<1x1xf32> to vector<16x16xf32>
    %568 = arith.divf %565, %567 : vector<16x16xf32>
    %cst_205 = arith.constant 9.99999974E-6 : f32
    %569 = arith.cmpf one, %568, %568 : vector<16x16xf32>
    %570 = vector.broadcast %cst_205 : f32 to vector<16x16xf32>
    %571 = arith.select %569, %570, %568 : vector<16x16xi1>, vector<16x16xf32>
    %cst_206 = arith.constant 0x7F800000 : f32
    %572 = vector.broadcast %cst_206 : f32 to vector<16x16xf32>
    %573 = arith.cmpf oeq, %571, %572 : vector<16x16xf32>
    %cst_207 = arith.constant 3.40282347E+38 : f32
    %574 = vector.broadcast %cst_207 : f32 to vector<16x16xf32>
    %575 = arith.select %573, %574, %571 : vector<16x16xi1>, vector<16x16xf32>
    %cst_208 = arith.constant 0xFF800000 : f32
    %576 = vector.broadcast %cst_208 : f32 to vector<16x16xf32>
    %577 = arith.cmpf oeq, %575, %576 : vector<16x16xf32>
    %cst_209 = arith.constant -3.40282347E+38 : f32
    %578 = vector.broadcast %cst_209 : f32 to vector<16x16xf32>
    %579 = arith.select %577, %578, %575 : vector<16x16xi1>, vector<16x16xf32>
    %cst_210 = arith.constant 1.000000e+00 : f32
    %580 = vector.broadcast %cst_210 : f32 to vector<16x16xf32>
    %581 = arith.subf %580, %553 : vector<16x16xf32>
    %cst_211 = arith.constant 6.000000e+00 : f32
    %582 = vector.broadcast %cst_211 : f32 to vector<16x16xf32>
    %583 = arith.mulf %579, %582 : vector<16x16xf32>
    %584 = arith.fptosi %583 : vector<16x16xf32> to vector<16x16xi32>
    %cst_212 = arith.constant 5.000000e-01 : f32
    %585 = vector.broadcast %cst_212 : f32 to vector<16x16xf32>
    %586 = arith.mulf %583, %585 : vector<16x16xf32>
    %587 = math.floor %586 : vector<16x16xf32>
    %cst_213 = arith.constant 2.000000e+00 : f32
    %588 = vector.broadcast %cst_213 : f32 to vector<16x16xf32>
    %589 = arith.mulf %588, %587 : vector<16x16xf32>
    %590 = arith.subf %583, %589 : vector<16x16xf32>
    %cst_214 = arith.constant 1.000000e+00 : f32
    %591 = vector.broadcast %cst_214 : f32 to vector<16x16xf32>
    %592 = arith.subf %590, %591 : vector<16x16xf32>
    %593 = math.absf %592 : vector<16x16xf32>
    %cst_215 = arith.constant 1.000000e+00 : f32
    %594 = vector.broadcast %cst_215 : f32 to vector<16x16xf32>
    %595 = arith.subf %594, %593 : vector<16x16xf32>
    %596 = arith.mulf %553, %595 : vector<16x16xf32>
    %c0_i32_216 = arith.constant 0 : i32
    %597 = vector.broadcast %c0_i32_216 : i32 to vector<16x16xi32>
    %598 = arith.cmpi eq, %584, %597 : vector<16x16xi32>
    %c1_i32_217 = arith.constant 1 : i32
    %599 = vector.broadcast %c1_i32_217 : i32 to vector<16x16xi32>
    %600 = arith.cmpi eq, %584, %599 : vector<16x16xi32>
    %c2_i32_218 = arith.constant 2 : i32
    %601 = vector.broadcast %c2_i32_218 : i32 to vector<16x16xi32>
    %602 = arith.cmpi eq, %584, %601 : vector<16x16xi32>
    %c3_i32_219 = arith.constant 3 : i32
    %603 = vector.broadcast %c3_i32_219 : i32 to vector<16x16xi32>
    %604 = arith.cmpi eq, %584, %603 : vector<16x16xi32>
    %c4_i32_220 = arith.constant 4 : i32
    %605 = vector.broadcast %c4_i32_220 : i32 to vector<16x16xi32>
    %606 = arith.cmpi eq, %584, %605 : vector<16x16xi32>
    %c5_i32_221 = arith.constant 5 : i32
    %607 = vector.broadcast %c5_i32_221 : i32 to vector<16x16xi32>
    %608 = arith.cmpi eq, %584, %607 : vector<16x16xi32>
    %609 = arith.ori %598, %608 : vector<16x16xi1>
    %610 = arith.ori %600, %606 : vector<16x16xi1>
    %cst_222 = arith.constant 0.000000e+00 : f32
    %611 = vector.broadcast %cst_222 : f32 to vector<16x16xf32>
    %612 = arith.select %610, %596, %611 : vector<16x16xi1>, vector<16x16xf32>
    %613 = arith.select %609, %553, %612 : vector<16x16xi1>, vector<16x16xf32>
    %614 = arith.addf %613, %581 : vector<16x16xf32>
    %615 = arith.ori %600, %602 : vector<16x16xi1>
    %616 = arith.ori %598, %604 : vector<16x16xi1>
    %cst_223 = arith.constant 0.000000e+00 : f32
    %617 = vector.broadcast %cst_223 : f32 to vector<16x16xf32>
    %618 = arith.select %616, %596, %617 : vector<16x16xi1>, vector<16x16xf32>
    %619 = arith.select %615, %553, %618 : vector<16x16xi1>, vector<16x16xf32>
    %620 = arith.addf %619, %581 : vector<16x16xf32>
    %621 = arith.ori %604, %606 : vector<16x16xi1>
    %622 = arith.ori %602, %608 : vector<16x16xi1>
    %cst_224 = arith.constant 0.000000e+00 : f32
    %623 = vector.broadcast %cst_224 : f32 to vector<16x16xf32>
    %624 = arith.select %622, %596, %623 : vector<16x16xi1>, vector<16x16xf32>
    %625 = arith.select %621, %553, %624 : vector<16x16xi1>, vector<16x16xf32>
    %626 = arith.addf %625, %581 : vector<16x16xf32>
    %cst_225 = arith.constant 6.000000e+00 : f32
    %627 = vector.broadcast %cst_225 : f32 to vector<16x16xf32>
    %628 = arith.mulf %527, %627 : vector<16x16xf32>
    %629 = arith.fptosi %628 : vector<16x16xf32> to vector<16x16xi32>
    %cst_226 = arith.constant 5.000000e-01 : f32
    %630 = vector.broadcast %cst_226 : f32 to vector<16x16xf32>
    %631 = arith.mulf %628, %630 : vector<16x16xf32>
    %632 = math.floor %631 : vector<16x16xf32>
    %cst_227 = arith.constant 2.000000e+00 : f32
    %633 = vector.broadcast %cst_227 : f32 to vector<16x16xf32>
    %634 = arith.mulf %633, %632 : vector<16x16xf32>
    %635 = arith.subf %628, %634 : vector<16x16xf32>
    %cst_228 = arith.constant 1.000000e+00 : f32
    %636 = vector.broadcast %cst_228 : f32 to vector<16x16xf32>
    %637 = arith.subf %635, %636 : vector<16x16xf32>
    %638 = math.absf %637 : vector<16x16xf32>
    %cst_229 = arith.constant 1.000000e+00 : f32
    %639 = vector.broadcast %cst_229 : f32 to vector<16x16xf32>
    %640 = arith.subf %639, %638 : vector<16x16xf32>
    %641 = arith.mulf %553, %640 : vector<16x16xf32>
    %c0_i32_230 = arith.constant 0 : i32
    %642 = vector.broadcast %c0_i32_230 : i32 to vector<16x16xi32>
    %643 = arith.cmpi eq, %629, %642 : vector<16x16xi32>
    %c1_i32_231 = arith.constant 1 : i32
    %644 = vector.broadcast %c1_i32_231 : i32 to vector<16x16xi32>
    %645 = arith.cmpi eq, %629, %644 : vector<16x16xi32>
    %c2_i32_232 = arith.constant 2 : i32
    %646 = vector.broadcast %c2_i32_232 : i32 to vector<16x16xi32>
    %647 = arith.cmpi eq, %629, %646 : vector<16x16xi32>
    %c3_i32_233 = arith.constant 3 : i32
    %648 = vector.broadcast %c3_i32_233 : i32 to vector<16x16xi32>
    %649 = arith.cmpi eq, %629, %648 : vector<16x16xi32>
    %c4_i32_234 = arith.constant 4 : i32
    %650 = vector.broadcast %c4_i32_234 : i32 to vector<16x16xi32>
    %651 = arith.cmpi eq, %629, %650 : vector<16x16xi32>
    %c5_i32_235 = arith.constant 5 : i32
    %652 = vector.broadcast %c5_i32_235 : i32 to vector<16x16xi32>
    %653 = arith.cmpi eq, %629, %652 : vector<16x16xi32>
    %654 = arith.ori %643, %653 : vector<16x16xi1>
    %655 = arith.ori %645, %651 : vector<16x16xi1>
    %cst_236 = arith.constant 0.000000e+00 : f32
    %656 = vector.broadcast %cst_236 : f32 to vector<16x16xf32>
    %657 = arith.select %655, %641, %656 : vector<16x16xi1>, vector<16x16xf32>
    %658 = arith.select %654, %553, %657 : vector<16x16xi1>, vector<16x16xf32>
    %659 = arith.addf %658, %581 : vector<16x16xf32>
    %660 = arith.ori %645, %647 : vector<16x16xi1>
    %661 = arith.ori %643, %649 : vector<16x16xi1>
    %cst_237 = arith.constant 0.000000e+00 : f32
    %662 = vector.broadcast %cst_237 : f32 to vector<16x16xf32>
    %663 = arith.select %661, %641, %662 : vector<16x16xi1>, vector<16x16xf32>
    %664 = arith.select %660, %553, %663 : vector<16x16xi1>, vector<16x16xf32>
    %665 = arith.addf %664, %581 : vector<16x16xf32>
    %666 = arith.ori %649, %651 : vector<16x16xi1>
    %667 = arith.ori %647, %653 : vector<16x16xi1>
    %cst_238 = arith.constant 0.000000e+00 : f32
    %668 = vector.broadcast %cst_238 : f32 to vector<16x16xf32>
    %669 = arith.select %667, %641, %668 : vector<16x16xi1>, vector<16x16xf32>
    %670 = arith.select %666, %553, %669 : vector<16x16xi1>, vector<16x16xf32>
    %671 = arith.addf %670, %581 : vector<16x16xf32>
    %c1_239 = arith.constant 1 : index
    %c0_240 = arith.constant 0 : index
    %c0_241 = arith.constant 0 : index
    %c0_242 = arith.constant 0 : index
    %672 = vector.load %arg10[%c1_239, %c0_240, %c0_241, %c0_242] : memref<2x6x16x16xf32, #tpu.memory_space<vmem>>, vector<1x1x16x16xf32>
    %673 = vector.shape_cast %672 : vector<1x1x16x16xf32> to vector<16x16xf32>
    %674 = vector.shape_cast %614 : vector<16x16xf32> to vector<1x1x16x16xf32>
    tpu.vector_store %arg10[%c1_239, %c0_240, %c0_241, %c0_242], %674 {strides = array<i32>} : memref<2x6x16x16xf32, #tpu.memory_space<vmem>>, vector<1x1x16x16xf32>,
    %c1_243 = arith.constant 1 : index
    %c1_244 = arith.constant 1 : index
    %c0_245 = arith.constant 0 : index
    %c0_246 = arith.constant 0 : index
    %675 = vector.load %arg10[%c1_243, %c1_244, %c0_245, %c0_246] : memref<2x6x16x16xf32, #tpu.memory_space<vmem>>, vector<1x1x16x16xf32>
    %676 = vector.shape_cast %675 : vector<1x1x16x16xf32> to vector<16x16xf32>
    %677 = vector.shape_cast %620 : vector<16x16xf32> to vector<1x1x16x16xf32>
    tpu.vector_store %arg10[%c1_243, %c1_244, %c0_245, %c0_246], %677 {strides = array<i32>} : memref<2x6x16x16xf32, #tpu.memory_space<vmem>>, vector<1x1x16x16xf32>,
    %c1_247 = arith.constant 1 : index
    %c2_248 = arith.constant 2 : index
    %c0_249 = arith.constant 0 : index
    %c0_250 = arith.constant 0 : index
    %678 = vector.load %arg10[%c1_247, %c2_248, %c0_249, %c0_250] : memref<2x6x16x16xf32, #tpu.memory_space<vmem>>, vector<1x1x16x16xf32>
    %679 = vector.shape_cast %678 : vector<1x1x16x16xf32> to vector<16x16xf32>
    %680 = vector.shape_cast %626 : vector<16x16xf32> to vector<1x1x16x16xf32>
    tpu.vector_store %arg10[%c1_247, %c2_248, %c0_249, %c0_250], %680 {strides = array<i32>} : memref<2x6x16x16xf32, #tpu.memory_space<vmem>>, vector<1x1x16x16xf32>,
    %c1_251 = arith.constant 1 : index
    %c3_252 = arith.constant 3 : index
    %c0_253 = arith.constant 0 : index
    %c0_254 = arith.constant 0 : index
    %681 = vector.load %arg10[%c1_251, %c3_252, %c0_253, %c0_254] : memref<2x6x16x16xf32, #tpu.memory_space<vmem>>, vector<1x1x16x16xf32>
    %682 = vector.shape_cast %681 : vector<1x1x16x16xf32> to vector<16x16xf32>
    %683 = vector.shape_cast %659 : vector<16x16xf32> to vector<1x1x16x16xf32>
    tpu.vector_store %arg10[%c1_251, %c3_252, %c0_253, %c0_254], %683 {strides = array<i32>} : memref<2x6x16x16xf32, #tpu.memory_space<vmem>>, vector<1x1x16x16xf32>,
    %c1_255 = arith.constant 1 : index
    %c4_256 = arith.constant 4 : index
    %c0_257 = arith.constant 0 : index
    %c0_258 = arith.constant 0 : index
    %684 = vector.load %arg10[%c1_255, %c4_256, %c0_257, %c0_258] : memref<2x6x16x16xf32, #tpu.memory_space<vmem>>, vector<1x1x16x16xf32>
    %685 = vector.shape_cast %684 : vector<1x1x16x16xf32> to vector<16x16xf32>
    %686 = vector.shape_cast %665 : vector<16x16xf32> to vector<1x1x16x16xf32>
    tpu.vector_store %arg10[%c1_255, %c4_256, %c0_257, %c0_258], %686 {strides = array<i32>} : memref<2x6x16x16xf32, #tpu.memory_space<vmem>>, vector<1x1x16x16xf32>,
    %c1_259 = arith.constant 1 : index
    %c5_260 = arith.constant 5 : index
    %c0_261 = arith.constant 0 : index
    %c0_262 = arith.constant 0 : index
    %687 = vector.load %arg10[%c1_259, %c5_260, %c0_261, %c0_262] : memref<2x6x16x16xf32, #tpu.memory_space<vmem>>, vector<1x1x16x16xf32>
    %688 = vector.shape_cast %687 : vector<1x1x16x16xf32> to vector<16x16xf32>
    %689 = vector.shape_cast %671 : vector<16x16xf32> to vector<1x1x16x16xf32>
    tpu.vector_store %arg10[%c1_259, %c5_260, %c0_261, %c0_262], %689 {strides = array<i32>} : memref<2x6x16x16xf32, #tpu.memory_space<vmem>>, vector<1x1x16x16xf32>,
    return
  }
  func.func @transform_0(%arg0: i32) -> (i32, i32, i32, i32) {
    %c0_i32 = arith.constant 0 : i32
    %c0_i32_0 = arith.constant 0 : i32
    %c0_i32_1 = arith.constant 0 : i32
    %c0_i32_2 = arith.constant 0 : i32
    return %arg0, %c0_i32, %c0_i32_0, %c0_i32_1 : i32, i32, i32, i32
  }
  func.func @transform_1(%arg0: i32) -> (i32, i32) {
    %c0_i32 = arith.constant 0 : i32
    %c0_i32_0 = arith.constant 0 : i32
    %c0_i32_1 = arith.constant 0 : i32
    return %c0_i32, %c0_i32_0 : i32, i32
  }
  func.func @transform_2(%arg0: i32) -> (i32, i32) {
    %c0_i32 = arith.constant 0 : i32
    %c0_i32_0 = arith.constant 0 : i32
    %c0_i32_1 = arith.constant 0 : i32
    return %c0_i32, %c0_i32_0 : i32, i32
  }
  func.func @transform_3(%arg0: i32) -> (i32, i32) {
    %c0_i32 = arith.constant 0 : i32
    %c0_i32_0 = arith.constant 0 : i32
    %c0_i32_1 = arith.constant 0 : i32
    return %c0_i32, %c0_i32_0 : i32, i32
  }
  func.func @transform_4(%arg0: i32) -> (i32, i32) {
    %c0_i32 = arith.constant 0 : i32
    %c0_i32_0 = arith.constant 0 : i32
    %c0_i32_1 = arith.constant 0 : i32
    return %c0_i32, %c0_i32_0 : i32, i32
  }
  func.func @transform_5(%arg0: i32) -> (i32, i32) {
    %c0_i32 = arith.constant 0 : i32
    %c0_i32_0 = arith.constant 0 : i32
    %c0_i32_1 = arith.constant 0 : i32
    return %c0_i32, %c0_i32_0 : i32, i32
  }
  func.func @transform_6(%arg0: i32) -> (i32, i32) {
    %c0_i32 = arith.constant 0 : i32
    %c0_i32_0 = arith.constant 0 : i32
    %c0_i32_1 = arith.constant 0 : i32
    return %c0_i32, %c0_i32_0 : i32, i32
  }
  func.func @transform_7(%arg0: i32) -> (i32, i32) {
    %c0_i32 = arith.constant 0 : i32
    %c0_i32_0 = arith.constant 0 : i32
    %c0_i32_1 = arith.constant 0 : i32
    return %c0_i32, %c0_i32_0 : i32, i32
  }
  func.func @transform_8(%arg0: i32) -> (i32, i32) {
    %c0_i32 = arith.constant 0 : i32
    %c0_i32_0 = arith.constant 0 : i32
    %c0_i32_1 = arith.constant 0 : i32
    return %c0_i32, %c0_i32_0 : i32, i32
  }
  func.func @transform_9(%arg0: i32) -> (i32, i32, i32, i32) {
    %c0_i32 = arith.constant 0 : i32
    %c0_i32_0 = arith.constant 0 : i32
    %c0_i32_1 = arith.constant 0 : i32
    %c0_i32_2 = arith.constant 0 : i32
    return %arg0, %c0_i32, %c0_i32_0, %c0_i32_1 : i32, i32, i32, i32
  }
}

</mosaic_0001>

<bundles_post_ra>
// kernel: tpu_custom_call.1
= control target key start
LH: loop header
LB: loop body
LE: loop exit
PB: predicated region body
PF: predicated region fallthrough
CT: control target
= control target key end

     0   :  { %s5131_s0 = inlined_call_operand.vmem [shape: f32[2,4,16,16], index: 0, kind: input, shape index: {}]   ;;  %s5132_s1 = inlined_call_operand.vmem [shape: f32[16,16], index: 1, kind: input, shape index: {}]   ;;  %s5133_s2 = inlined_call_operand.vmem [shape: f32[16,16], index: 2, kind: input, shape index: {}]   ;;  %s5134_s3 = inlined_call_operand.vmem [shape: f32[32,16], index: 3, kind: input, shape index: {}]   ;;  %s5135_s4 = inlined_call_operand.vmem [shape: f32[32,16], index: 4, kind: input, shape index: {}]   ;;  %s5136_s5 = inlined_call_operand.vmem [shape: f32[32,16], index: 5, kind: input, shape index: {}]   ;;  %s5137_s6 = inlined_call_operand.vmem [shape: f32[32,16], index: 6, kind: input, shape index: {}]   ;;  %s5138_s7 = inlined_call_operand.vmem [shape: f32[32,16], index: 7, kind: input, shape index: {}]   ;;  %s5139_s8 = inlined_call_operand.vmem [shape: f32[32,16], index: 8, kind: input, shape index: {}]   ;;  %s5140_s9 = inlined_call_operand.hbm [shape: f32[2,6,16,16], index: 9, kind: output, shape index: {}]  }
   0x1   :  { %v33_v0 = vld [vmem:[%s5132_s1] sm:$0xff]  ;;  %v34_v1 = vld [vmem:[%s5132_s1 + $0x8] sm:$0xff]  ;;  %v3008_v4 = vld [vmem:[%s5131_s0 + $0x10] sm:$0xff] }
   0x2   :  { %v37_v2 = vld [vmem:[%s5131_s0] sm:$0xff]  ;;  %v3741_v3 = vpack.c.bf16 %v34_v1, %v33_v0  ;;  %v3012_v6 = vld [vmem:[%s5131_s0 + $0x30] sm:$0xff]  ;;  %v38_v8 = vld [vmem:[%s5131_s0 + $0x8] sm:$0xff] }
   0x3   :  { %v3010_v5 = vld [vmem:[%s5131_s0 + $0x20] sm:$0xff]  ;;  %v42_v7 = vadd.f32 %v3008_v4, %v37_v2  ;;  %v3009_v9 = vld [vmem:[%s5131_s0 + $0x18] sm:$0xff]  ;;  %v3011_v10 = vld [vmem:[%s5131_s0 + $0x28] sm:$0xff] }
   0x4   :  { %3463 = vmatprep.subr.bf16.mxu0 %v3741_v3  ;;  %v43_v11 = vadd.f32 %v3009_v9, %v38_v8  ;;  %v3013_v12 = vld [vmem:[%s5131_s0 + $0x38] sm:$0xff]  ;;  %v3014_v13 = vld [vmem:[%s5131_s0 + $0x40] sm:$0xff]  ;;  %v3016_v14 = vld [vmem:[%s5131_s0 + $0x50] sm:$0xff] }
   0x5   :  { %3465 = vmatpush3.bf16.msra.mxu0 %v3741_v3  ;;  %v47_v15 = vadd.f32 %v3010_v5, %v42_v7  ;;  %v62_v16 = vadd.f32 %v3016_v14, %v3014_v13  ;;  %v3018_v17 = vld [vmem:[%s5131_s0 + $0x60] sm:$0xff]  ;;  %v3020_v18 = vld [vmem:[%s5131_s0 + $0x70] sm:$0xff]  ;;  %v36_v21 = vld [vmem:[%s5133_s2 + $0x8] sm:$0xff] }
   0x6   :  { %v35_v19 = vld [vmem:[%s5133_s2] sm:$0xff]  ;;  %v48_v20 = vadd.f32 %v3011_v10, %v43_v11  ;;  %v3015_v22 = vld [vmem:[%s5131_s0 + $0x48] sm:$0xff]  ;;  %v3017_v23 = vld [vmem:[%s5131_s0 + $0x58] sm:$0xff]  ;;  %3471 = vmatprep.subr.bf16.mxu0 %v3741_v3 }
   0x7   :  { %v52_v24 = vadd.f32 %v3012_v6, %v47_v15  ;;  %v67_v25 = vadd.f32 %v3018_v17, %v62_v16  ;;  %v3791_v26 = vpack.c.bf16 %v36_v21, %v35_v19  ;;  %v63_v27 = vadd.f32 %v3017_v23, %v3015_v22  ;;  %v3019_v28 = vld [vmem:[%s5131_s0 + $0x68] sm:$0xff] }
   0x8   :  { %14 = vsyncpa [#allocation3], 0  ;;  %vm5143_vm0 = vcmask 130048   ;;  %v53_v29 = vadd.f32 %v3013_v12, %v48_v20  ;;  %v3021_v30 = vld [vmem:[%s5131_s0 + $0x78] sm:$0xff]  ;;  %v756_v58 = vld [vmem:[%s5134_s3 + $0x8] sm:$0xff]  ;;  %vm3677_vm13 = vmmov 1  }
   0x9   :  { %v54_v31 = vmul.f32 0.25, %v52_v24  ;;  %v72_v32 = vadd.f32 %v3020_v18, %v67_v25  ;;  %3467 = vmatprep.subr.bf16.mxu1 %v3791_v26  ;;  %v68_v33 = vadd.f32 %v3019_v28, %v63_v27  ;;  %v760_v60 = vld [vmem:[%s5135_s4 + $0x8] sm:$0xff]  ;;  %v755_v62 = vld [vmem:[%s5134_s3] sm:$0xff]  ;;  %v758_v12 = vld [vmem:[%s5134_s3 + $0x18] sm:$0xff]  ;;  %s3679_s30 = smov [#allocation2]  }
   0xa   :  { %v55_v34 = vmul.f32 0.25, %v53_v29  ;;  %3469 = vmatpush3.bf16.msra.mxu1 %v3791_v26  ;;  %v3847_v61 = vld [vmem:[%s5139_s8 + $0x8] sm:$0xff]  ;;  %v759_v2 = vld [vmem:[%s5135_s4] sm:$0xff]  ;;  %v762_v13 = vld [vmem:[%s5135_s4 + $0x18] sm:$0xff]  ;;  %s2997_s10 = sshll.u32 %s3679_s30, 4  ;;  %s2998_s10 = int_to_ptr.vmem [resolvable:$true] %s2997_s10 }
   0xb   :  { %3274 = vmatprep.mubr.msk.f32.mxu0 %vm5143_vm0, %v54_v31  ;;  %v74_v35 = vmul.f32 0.25, %v72_v32  ;;  %v73_v36 = vadd.f32 %v3021_v30, %v68_v33  ;;  %3284 = vmatprep.mubr.msk.f32.mxu1 %vm5143_vm0, %v54_v31  ;;  %v820_v1 = vld [vmem:[%s5138_s7 + $0x8] sm:$0xff]  ;;  %v3861_v4 = vld [vmem:[%s5139_s8] sm:$0xff]  ;;  %v757_v19 = vld [vmem:[%s5134_s3 + $0x10] sm:$0xff]  ;;  %s3653_s11 = scalar_lea.vmem %s2998_s10, 3072  ;;  %p3658_p1 = scmp.lt.s32.totalorder %s2998_s10, %s2998_s10 }
   0xc   :  { %3275 = vmatmul.mubr.msk.f32.vlgmr.msra.gmra.mrb[0].mxu0 %vm5143_vm0, %v55_v34  ;;  %3475 = vmatprep.subr.bf16.mxu1 %v3791_v26  ;;  %v3866_v5 = vld [vmem:[%s5137_s6 + $0x8] sm:$0xff]  ;;  %v819_v7 = vld [vmem:[%s5138_s7] sm:$0xff]  ;;  %v3896_v20 = vld [vmem:[%s5139_s8 + $0x18] sm:$0xff]  ;;  %p3654_p0 = scmp.ne.s32.totalorder %s2998_s10, %s3653_s11  ;;  %p3659_p2 = scmp.lt.s32.totalorder %s3653_s11, %s3653_s11 }
   0xd   :  { %3277 = vmatprep.mubr.msk.f32.mxu0 %vm5143_vm0, %v74_v35  ;;  %v75_v37 = vmul.f32 0.25, %v73_v36  ;;  %3285 = vmatmul.mubr.msk.f32.vlgmr.msra.gmra.mrb[0].mxu1 %vm5143_vm0, %v55_v34  ;;  %v787_v8 = vld [vmem:[%s5136_s5] sm:$0xff]  ;;  %v788_v14 = vld [vmem:[%s5136_s5 + $0x8] sm:$0xff]  ;;  %v3902_v22 = vld [vmem:[%s5137_s6 + $0x18] sm:$0xff] }
   0xe   :  { %3287 = vmatprep.mubr.msk.f32.mxu1 %vm5143_vm0, %v74_v35  ;;  %3473 = vmatpush3.bf16.msra.mxu0 %v3741_v3  ;;  %v3877_v9 = vld [vmem:[%s5137_s6] sm:$0xff]  ;;  %v761_v25 = vld [vmem:[%s5135_s4 + $0x10] sm:$0xff]  ;;  %p3660_p3 = por %p3659_p2, %p3658_p1 }
   0xf   :  { %3479 = vmatprep.subr.bf16.mxu0 %v3741_v3  ;;  %3477 = vmatpush3.bf16.msra.mxu1 %v3791_v26  ;;  %v3912_v27 = vld [vmem:[%s5139_s8 + $0x10] sm:$0xff] }
  0x10   :  { %3278 = vmatmul.mubr.msk.f32.gmra.mrb[2].mxu0 %vm5143_vm0, %v75_v37  ;;  %3510 = vmatprep.subr.bf16.mxu1 %v3791_v26  ;;  %v3918_v30 = vld [vmem:[%s5137_s6 + $0x10] sm:$0xff]  ;;  %p3661_p4 = pnand %p3660_p3, %p3654_p0 }
  0x11   :  { %3288 = vmatmul.mubr.msk.f32.gmra.mrb[2].mxu1 %vm5143_vm0, %v75_v37 }
  0xdf   :  { %v3276_v38 = vpop.f32.mrb[0].mxu0 }
  0xe0   :  { %v155_v39 = vpop.f32.mrb[1].mxu0  ;;  %v3286_v40 = vpop.f32.mrb[0].mxu1 }
  0xe1   :  { %259 = vxpose.xlu0.b32.start [1/2] (short) (narrow) %v155_v39, 16  ;;  %v240_v41 = vpop.f32.mrb[1].mxu1 }
  0xe3   :  { %v3279_v42 = vpop.f32.mrb[2].mxu0 }
  0xe4   :  { %v165_v43 = vpop.f32.mrb[3].mxu0  ;;  %v3289_v44 = vpop.f32.mrb[2].mxu1 }
  0xe5   :  { %260 = vxpose.xlu0.b32.end [2/2] (short) (narrow) %v3276_v38, 16  ;;  %291 = vxpose.xlu1.b32.start [1/2] (short) (narrow) %v165_v43, 16  ;;  %v250_v45 = vpop.f32.mrb[3].mxu1 }
  0xe9   :  { %323 = vxpose.xlu0.b32.start [1/2] (short) (narrow) %v240_v41, 16  ;;  %292 = vxpose.xlu1.b32.end [2/2] (short) (narrow) %v3279_v42, 16 }
  0xed   :  { %324 = vxpose.xlu0.b32.end [2/2] (short) (narrow) %v3286_v40, 16  ;;  %355 = vxpose.xlu1.b32.start [1/2] (short) (narrow) %v250_v45, 16 }
  0xf1   :  { %356 = vxpose.xlu1.b32.end [2/2] (short) (narrow) %v3289_v44, 16 }
 0x161   :  { %v275_v46 = vpop.trf.xlu0 }
 0x162   :  { %3294 = vmatprep.mubr.msk.f32.mxu0 %vm5143_vm0, %v275_v46 }
 0x165   :  { %v276_v47 = vpop.trf.xlu0  ;;  %v307_v48 = vpop.trf.xlu1 }
 0x166   :  { %3295 = vmatmul.mubr.msk.f32.vlgmr.msra.gmra.mrb[4].mxu0 %vm5143_vm0, %v276_v47 }
 0x167   :  { %3481 = vmatpush3.bf16.msra.mxu0 %v3741_v3  ;;  %3297 = vmatprep.mubr.msk.f32.mxu0 %vm5143_vm0, %v307_v48 }
 0x168   :  { %3483 = vmatprep.subr.bf16.mxu0 %v3791_v26 }
 0x169   :  { %v339_v49 = vpop.trf.xlu0  ;;  %v308_v50 = vpop.trf.xlu1 }
 0x16a   :  { %3298 = vmatmul.mubr.msk.f32.gmra.mrb[6].mxu0 %vm5143_vm0, %v308_v50  ;;  %3304 = vmatprep.mubr.msk.f32.mxu1 %vm5143_vm0, %v339_v49 }
 0x16b   :  { %3314 = vmatprep.mubr.msk.f32.mxu0 %vm5143_vm0, %v339_v49 }
 0x16d   :  { %v340_v51 = vpop.trf.xlu0  ;;  %v371_v52 = vpop.trf.xlu1 }
 0x16e   :  { %3305 = vmatmul.mubr.msk.f32.vlgmr.msra.gmra.mrb[4].mxu1 %vm5143_vm0, %v340_v51  ;;  %3315 = vmatmul.mubr.msk.f32.vlgmr.msra.gmra.mrb[8].mxu0 %vm5143_vm0, %v340_v51 }
 0x16f   :  { %3485 = vmatpush3.bf16.msra.mxu0 %v3791_v26  ;;  %3307 = vmatprep.mubr.msk.f32.mxu1 %vm5143_vm0, %v371_v52 }
 0x170   :  { %3317 = vmatprep.mubr.msk.f32.mxu0 %vm5143_vm0, %v371_v52  ;;  %3487 = vmatprep.subr.bf16.mxu0 %v3791_v26 }
 0x171   :  { %v372_v53 = vpop.trf.xlu1  ;;  %3511 = vmatpush3.bf16.msra.mxu1 %v3791_v26 }
 0x172   :  { %3308 = vmatmul.mubr.msk.f32.gmra.mrb[6].mxu1 %vm5143_vm0, %v372_v53  ;;  %3318 = vmatmul.mubr.msk.f32.gmra.mrb[10].mxu0 %vm5143_vm0, %v372_v53 }
 0x173   :  { %3324 = vmatprep.mubr.msk.f32.mxu0 %vm5143_vm0, %v275_v46  ;;  %3491 = vmatprep.subr.bf16.mxu1 %v3741_v3 }
 0x176   :  { %3325 = vmatmul.mubr.msk.f32.vlgmr.msra.gmra.mrb[8].mxu0 %vm5143_vm0, %v276_v47 }
 0x177   :  { %3327 = vmatprep.mubr.msk.f32.mxu0 %vm5143_vm0, %v307_v48  ;;  %3489 = vmatpush3.bf16.msra.mxu0 %v3791_v26 }
 0x178   :  { %3495 = vmatprep.subr.bf16.mxu0 %v3741_v3 }
 0x17a   :  { %3328 = vmatmul.mubr.msk.f32.gmra.mrb[10].mxu0 %vm5143_vm0, %v308_v50 }
 0x239   :  { %v3296_v54 = vpop.f32.mrb[4].mxu0 }
 0x23a   :  { %v465_v55 = vpop.f32.mrb[5].mxu0 }
 0x23d   :  { %v3299_v56 = vpop.f32.mrb[6].mxu0 }
 0x23e   :  { %v475_v57 = vpop.f32.mrb[7].mxu0 }
 0x241   :  { %v3306_v59 = vpop.f32.mrb[4].mxu1 }
 0x242   :  { %v582_v63 = vsub.f32 %v3296_v54, %v3306_v59  ;;  %v562_v0 = vpop.f32.mrb[5].mxu1 }
 0x243   :  { %v581_v6 = vsub.f32 %v465_v55, %v562_v0 }
 0x244   :  { %v764_v10 = vmul.f32 %v756_v58, %v582_v63  ;;  %v776_v11 = vmul.f32 %v760_v60, %v582_v63  ;;  %v840_v16 = vmul.f32 %v3847_v61, %v582_v63  ;;  %v808_v21 = vmul.f32 %v3866_v5, %v582_v63 }
 0x245   :  { %v3309_v15 = vpop.f32.mrb[6].mxu1  ;;  %v775_v17 = vmul.f32 %v759_v2, %v581_v6  ;;  %v839_v18 = vmul.f32 %v3861_v4, %v581_v6  ;;  %v807_v28 = vmul.f32 %v3877_v9, %v581_v6  ;;  %v763_v29 = vmul.f32 %v755_v62, %v581_v6 }
 0x246   :  { %v3904_v23 = vsub.f32 %v3299_v56, %v3309_v15  ;;  %v572_v24 = vpop.f32.mrb[7].mxu1  ;;  %v3920_v31 = vmul.f32 %v787_v8, %v581_v6  ;;  %v3924_v33 = vmul.f32 %v788_v14, %v582_v63  ;;  %v3926_v34 = vmul.f32 %v819_v7, %v581_v6  ;;  %v821_v6 = vld [vmem:[%s5138_s7 + $0x10] sm:$0xff] }
 0x247   :  { %v3922_v32 = vsub.f32 %v475_v57, %v572_v24  ;;  %v3928_v35 = vmul.f32 %v820_v1, %v582_v63 }
 0x248   :  { %v778_v36 = vmul.f32 %v762_v13, %v3904_v23  ;;  %v842_v37 = vmul.f32 %v3896_v20, %v3904_v23  ;;  %v810_v38 = vmul.f32 %v3902_v22, %v3904_v23  ;;  %v766_v39 = vmul.f32 %v758_v12, %v3904_v23 }
 0x249   :  { %v3936_v40 = vpop.f32.mrb[8].mxu0  ;;  %v777_v41 = vmul.f32 %v761_v25, %v3922_v32  ;;  %v841_v42 = vmul.f32 %v3912_v27, %v3922_v32  ;;  %v809_v43 = vmul.f32 %v3918_v30, %v3922_v32  ;;  %v765_v44 = vmul.f32 %v757_v19, %v3922_v32 }
 0x24a   :  { %v768_v45 = vmul.f32 %v3936_v40, %v760_v60  ;;  %v780_v46 = vmul.f32 %v3936_v40, %v756_v58  ;;  %v844_v47 = vmul.f32 %v3936_v40, %v820_v1  ;;  %v736_v48 = vpop.f32.mrb[9].mxu0  ;;  %v812_v49 = vmul.f32 %v3936_v40, %v788_v14  ;;  %v790_v1 = vld [vmem:[%s5136_s5 + $0x18] sm:$0xff] }
 0x24b   :  { %v779_v50 = vmul.f32 %v755_v62, %v736_v48  ;;  %v843_v51 = vmul.f32 %v819_v7, %v736_v48  ;;  %v811_v52 = vmul.f32 %v787_v8, %v736_v48  ;;  %v767_v53 = vmul.f32 %v759_v2, %v736_v48  ;;  %v822_v62 = vld [vmem:[%s5138_s7 + $0x18] sm:$0xff] }
 0x24c   :  { %v3948_v54 = vsub.f32 %v764_v10, %v768_v45  ;;  %v3950_v55 = vadd.f32 %v780_v46, %v776_v11  ;;  %v3952_v56 = vadd.f32 %v844_v47, %v840_v16  ;;  %v3954_v57 = vadd.f32 %v812_v49, %v808_v21  ;;  %v789_v10 = vld [vmem:[%s5136_s5 + $0x10] sm:$0xff] }
 0x24d   :  { %v3329_v59 = vpop.f32.mrb[10].mxu0  ;;  %v3956_v60 = vadd.f32 %v779_v50, %v775_v17  ;;  %v3958_v58 = vadd.f32 %v843_v51, %v839_v18  ;;  %v3963_v63 = vadd.f32 %v811_v52, %v807_v28  ;;  %v3965_v0 = vsub.f32 %v763_v29, %v767_v53 }
 0x24e   :  { %v746_v2 = vpop.f32.mrb[11].mxu0  ;;  %v782_v7 = vmul.f32 %v3329_v59, %v758_v12  ;;  %v846_v8 = vmul.f32 %v3329_v59, %v822_v62  ;;  %v814_v11 = vmul.f32 %v3329_v59, %v790_v1  ;;  %v770_v14 = vmul.f32 %v3329_v59, %v762_v13 }
 0x24f   :  { %3334 = vmatprep.mubr.msk.f32.mxu0 %vm5143_vm0, %v3956_v60  ;;  %3346 = vmatprep.mubr.msk.f32.mxu1 %vm5143_vm0, %v3958_v58  ;;  %v781_v15 = vmul.f32 %v757_v19, %v746_v2  ;;  %v845_v16 = vmul.f32 %v821_v6, %v746_v2  ;;  %v813_v17 = vmul.f32 %v789_v10, %v746_v2 }
 0x250   :  { %3335 = vmatmul.mubr.msk.f32.vlgmr.msra.gmra.mrb[12].mxu0 %vm5143_vm0, %v3950_v55  ;;  %3347 = vmatmul.mubr.msk.f32.vlgmr.msra.gmra.mrb[8].mxu1 %vm5143_vm0, %v3952_v56  ;;  %v786_v12 = vadd.f32 %v782_v7, %v778_v36  ;;  %v3984_v18 = vadd.f32 %v846_v8, %v842_v37  ;;  %v769_v21 = vmul.f32 %v761_v25, %v746_v2 }
 0x251   :  { %3497 = vmatpush3.bf16.msra.mxu0 %v3741_v3  ;;  %v785_v13 = vadd.f32 %v781_v15, %v777_v41  ;;  %v849_v24 = vadd.f32 %v845_v16, %v841_v42  ;;  %3493 = vmatpush3.bf16.msra.mxu1 %v3741_v3  ;;  %v817_v28 = vadd.f32 %v813_v17, %v809_v43 }
 0x252   :  { %v773_v19 = vsub.f32 %v765_v44, %v769_v21  ;;  %v818_v29 = vadd.f32 %v814_v11, %v810_v38  ;;  %v774_v45 = vsub.f32 %v766_v39, %v770_v14  ;;  %v799_v46 = vmul.f32 %v3877_v9, %v736_v48  ;;  %3499 = vmatprep.subr.bf16.mxu0 %v3791_v26 }
 0x253   :  { %3337 = vmatprep.mubr.msk.f32.mxu0 %vm5143_vm0, %v785_v13  ;;  %3349 = vmatprep.mubr.msk.f32.mxu1 %vm5143_vm0, %v849_v24  ;;  %v800_v25 = vmul.f32 %v3936_v40, %v3866_v5  ;;  %v797_v36 = vmul.f32 %v789_v10, %v3922_v32  ;;  %v801_v37 = vmul.f32 %v3918_v30, %v746_v2 }
 0x254   :  { %3338 = vmatmul.mubr.msk.f32.gmra.mrb[14].mxu0 %vm5143_vm0, %v786_v12  ;;  %3350 = vmatmul.mubr.msk.f32.gmra.mrb[10].mxu1 %vm5143_vm0, %v3984_v18  ;;  %v803_v9 = vsub.f32 %v3920_v31, %v799_v46  ;;  %v798_v38 = vmul.f32 %v790_v1, %v3904_v23  ;;  %v802_v39 = vmul.f32 %v3329_v59, %v3902_v22 }
 0x255   :  { %3340 = vmatprep.mubr.msk.f32.mxu0 %vm5143_vm0, %v3963_v63  ;;  %3356 = vmatprep.mubr.msk.f32.mxu1 %vm5143_vm0, %v3965_v0  ;;  %v804_v5 = vsub.f32 %v3924_v33, %v800_v25  ;;  %v805_v30 = vsub.f32 %v797_v36, %v801_v37  ;;  %v831_v41 = vmul.f32 %v3861_v4, %v736_v48 }
 0x256   :  { %v806_v42 = vsub.f32 %v798_v38, %v802_v39  ;;  %v832_v43 = vmul.f32 %v3936_v40, %v3847_v61  ;;  %v829_v31 = vmul.f32 %v821_v6, %v3922_v32  ;;  %v833_v44 = vmul.f32 %v3912_v27, %v746_v2  ;;  %3503 = vmatprep.subr.bf16.mxu1 %v3791_v26 }
 0x257   :  { %v835_v22 = vsub.f32 %v3926_v34, %v831_v41  ;;  %v830_v47 = vmul.f32 %v822_v62, %v3904_v23  ;;  %v834_v49 = vmul.f32 %v3329_v59, %v3896_v20 }
 0x258   :  { %3341 = vmatmul.mubr.msk.f32.gmra.mrb[16].mxu0 %vm5143_vm0, %v3954_v57  ;;  %3357 = vmatmul.mubr.msk.f32.vlgmr.msra.gmra.mrb[12].mxu1 %vm5143_vm0, %v3948_v54  ;;  %v836_v61 = vsub.f32 %v3928_v35, %v832_v43  ;;  %v837_v4 = vsub.f32 %v829_v31, %v833_v44 }
 0x259   :  { %3343 = vmatprep.mubr.msk.f32.mxu0 %vm5143_vm0, %v817_v28  ;;  %3359 = vmatprep.mubr.msk.f32.mxu1 %vm5143_vm0, %v773_v19  ;;  %v838_v27 = vsub.f32 %v830_v47, %v834_v49 }
 0x25a   :  { %3505 = vmatpush3.bf16.msra.mxu1 %v3791_v26 }
 0x25b   :  { %3507 = vmatprep.subr.bf16.mxu1 %v3741_v3 }
 0x25c   :  { %3344 = vmatmul.mubr.msk.f32.gmra.mrb[18].mxu0 %vm5143_vm0, %v818_v29  ;;  %3360 = vmatmul.mubr.msk.f32.gmra.mrb[14].mxu1 %vm5143_vm0, %v774_v45 }
 0x25d   :  { %3362 = vmatprep.mubr.msk.f32.mxu1 %vm5143_vm0, %v803_v9  ;;  %3378 = vmatprep.mubr.msk.f32.mxu0 %vm5143_vm0, %v3956_v60 }
 0x260   :  { %3363 = vmatmul.mubr.msk.f32.gmra.mrb[16].mxu1 %vm5143_vm0, %v804_v5  ;;  %3379 = vmatmul.mubr.msk.f32.vlgmr.msra.gmra.mrb[20].mxu0 %vm5143_vm0, %v3950_v55 }
 0x261   :  { %3501 = vmatpush3.bf16.msra.mxu0 %v3791_v26  ;;  %3365 = vmatprep.mubr.msk.f32.mxu1 %vm5143_vm0, %v805_v30 }
 0x262   :  { %3381 = vmatprep.mubr.msk.f32.mxu0 %vm5143_vm0, %v785_v13 }
 0x264   :  { %3366 = vmatmul.mubr.msk.f32.gmra.mrb[18].mxu1 %vm5143_vm0, %v806_v42  ;;  %3382 = vmatmul.mubr.msk.f32.gmra.mrb[22].mxu0 %vm5143_vm0, %v786_v12 }
 0x265   :  { %3368 = vmatprep.mubr.msk.f32.mxu1 %vm5143_vm0, %v835_v22  ;;  %3384 = vmatprep.mubr.msk.f32.mxu0 %vm5143_vm0, %v3963_v63 }
 0x268   :  { %3369 = vmatmul.mubr.msk.f32.gmra.mrb[8].mxu1 %vm5143_vm0, %v836_v61  ;;  %3385 = vmatmul.mubr.msk.f32.gmra.mrb[24].mxu0 %vm5143_vm0, %v3954_v57 }
 0x269   :  { %3371 = vmatprep.mubr.msk.f32.mxu1 %vm5143_vm0, %v837_v4  ;;  %3387 = vmatprep.mubr.msk.f32.mxu0 %vm5143_vm0, %v817_v28 }
 0x26c   :  { %3372 = vmatmul.mubr.msk.f32.gmra.mrb[10].mxu1 %vm5143_vm0, %v838_v27  ;;  %3388 = vmatmul.mubr.msk.f32.gmra.mrb[26].mxu0 %vm5143_vm0, %v818_v29 }
 0x26d   :  { %3390 = vmatprep.mubr.msk.f32.mxu0 %vm5143_vm0, %v3958_v58 }
 0x270   :  { %3391 = vmatmul.mubr.msk.f32.gmra.mrb[28].mxu0 %vm5143_vm0, %v3952_v56 }
 0x271   :  { %3393 = vmatprep.mubr.msk.f32.mxu0 %vm5143_vm0, %v849_v24 }
 0x274   :  { %3394 = vmatmul.mubr.msk.f32.gmra.mrb[30].mxu0 %vm5143_vm0, %v3984_v18 }
 0x275   :  { %3400 = vmatprep.mubr.msk.f32.mxu0 %vm5143_vm0, %v3965_v0 }
 0x278   :  { %3401 = vmatmul.mubr.msk.f32.vlgmr.msra.gmra.mrb[32].mxu0 %vm5143_vm0, %v3948_v54 }
 0x279   :  { %3403 = vmatprep.mubr.msk.f32.mxu0 %vm5143_vm0, %v773_v19 }
 0x27c   :  { %3404 = vmatmul.mubr.msk.f32.gmra.mrb[34].mxu0 %vm5143_vm0, %v774_v45 }
 0x27d   :  { %3406 = vmatprep.mubr.msk.f32.mxu0 %vm5143_vm0, %v803_v9 }
 0x280   :  { %3407 = vmatmul.mubr.msk.f32.gmra.mrb[36].mxu0 %vm5143_vm0, %v804_v5 }
 0x281   :  { %3409 = vmatprep.mubr.msk.f32.mxu0 %vm5143_vm0, %v805_v30 }
 0x284   :  { %3410 = vmatmul.mubr.msk.f32.gmra.mrb[38].mxu0 %vm5143_vm0, %v806_v42 }
 0x285   :  { %3412 = vmatprep.mubr.msk.f32.mxu0 %vm5143_vm0, %v835_v22 }
 0x288   :  { %3413 = vmatmul.mubr.msk.f32.gmra.mrb[40].mxu0 %vm5143_vm0, %v836_v61 }
 0x289   :  { %3415 = vmatprep.mubr.msk.f32.mxu0 %vm5143_vm0, %v837_v4 }
 0x28c   :  { %3416 = vmatmul.mubr.msk.f32.gmra.mrb[42].mxu0 %vm5143_vm0, %v838_v27 }
 0x323   :  { %v3336_v26 = vpop.f32.mrb[12].mxu0 }
 0x324   :  { %v953_v20 = vpop.f32.mrb[13].mxu0 }
 0x327   :  { %v3339_v23 = vpop.f32.mrb[14].mxu0 }
 0x328   :  { %v963_v32 = vpop.f32.mrb[15].mxu0 }
 0x32b   :  { %v3342_v33 = vpop.f32.mrb[16].mxu0  ;;  %v3358_v34 = vpop.f32.mrb[12].mxu1 }
 0x32c   :  { %v4069_v35 = vadd.f32 %v3358_v34, %v3336_v26  ;;  %v973_v40 = vpop.f32.mrb[17].mxu0  ;;  %v1114_v48 = vpop.f32.mrb[13].mxu1 }
 0x32d   :  { %v4071_v50 = vadd.f32 %v1114_v48, %v953_v20 }
 0x32f   :  { %v3345_v51 = vpop.f32.mrb[18].mxu0  ;;  %v3361_v52 = vpop.f32.mrb[14].mxu1 }
 0x330   :  { %v4073_v53 = vadd.f32 %v3361_v52, %v3339_v23  ;;  %v983_v54 = vpop.f32.mrb[19].mxu0  ;;  %v1124_v55 = vpop.f32.mrb[15].mxu1 }
 0x331   :  { %v1125_v56 = vadd.f32 %v1124_v55, %v963_v32 }
 0x333   :  { %v3364_v57 = vpop.f32.mrb[16].mxu1  ;;  %v3380_v59 = vpop.f32.mrb[20].mxu0 }
 0x334   :  { %v1140_v60 = vadd.f32 %v3364_v57, %v3342_v33  ;;  %v1134_v58 = vpop.f32.mrb[17].mxu1  ;;  %v1239_v62 = vpop.f32.mrb[21].mxu0 }
 0x335   :  { %v1135_v63 = vadd.f32 %v1134_v58, %v973_v40 }
 0x337   :  { %v3367_v0 = vpop.f32.mrb[18].mxu1  ;;  %v3383_v1 = vpop.f32.mrb[22].mxu0 }
 0x338   :  { %v1150_v2 = vadd.f32 %v3367_v0, %v3345_v51  ;;  %v1144_v6 = vpop.f32.mrb[19].mxu1  ;;  %v1249_v7 = vpop.f32.mrb[23].mxu0 }
 0x339   :  { %v1145_v8 = vadd.f32 %v1144_v6, %v983_v54 }
 0x33b   :  { %v3370_v10 = vpop.f32.mrb[8].mxu1  ;;  %v3386_v11 = vpop.f32.mrb[24].mxu0 }
 0x33c   :  { %v1154_v14 = vpop.f32.mrb[9].mxu1  ;;  %v1259_v15 = vpop.f32.mrb[25].mxu0 }
 0x33f   :  { %v3373_v16 = vpop.f32.mrb[10].mxu1  ;;  %v3389_v17 = vpop.f32.mrb[26].mxu0 }
 0x340   :  { %v1164_v12 = vpop.f32.mrb[11].mxu1  ;;  %v1269_v18 = vpop.f32.mrb[27].mxu0 }
 0x343   :  { %v3392_v21 = vpop.f32.mrb[28].mxu0 }
 0x344   :  { %v1279_v13 = vpop.f32.mrb[29].mxu0 }
 0x347   :  { %v3395_v24 = vpop.f32.mrb[30].mxu0 }
 0x348   :  { %v1289_v28 = vpop.f32.mrb[31].mxu0 }
 0x34b   :  { %v3402_v19 = vpop.f32.mrb[32].mxu0 }
 0x34c   :  { %v1424_v29 = vsub.f32 %v3380_v59, %v3402_v19  ;;  %v1364_v45 = vpop.f32.mrb[33].mxu0 }
 0x34d   :  { %v1423_v46 = vsub.f32 %v1239_v62, %v1364_v45 }
 0x34f   :  { %1627 = vxpose.xlu0.b32.start [1/2] (short) (narrow) %v1423_v46, 16  ;;  %v3405_v25 = vpop.f32.mrb[34].mxu0 }
 0x350   :  { %v1426_v36 = vsub.f32 %v3383_v1, %v3405_v25  ;;  %v1374_v37 = vpop.f32.mrb[35].mxu0 }
 0x351   :  { %v1425_v9 = vsub.f32 %v1249_v7, %v1374_v37 }
 0x353   :  { %1628 = vxpose.xlu0.b32.end [2/2] (short) (narrow) %v1424_v29, 16  ;;  %1659 = vxpose.xlu1.b32.start [1/2] (short) (narrow) %v1425_v9, 16  ;;  %v3408_v38 = vpop.f32.mrb[36].mxu0 }
 0x354   :  { %v1428_v39 = vsub.f32 %v3386_v11, %v3408_v38  ;;  %v1384_v5 = vpop.f32.mrb[37].mxu0 }
 0x355   :  { %v1427_v30 = vsub.f32 %v1259_v15, %v1384_v5 }
 0x357   :  { %1660 = vxpose.xlu1.b32.end [2/2] (short) (narrow) %v1426_v36, 16  ;;  %1691 = vxpose.xlu0.b32.start [1/2] (short) (narrow) %v1427_v30, 16  ;;  %v3411_v41 = vpop.f32.mrb[38].mxu0 }
 0x358   :  { %v1430_v42 = vsub.f32 %v3389_v17, %v3411_v41  ;;  %v1394_v43 = vpop.f32.mrb[39].mxu0 }
 0x359   :  { %v1429_v31 = vsub.f32 %v1269_v18, %v1394_v43 }
 0x35b   :  { %1692 = vxpose.xlu0.b32.end [2/2] (short) (narrow) %v1428_v39, 16  ;;  %1723 = vxpose.xlu1.b32.start [1/2] (short) (narrow) %v1429_v31, 16  ;;  %v3414_v44 = vpop.f32.mrb[40].mxu0 }
 0x35c   :  { %v1432_v22 = vsub.f32 %v3392_v21, %v3414_v44  ;;  %v1404_v47 = vpop.f32.mrb[41].mxu0 }
 0x35d   :  { %v1431_v49 = vsub.f32 %v1279_v13, %v1404_v47 }
 0x35f   :  { %1724 = vxpose.xlu1.b32.end [2/2] (short) (narrow) %v1430_v42, 16  ;;  %1755 = vxpose.xlu0.b32.start [1/2] (short) (narrow) %v1431_v49, 16  ;;  %v3417_v61 = vpop.f32.mrb[42].mxu0 }
 0x360   :  { %v1434_v4 = vsub.f32 %v3395_v24, %v3417_v61  ;;  %v1414_v27 = vpop.f32.mrb[43].mxu0 }
 0x361   :  { %v1433_v26 = vsub.f32 %v1289_v28, %v1414_v27 }
 0x363   :  { %1756 = vxpose.xlu0.b32.end [2/2] (short) (narrow) %v1432_v22, 16  ;;  %1787 = vxpose.xlu1.b32.start [1/2] (short) (narrow) %v1433_v26, 16 }
 0x367   :  { %1435 = vxpose.xlu0.b32.start [1/2] (short) (narrow) %v4071_v50, 16  ;;  %1788 = vxpose.xlu1.b32.end [2/2] (short) (narrow) %v1434_v4, 16 }
 0x36b   :  { %1436 = vxpose.xlu0.b32.end [2/2] (short) (narrow) %v4069_v35, 16  ;;  %1467 = vxpose.xlu1.b32.start [1/2] (short) (narrow) %v1125_v56, 16 }
 0x36f   :  { %1499 = vxpose.xlu0.b32.start [1/2] (short) (narrow) %v1135_v63, 16  ;;  %1468 = vxpose.xlu1.b32.end [2/2] (short) (narrow) %v4073_v53, 16 }
 0x373   :  { %1500 = vxpose.xlu0.b32.end [2/2] (short) (narrow) %v1140_v60, 16  ;;  %1531 = vxpose.xlu1.b32.start [1/2] (short) (narrow) %v1145_v8, 16 }
 0x377   :  { %1563 = vxpose.xlu0.b32.start [1/2] (short) (narrow) %v1154_v14, 16  ;;  %1532 = vxpose.xlu1.b32.end [2/2] (short) (narrow) %v1150_v2, 16 }
 0x37b   :  { %1564 = vxpose.xlu0.b32.end [2/2] (short) (narrow) %v3370_v10, 16  ;;  %1595 = vxpose.xlu1.b32.start [1/2] (short) (narrow) %v1164_v12, 16 }
 0x37f   :  { %1596 = vxpose.xlu1.b32.end [2/2] (short) (narrow) %v3373_v16, 16 }
 0x3cf   :  { %v1643_v20 = vpop.trf.xlu0 }
 0x3d0   :  { %3422 = vmatprep.mubr.msk.f32.mxu1 %vm5143_vm0, %v1643_v20 }
 0x3d3   :  { %v1644_v23 = vpop.trf.xlu0  ;;  %v1675_v32 = vpop.trf.xlu1 }
 0x3d4   :  { %3423 = vmatmul.mubr.msk.f32.vlgmr.msra.gmra.mrb[20].mxu1 %vm5143_vm0, %v1644_v23 }
 0x3d5   :  { %3509 = vmatpush3.bf16.msra.mxu1 %v3741_v3  ;;  %3425 = vmatprep.mubr.msk.f32.mxu1 %vm5143_vm0, %v1675_v32 }
 0x3d7   :  { %v1676_v33 = vpop.trf.xlu1  ;;  %v1707_v34 = vpop.trf.xlu0 }
 0x3d8   :  { %3426 = vmatmul.mubr.msk.f32.gmra.mrb[22].mxu1 %vm5143_vm0, %v1676_v33 }
 0x3d9   :  { %3428 = vmatprep.mubr.msk.f32.mxu1 %vm5143_vm0, %v1707_v34 }
 0x3db   :  { %v1708_v35 = vpop.trf.xlu0  ;;  %v1739_v40 = vpop.trf.xlu1 }
 0x3dc   :  { %3429 = vmatmul.mubr.msk.f32.gmra.mrb[24].mxu1 %vm5143_vm0, %v1708_v35 }
 0x3dd   :  { %3431 = vmatprep.mubr.msk.f32.mxu1 %vm5143_vm0, %v1739_v40 }
 0x3df   :  { %v1740_v48 = vpop.trf.xlu1  ;;  %v1771_v50 = vpop.trf.xlu0 }
 0x3e0   :  { %3432 = vmatmul.mubr.msk.f32.gmra.mrb[26].mxu1 %vm5143_vm0, %v1740_v48 }
 0x3e1   :  { %3434 = vmatprep.mubr.msk.f32.mxu1 %vm5143_vm0, %v1771_v50 }
 0x3e3   :  { %v1772_v3 = vpop.trf.xlu0  ;;  %v1803_v51 = vpop.trf.xlu1 }
 0x3e4   :  { %3435 = vmatmul.mubr.msk.f32.gmra.mrb[28].mxu1 %vm5143_vm0, %v1772_v3 }
 0x3e5   :  { %3437 = vmatprep.mubr.msk.f32.mxu1 %vm5143_vm0, %v1803_v51 }
 0x3e7   :  { %v1451_v52 = vpop.trf.xlu0  ;;  %v1804_v53 = vpop.trf.xlu1 }
 0x3e8   :  { %3438 = vmatmul.mubr.msk.f32.gmra.mrb[30].mxu1 %vm5143_vm0, %v1804_v53 }
 0x3e9   :  { %3444 = vmatprep.mubr.msk.f32.mxu1 %vm5143_vm0, %v1451_v52 }
 0x3eb   :  { %v1452_v54 = vpop.trf.xlu0  ;;  %v1483_v55 = vpop.trf.xlu1 }
 0x3ec   :  { %3445 = vmatmul.mubr.msk.f32.vlgmr.msra.gmra.mrb[20].mxu1 %vm5143_vm0, %v1452_v54 }
 0x3ed   :  { %3447 = vmatprep.mubr.msk.f32.mxu1 %vm5143_vm0, %v1483_v55 }
 0x3ef   :  { %v1515_v56 = vpop.trf.xlu0  ;;  %v1484_v57 = vpop.trf.xlu1 }
 0x3f0   :  { %3448 = vmatmul.mubr.msk.f32.gmra.mrb[22].mxu1 %vm5143_vm0, %v1484_v57 }
 0x3f1   :  { %3450 = vmatprep.mubr.msk.f32.mxu1 %vm5143_vm0, %v1515_v56 }
 0x3f3   :  { %v1516_v59 = vpop.trf.xlu0  ;;  %v1547_v60 = vpop.trf.xlu1 }
 0x3f4   :  { %3451 = vmatmul.mubr.msk.f32.gmra.mrb[24].mxu1 %vm5143_vm0, %v1516_v59 }
 0x3f5   :  { %3453 = vmatprep.mubr.msk.f32.mxu1 %vm5143_vm0, %v1547_v60 }
 0x3f7   :  { %v1579_v58 = vpop.trf.xlu0  ;;  %v1548_v62 = vpop.trf.xlu1 }
 0x3f8   :  { %3454 = vmatmul.mubr.msk.f32.gmra.mrb[26].mxu1 %vm5143_vm0, %v1548_v62 }
 0x3f9   :  { %3456 = vmatprep.mubr.msk.f32.mxu1 %vm5143_vm0, %v1579_v58 }
 0x3fb   :  { %v1580_v63 = vpop.trf.xlu0  ;;  %v1611_v0 = vpop.trf.xlu1 }
 0x3fc   :  { %3457 = vmatmul.mubr.msk.f32.gmra.mrb[28].mxu1 %vm5143_vm0, %v1580_v63 }
 0x3fd   :  { %3459 = vmatprep.mubr.msk.f32.mxu1 %vm5143_vm0, %v1611_v0 }
 0x3ff   :  { %v1612_v1 = vpop.trf.xlu1 }
 0x400   :  { %3460 = vmatmul.mubr.msk.f32.gmra.mrb[30].mxu1 %vm5143_vm0, %v1612_v1 }
 0x4bf   :  { %v4103_v2 = vpop.f32.mrb[20].mxu1 }
 0x4c0   :  { %v4105_v6 = vpop.f32.mrb[21].mxu1 }
 0x4c3   :  { %v4107_v7 = vpop.f32.mrb[22].mxu1 }
 0x4c4   :  { %v4109_v8 = vpop.f32.mrb[23].mxu1 }
 0x4c7   :  { %v3452_v10 = vpop.f32.mrb[24].mxu1 }
 0x4c8   :  { %v2144_v11 = vadd.f32 1e-06, %v3452_v10  ;;  %v2102_v14 = vpop.f32.mrb[25].mxu1  ;;  %v2208_v13 = vmul.f32 %v3452_v10, %v3452_v10 }
 0x4c9   :  { %v2143_v15 = vadd.f32 1e-06, %v2102_v14  ;;  %v2207_v19 = vmul.f32 %v2102_v14, %v2102_v14 }
 0x4ca   :  { %3585 = vrcp.f32 %v2144_v11 }
 0x4cb   :  { %3587 = vrcp.f32 %v2143_v15  ;;  %v3455_v16 = vpop.f32.mrb[26].mxu1 }
 0x4cc   :  { %v2569_v17 = vadd.f32 1e-06, %v3455_v16  ;;  %v2112_v12 = vpop.f32.mrb[27].mxu1  ;;  %v2633_v9 = vmul.f32 %v3455_v16, %v3455_v16 }
 0x4cd   :  { %v2568_v18 = vadd.f32 1e-06, %v2112_v12  ;;  %v2632_v41 = vmul.f32 %v2112_v12, %v2112_v12 }
 0x4ce   :  { %3589 = vrcp.f32 %v2569_v17 }
 0x4cf   :  { %3591 = vrcp.f32 %v2568_v18  ;;  %v3458_v21 = vpop.f32.mrb[28].mxu1 }
 0x4d0   :  { %v2210_v24 = vmul.f32 %v3458_v21, %v3458_v21  ;;  %v2122_v28 = vpop.f32.mrb[29].mxu1  ;;  %v2142_v46 = vsub.f32 0.0, %v3458_v21 }
 0x4d1   :  { %v2209_v29 = vmul.f32 %v2122_v28, %v2122_v28  ;;  %v2141_v38 = vsub.f32 0.0, %v2122_v28 }
 0x4d2   :  { %v2212_v45 = vadd.f32 %v2210_v24, %v2208_v13 }
 0x4d3   :  { %v4111_v25 = vadd.f32 %v2209_v29, %v2207_v19  ;;  %v3461_v36 = vpop.f32.mrb[30].mxu1 }
 0x4d4   :  { %v3586_v37 = vpop.eup %3585  ;;  %3593 = vrsqrt.f32 %v2212_v45  ;;  %v2635_v39 = vmul.f32 %v3461_v36, %v3461_v36  ;;  %v2132_v5 = vpop.f32.mrb[31].mxu1  ;;  %v2567_v47 = vsub.f32 0.0, %v3461_v36  ;;  %vm2222_vm1 = vcmp.eq.f32.partialorder %v2212_v45, inf }
 0x4d5   :  { %v3588_v30 = vpop.eup %3587  ;;  %v4113_v42 = vmul.f32 %v3586_v37, %v2142_v46  ;;  %3595 = vrsqrt.f32 %v4111_v25  ;;  %v2634_v43 = vmul.f32 %v2132_v5, %v2132_v5  ;;  %v2566_v27 = vsub.f32 0.0, %v2132_v5 }
 0x4d6   :  { %v4116_v31 = vmul.f32 %v3588_v30, %v2141_v38  ;;  %v4118_v44 = vadd.f32 %v2635_v39, %v2633_v9  ;;  %vm2215_vm2 = vcmp.eq.f32.partialorder %v4111_v25, inf  ;;  %vm2217_vm3 = vcmp.eq.f32.partialorder %v4111_v25, 0.0 }
 0x4d7   :  { %v4121_v22 = vand.u32 2147483647, %v4113_v42  ;;  %v4123_v49 = vadd.f32 %v2634_v43, %v2632_v41  ;;  %v2218_v40 = vand.u32 2147483648, %v4111_v25  ;;  %vm2224_vm4 = vcmp.eq.f32.partialorder %v2212_v45, 0.0 }
 0x4d8   :  { %v3590_v61 = vpop.eup %3589  ;;  %v4126_v4 = vand.u32 2147483647, %v4116_v31  ;;  %3597 = vrsqrt.f32 %v4118_v44  ;;  %v2225_v50 = vand.u32 2147483648, %v2212_v45  ;;  %vm2647_vm7 = vcmp.eq.f32.partialorder %v4118_v44, inf }
 0x4d9   :  { %v3592_v26 = vpop.eup %3591  ;;  %v2166_v20 = vadd.f32 1.0, %v4121_v22  ;;  %v4130_v23 = vmul.f32 %v3590_v61, %v2567_v47  ;;  %3599 = vrsqrt.f32 %v4123_v49  ;;  %vm2640_vm5 = vcmp.eq.f32.partialorder %v4123_v49, inf }
 0x4da   :  { %v2165_v32 = vadd.f32 1.0, %v4126_v4  ;;  %v4134_v33 = vmul.f32 %v3592_v26, %v2566_v27  ;;  %vm2642_vm6 = vcmp.eq.f32.partialorder %v4123_v49, 0.0  ;;  %v2643_v53 = vand.u32 2147483648, %v4123_v49 }
 0x4db   :  { %3601 = vrcp.f32 %v2166_v20  ;;  %v4137_v34 = vand.u32 2147483647, %v4130_v23  ;;  %vm2649_vm8 = vcmp.eq.f32.partialorder %v4118_v44, 0.0  ;;  %v2650_v55 = vand.u32 2147483648, %v4118_v44 }
 0x4dc   :  { %3603 = vrcp.f32 %v2165_v32  ;;  %v4140_v35 = vand.u32 2147483647, %v4134_v33  ;;  %vm2151_vm9 = vcmp.gt.f32.partialorder %v4126_v4, 2.4142137  ;;  %vm2152_vm10 = vcmp.gt.f32.partialorder %v4121_v22, 2.4142137 }
 0x4dd   :  { %3605 = vrcp.f32 %v4126_v4  ;;  %v2591_v51 = vadd.f32 1.0, %v4137_v34  ;;  %vm2153_vm11 = vcmp.gt.f32.partialorder %v4126_v4, 0.41421357  ;;  %v3118_v14 = vadd.f32 -1.0, %v4126_v4  ;;  %vm2155_vm14 = vmxor %vm2151_vm9, %vm3677_vm13 }
 0x4de   :  { %v3594_v48 = vpop.eup %3593  ;;  %v2590_v56 = vadd.f32 1.0, %v4140_v35  ;;  %3607 = vrcp.f32 %v4121_v22  ;;  %v3119_v15 = vadd.f32 -1.0, %v4121_v22  ;;  %vm2154_vm12 = vcmp.gt.f32.partialorder %v4121_v22, 0.41421357  ;;  %vm4205_vm15 = vmxor %vm2152_vm10, %vm3677_vm13 }
 0x4df   :  { %v3596_v3 = vpop.eup %3595  ;;  %v2221_v52 = vmul.f32 %v3594_v48, %v2212_v45  ;;  %3609 = vrcp.f32 %v2591_v51 }
 0x4e0   :  { %v2214_v54 = vmul.f32 %v3596_v3, %v4111_v25 }
 0x4e1   :  { %v2223_v57 = vsel %vm2222_vm1, %v2212_v45, %v2221_v52  ;;  %vm4216_vm1 = vmand %vm2153_vm11, %vm2155_vm14 }
 0x4e2   :  { %v3598_v59 = vpop.eup %3597  ;;  %v2216_v60 = vsel %vm2215_vm2, %v4111_v25, %v2214_v54  ;;  %v2226_v58 = vsel %vm2224_vm4, %v2225_v50, %v2223_v57  ;;  %vm4227_vm2 = vmand %vm2154_vm12, %vm4205_vm15  ;;  %vm5141_vm4 = vcmp.gt.f32.partialorder %v4137_v34, 2.4142137 }
 0x4e3   :  { %v3600_v62 = vpop.eup %3599  ;;  %v2219_v63 = vsel %vm2217_vm3, %v2218_v40, %v2216_v60  ;;  %v4166_v0 = vadd.f32 1e-06, %v2226_v58  ;;  %v2646_v1 = vmul.f32 %v3598_v59, %v4118_v44  ;;  %vm5142_vm3 = vcmp.gt.f32.partialorder %v4140_v35, 2.4142137 }
 0x4e4   :  { %v4169_v10 = vadd.f32 1e-06, %v2219_v63  ;;  %v2639_v11 = vmul.f32 %v3600_v62, %v4123_v49  ;;  %v3678_v63 = vmov 0.0  }
 0x4e5   :  { %v3602_v16 = vpop.eup %3601  ;;  %3611 = vrcp.f32 %v4166_v0  ;;  %v2336_v17 = vsel %vm5143_vm0, %v4166_v0, inf  ;;  %v2349_v12 = vsel %vm5143_vm0, %v4166_v0, -inf  ;;  %v2648_v18 = vsel %vm2647_vm7, %v4118_v44, %v2646_v1 }
 0x4e6   :  { %v3604_v21 = vpop.eup %3603  ;;  %v2335_v13 = vsel %vm5143_vm0, %v4169_v10, inf  ;;  %3613 = vrcp.f32 %v4169_v10  ;;  %v2348_v24 = vsel %vm5143_vm0, %v4169_v10, -inf  ;;  %v2641_v28 = vsel %vm2640_vm5, %v4123_v49, %v2639_v11 }
 0x4e7   :  { %v2337_v19 = vmin.f32 %v2335_v13, %v2336_v17  ;;  %v2644_v29 = vsel %vm2642_vm6, %v2643_v53, %v2641_v28  ;;  %v2651_v45 = vsel %vm2649_vm8, %v2650_v55, %v2648_v18  ;;  %v3606_v46 = vpop.eup %3605  ;;  %v2169_v9 = vmul.f32 %v3604_v21, %v3118_v14  ;;  %vm4280_vm6 = vmxor %vm5142_vm3, %vm3677_vm13 }
 0x4e8   :  { %v4198_v25 = vadd.f32 1e-06, %v2644_v29  ;;  %v4200_v36 = vadd.f32 1e-06, %v2651_v45  ;;  %v2170_v38 = vmul.f32 %v3602_v16, %v3119_v15  ;;  %3615 = vrcp.f32 %v2590_v56  ;;  %v3608_v44 = vpop.eup %3607  ;;  %vm2581_vm8 = vmxor %vm5141_vm4, %vm3677_vm13 }
 0x4e9   :  { %2338 = vmin.xlane.f32.xlu1 %v2337_v19  ;;  %v2350_v39 = vmax.f32 %v2348_v24, %v2349_v12  ;;  %v2161_v43 = vsub.f32 0.0, %v3606_v46  ;;  %v2171_v27 = vsel %vm4216_vm1, %v2169_v9, %v4126_v4  ;;  %v2162_v20 = vsub.f32 0.0, %v3608_v44  ;;  %v3610_v48 = vpop.eup %3609 }
 0x4ea   :  { %3617 = vrcp.f32 %v4200_v36  ;;  %v2760_v5 = vsel %vm5143_vm0, %v4198_v25, inf  ;;  %v2761_v30 = vsel %vm5143_vm0, %v4200_v36, inf  ;;  %v2773_v49 = vsel %vm5143_vm0, %v4198_v25, -inf }
 0x4eb   :  { %v2762_v47 = vmin.f32 %v2760_v5, %v2761_v30  ;;  %3619 = vrcp.f32 %v4198_v25  ;;  %v2774_v26 = vsel %vm5143_vm0, %v4200_v36, -inf  ;;  %v2172_v32 = vsel %vm4227_vm2, %v2170_v38, %v4121_v22 }
 0x4ec   :  { %v4241_v40 = vsel %vm2151_vm9, %v2161_v43, %v2171_v27  ;;  %v4247_v3 = vsel %vm2152_vm10, %v2162_v20, %v2172_v32  ;;  %3621 = vrcp.f32 %v4140_v35  ;;  %v2775_v52 = vmax.f32 %v2773_v49, %v2774_v26 }
 0x4ed   :  { %2351 = vmax.xlane.f32.xlu1 %v2350_v39  ;;  %2763 = vmin.xlane.f32.xlu0 %v2762_v47  ;;  %v2179_v50 = vmul.f32 %v4241_v40, %v4241_v40  ;;  %v2180_v53 = vmul.f32 %v4247_v3, %v4247_v3  ;;  %3623 = vrcp.f32 %v4137_v34  ;;  %vm2578_vm5 = vcmp.gt.f32.partialorder %v4140_v35, 0.41421357 }
 0x4ee   :  { %v3134_v15 = vadd.f32 -1.0, %v4140_v35  ;;  %v3135_v18 = vadd.f32 -1.0, %v4137_v34  ;;  %vm2579_vm7 = vcmp.gt.f32.partialorder %v4137_v34, 0.41421357  ;;  %v2176_v38 = vsel %vm4227_vm2, 0.7853982, %v3678_v63  ;;  %vm4301_vm11 = vmand %vm2578_vm5, %vm4280_vm6 }
 0x4ef   :  { %v3612_v51 = vpop.eup %3611  ;;  %v2181_v54 = vmul.f32 0.080537446, %v2179_v50  ;;  %v2182_v57 = vmul.f32 0.080537446, %v2180_v53  ;;  %vm4318_vm12 = vmand %vm2579_vm7, %vm2581_vm8  ;;  %v2178_v27 = vsel %vm2152_vm10, 1.5707964, %v2176_v38 }
 0x4f0   :  { %v3614_v55 = vpop.eup %3613  ;;  %v4253_v56 = vmul.f32 %v3612_v51, %v4103_v2  ;;  %v2175_v2 = vsel %vm4216_vm1, 0.7853982, %v3678_v63  ;;  %v2595_v9 = vmul.f32 %v3610_v48, %v3135_v18  ;;  %vm2202_vm2 = vcmp.lt.f32.partialorder %v4113_v42, 0.0 }
 0x4f1   :  { %2776 = vmax.xlane.f32.xlu1 %v2775_v52  ;;  %v3120_v59 = vadd.f32 -0.13877685, %v2181_v54  ;;  %v4256_v60 = vmul.f32 %v3614_v55, %v4105_v6  ;;  %v3121_v1 = vadd.f32 -0.13877685, %v2182_v57 }
 0x4f2   :  { %v4260_v58 = vand.u32 2147483647, %v4253_v56  ;;  %v3616_v62 = vpop.eup %3615  ;;  %v2597_v26 = vsel %vm4318_vm12, %v2595_v9, %v4137_v34 }
 0x4f3   :  { %v2185_v11 = vmul.f32 %v3120_v59, %v2179_v50  ;;  %v4267_v14 = vand.u32 2147483647, %v4256_v60  ;;  %v2186_v17 = vmul.f32 %v3121_v1, %v2180_v53  ;;  %v2594_v28 = vmul.f32 %v3616_v62, %v3134_v15 }
 0x4f4   :  { %v3618_v6 = vpop.eup %3617  ;;  %3625 = vrcp.f32 %v4260_v58  ;;  %v2250_v13 = vadd.f32 1.0, %v4260_v58  ;;  %vm2236_vm14 = vcmp.gt.f32.partialorder %v4260_v58, 2.4142137  ;;  %vm2238_vm15 = vcmp.gt.f32.partialorder %v4260_v58, 0.41421357 }
 0x4f5   :  { %v3620_v16 = vpop.eup %3619  ;;  %v2187_v12 = vadd.f32 0.19977711, %v2185_v11  ;;  %3627 = vrcp.f32 %v4267_v14  ;;  %v2249_v21 = vadd.f32 1.0, %v4267_v14  ;;  %v2188_v19 = vadd.f32 0.19977711, %v2186_v17  ;;  %vm4360_vm6 = vmxor %vm2236_vm14, %vm3677_vm13 }
 0x4f6   :  { %v4285_v45 = vmul.f32 %v3620_v16, %v4109_v8  ;;  %v4288_v46 = vmul.f32 %v3618_v6, %v4107_v7  ;;  %v3622_v37 = vpop.eup %3621  ;;  %v2177_v8 = vsel %vm2151_vm9, 1.5707964, %v2175_v2  ;;  %v2596_v41 = vsel %vm4301_vm11, %v2594_v28, %v4140_v35 }
 0x4f7   :  { %v2189_v29 = vmul.f32 %v2187_v12, %v2179_v50  ;;  %3629 = vrcp.f32 %v2249_v21  ;;  %v2190_v39 = vmul.f32 %v2188_v19, %v2180_v53  ;;  %v3624_v43 = vpop.eup %3623  ;;  %v2586_v4 = vsub.f32 0.0, %v3622_v37 }
 0x4f8   :  { %3631 = vrcp.f32 %v2250_v13  ;;  %v4308_v30 = vand.u32 2147483647, %v4285_v45  ;;  %v4314_v49 = vand.u32 2147483647, %v4288_v46  ;;  %vm2201_vm9 = vcmp.lt.f32.partialorder %v4116_v31, 0.0 }
 0x4f9   :  { %v3122_v5 = vadd.f32 -0.3333295, %v2189_v29  ;;  %v3123_v44 = vadd.f32 -0.3333295, %v2190_v39  ;;  %vm2235_vm1 = vcmp.gt.f32.partialorder %v4267_v14, 2.4142137  ;;  %v4334_v48 = vsel %vm5142_vm3, %v2586_v4, %v2596_v41  ;;  %vm4388_vm3 = vmand %vm2238_vm15, %vm4360_vm6 }
 0x4fa   :  { %3633 = vrcp.f32 %v4308_v30  ;;  %v2674_v22 = vadd.f32 1.0, %v4308_v30  ;;  %v2587_v51 = vsub.f32 0.0, %v3624_v43  ;;  %v3125_v55 = vadd.f32 -1.0, %v4260_v58  ;;  %vm2239_vm5 = vmxor %vm2235_vm1, %vm3677_vm13 }
 0x4fb   :  { %v2193_v47 = vmul.f32 %v3122_v5, %v2179_v50  ;;  %v2194_v20 = vmul.f32 %v3123_v44, %v2180_v53  ;;  %v2675_v50 = vadd.f32 1.0, %v4314_v49  ;;  %3635 = vrcp.f32 %v4314_v49 }
 0x4fc   :  { %vm2237_vm10 = vcmp.gt.f32.partialorder %v4267_v14, 0.41421357  ;;  %3637 = vrcp.f32 %v2674_v22  ;;  %v4346_v59 = vsel %vm5141_vm4, %v2587_v51, %v2597_v26  ;;  %v4350_v62 = vmul.f32 %v4334_v48, %v4334_v48 }
 0x4fd   :  { %v2195_v32 = vmul.f32 %v2193_v47, %v4241_v40  ;;  %v2196_v53 = vmul.f32 %v2194_v20, %v4247_v3  ;;  %v3124_v11 = vadd.f32 -1.0, %v4267_v14  ;;  %3639 = vrcp.f32 %v2675_v50  ;;  %vm4375_vm4 = vmand %vm2237_vm10, %vm2239_vm5 }
 0x4fe   :  { %v3626_v52 = vpop.eup %3625  ;;  %vm2660_vm7 = vcmp.gt.f32.partialorder %v4308_v30, 2.4142137  ;;  %vm2662_vm8 = vcmp.gt.f32.partialorder %v4308_v30, 0.41421357  ;;  %v2606_v16 = vmul.f32 0.080537446, %v4350_v62 }
 0x4ff   :  { %v2197_v54 = vadd.f32 %v2195_v32, %v2177_v8  ;;  %v3628_v57 = vpop.eup %3627  ;;  %v2198_v2 = vadd.f32 %v2196_v53, %v2178_v27  ;;  %v3140_v13 = vadd.f32 -1.0, %v4308_v30  ;;  %v2246_v19 = vsub.f32 0.0, %v3626_v52 }
 0x500   :  { %v2245_v28 = vsub.f32 0.0, %v3628_v57  ;;  %v3136_v5 = vadd.f32 -0.13877685, %v2606_v16  ;;  %vm2663_vm15 = vcmp.gt.f32.partialorder %v4314_v49, 0.41421357  ;;  %v3141_v57 = vadd.f32 -1.0, %v4314_v49 }
 0x501   :  { %v2199_v1 = vadd.f32 %v2197_v54, %v4241_v40  ;;  %v3630_v6 = vpop.eup %3629  ;;  %v4368_v40 = vmul.f32 %v4346_v59, %v4346_v59  ;;  %v2200_v12 = vadd.f32 %v2198_v2, %v4247_v3  ;;  %vm2627_vm6 = vcmp.lt.f32.partialorder %v4130_v23, 0.0 }
 0x502   :  { %v3632_v17 = vpop.eup %3631  ;;  %v2253_v21 = vmul.f32 %v3630_v6, %v3124_v11  ;;  %v2610_v2 = vmul.f32 %v3136_v5, %v4350_v62 }
 0x503   :  { %v2203_v18 = vsub.f32 0.0, %v2199_v1  ;;  %v2254_v29 = vmul.f32 %v3632_v17, %v3125_v55  ;;  %v2607_v37 = vmul.f32 0.080537446, %v4368_v40  ;;  %v2204_v9 = vsub.f32 0.0, %v2200_v12 }
 0x504   :  { %v2255_v39 = vsel %vm4375_vm4, %v2253_v21, %v4267_v14  ;;  %v3634_v27 = vpop.eup %3633  ;;  %v2612_v21 = vadd.f32 0.19977711, %v2610_v2 }
 0x505   :  { %v4382_v38 = vsel %vm2201_vm9, %v2203_v18, %v2199_v1  ;;  %v2256_v41 = vsel %vm4388_vm3, %v2254_v29, %v4260_v58  ;;  %v4404_v43 = vsel %vm2235_vm1, %v2245_v28, %v2255_v39  ;;  %v4408_v44 = vsel %vm2202_vm2, %v2204_v9, %v2200_v12  ;;  %v3636_v22 = vpop.eup %3635  ;;  %vm2664_vm2 = vmxor %vm2660_vm7, %vm3677_vm13 }
 0x506   :  { %v2392_v8 = vsel %vm5143_vm0, %v4382_v38, -inf  ;;  %v2379_v31 = vsel %vm5143_vm0, %v4382_v38, inf  ;;  %v4412_v47 = vsel %vm2236_vm14, %v2246_v19, %v2256_v41  ;;  %v2263_v4 = vmul.f32 %v4404_v43, %v4404_v43  ;;  %v3638_v53 = vpop.eup %3637  ;;  %vm4439_vm5 = vmand %vm2662_vm8, %vm2664_vm2 }
 0x507   :  { %vm2661_vm9 = vcmp.gt.f32.partialorder %v4314_v49, 2.4142137  ;;  %v2393_v26 = vsel %vm5143_vm0, %v4408_v44, -inf  ;;  %v2380_v20 = vsel %vm5143_vm0, %v4408_v44, inf  ;;  %v2264_v42 = vmul.f32 %v4412_v47, %v4412_v47  ;;  %v3640_v11 = vpop.eup %3639 }
 0x508   :  { %v3137_v32 = vadd.f32 -0.13877685, %v2607_v37  ;;  %v2394_v50 = vmax.f32 %v2392_v8, %v2393_v26  ;;  %v2381_v51 = vmin.f32 %v2379_v31, %v2380_v20  ;;  %v2265_v52 = vmul.f32 0.080537446, %v2263_v4  ;;  %vm4430_vm10 = vmxor %vm2661_vm9, %vm3677_vm13 }
 0x509   :  { %v2266_v54 = vmul.f32 0.080537446, %v2264_v42  ;;  %v2670_v15 = vsub.f32 0.0, %v3634_v27  ;;  %v2678_v16 = vmul.f32 %v3638_v53, %v3140_v13  ;;  %v2679_v18 = vmul.f32 %v3640_v11, %v3141_v57  ;;  %vm4447_vm13 = vmand %vm2663_vm15, %vm4430_vm10 }
 0x50a   :  { %v2611_v1 = vmul.f32 %v3137_v32, %v4368_v40  ;;  %2395 = vmax.xlane.f32.xlu1 %v2394_v50  ;;  %2382 = vmin.xlane.f32.xlu0 %v2381_v51  ;;  %v3126_v6 = vadd.f32 -0.13877685, %v2265_v52  ;;  %v2671_v13 = vsub.f32 0.0, %v3636_v22  ;;  %v2614_v8 = vmul.f32 %v2612_v21, %v4350_v62 }
 0x50b   :  { %v3127_v17 = vadd.f32 -0.13877685, %v2266_v54  ;;  %v2680_v37 = vsel %vm4439_vm5, %v2678_v16, %v4308_v30  ;;  %v2681_v39 = vsel %vm4447_vm13, %v2679_v18, %v4314_v49  ;;  %v2600_v18 = vsel %vm4301_vm11, 0.7853982, %v3678_v63 }
 0x50c   :  { %v2613_v28 = vadd.f32 0.19977711, %v2611_v1  ;;  %v2269_v19 = vmul.f32 %v3126_v6, %v2263_v4  ;;  %v4459_v5 = vsel %vm2660_vm7, %v2670_v15, %v2680_v37  ;;  %v4464_v41 = vsel %vm2661_vm9, %v2671_v13, %v2681_v39 }
 0x50d   :  { %v2270_v9 = vmul.f32 %v3127_v17, %v2264_v42  ;;  %v2688_v27 = vmul.f32 %v4459_v5, %v4459_v5  ;;  %v2689_v32 = vmul.f32 %v4464_v41, %v4464_v41  ;;  %v3138_v22 = vadd.f32 -0.3333295, %v2614_v8 }
 0x50e   :  { %v2271_v31 = vadd.f32 0.19977711, %v2269_v19  ;;  %v2615_v26 = vmul.f32 %v2613_v28, %v4368_v40  ;;  %v2259_v15 = vsel %vm4375_vm4, 0.7853982, %v3678_v63  ;;  %v2260_v21 = vsel %vm4388_vm3, 0.7853982, %v3678_v63 }
 0x50f   :  { %v2272_v20 = vadd.f32 0.19977711, %v2270_v9  ;;  %v2690_v51 = vmul.f32 0.080537446, %v2688_v27  ;;  %v2691_v54 = vmul.f32 0.080537446, %v2689_v32  ;;  %v2618_v2 = vmul.f32 %v3138_v22, %v4350_v62 }
 0x510   :  { %v2273_v50 = vmul.f32 %v2271_v31, %v2263_v4  ;;  %v3139_v52 = vadd.f32 -0.3333295, %v2615_v26  ;;  %v2261_v7 = vsel %vm2235_vm1, 1.5707964, %v2259_v15  ;;  %vm5185_vm3 = vcmp.gt.f32.partialorder %v4140_v35, 2.4142137 }
 0x511   :  { %v2274_v53 = vmul.f32 %v2272_v20, %v2264_v42  ;;  %v3142_v57 = vadd.f32 -0.13877685, %v2690_v51  ;;  %v3143_v6 = vadd.f32 -0.13877685, %v2691_v54  ;;  %v2602_v61 = vsel %vm5185_vm3, 1.5707964, %v2600_v18 }
 0x512   :  { %v3128_v55 = vadd.f32 -0.3333295, %v2273_v50  ;;  %v2619_v1 = vmul.f32 %v3139_v52, %v4368_v40  ;;  %v2601_v40 = vsel %vm4318_vm12, 0.7853982, %v3678_v63  ;;  %v2684_v31 = vsel %vm4439_vm5, 0.7853982, %v3678_v63 }
 0x513   :  { %v3129_v11 = vadd.f32 -0.3333295, %v2274_v53  ;;  %v2694_v17 = vmul.f32 %v3142_v57, %v2688_v27  ;;  %v2695_v62 = vmul.f32 %v3143_v6, %v2689_v32  ;;  %vm5186_vm4 = vcmp.gt.f32.partialorder %v4137_v34, 2.4142137 }
 0x514   :  { %v2277_v16 = vmul.f32 %v3128_v55, %v2263_v4  ;;  %v2620_v4 = vmul.f32 %v2618_v2, %v4334_v48  ;;  %v2621_v13 = vmul.f32 %v2619_v1, %v4346_v59  ;;  %v2603_v14 = vsel %vm5186_vm4, 1.5707964, %v2601_v40 }
 0x515   :  { %v2278_v28 = vmul.f32 %v3129_v11, %v2264_v42  ;;  %v2696_v24 = vadd.f32 0.19977711, %v2694_v17  ;;  %v2697_v3 = vadd.f32 0.19977711, %v2695_v62  ;;  %v2262_v42 = vsel %vm2236_vm14, 1.5707964, %v2260_v21 }
 0x516   :  { %v2279_v19 = vmul.f32 %v2277_v16, %v4404_v43  ;;  %v2622_v50 = vadd.f32 %v2620_v4, %v2602_v61  ;;  %v2623_v58 = vadd.f32 %v2621_v13, %v2603_v14  ;;  %vm2285_vm11 = vcmp.lt.f32.partialorder %v4256_v60, 0.0 }
 0x517   :  { %v2280_v37 = vmul.f32 %v2278_v28, %v4412_v47  ;;  %v2698_v39 = vmul.f32 %v2696_v24, %v2688_v27  ;;  %v2699_v26 = vmul.f32 %v2697_v3, %v2689_v32  ;;  %vm2286_vm12 = vcmp.lt.f32.partialorder %v4253_v56, 0.0 }
 0x518   :  { %v2281_v9 = vadd.f32 %v2279_v19, %v2261_v7  ;;  %v2685_v34 = vsel %vm4447_vm13, 0.7853982, %v3678_v63  ;;  %v2624_v57 = vadd.f32 %v2622_v50, %v4334_v48  ;;  %v2625_v60 = vadd.f32 %v2623_v58, %v4346_v59 }
 0x519   :  { %v2282_v8 = vadd.f32 %v2280_v37, %v2262_v42  ;;  %v3144_v22 = vadd.f32 -0.3333295, %v2698_v39  ;;  %v3145_v52 = vadd.f32 -0.3333295, %v2699_v26  ;;  %v2687_v48 = vsel %vm2661_vm9, 1.5707964, %v2685_v34 }
 0x51a   :  { %v2283_v20 = vadd.f32 %v2281_v9, %v4404_v43  ;;  %v2686_v43 = vsel %vm2660_vm7, 1.5707964, %v2684_v31  ;;  %v2628_v15 = vsub.f32 0.0, %v2624_v57  ;;  %v2629_v17 = vsub.f32 0.0, %v2625_v60 }
 0x51b   :  { %v2284_v51 = vadd.f32 %v2282_v8, %v4412_v47  ;;  %v2702_v53 = vmul.f32 %v3144_v22, %v2688_v27  ;;  %v2703_v54 = vmul.f32 %v3145_v52, %v2689_v32  ;;  %vm2626_vm14 = vcmp.lt.f32.partialorder %v4134_v33, 0.0 }
 0x51c   :  { %v2287_v35 = vsub.f32 0.0, %v2283_v20  ;;  %vm2710_vm1 = vcmp.lt.f32.partialorder %v4285_v45, 0.0  ;;  %vm2711_vm7 = vcmp.lt.f32.partialorder %v4288_v46, 0.0  ;;  %v4535_v28 = vsel %vm2626_vm14, %v2628_v15, %v2624_v57 }
 0x51d   :  { %v2288_v12 = vsub.f32 0.0, %v2284_v51  ;;  %v2704_v47 = vmul.f32 %v2702_v53, %v4459_v5  ;;  %v2705_v30 = vmul.f32 %v2703_v54, %v4464_v41  ;;  %v4543_v33 = vsel %vm2627_vm6, %v2629_v17, %v2625_v60 }
 0x51e   :  { %v4509_v55 = vsel %vm2285_vm11, %v2287_v35, %v2283_v20  ;;  %v2817_v19 = vsel %vm5143_vm0, %v4535_v28, -inf  ;;  %v2818_v24 = vsel %vm5143_vm0, %v4543_v33, -inf  ;;  %v2804_v4 = vsel %vm5143_vm0, %v4535_v28, inf }
 0x51f   :  { %v4514_v56 = vsel %vm2286_vm12, %v2288_v12, %v2284_v51  ;;  %v2304_v27 = vsel %vm5143_vm0, %v4509_v55, -inf  ;;  %v2291_v63 = vsel %vm5143_vm0, %v4509_v55, inf  ;;  %v2706_v59 = vadd.f32 %v2704_v47, %v2686_v43 }
 0x520   :  { %v2305_v29 = vsel %vm5143_vm0, %v4514_v56, -inf  ;;  %v2292_v32 = vsel %vm5143_vm0, %v4514_v56, inf  ;;  %v2707_v11 = vadd.f32 %v2705_v30, %v2687_v48  ;;  %v2805_v13 = vsel %vm5143_vm0, %v4543_v33, inf }
 0x521   :  { %v2306_v2 = vmax.f32 %v2304_v27, %v2305_v29  ;;  %v2293_v1 = vmin.f32 %v2291_v63, %v2292_v32  ;;  %v2708_v6 = vadd.f32 %v2706_v59, %v4459_v5  ;;  %v2819_v7 = vmax.f32 %v2817_v19, %v2818_v24 }
 0x522   :  { %v2709_v16 = vadd.f32 %v2707_v11, %v4464_v41  ;;  %v2806_v37 = vmin.f32 %v2804_v4, %v2805_v13 }
 0x523   :  { %2307 = vmax.xlane.f32.xlu1 %v2306_v2  ;;  %2294 = vmin.xlane.f32.xlu0 %v2293_v1  ;;  %v2712_v18 = vsub.f32 0.0, %v2708_v6 }
 0x524   :  { %v2713_v21 = vsub.f32 0.0, %v2709_v16 }
 0x525   :  { %v4533_v49 = vsel %vm2710_vm1, %v2712_v18, %v2708_v6 }
 0x526   :  { %v4537_v5 = vsel %vm2711_vm7, %v2713_v21, %v2709_v16  ;;  %v2729_v41 = vsel %vm5143_vm0, %v4533_v49, -inf  ;;  %v2716_v62 = vsel %vm5143_vm0, %v4533_v49, inf }
 0x527   :  { %v2730_v45 = vsel %vm5143_vm0, %v4537_v5, -inf  ;;  %v2717_v23 = vsel %vm5143_vm0, %v4537_v5, inf }
 0x528   :  { %v2731_v46 = vmax.f32 %v2729_v41, %v2730_v45  ;;  %v2718_v40 = vmin.f32 %v2716_v62, %v2717_v23 }
 0x52a   :  { %2732 = vmax.xlane.f32.xlu1 %v2731_v46  ;;  %2719 = vmin.xlane.f32.xlu0 %v2718_v40 }
 0x52e   :  { %2820 = vmax.xlane.f32.xlu1 %v2819_v7  ;;  %2807 = vmin.xlane.f32.xlu0 %v2806_v37 }
 0x576   :  { %v2339_v3 = vpop.xlane.xlu1 %2338 }
 0x577   :  { %v2340_v8 = vrot.slane %v2339_v3, 4 }
 0x579   :  { %v2341_v20 = vmin.f32 %v2339_v3, %v2340_v8 }
 0x57a   :  { %v2352_v42 = vpop.xlane.xlu1 %2351  ;;  %v2764_v9 = vpop.xlane.xlu0 %2763 }
 0x57b   :  { %v2353_v26 = vrot.slane %v2352_v42, 4  ;;  %v2342_v51 = vrot.slane %v2341_v20, 2  ;;  %v2765_v52 = vrot.slane %v2764_v9, 4 }
 0x57d   :  { %v2354_v50 = vmax.f32 %v2352_v42, %v2353_v26  ;;  %v2766_v63 = vmin.f32 %v2764_v9, %v2765_v52  ;;  %v2343_v29 = vmin.f32 %v2341_v20, %v2342_v51 }
 0x57e   :  { %v2777_v39 = vpop.xlane.xlu1 %2776 }
 0x57f   :  { %v2355_v54 = vrot.slane %v2354_v50, 2  ;;  %v2778_v47 = vrot.slane %v2777_v39, 4  ;;  %v2767_v15 = vrot.slane %v2766_v63, 2  ;;  %v2344_v18 = vrot.slane %v2343_v29, 1 }
 0x581   :  { %v2779_v59 = vmax.f32 %v2777_v39, %v2778_v47  ;;  %v2356_v2 = vmax.f32 %v2354_v50, %v2355_v54  ;;  %v2345_v42 = vmin.f32 %v2343_v29, %v2344_v18  ;;  %v2768_v39 = vmin.f32 %v2766_v63, %v2767_v15 }
 0x583   :  { %v2780_v46 = vrot.slane %v2779_v59, 2  ;;  %v2357_v40 = vrot.slane %v2356_v2, 1 }
 0x597   :  { %v2383_v61 = vpop.xlane.xlu0 %2382  ;;  %v2396_v31 = vpop.xlane.xlu1 %2395 }
 0x598   :  { %v2384_v14 = vrot.slane %v2383_v61, 4  ;;  %v2397_v22 = vrot.slane %v2396_v31, 4 }
 0x59a   :  { %v2385_v58 = vmin.f32 %v2383_v61, %v2384_v14  ;;  %v2398_v35 = vmax.f32 %v2396_v31, %v2397_v22  ;;  %v2358_v14 = vmax.f32 %v2356_v2, %v2357_v40  ;;  %v2781_v22 = vmax.f32 %v2779_v59, %v2780_v46 }
 0x59c   :  { %v2386_v57 = vrot.slane %v2385_v58, 2  ;;  %v2399_v30 = vrot.slane %v2398_v35, 2  ;;  %v2782_v47 = vrot.slane %v2781_v22, 1 }
 0x59e   :  { %v2387_v1 = vmin.f32 %v2385_v58, %v2386_v57  ;;  %v2400_v21 = vmax.f32 %v2398_v35, %v2399_v30 }
 0x5a0   :  { %v2388_v19 = vrot.slane %v2387_v1, 1  ;;  %v2401_v9 = vrot.slane %v2400_v21, 1 }
 0x5a2   :  { %v2389_v20 = vmin.f32 %v2387_v1, %v2388_v19  ;;  %v2402_v35 = vmax.f32 %v2400_v21, %v2401_v9 }
 0x5b0   :  { %v2295_v53 = vpop.xlane.xlu0 %2294  ;;  %v2308_v12 = vpop.xlane.xlu1 %2307 }
 0x5b1   :  { %v2296_v34 = vrot.slane %v2295_v53, 4  ;;  %v2309_v43 = vrot.slane %v2308_v12, 4 }
 0x5b3   :  { %v2297_v60 = vmin.f32 %v2295_v53, %v2296_v34  ;;  %v2310_v27 = vmax.f32 %v2308_v12, %v2309_v43  ;;  %v2769_v53 = vrot.slane %v2768_v39, 1 }
 0x5b5   :  { %v2298_v32 = vrot.slane %v2297_v60, 2  ;;  %v2311_v48 = vrot.slane %v2310_v27, 2  ;;  %v2770_v30 = vmin.f32 %v2768_v39, %v2769_v53 }
 0x5b7   :  { %v2299_v11 = vmin.f32 %v2297_v60, %v2298_v32  ;;  %v2312_v6 = vmax.f32 %v2310_v27, %v2311_v48  ;;  %v2720_v16 = vpop.xlane.xlu0 %2719  ;;  %v2733_v17 = vpop.xlane.xlu1 %2732  ;;  %v2783_v48 = vmax.f32 %v2781_v22, %v2782_v47 }
 0x5b8   :  { %v2721_v41 = vrot.slane %v2720_v16, 4  ;;  %v2734_v62 = vrot.slane %v2733_v17, 4 }
 0x5b9   :  { %v2300_v45 = vrot.slane %v2299_v11, 1  ;;  %v2313_v23 = vrot.slane %v2312_v6, 1 }
 0x5ba   :  { %v2722_v24 = vmin.f32 %v2720_v16, %v2721_v41  ;;  %v2735_v4 = vmax.f32 %v2733_v17, %v2734_v62 }
 0x5bb   :  { %v2301_v13 = vmin.f32 %v2299_v11, %v2300_v45  ;;  %v2314_v7 = vmax.f32 %v2312_v6, %v2313_v23  ;;  %v2808_v37 = vpop.xlane.xlu0 %2807  ;;  %v2821_v3 = vpop.xlane.xlu1 %2820 }
 0x5bc   :  { %v2723_v61 = vrot.slane %v2722_v24, 2  ;;  %v2736_v8 = vrot.slane %v2735_v4, 2  ;;  %v2809_v31 = vrot.slane %v2808_v37, 4  ;;  %v2822_v26 = vrot.slane %v2821_v3, 4 }
 0x5bd   :  { %3540 = vpush %v2301_v13 }
 0x5be   :  { %3542 = vpush %v2314_v7  ;;  %v2810_v50 = vmin.f32 %v2808_v37, %v2809_v31  ;;  %v2823_v58 = vmax.f32 %v2821_v3, %v2822_v26  ;;  %v2724_v51 = vmin.f32 %v2722_v24, %v2723_v61  ;;  %v2737_v52 = vmax.f32 %v2735_v4, %v2736_v8 }
 0x5bf   :  { %3544 = vpush %v2345_v42 }
 0x5c0   :  { %3546 = vpush %v2358_v14  ;;  %v2811_v12 = vrot.slane %v2810_v50, 2  ;;  %v2824_v34 = vrot.slane %v2823_v58, 2  ;;  %v2725_v43 = vrot.slane %v2724_v51, 1  ;;  %v2738_v54 = vrot.slane %v2737_v52, 1 }
 0x5c1   :  { %3548 = vpush %v2389_v20 }
 0x5c2   :  { %3550 = vpush %v2402_v35  ;;  %v2812_v57 = vmin.f32 %v2810_v50, %v2811_v12  ;;  %v2825_v60 = vmax.f32 %v2823_v58, %v2824_v34  ;;  %v2726_v27 = vmin.f32 %v2724_v51, %v2725_v43  ;;  %v2739_v63 = vmax.f32 %v2737_v52, %v2738_v54 }
 0x5c4   :  { %3560 = vpush %v2726_v27  ;;  %v2813_v29 = vrot.slane %v2812_v57, 1  ;;  %v2826_v32 = vrot.slane %v2825_v60, 1 }
 0x5c5   :  { %3562 = vpush %v2739_v63 }
 0x5c6   :  { %3564 = vpush %v2770_v30  ;;  %v2814_v59 = vmin.f32 %v2812_v57, %v2813_v29  ;;  %v2827_v2 = vmax.f32 %v2825_v60, %v2826_v32 }
 0x5c7   :  { %3566 = vpush %v2783_v48 }
 0x5c8   :  { %3568 = vpush %v2814_v59 }
 0x5c9   :  { %3570 = vpush %v2827_v2 }
 0x5ee   :  { %s3541_s5 = spop %3540 }
 0x5ef   :  { %v2303_v1 = vstv %s3541_s5  ;;  %s3543_s7 = spop %3542 }
 0x5f0   :  { %v2316_v11 = vstv %s3543_s7  ;;  %s3545_s22 = spop %3544  ;;  %v2317_v19 = vsub.f32 %v4509_v55, %v2303_v1  ;;  %v2318_v24 = vsub.f32 %v4514_v56, %v2303_v1 }
 0x5f1   :  { %v2319_v6 = vsub.f32 %v2316_v11, %v2303_v1  ;;  %v2347_v15 = vstv %s3545_s22  ;;  %s3547_s23 = spop %3546 }
 0x5f2   :  { %v2360_v16 = vstv %s3547_s23  ;;  %s3549_s2 = spop %3548  ;;  %v2361_v4 = vsub.f32 %v4169_v10, %v2347_v15  ;;  %v2362_v13 = vsub.f32 %v4166_v0, %v2347_v15 }
 0x5f3   :  { %3641 = vrcp.f32 %v2319_v6  ;;  %v2363_v17 = vsub.f32 %v2360_v16, %v2347_v15  ;;  %v2391_v18 = vstv %s3549_s2  ;;  %s3551_s24 = spop %3550 }
 0x5f4   :  { %v2404_v21 = vstv %s3551_s24  ;;  %v2405_v37 = vsub.f32 %v4382_v38, %v2391_v18  ;;  %v2406_v3 = vsub.f32 %v4408_v44, %v2391_v18 }
 0x5f5   :  { %3643 = vrcp.f32 %v2363_v17  ;;  %v2407_v41 = vsub.f32 %v2404_v21, %v2391_v18  ;;  %s3561_s0 = spop %3560 }
 0x5f6   :  { %v4557_v62 = vstv %s3561_s0  ;;  %s3563_s25 = spop %3562 }
 0x5f7   :  { %3645 = vrcp.f32 %v2407_v41  ;;  %v2741_v45 = vstv %s3563_s25  ;;  %s3565_s26 = spop %3564  ;;  %v2742_v56 = vsub.f32 %v4533_v49, %v4557_v62  ;;  %v2743_v0 = vsub.f32 %v4537_v5, %v4557_v62 }
 0x5f8   :  { %v2744_v23 = vsub.f32 %v2741_v45, %v4557_v62  ;;  %s3567_s27 = spop %3566  ;;  %v4560_v46 = vstv %s3565_s26 }
 0x5f9   :  { %v2785_v40 = vstv %s3567_s27  ;;  %s3569_s28 = spop %3568  ;;  %v2786_v10 = vsub.f32 %v4198_v25, %v4560_v46  ;;  %v2787_v38 = vsub.f32 %v4200_v36, %v4560_v46 }
 0x5fa   :  { %s3571_s29 = spop %3570  ;;  %3647 = vrcp.f32 %v2744_v23  ;;  %v2788_v42 = vsub.f32 %v2785_v40, %v4560_v46  ;;  %v4569_v61 = vstv %s3569_s28 }
 0x5fb   :  { %v2829_v8 = vstv %s3571_s29 }
 0x5fc   :  { %3649 = vrcp.f32 %v2788_v42  ;;  %v2832_v22 = vsub.f32 %v2829_v8, %v4569_v61 }
 0x5fd   :  { %v3642_v7 = vpop.eup %3641 }
 0x5fe   :  { %v2321_v9 = vmul.f32 %v3642_v7, %v2317_v19  ;;  %v2322_v39 = vmul.f32 %v3642_v7, %v2318_v24  ;;  %3651 = vrcp.f32 %v2832_v22 }
 0x5ff   :  { %v3644_v55 = vpop.eup %3643 }
 0x600   :  { %vm2323_vm8 = vcmp.ne.f32.partialorder %v2321_v9, %v2321_v9  ;;  %vm2324_vm9 = vcmp.ne.f32.partialorder %v2322_v39, %v2322_v39  ;;  %v2365_v44 = vmul.f32 %v3644_v55, %v2361_v4  ;;  %v2366_v31 = vmul.f32 %v3644_v55, %v2362_v13 }
 0x601   :  { %v3646_v26 = vpop.eup %3645  ;;  %v2325_v14 = vsel %vm2323_vm8, 1e-05, %v2321_v9  ;;  %v2326_v20 = vsel %vm2324_vm9, 1e-05, %v2322_v39 }
 0x602   :  { %vm2327_vm15 = vcmp.eq.f32.partialorder %v2325_v14, inf  ;;  %vm2328_vm2 = vcmp.eq.f32.partialorder %v2326_v20, inf  ;;  %vm2367_vm10 = vcmp.ne.f32.partialorder %v2365_v44, %v2365_v44  ;;  %vm2368_vm5 = vcmp.ne.f32.partialorder %v2366_v31, %v2366_v31 }
 0x603   :  { %v2329_v49 = vsel %vm2327_vm15, 3.4028235e+38, %v2325_v14  ;;  %v2330_v50 = vsel %vm2328_vm2, 3.4028235e+38, %v2326_v20  ;;  %v2369_v58 = vsel %vm2367_vm10, 1e-05, %v2365_v44  ;;  %v2409_v51 = vmul.f32 %v3646_v26, %v2405_v37 }
 0x604   :  { %vm2331_vm13 = vcmp.eq.f32.partialorder %v2329_v49, -inf  ;;  %vm2332_vm3 = vcmp.eq.f32.partialorder %v2330_v50, -inf  ;;  %v2370_v52 = vsel %vm2368_vm5, 1e-05, %v2366_v31  ;;  %vm2371_vm4 = vcmp.eq.f32.partialorder %v2369_v58, inf  ;;  %v3648_v57 = vpop.eup %3647 }
 0x605   :  { %v2333_v35 = vsel %vm2331_vm13, -3.4028235e+38, %v2329_v49  ;;  %v2334_v53 = vsel %vm2332_vm3, -3.4028235e+38, %v2330_v50  ;;  %vm2372_vm11 = vcmp.eq.f32.partialorder %v2370_v52, inf  ;;  %v2410_v12 = vmul.f32 %v3646_v26, %v2406_v3 }
 0x606   :  { %v2487_v34 = vmul.f32 6.0, %v2333_v35  ;;  %v2488_v43 = vmul.f32 6.0, %v2334_v53  ;;  %v2373_v54 = vsel %vm2371_vm4, 3.4028235e+38, %v2369_v58  ;;  %v2374_v47 = vsel %vm2372_vm11, 3.4028235e+38, %v2370_v52  ;;  %v3650_v6 = vpop.eup %3649 }
 0x607   :  { %vm2375_vm12 = vcmp.eq.f32.partialorder %v2373_v54, -inf  ;;  %vm2376_vm14 = vcmp.eq.f32.partialorder %v2374_v47, -inf  ;;  %vm2411_vm1 = vcmp.ne.f32.partialorder %v2409_v51, %v2409_v51  ;;  %vm2412_vm6 = vcmp.ne.f32.partialorder %v2410_v12, %v2410_v12 }
 0x608   :  { %v3556_v60 = vtrunc.f32 %v2487_v34  ;;  %v3558_v27 = vtrunc.f32 %v2488_v43  ;;  %v2491_v63 = vmul.f32 0.5, %v2487_v34  ;;  %v2492_v30 = vmul.f32 0.5, %v2488_v43  ;;  %v4636_v39 = vpop.eup %3651 }
 0x609   :  { %v4580_v29 = vsel %vm2375_vm12, -3.4028235e+38, %v2373_v54  ;;  %v4582_v32 = vsel %vm2376_vm14, -3.4028235e+38, %v2374_v47  ;;  %v2413_v48 = vsel %vm2411_vm1, 1e-05, %v2409_v51  ;;  %v2746_v17 = vmul.f32 %v3648_v57, %v2742_v56 }
 0x60a   :  { %v4584_v59 = vcvt.f32.s32 %v3556_v60  ;;  %v4586_v2 = vcvt.f32.s32 %v3558_v27  ;;  %v2493_v1 = vfloor.f32 %v2491_v63  ;;  %v2494_v11 = vfloor.f32 %v2492_v30 }
 0x60b   :  { %v4589_v15 = vsub.f32 1.0, %v4580_v29  ;;  %v2414_v16 = vsel %vm2412_vm6, 1e-05, %v2410_v12  ;;  %vm2415_vm7 = vcmp.eq.f32.partialorder %v2413_v48, inf  ;;  %v2747_v7 = vmul.f32 %v3648_v57, %v2743_v0 }
 0x60c   :  { %v2495_v18 = vmul.f32 2.0, %v2493_v1  ;;  %v2496_v21 = vmul.f32 2.0, %v2494_v11  ;;  %vm5147_vm8 = vcmp.eq.s32.totalorder %v4584_v59, 0  ;;  %vm2508_vm9 = vcmp.eq.s32.totalorder %v4586_v2, 0 }
 0x60d   :  { %vm2509_vm15 = vcmp.eq.s32.totalorder %v4584_v59, 1  ;;  %vm2510_vm2 = vcmp.eq.s32.totalorder %v4586_v2, 1  ;;  %vm5144_vm10 = vcmp.eq.s32.totalorder %v4584_v59, 2  ;;  %vm5145_vm5 = vcmp.eq.s32.totalorder %v4586_v2, 2 }
 0x60e   :  { %v2497_v41 = vsub.f32 %v2487_v34, %v2495_v18  ;;  %v2498_v45 = vsub.f32 %v2488_v43, %v2496_v21  ;;  %vm2513_vm13 = vcmp.eq.s32.totalorder %v4584_v59, 3  ;;  %vm2515_vm4 = vcmp.eq.s32.totalorder %v4584_v59, 4  ;;  %vm4607_vm1 = vmor %vm2509_vm15, %vm5144_vm10 }
 0x60f   :  { %vm5148_vm11 = vcmp.eq.s32.totalorder %v4586_v2, 4  ;;  %vm5146_vm12 = vcmp.eq.s32.totalorder %v4584_v59, 5  ;;  %vm2518_vm14 = vcmp.eq.s32.totalorder %v4586_v2, 5  ;;  %vm2416_vm6 = vcmp.eq.f32.partialorder %v2414_v16, inf  ;;  %vm4616_vm0 = vmor %vm2510_vm2, %vm5145_vm5 }
 0x610   :  { %v3132_v23 = vadd.f32 -1.0, %v2497_v41  ;;  %v3133_v40 = vadd.f32 -1.0, %v2498_v45  ;;  %v2417_v24 = vsel %vm2415_vm7, 3.4028235e+38, %v2413_v48  ;;  %v2418_v13 = vsel %vm2416_vm6, 3.4028235e+38, %v2414_v16  ;;  %vm4627_vm7 = vmor %vm5147_vm8, %vm5146_vm12 }
 0x611   :  { %vm2419_vm3 = vcmp.eq.f32.partialorder %v2417_v24, -inf  ;;  %vm2748_vm10 = vcmp.ne.f32.partialorder %v2746_v17, %v2746_v17  ;;  %vm2420_vm5 = vcmp.eq.f32.partialorder %v2418_v13, -inf  ;;  %v4634_v9 = vmul.f32 %v3650_v6, %v2786_v10  ;;  %vm4642_vm6 = vmor %vm2508_vm9, %vm2518_vm14 }
 0x612   :  { %v2501_v37 = vand.u32 2147483647, %v3132_v23  ;;  %v2502_v3 = vand.u32 2147483647, %v3133_v40  ;;  %v2421_v62 = vsel %vm2419_vm3, -3.4028235e+38, %v2417_v24  ;;  %vm2749_vm12 = vcmp.ne.f32.partialorder %v2747_v7, %v2747_v7  ;;  %vm4650_vm8 = vmor %vm2509_vm15, %vm2515_vm4 }
 0x613   :  { %v2422_v8 = vsel %vm2420_vm5, -3.4028235e+38, %v2418_v13  ;;  %v2750_v55 = vsel %vm2748_vm10, 1e-05, %v2746_v17  ;;  %v4654_v10 = vmul.f32 6.0, %v2421_v62  ;;  %v4659_v31 = vsub.f32 1.0, %v4582_v32  ;;  %vm4665_vm10 = vmor %vm2510_vm2, %vm5148_vm11 }
 0x614   :  { %v2503_v56 = vsub.f32 1.0, %v2501_v37  ;;  %v2504_v0 = vsub.f32 1.0, %v2502_v3  ;;  %v4656_v44 = vmul.f32 6.0, %v2422_v8  ;;  %v2751_v14 = vsel %vm2749_vm12, 1e-05, %v2747_v7 }
 0x615   :  { %vm2752_vm15 = vcmp.eq.f32.partialorder %v2750_v55, inf  ;;  %v4672_v20 = vmul.f32 %v3650_v6, %v2787_v38  ;;  %vm5199_vm5 = vcmp.eq.s32.totalorder %v4584_v59, 0  ;;  %v3552_v58 = vtrunc.f32 %v4654_v10 }
 0x616   :  { %v2505_v22 = vmul.f32 %v2503_v56, %v4580_v29  ;;  %v2506_v49 = vmul.f32 %v2504_v0, %v4582_v32  ;;  %vm4680_vm3 = vmor %vm5199_vm5, %vm2513_vm13  ;;  %v3554_v51 = vtrunc.f32 %v4656_v44  ;;  %vm5202_vm2 = vcmp.eq.s32.totalorder %v4586_v2, 3 }
 0x617   :  { %vm2532_vm12 = vmor %vm2508_vm9, %vm5202_vm2  ;;  %v2429_v36 = vmul.f32 0.5, %v4654_v10  ;;  %v2430_v46 = vmul.f32 0.5, %v4656_v44  ;;  %vm2753_vm11 = vcmp.eq.f32.partialorder %v2751_v14, inf  ;;  %v2754_v38 = vsel %vm2752_vm15, 3.4028235e+38, %v2750_v55 }
 0x618   :  { %v2523_v52 = vsel %vm4650_vm8, %v2505_v22, 0.0  ;;  %v2524_v35 = vsel %vm4665_vm10, %v2506_v49, 0.0  ;;  %v2533_v53 = vsel %vm4680_vm3, %v2505_v22, 0.0  ;;  %v2534_v12 = vsel %vm2532_vm12, %v2506_v49, 0.0  ;;  %vm4702_vm9 = vmor %vm2513_vm13, %vm2515_vm4 }
 0x619   :  { %vm2792_vm15 = vcmp.ne.f32.partialorder %v4634_v9, %v4634_v9  ;;  %v2525_v43 = vsel %vm4627_vm7, %v4580_v29, %v2523_v52  ;;  %v2526_v54 = vsel %vm4642_vm6, %v4582_v32, %v2524_v35  ;;  %v2535_v47 = vsel %vm4607_vm1, %v4580_v29, %v2533_v53  ;;  %vm5209_vm6 = vmmov %vm5202_vm2 }
 0x61a   :  { %v2536_v57 = vsel %vm4616_vm0, %v4582_v32, %v2534_v12  ;;  %vm5205_vm8 = vcmp.eq.s32.totalorder %v4584_v59, 5  ;;  %vm5206_vm13 = vcmp.eq.s32.totalorder %v4584_v59, 2  ;;  %v2527_v60 = vadd.f32 %v2525_v43, %v4589_v15 }
 0x61b   :  { %vm2541_vm4 = vmor %vm5206_vm13, %vm5205_vm8  ;;  %v2528_v27 = vadd.f32 %v2526_v54, %v4659_v31  ;;  %v2537_v63 = vadd.f32 %v2535_v47, %v4589_v15  ;;  %v2538_v30 = vadd.f32 %v2536_v57, %v4659_v31  ;;  %vm5207_vm1 = vcmp.eq.s32.totalorder %v4586_v2, 2 }
 0x61c   :  { %vm2542_vm7 = vmor %vm5207_vm1, %vm2518_vm14  ;;  %vm5208_vm0 = vcmp.eq.s32.totalorder %v4586_v2, 4  ;;  %v2543_v48 = vsel %vm2541_vm4, %v2505_v22, 0.0  ;;  %v4736_v1 = vcvt.f32.s32 %v3552_v58  ;;  %v4738_v11 = vcvt.f32.s32 %v3554_v51 }
 0x61d   :  { %vm2540_vm10 = vmor %vm5209_vm6, %vm5208_vm0  ;;  %v2544_v59 = vsel %vm2542_vm7, %v2506_v49, 0.0  ;;  %v2545_v6 = vsel %vm4702_vm9, %v4580_v29, %v2543_v48  ;;  %vm5210_vm5 = vcmask 130048   ;;  %v2431_v2 = vfloor.f32 %v2429_v36 }
 0x61e   :  { %v2546_v16 = vsel %vm2540_vm10, %v4582_v32, %v2544_v59  ;;  %2558 = vst.msk [vmem:[#allocation2 + $0x30] sm:$0xff] %vm5210_vm5, %v2527_v60  ;;  %vm5211_vm14 = vmmov %vm5210_vm5  ;;  %v2432_v17 = vfloor.f32 %v2430_v46  ;;  %v2547_v18 = vadd.f32 %v2545_v6, %v4589_v15  ;;  %vm2445_vm12 = vcmp.eq.s32.totalorder %v4736_v1, 0 }
 0x61f   :  { %2559 = vst.msk [vmem:[#allocation2 + $0x38] sm:$0xff] %vm5211_vm14, %v2528_v27  ;;  %vm5212_vm3 = vmmov %vm5210_vm5  ;;  %v2548_v21 = vadd.f32 %v2546_v16, %v4659_v31  ;;  %vm2446_vm9 = vcmp.eq.s32.totalorder %v4738_v11, 0  ;;  %v2433_v41 = vmul.f32 2.0, %v2431_v2  ;;  %vm2447_vm8 = vcmp.eq.s32.totalorder %v4736_v1, 1 }
 0x620   :  { %2561 = vst.msk [vmem:[#allocation2 + $0x40] sm:$0xff] %vm5212_vm3, %v2537_v63  ;;  %vm5213_vm2 = vmmov %vm5212_vm3  ;;  %v2434_v45 = vmul.f32 2.0, %v2432_v17  ;;  %vm2448_vm13 = vcmp.eq.s32.totalorder %v4738_v11, 1  ;;  %vm5152_vm7 = vcmp.eq.s32.totalorder %v4736_v1, 2  ;;  %vm5150_vm0 = vcmp.eq.s32.totalorder %v4738_v11, 2 }
 0x621   :  { %2562 = vst.msk [vmem:[#allocation2 + $0x48] sm:$0xff] %vm5213_vm2, %v2538_v30  ;;  %vm5214_vm4 = vmmov %vm5213_vm2  ;;  %v2435_v23 = vsub.f32 %v4654_v10, %v2433_v41  ;;  %vm2453_vm5 = vcmp.eq.s32.totalorder %v4736_v1, 4  ;;  %vm5149_vm14 = vcmp.eq.s32.totalorder %v4738_v11, 4  ;;  %vm2455_vm3 = vcmp.eq.s32.totalorder %v4736_v1, 5 }
 0x622   :  { %2564 = vst.msk [vmem:[#allocation2 + $0x50] sm:$0xff] %vm5214_vm4, %v2547_v18  ;;  %vm5215_vm1 = vmmov %vm5213_vm2  ;;  %v2436_v40 = vsub.f32 %v4656_v44, %v2434_v45  ;;  %vm5151_vm2 = vcmp.eq.s32.totalorder %v4738_v11, 5  ;;  %v2755_v19 = vsel %vm2753_vm11, 3.4028235e+38, %v2751_v14  ;;  %vm2756_vm4 = vcmp.eq.f32.partialorder %v2754_v38, -inf }
 0x623   :  { %2565 = vst.msk [vmem:[#allocation2 + $0x58] sm:$0xff] %vm5215_vm1, %v2548_v21  ;;  %v3130_v24 = vadd.f32 -1.0, %v2435_v23  ;;  %vm4771_vm1 = vmor %vm2447_vm8, %vm5152_vm7  ;;  %vm2757_vm10 = vcmp.eq.f32.partialorder %v2755_v19, -inf  ;;  %v2758_v7 = vsel %vm2756_vm4, -3.4028235e+38, %v2754_v38  ;;  %vm2793_vm11 = vcmp.ne.f32.partialorder %v4672_v20, %v4672_v20 }
 0x624   :  { %v3131_v4 = vadd.f32 -1.0, %v2436_v40  ;;  %vm4779_vm6 = vmor %vm2447_vm8, %vm2453_vm5  ;;  %v2759_v3 = vsel %vm2757_vm10, -3.4028235e+38, %v2755_v19  ;;  %v4783_v42 = vmul.f32 6.0, %v2758_v7  ;;  %v2794_v5 = vsel %vm2792_vm15, 1e-05, %v4634_v9 }
 0x625   :  { %v2439_v62 = vand.u32 2147483647, %v3130_v24  ;;  %vm4795_vm8 = vmor %vm2445_vm12, %vm2455_vm3  ;;  %v4799_v56 = vmul.f32 6.0, %v2759_v3  ;;  %vm2796_vm10 = vcmp.eq.f32.partialorder %v2794_v5, inf  ;;  %v4812_v10 = vsel %vm2793_vm11, 1e-05, %v4672_v20 }
 0x626   :  { %v2440_v8 = vand.u32 2147483647, %v3131_v4  ;;  %vm4805_vm4 = vmor %vm2446_vm9, %vm5151_vm2  ;;  %v3576_v9 = vtrunc.f32 %v4783_v42  ;;  %v2916_v25 = vmul.f32 0.5, %v4783_v42  ;;  %v4814_v44 = vsel %vm2796_vm10, 3.4028235e+38, %v2794_v5 }
 0x627   :  { %v2441_v26 = vsub.f32 1.0, %v2439_v62  ;;  %vm4820_vm15 = vmor %vm2448_vm13, %vm5149_vm14  ;;  %v3578_v49 = vtrunc.f32 %v4799_v56  ;;  %v2917_v50 = vmul.f32 0.5, %v4799_v56  ;;  %v2830_v51 = vsub.f32 %v4535_v28, %v4569_v61 }
 0x628   :  { %v2442_v14 = vsub.f32 1.0, %v2440_v8  ;;  %vm4830_vm11 = vmor %vm2448_vm13, %vm5150_vm0  ;;  %v2918_v58 = vfloor.f32 %v2916_v25  ;;  %v2831_v36 = vsub.f32 %v4543_v33, %v4569_v61  ;;  %vm5228_vm10 = vcmp.eq.s32.totalorder %v4736_v1, 3 }
 0x629   :  { %v2443_v46 = vmul.f32 %v2441_v26, %v4580_v29  ;;  %vm4844_vm14 = vmor %vm2445_vm12, %vm5228_vm10  ;;  %v4848_v35 = vcvt.f32.s32 %v3576_v9  ;;  %vm2797_vm13 = vcmp.eq.f32.partialorder %v4812_v10, inf  ;;  %vm5231_vm0 = vcmp.eq.s32.totalorder %v4738_v11, 3 }
 0x62a   :  { %v2444_v38 = vmul.f32 %v2442_v14, %v4582_v32  ;;  %vm2470_vm2 = vmor %vm2446_vm9, %vm5231_vm0  ;;  %v4855_v28 = vcvt.f32.s32 %v3578_v49  ;;  %v2919_v53 = vfloor.f32 %v2917_v50  ;;  %v2920_v12 = vmul.f32 2.0, %v2918_v58 }
 0x62b   :  { %vm2800_vm7 = vcmp.eq.f32.partialorder %v4814_v44, -inf  ;;  %v2461_v34 = vsel %vm4779_vm6, %v2443_v46, 0.0  ;;  %v2471_v54 = vsel %vm4844_vm14, %v2443_v46, 0.0  ;;  %vm5232_vm12 = vmmov %vm5228_vm10  ;;  %vm5235_vm0 = vcmp.eq.s32.totalorder %v4736_v1, 2 }
 0x62c   :  { %v2462_v43 = vsel %vm4820_vm15, %v2444_v38, 0.0  ;;  %v2472_v47 = vsel %vm2470_vm2, %v2444_v38, 0.0  ;;  %vm4868_vm9 = vmor %vm5232_vm12, %vm2453_vm5  ;;  %v2463_v60 = vsel %vm4795_vm8, %v4580_v29, %v2461_v34  ;;  %v2473_v63 = vsel %vm4771_vm1, %v4580_v29, %v2471_v54 }
 0x62d   :  { %v2464_v27 = vsel %vm4805_vm4, %v4582_v32, %v2462_v43  ;;  %v2474_v30 = vsel %vm4830_vm11, %v4582_v32, %v2472_v47  ;;  %vm2479_vm6 = vmor %vm5235_vm0, %vm2455_vm3  ;;  %v2465_v48 = vadd.f32 %v2463_v60, %v4589_v15  ;;  %v2475_v6 = vadd.f32 %v2473_v63, %v4589_v15 }
 0x62e   :  { %v2466_v59 = vadd.f32 %v2464_v27, %v4659_v31  ;;  %v2476_v16 = vadd.f32 %v2474_v30, %v4659_v31  ;;  %vm5236_vm5 = vcmp.eq.s32.totalorder %v4738_v11, 5  ;;  %vm5237_vm14 = vcmp.eq.s32.totalorder %v4738_v11, 2 }
 0x62f   :  { %vm2480_vm2 = vmor %vm5237_vm14, %vm5236_vm5  ;;  %vm5238_vm1 = vcmp.eq.s32.totalorder %v4738_v11, 4  ;;  %vm5239_vm8 = vcmp.eq.s32.totalorder %v4738_v11, 3  ;;  %v2481_v1 = vsel %vm2479_vm6, %v2443_v46, 0.0  ;;  %v2921_v17 = vmul.f32 2.0, %v2919_v53 }
 0x630   :  { %vm2478_vm4 = vmor %vm5239_vm8, %vm5238_vm1  ;;  %v2482_v2 = vsel %vm2480_vm2, %v2444_v38, 0.0  ;;  %v2922_v18 = vsub.f32 %v4783_v42, %v2920_v12  ;;  %v2483_v21 = vsel %vm4868_vm9, %v4580_v29, %v2481_v1  ;;  %vm5240_vm3 = vcmask 130048  }
 0x631   :  { %v2484_v41 = vsel %vm2478_vm4, %v4582_v32, %v2482_v2  ;;  %2549 = vst.msk [vmem:[#allocation2] sm:$0xff] %vm5240_vm3, %v2465_v48  ;;  %vm5241_vm15 = vmmov %vm5240_vm3  ;;  %vm2934_vm12 = vcmp.eq.s32.totalorder %v4848_v35, 1  ;;  %vm5153_vm0 = vcmp.eq.s32.totalorder %v4848_v35, 2  ;;  %v2485_v11 = vadd.f32 %v2483_v21, %v4589_v15 }
 0x632   :  { %2550 = vst.msk [vmem:[#allocation2 + $0x8] sm:$0xff] %vm5241_vm15, %v2466_v59  ;;  %vm5242_vm11 = vmmov %vm5240_vm3  ;;  %v2486_v45 = vadd.f32 %v2484_v41, %v4659_v31  ;;  %v2923_v29 = vsub.f32 %v4799_v56, %v2921_v17  ;;  %v3148_v23 = vadd.f32 -1.0, %v2922_v18  ;;  %vm2932_vm9 = vcmp.eq.s32.totalorder %v4848_v35, 0 }
 0x633   :  { %2552 = vst.msk [vmem:[#allocation2 + $0x10] sm:$0xff] %vm5242_vm11, %v2475_v6  ;;  %vm5243_vm10 = vmmov %vm5240_vm3  ;;  %vm2933_vm6 = vcmp.eq.s32.totalorder %v4855_v28, 0  ;;  %vm2935_vm5 = vcmp.eq.s32.totalorder %v4855_v28, 1  ;;  %vm5156_vm14 = vcmp.eq.s32.totalorder %v4848_v35, 4  ;;  %vm2938_vm8 = vcmp.eq.s32.totalorder %v4848_v35, 3 }
 0x634   :  { %2553 = vst.msk [vmem:[#allocation2 + $0x18] sm:$0xff] %vm5243_vm10, %v2476_v16  ;;  %vm5244_vm2 = vmmov %vm5240_vm3  ;;  %v3149_v32 = vadd.f32 -1.0, %v2923_v29  ;;  %v2926_v40 = vand.u32 2147483647, %v3148_v23  ;;  %vm5155_vm4 = vcmp.eq.s32.totalorder %v4848_v35, 5  ;;  %vm2941_vm15 = vcmp.eq.s32.totalorder %v4855_v28, 4 }
 0x635   :  { %2555 = vst.msk [vmem:[#allocation2 + $0x20] sm:$0xff] %vm5244_vm2, %v2485_v11  ;;  %vm5245_vm1 = vmmov %vm5244_vm2  ;;  %vm5154_vm11 = vcmp.eq.s32.totalorder %v4855_v28, 5  ;;  %v2799_v31 = vsel %vm2797_vm13, 3.4028235e+38, %v4812_v10  ;;  %v2834_v24 = vmul.f32 %v4636_v39, %v2830_v51  ;;  %v4947_v7 = vsel %vm2800_vm7, -3.4028235e+38, %v4814_v44 }
 0x636   :  { %2556 = vst.msk [vmem:[#allocation2 + $0x28] sm:$0xff] %vm5245_vm1, %v2486_v45  ;;  %vm4926_vm3 = vmor %vm2934_vm12, %vm5153_vm0  ;;  %v2927_v4 = vand.u32 2147483647, %v3149_v32  ;;  %v2928_v13 = vsub.f32 1.0, %v2926_v40  ;;  %vm2801_vm2 = vcmp.eq.f32.partialorder %v2799_v31, -inf  ;;  %v2835_v5 = vmul.f32 %v4636_v39, %v2831_v36 }
 0x637   :  { %vm4939_vm10 = vmor %vm2934_vm12, %vm5156_vm14  ;;  %vm2937_vm12 = vcmp.eq.s32.totalorder %v4855_v28, 2  ;;  %v4958_v3 = vsel %vm2801_vm2, -3.4028235e+38, %v2799_v31  ;;  %vm2836_vm7 = vcmp.ne.f32.partialorder %v2834_v24, %v2834_v24  ;;  %vm2939_vm0 = vcmp.eq.s32.totalorder %v4855_v28, 3 }
 0x638   :  { %vm4953_vm13 = vmor %vm2932_vm9, %vm5155_vm4  ;;  %v2929_v62 = vsub.f32 1.0, %v2927_v4  ;;  %v2930_v8 = vmul.f32 %v2928_v13, %v4947_v7  ;;  %v2838_v56 = vsel %vm2836_vm7, 1e-05, %v2834_v24  ;;  %v4983_v0 = vsub.f32 1.0, %v4947_v7 }
 0x639   :  { %vm4964_vm1 = vmor %vm2933_vm6, %vm5154_vm11  ;;  %v4986_v33 = vsub.f32 1.0, %v4958_v3  ;;  %vm2837_vm4 = vcmp.ne.f32.partialorder %v2835_v5, %v2835_v5  ;;  %vm2840_vm14 = vcmp.eq.f32.partialorder %v2838_v56, inf }
 0x63a   :  { %vm4978_vm2 = vmor %vm2935_vm5, %vm2941_vm15  ;;  %v2931_v61 = vmul.f32 %v2929_v62, %v4958_v3  ;;  %v2948_v39 = vsel %vm4939_vm10, %v2930_v8, 0.0  ;;  %v2839_v25 = vsel %vm2837_vm4, 1e-05, %v2835_v5  ;;  %v2842_v26 = vsel %vm2840_vm14, 3.4028235e+38, %v2838_v56 }
 0x63b   :  { %vm2956_vm11 = vmor %vm2932_vm9, %vm2938_vm8  ;;  %v2950_v10 = vsel %vm4953_vm13, %v4947_v7, %v2948_v39  ;;  %vm2841_vm10 = vcmp.eq.f32.partialorder %v2839_v25, inf  ;;  %vm5258_vm14 = vcmp.eq.s32.totalorder %v4848_v35, 2  ;;  %vm5259_vm13 = vcmp.eq.s32.totalorder %v4855_v28, 5 }
 0x63c   :  { %vm2955_vm7 = vmor %vm2935_vm5, %vm2937_vm12  ;;  %v2958_v9 = vsel %vm2956_vm11, %v2930_v8, 0.0  ;;  %v2949_v14 = vsel %vm4978_vm2, %v2931_v61, 0.0  ;;  %v2952_v22 = vadd.f32 %v2950_v10, %v4983_v0  ;;  %vm5256_vm5 = vcmp.eq.s32.totalorder %v4848_v35, 4 }
 0x63d   :  { %vm2957_vm9 = vmor %vm2933_vm6, %vm2939_vm0  ;;  %v2960_v44 = vsel %vm4926_vm3, %v4947_v7, %v2958_v9  ;;  %v2951_v20 = vsel %vm4964_vm1, %v4958_v3, %v2949_v14  ;;  %vm5257_vm6 = vcmp.eq.s32.totalorder %v4848_v35, 5  ;;  %v2843_v51 = vsel %vm2841_vm10, 3.4028235e+38, %v2839_v25 }
 0x63e   :  { %v2959_v49 = vsel %vm2957_vm9, %v2931_v61, 0.0  ;;  %v2962_v50 = vadd.f32 %v2960_v44, %v4983_v0  ;;  %vm2964_vm4 = vmor %vm2938_vm8, %vm5256_vm5  ;;  %vm2844_vm11 = vcmp.eq.f32.partialorder %v2842_v26, -inf  ;;  %v2953_v36 = vadd.f32 %v2951_v20, %v4986_v33 }
 0x63f   :  { %v2961_v58 = vsel %vm2955_vm7, %v4958_v3, %v2959_v49  ;;  %vm2966_vm3 = vmor %vm5258_vm14, %vm5257_vm6  ;;  %vm5260_vm1 = vcmask 130048   ;;  %vm2845_vm7 = vcmp.eq.f32.partialorder %v2843_v51, -inf  ;;  %v2846_v53 = vsel %vm2844_vm11, -3.4028235e+38, %v2842_v26 }
 0x640   :  { %v2963_v46 = vadd.f32 %v2961_v58, %v4986_v33  ;;  %vm2967_vm8 = vmor %vm2937_vm12, %vm5259_vm13  ;;  %v2968_v38 = vsel %vm2966_vm3, %v2930_v8, 0.0  ;;  %2984 = vst.msk [vmem:[#allocation2 + $0x90] sm:$0xff] %vm5260_vm1, %v2952_v22  ;;  %v2847_v12 = vsel %vm2845_vm7, -3.4028235e+38, %v2843_v51  ;;  %v2850_v54 = vmul.f32 6.0, %v2846_v53 }
 0x641   :  { %vm5261_vm2 = vmmov %vm5260_vm1  ;;  %v2969_v52 = vsel %vm2967_vm8, %v2931_v61, 0.0  ;;  %v2970_v35 = vsel %vm2964_vm4, %v4947_v7, %v2968_v38  ;;  %v2851_v47 = vmul.f32 6.0, %v2847_v12 }
 0x642   :  { %2987 = vst.msk [vmem:[#allocation2 + $0xa0] sm:$0xff] %vm5261_vm2, %v2962_v50  ;;  %vm2965_vm9 = vmor %vm2939_vm0, %vm2941_vm15  ;;  %v2972_v43 = vadd.f32 %v2970_v35, %v4983_v0  ;;  %v3572_v28 = vtrunc.f32 %v2850_v54  ;;  %v2854_v27 = vmul.f32 0.5, %v2850_v54 }
 0x643   :  { %v2971_v34 = vsel %vm2965_vm9, %v4958_v3, %v2969_v52  ;;  %vm5262_vm12 = vmmov %vm5260_vm1  ;;  %v3574_v60 = vtrunc.f32 %v2851_v47  ;;  %v2855_v63 = vmul.f32 0.5, %v2851_v47 }
 0x644   :  { %2985 = vst.msk [vmem:[#allocation2 + $0x98] sm:$0xff] %vm5262_vm12, %v2953_v36  ;;  %vm5263_vm10 = vmmov %vm5260_vm1  ;;  %v2973_v57 = vadd.f32 %v2971_v34, %v4986_v33  ;;  %v3573_v30 = vcvt.f32.s32 %v3572_v28  ;;  %v2856_v59 = vfloor.f32 %v2854_v27 }
 0x645   :  { %2988 = vst.msk [vmem:[#allocation2 + $0xa8] sm:$0xff] %vm5263_vm10, %v2963_v46  ;;  %vm5264_vm5 = vmmov %vm5260_vm1  ;;  %v3575_v48 = vcvt.f32.s32 %v3574_v60  ;;  %v2857_v6 = vfloor.f32 %v2855_v63 }
 0x646   :  { %2990 = vst.msk [vmem:[#allocation2 + $0xb0] sm:$0xff] %vm5264_vm5, %v2972_v43  ;;  %vm5265_vm0 = vmmov %vm5260_vm1  ;;  %v2858_v16 = vmul.f32 2.0, %v2856_v59  ;;  %vm2872_vm15 = vcmp.eq.s32.totalorder %v3573_v30, 1  ;;  %vm5158_vm4 = vcmp.eq.s32.totalorder %v3573_v30, 2  ;;  %vm2870_vm3 = vcmp.eq.s32.totalorder %v3573_v30, 0 }
 0x647   :  { %2991 = vst.msk [vmem:[#allocation2 + $0xb8] sm:$0xff] %vm5265_vm0, %v2973_v57  ;;  %v2859_v1 = vmul.f32 2.0, %v2857_v6  ;;  %vm2873_vm6 = vcmp.eq.s32.totalorder %v3575_v48, 1  ;;  %vm5157_vm14 = vcmp.eq.s32.totalorder %v3575_v48, 2  ;;  %vm5159_vm11 = vcmp.eq.s32.totalorder %v3573_v30, 5  ;;  %vm5047_vm1 = vmor %vm2872_vm15, %vm5158_vm4 }
 0x648   :  { %v2860_v2 = vsub.f32 %v2850_v54, %v2858_v16  ;;  %vm2871_vm13 = vcmp.eq.s32.totalorder %v3575_v48, 0  ;;  %vm5160_vm8 = vcmp.eq.s32.totalorder %v3575_v48, 5  ;;  %vm2878_vm2 = vcmp.eq.s32.totalorder %v3573_v30, 4  ;;  %vm5053_vm7 = vmor %vm2873_vm6, %vm5157_vm14 }
 0x649   :  { %v2861_v17 = vsub.f32 %v2851_v47, %v2859_v1  ;;  %vm2879_vm9 = vcmp.eq.s32.totalorder %v3575_v48, 4  ;;  %vm5059_vm12 = vmor %vm2870_vm3, %vm5159_vm11  ;;  %vm2876_vm10 = vcmp.eq.s32.totalorder %v3573_v30, 3  ;;  %vm2877_vm0 = vcmp.eq.s32.totalorder %v3575_v48, 3 }
 0x64a   :  { %v3146_v18 = vadd.f32 -1.0, %v2860_v2  ;;  %vm5065_vm5 = vmor %vm2871_vm13, %vm5160_vm8 }
 0x64b   :  { %v3147_v21 = vadd.f32 -1.0, %v2861_v17  ;;  %vm2884_vm14 = vmor %vm2872_vm15, %vm2878_vm2 }
 0x64c   :  { %v2864_v45 = vand.u32 2147483647, %v3146_v18  ;;  %vm2885_vm4 = vmor %vm2873_vm6, %vm2879_vm9  ;;  %vm5277_vm6 = vcmp.eq.s32.totalorder %v3573_v30, 2 }
 0x64d   :  { %v2865_v29 = vand.u32 2147483647, %v3147_v21  ;;  %vm2894_vm11 = vmor %vm2870_vm3, %vm2876_vm10  ;;  %vm5278_vm3 = vcmp.eq.s32.totalorder %v3575_v48, 5 }
 0x64e   :  { %v2866_v40 = vsub.f32 1.0, %v2864_v45  ;;  %vm2895_vm8 = vmor %vm2871_vm13, %vm2877_vm0 }
 0x64f   :  { %v2867_v15 = vsub.f32 1.0, %v2865_v29  ;;  %vm5081_vm15 = vmor %vm2876_vm10, %vm2878_vm2 }
 0x650   :  { %v2868_v31 = vmul.f32 %v2866_v40, %v4947_v7 }
 0x651   :  { %v2869_v19 = vmul.f32 %v2867_v15, %v4958_v3 }
 0x652   :  { %v2886_v24 = vsel %vm2884_vm14, %v2868_v31, 0.0  ;;  %v2896_v13 = vsel %vm2894_vm11, %v2868_v31, 0.0  ;;  %vm5279_vm11 = vcmp.eq.s32.totalorder %v3575_v48, 2 }
 0x653   :  { %v2887_v4 = vsel %vm2885_vm4, %v2869_v19, 0.0  ;;  %v2897_v37 = vsel %vm2895_vm8, %v2869_v19, 0.0  ;;  %v2888_v5 = vsel %vm5059_vm12, %v4947_v7, %v2886_v24  ;;  %v2898_v8 = vsel %vm5047_vm1, %v4947_v7, %v2896_v13  ;;  %vm2905_vm13 = vmor %vm5279_vm11, %vm5278_vm3 }
 0x654   :  { %v2889_v62 = vsel %vm5065_vm5, %v4958_v3, %v2887_v4  ;;  %v2899_v55 = vsel %vm5053_vm7, %v4958_v3, %v2897_v37  ;;  %vm5276_vm4 = vcmp.eq.s32.totalorder %v3573_v30, 5  ;;  %v2890_v56 = vadd.f32 %v2888_v5, %v4983_v0  ;;  %vm2903_vm8 = vmor %vm2877_vm0, %vm2879_vm9 }
 0x655   :  { %vm2904_vm14 = vmor %vm5277_vm6, %vm5276_vm4  ;;  %v2891_v61 = vadd.f32 %v2889_v62, %v4986_v33  ;;  %v2900_v39 = vadd.f32 %v2898_v8, %v4983_v0  ;;  %v2901_v9 = vadd.f32 %v2899_v55, %v4986_v33  ;;  %v2907_v10 = vsel %vm2905_vm13, %v2869_v19, 0.0 }
 0x656   :  { %v2906_v25 = vsel %vm2904_vm14, %v2868_v31, 0.0  ;;  %v2909_v26 = vsel %vm2903_vm8, %v4958_v3, %v2907_v10  ;;  %vm5280_vm1 = vcmask 130048  }
 0x657   :  { %v2908_v44 = vsel %vm5081_vm15, %v4947_v7, %v2906_v25  ;;  %2975 = vst.msk [vmem:[#allocation2 + $0x60] sm:$0xff] %vm5280_vm1, %v2890_v56  ;;  %vm5281_vm2 = vmmov %vm5280_vm1  ;;  %v2911_v22 = vadd.f32 %v2909_v26, %v4986_v33 }
 0x658   :  { %2976 = vst.msk [vmem:[#allocation2 + $0x68] sm:$0xff] %vm5281_vm2, %v2891_v61  ;;  %vm5282_vm7 = vmmov %vm5280_vm1  ;;  %v2910_v14 = vadd.f32 %v2908_v44, %v4983_v0 }
 0x659   :  { %2978 = vst.msk [vmem:[#allocation2 + $0x70] sm:$0xff] %vm5282_vm7, %v2900_v39  ;;  %vm5283_vm12 = vmmov %vm5280_vm1 }
 0x65a   :  { %2979 = vst.msk [vmem:[#allocation2 + $0x78] sm:$0xff] %vm5283_vm12, %v2901_v9  ;;  %vm5284_vm9 = vmmov %vm5280_vm1 }
 0x65b   :  { %2981 = vst.msk [vmem:[#allocation2 + $0x80] sm:$0xff] %vm5284_vm9, %v2910_v14  ;;  %vm5285_vm10 = vmmov %vm5280_vm1 }
 0x65c   :  { %2982 = vst.msk [vmem:[#allocation2 + $0x88] sm:$0xff] %vm5285_vm10, %v2911_v22 }
 0x65d   :  { %3664 = shalt.err (!%p3661_p4)
}
 0x65e   :  { %s3665_s14 = scalar_lea.hbm %s5140_s9, 3072 }
 0x65f   :  { %p3666_p5 = scmp.ne.s32.totalorder %s5140_s9, %s3665_s14  ;;  %p3669_p6 = scmp.lt.u32.totalorder %s3665_s14, %s5140_s9 }
 0x661   :  { %p3671_p7 = pnand %p3669_p6, %p3666_p5 }
 0x663   :  { %3674 = shalt.err (!%p3671_p7)
}
 0x664   :  { %s3680_s4 = smov 128   ;;  %s3681_s6 = smov 8  }
 0x665   :  { %3003 = dma.vmem_to_hbm [thread:$0]  %s2998_s10, 3072, %s5140_s9, [#allocation3], %s3680_s4, %s3680_s4, %s3681_s6  }
 0x666   :  { %3675 = dma.done.wait [#allocation3], 3072  }
 0x667   :  { %3676 = vsyncadd [#allocation3], 4294964224 }
 0x668   :  { %3007 = vsyncpa [#allocation3], 1 }

// kernel: tpu_custom_call.1
= control target key start
LH: loop header
LB: loop body
LE: loop exit
PB: predicated region body
PF: predicated region fallthrough
CT: control target
= control target key end

     0   :  { %s5131_s0 = inlined_call_operand.vmem [shape: f32[2,4,16,16], index: 0, kind: input, shape index: {}]   ;;  %s5132_s1 = inlined_call_operand.vmem [shape: f32[16,16], index: 1, kind: input, shape index: {}]   ;;  %s5133_s2 = inlined_call_operand.vmem [shape: f32[16,16], index: 2, kind: input, shape index: {}]   ;;  %s5134_s3 = inlined_call_operand.vmem [shape: f32[32,16], index: 3, kind: input, shape index: {}]   ;;  %s5135_s4 = inlined_call_operand.vmem [shape: f32[32,16], index: 4, kind: input, shape index: {}]   ;;  %s5136_s5 = inlined_call_operand.vmem [shape: f32[32,16], index: 5, kind: input, shape index: {}]   ;;  %s5137_s6 = inlined_call_operand.vmem [shape: f32[32,16], index: 6, kind: input, shape index: {}]   ;;  %s5138_s7 = inlined_call_operand.vmem [shape: f32[32,16], index: 7, kind: input, shape index: {}]   ;;  %s5139_s8 = inlined_call_operand.vmem [shape: f32[32,16], index: 8, kind: input, shape index: {}]   ;;  %s5140_s9 = inlined_call_operand.hbm [shape: f32[2,6,16,16], index: 9, kind: output, shape index: {}]  }
   0x1   :  { %v33_v0 = vld [vmem:[%s5132_s1] sm:$0xff]  ;;  %v34_v1 = vld [vmem:[%s5132_s1 + $0x8] sm:$0xff]  ;;  %v3008_v4 = vld [vmem:[%s5131_s0 + $0x10] sm:$0xff] }
   0x2   :  { %v37_v2 = vld [vmem:[%s5131_s0] sm:$0xff]  ;;  %v3741_v3 = vpack.c.bf16 %v34_v1, %v33_v0  ;;  %v3012_v6 = vld [vmem:[%s5131_s0 + $0x30] sm:$0xff]  ;;  %v38_v8 = vld [vmem:[%s5131_s0 + $0x8] sm:$0xff] }
   0x3   :  { %v3010_v5 = vld [vmem:[%s5131_s0 + $0x20] sm:$0xff]  ;;  %v42_v7 = vadd.f32 %v3008_v4, %v37_v2  ;;  %v3009_v9 = vld [vmem:[%s5131_s0 + $0x18] sm:$0xff]  ;;  %v3011_v10 = vld [vmem:[%s5131_s0 + $0x28] sm:$0xff] }
   0x4   :  { %3463 = vmatprep.subr.bf16.mxu0 %v3741_v3  ;;  %v43_v11 = vadd.f32 %v3009_v9, %v38_v8  ;;  %v3013_v12 = vld [vmem:[%s5131_s0 + $0x38] sm:$0xff]  ;;  %v3014_v13 = vld [vmem:[%s5131_s0 + $0x40] sm:$0xff]  ;;  %v3016_v14 = vld [vmem:[%s5131_s0 + $0x50] sm:$0xff] }
   0x5   :  { %3465 = vmatpush3.bf16.msra.mxu0 %v3741_v3  ;;  %v47_v15 = vadd.f32 %v3010_v5, %v42_v7  ;;  %v62_v16 = vadd.f32 %v3016_v14, %v3014_v13  ;;  %v3018_v17 = vld [vmem:[%s5131_s0 + $0x60] sm:$0xff]  ;;  %v3020_v18 = vld [vmem:[%s5131_s0 + $0x70] sm:$0xff]  ;;  %v36_v21 = vld [vmem:[%s5133_s2 + $0x8] sm:$0xff] }
   0x6   :  { %v35_v19 = vld [vmem:[%s5133_s2] sm:$0xff]  ;;  %v48_v20 = vadd.f32 %v3011_v10, %v43_v11  ;;  %v3015_v22 = vld [vmem:[%s5131_s0 + $0x48] sm:$0xff]  ;;  %v3017_v23 = vld [vmem:[%s5131_s0 + $0x58] sm:$0xff]  ;;  %3471 = vmatprep.subr.bf16.mxu0 %v3741_v3 }
   0x7   :  { %v52_v24 = vadd.f32 %v3012_v6, %v47_v15  ;;  %v67_v25 = vadd.f32 %v3018_v17, %v62_v16  ;;  %v3791_v26 = vpack.c.bf16 %v36_v21, %v35_v19  ;;  %v63_v27 = vadd.f32 %v3017_v23, %v3015_v22  ;;  %v3019_v28 = vld [vmem:[%s5131_s0 + $0x68] sm:$0xff] }
   0x8   :  { %14 = vsyncpa [#allocation3], 0  ;;  %vm5143_vm0 = vcmask 130048   ;;  %v53_v29 = vadd.f32 %v3013_v12, %v48_v20  ;;  %v3021_v30 = vld [vmem:[%s5131_s0 + $0x78] sm:$0xff]  ;;  %v756_v58 = vld [vmem:[%s5134_s3 + $0x8] sm:$0xff]  ;;  %vm3677_vm13 = vmmov 1  }
   0x9   :  { %v54_v31 = vmul.f32 0.25, %v52_v24  ;;  %v72_v32 = vadd.f32 %v3020_v18, %v67_v25  ;;  %3467 = vmatprep.subr.bf16.mxu1 %v3791_v26  ;;  %v68_v33 = vadd.f32 %v3019_v28, %v63_v27  ;;  %v760_v60 = vld [vmem:[%s5135_s4 + $0x8] sm:$0xff]  ;;  %v755_v62 = vld [vmem:[%s5134_s3] sm:$0xff]  ;;  %v758_v12 = vld [vmem:[%s5134_s3 + $0x18] sm:$0xff]  ;;  %s3679_s30 = smov [#allocation2]  }
   0xa   :  { %v55_v34 = vmul.f32 0.25, %v53_v29  ;;  %3469 = vmatpush3.bf16.msra.mxu1 %v3791_v26  ;;  %v3847_v61 = vld [vmem:[%s5139_s8 + $0x8] sm:$0xff]  ;;  %v759_v2 = vld [vmem:[%s5135_s4] sm:$0xff]  ;;  %v762_v13 = vld [vmem:[%s5135_s4 + $0x18] sm:$0xff]  ;;  %s2997_s10 = sshll.u32 %s3679_s30, 4  ;;  %s2998_s10 = int_to_ptr.vmem [resolvable:$true] %s2997_s10 }
   0xb   :  { %3274 = vmatprep.mubr.msk.f32.mxu0 %vm5143_vm0, %v54_v31  ;;  %v74_v35 = vmul.f32 0.25, %v72_v32  ;;  %v73_v36 = vadd.f32 %v3021_v30, %v68_v33  ;;  %3284 = vmatprep.mubr.msk.f32.mxu1 %vm5143_vm0, %v54_v31  ;;  %v820_v1 = vld [vmem:[%s5138_s7 + $0x8] sm:$0xff]  ;;  %v3861_v4 = vld [vmem:[%s5139_s8] sm:$0xff]  ;;  %v757_v19 = vld [vmem:[%s5134_s3 + $0x10] sm:$0xff]  ;;  %s3653_s11 = scalar_lea.vmem %s2998_s10, 3072  ;;  %p3658_p1 = scmp.lt.s32.totalorder %s2998_s10, %s2998_s10 }
   0xc   :  { %3275 = vmatmul.mubr.msk.f32.vlgmr.msra.gmra.mrb[0].mxu0 %vm5143_vm0, %v55_v34  ;;  %3475 = vmatprep.subr.bf16.mxu1 %v3791_v26  ;;  %v3866_v5 = vld [vmem:[%s5137_s6 + $0x8] sm:$0xff]  ;;  %v819_v7 = vld [vmem:[%s5138_s7] sm:$0xff]  ;;  %v3896_v20 = vld [vmem:[%s5139_s8 + $0x18] sm:$0xff]  ;;  %p3654_p0 = scmp.ne.s32.totalorder %s2998_s10, %s3653_s11  ;;  %p3659_p2 = scmp.lt.s32.totalorder %s3653_s11, %s3653_s11 }
   0xd   :  { %3277 = vmatprep.mubr.msk.f32.mxu0 %vm5143_vm0, %v74_v35  ;;  %v75_v37 = vmul.f32 0.25, %v73_v36  ;;  %3285 = vmatmul.mubr.msk.f32.vlgmr.msra.gmra.mrb[0].mxu1 %vm5143_vm0, %v55_v34  ;;  %v787_v8 = vld [vmem:[%s5136_s5] sm:$0xff]  ;;  %v788_v14 = vld [vmem:[%s5136_s5 + $0x8] sm:$0xff]  ;;  %v3902_v22 = vld [vmem:[%s5137_s6 + $0x18] sm:$0xff] }
   0xe   :  { %3287 = vmatprep.mubr.msk.f32.mxu1 %vm5143_vm0, %v74_v35  ;;  %3473 = vmatpush3.bf16.msra.mxu0 %v3741_v3  ;;  %v3877_v9 = vld [vmem:[%s5137_s6] sm:$0xff]  ;;  %v761_v25 = vld [vmem:[%s5135_s4 + $0x10] sm:$0xff]  ;;  %p3660_p3 = por %p3659_p2, %p3658_p1 }
   0xf   :  { %3479 = vmatprep.subr.bf16.mxu0 %v3741_v3  ;;  %3477 = vmatpush3.bf16.msra.mxu1 %v3791_v26  ;;  %v3912_v27 = vld [vmem:[%s5139_s8 + $0x10] sm:$0xff] }
  0x10   :  { %3278 = vmatmul.mubr.msk.f32.gmra.mrb[2].mxu0 %vm5143_vm0, %v75_v37  ;;  %3510 = vmatprep.subr.bf16.mxu1 %v3791_v26  ;;  %v3918_v30 = vld [vmem:[%s5137_s6 + $0x10] sm:$0xff]  ;;  %p3661_p4 = pnand %p3660_p3, %p3654_p0 }
  0x11   :  { %3288 = vmatmul.mubr.msk.f32.gmra.mrb[2].mxu1 %vm5143_vm0, %v75_v37 }
  0xdf   :  { %v3276_v38 = vpop.f32.mrb[0].mxu0 }
  0xe0   :  { %v155_v39 = vpop.f32.mrb[1].mxu0  ;;  %v3286_v40 = vpop.f32.mrb[0].mxu1 }
  0xe1   :  { %259 = vxpose.xlu0.b32.start [1/2] (short) (narrow) %v155_v39, 16  ;;  %v240_v41 = vpop.f32.mrb[1].mxu1 }
  0xe3   :  { %v3279_v42 = vpop.f32.mrb[2].mxu0 }
  0xe4   :  { %v165_v43 = vpop.f32.mrb[3].mxu0  ;;  %v3289_v44 = vpop.f32.mrb[2].mxu1 }
  0xe5   :  { %260 = vxpose.xlu0.b32.end [2/2] (short) (narrow) %v3276_v38, 16  ;;  %291 = vxpose.xlu1.b32.start [1/2] (short) (narrow) %v165_v43, 16  ;;  %v250_v45 = vpop.f32.mrb[3].mxu1 }
  0xe9   :  { %323 = vxpose.xlu0.b32.start [1/2] (short) (narrow) %v240_v41, 16  ;;  %292 = vxpose.xlu1.b32.end [2/2] (short) (narrow) %v3279_v42, 16 }
  0xed   :  { %324 = vxpose.xlu0.b32.end [2/2] (short) (narrow) %v3286_v40, 16  ;;  %355 = vxpose.xlu1.b32.start [1/2] (short) (narrow) %v250_v45, 16 }
  0xf1   :  { %356 = vxpose.xlu1.b32.end [2/2] (short) (narrow) %v3289_v44, 16 }
 0x161   :  { %v275_v46 = vpop.trf.xlu0 }
 0x162   :  { %3294 = vmatprep.mubr.msk.f32.mxu0 %vm5143_vm0, %v275_v46 }
 0x165   :  { %v276_v47 = vpop.trf.xlu0  ;;  %v307_v48 = vpop.trf.xlu1 }
 0x166   :  { %3295 = vmatmul.mubr.msk.f32.vlgmr.msra.gmra.mrb[4].mxu0 %vm5143_vm0, %v276_v47 }
 0x167   :  { %3481 = vmatpush3.bf16.msra.mxu0 %v3741_v3  ;;  %3297 = vmatprep.mubr.msk.f32.mxu0 %vm5143_vm0, %v307_v48 }
 0x168   :  { %3483 = vmatprep.subr.bf16.mxu0 %v3791_v26 }
 0x169   :  { %v339_v49 = vpop.trf.xlu0  ;;  %v308_v50 = vpop.trf.xlu1 }
 0x16a   :  { %3298 = vmatmul.mubr.msk.f32.gmra.mrb[6].mxu0 %vm5143_vm0, %v308_v50  ;;  %3304 = vmatprep.mubr.msk.f32.mxu1 %vm5143_vm0, %v339_v49 }
 0x16b   :  { %3314 = vmatprep.mubr.msk.f32.mxu0 %vm5143_vm0, %v339_v49 }
 0x16d   :  { %v340_v51 = vpop.trf.xlu0  ;;  %v371_v52 = vpop.trf.xlu1 }
 0x16e   :  { %3305 = vmatmul.mubr.msk.f32.vlgmr.msra.gmra.mrb[4].mxu1 %vm5143_vm0, %v340_v51  ;;  %3315 = vmatmul.mubr.msk.f32.vlgmr.msra.gmra.mrb[8].mxu0 %vm5143_vm0, %v340_v51 }
 0x16f   :  { %3485 = vmatpush3.bf16.msra.mxu0 %v3791_v26  ;;  %3307 = vmatprep.mubr.msk.f32.mxu1 %vm5143_vm0, %v371_v52 }
 0x170   :  { %3317 = vmatprep.mubr.msk.f32.mxu0 %vm5143_vm0, %v371_v52  ;;  %3487 = vmatprep.subr.bf16.mxu0 %v3791_v26 }
 0x171   :  { %v372_v53 = vpop.trf.xlu1  ;;  %3511 = vmatpush3.bf16.msra.mxu1 %v3791_v26 }
 0x172   :  { %3308 = vmatmul.mubr.msk.f32.gmra.mrb[6].mxu1 %vm5143_vm0, %v372_v53  ;;  %3318 = vmatmul.mubr.msk.f32.gmra.mrb[10].mxu0 %vm5143_vm0, %v372_v53 }
 0x173   :  { %3324 = vmatprep.mubr.msk.f32.mxu0 %vm5143_vm0, %v275_v46  ;;  %3491 = vmatprep.subr.bf16.mxu1 %v3741_v3 }
 0x176   :  { %3325 = vmatmul.mubr.msk.f32.vlgmr.msra.gmra.mrb[8].mxu0 %vm5143_vm0, %v276_v47 }
 0x177   :  { %3327 = vmatprep.mubr.msk.f32.mxu0 %vm5143_vm0, %v307_v48  ;;  %3489 = vmatpush3.bf16.msra.mxu0 %v3791_v26 }
 0x178   :  { %3495 = vmatprep.subr.bf16.mxu0 %v3741_v3 }
 0x17a   :  { %3328 = vmatmul.mubr.msk.f32.gmra.mrb[10].mxu0 %vm5143_vm0, %v308_v50 }
 0x239   :  { %v3296_v54 = vpop.f32.mrb[4].mxu0 }
 0x23a   :  { %v465_v55 = vpop.f32.mrb[5].mxu0 }
 0x23d   :  { %v3299_v56 = vpop.f32.mrb[6].mxu0 }
 0x23e   :  { %v475_v57 = vpop.f32.mrb[7].mxu0 }
 0x241   :  { %v3306_v59 = vpop.f32.mrb[4].mxu1 }
 0x242   :  { %v582_v63 = vsub.f32 %v3296_v54, %v3306_v59  ;;  %v562_v0 = vpop.f32.mrb[5].mxu1 }
 0x243   :  { %v581_v6 = vsub.f32 %v465_v55, %v562_v0 }
 0x244   :  { %v764_v10 = vmul.f32 %v756_v58, %v582_v63  ;;  %v776_v11 = vmul.f32 %v760_v60, %v582_v63  ;;  %v840_v16 = vmul.f32 %v3847_v61, %v582_v63  ;;  %v808_v21 = vmul.f32 %v3866_v5, %v582_v63 }
 0x245   :  { %v3309_v15 = vpop.f32.mrb[6].mxu1  ;;  %v775_v17 = vmul.f32 %v759_v2, %v581_v6  ;;  %v839_v18 = vmul.f32 %v3861_v4, %v581_v6  ;;  %v807_v28 = vmul.f32 %v3877_v9, %v581_v6  ;;  %v763_v29 = vmul.f32 %v755_v62, %v581_v6 }
 0x246   :  { %v3904_v23 = vsub.f32 %v3299_v56, %v3309_v15  ;;  %v572_v24 = vpop.f32.mrb[7].mxu1  ;;  %v3920_v31 = vmul.f32 %v787_v8, %v581_v6  ;;  %v3924_v33 = vmul.f32 %v788_v14, %v582_v63  ;;  %v3926_v34 = vmul.f32 %v819_v7, %v581_v6  ;;  %v821_v6 = vld [vmem:[%s5138_s7 + $0x10] sm:$0xff] }
 0x247   :  { %v3922_v32 = vsub.f32 %v475_v57, %v572_v24  ;;  %v3928_v35 = vmul.f32 %v820_v1, %v582_v63 }
 0x248   :  { %v778_v36 = vmul.f32 %v762_v13, %v3904_v23  ;;  %v842_v37 = vmul.f32 %v3896_v20, %v3904_v23  ;;  %v810_v38 = vmul.f32 %v3902_v22, %v3904_v23  ;;  %v766_v39 = vmul.f32 %v758_v12, %v3904_v23 }
 0x249   :  { %v3936_v40 = vpop.f32.mrb[8].mxu0  ;;  %v777_v41 = vmul.f32 %v761_v25, %v3922_v32  ;;  %v841_v42 = vmul.f32 %v3912_v27, %v3922_v32  ;;  %v809_v43 = vmul.f32 %v3918_v30, %v3922_v32  ;;  %v765_v44 = vmul.f32 %v757_v19, %v3922_v32 }
 0x24a   :  { %v768_v45 = vmul.f32 %v3936_v40, %v760_v60  ;;  %v780_v46 = vmul.f32 %v3936_v40, %v756_v58  ;;  %v844_v47 = vmul.f32 %v3936_v40, %v820_v1  ;;  %v736_v48 = vpop.f32.mrb[9].mxu0  ;;  %v812_v49 = vmul.f32 %v3936_v40, %v788_v14  ;;  %v790_v1 = vld [vmem:[%s5136_s5 + $0x18] sm:$0xff] }
 0x24b   :  { %v779_v50 = vmul.f32 %v755_v62, %v736_v48  ;;  %v843_v51 = vmul.f32 %v819_v7, %v736_v48  ;;  %v811_v52 = vmul.f32 %v787_v8, %v736_v48  ;;  %v767_v53 = vmul.f32 %v759_v2, %v736_v48  ;;  %v822_v62 = vld [vmem:[%s5138_s7 + $0x18] sm:$0xff] }
 0x24c   :  { %v3948_v54 = vsub.f32 %v764_v10, %v768_v45  ;;  %v3950_v55 = vadd.f32 %v780_v46, %v776_v11  ;;  %v3952_v56 = vadd.f32 %v844_v47, %v840_v16  ;;  %v3954_v57 = vadd.f32 %v812_v49, %v808_v21  ;;  %v789_v10 = vld [vmem:[%s5136_s5 + $0x10] sm:$0xff] }
 0x24d   :  { %v3329_v59 = vpop.f32.mrb[10].mxu0  ;;  %v3956_v60 = vadd.f32 %v779_v50, %v775_v17  ;;  %v3958_v58 = vadd.f32 %v843_v51, %v839_v18  ;;  %v3963_v63 = vadd.f32 %v811_v52, %v807_v28  ;;  %v3965_v0 = vsub.f32 %v763_v29, %v767_v53 }
 0x24e   :  { %v746_v2 = vpop.f32.mrb[11].mxu0  ;;  %v782_v7 = vmul.f32 %v3329_v59, %v758_v12  ;;  %v846_v8 = vmul.f32 %v3329_v59, %v822_v62  ;;  %v814_v11 = vmul.f32 %v3329_v59, %v790_v1  ;;  %v770_v14 = vmul.f32 %v3329_v59, %v762_v13 }
 0x24f   :  { %3334 = vmatprep.mubr.msk.f32.mxu0 %vm5143_vm0, %v3956_v60  ;;  %3346 = vmatprep.mubr.msk.f32.mxu1 %vm5143_vm0, %v3958_v58  ;;  %v781_v15 = vmul.f32 %v757_v19, %v746_v2  ;;  %v845_v16 = vmul.f32 %v821_v6, %v746_v2  ;;  %v813_v17 = vmul.f32 %v789_v10, %v746_v2 }
 0x250   :  { %3335 = vmatmul.mubr.msk.f32.vlgmr.msra.gmra.mrb[12].mxu0 %vm5143_vm0, %v3950_v55  ;;  %3347 = vmatmul.mubr.msk.f32.vlgmr.msra.gmra.mrb[8].mxu1 %vm5143_vm0, %v3952_v56  ;;  %v786_v12 = vadd.f32 %v782_v7, %v778_v36  ;;  %v3984_v18 = vadd.f32 %v846_v8, %v842_v37  ;;  %v769_v21 = vmul.f32 %v761_v25, %v746_v2 }
 0x251   :  { %3497 = vmatpush3.bf16.msra.mxu0 %v3741_v3  ;;  %v785_v13 = vadd.f32 %v781_v15, %v777_v41  ;;  %v849_v24 = vadd.f32 %v845_v16, %v841_v42  ;;  %3493 = vmatpush3.bf16.msra.mxu1 %v3741_v3  ;;  %v817_v28 = vadd.f32 %v813_v17, %v809_v43 }
 0x252   :  { %v773_v19 = vsub.f32 %v765_v44, %v769_v21  ;;  %v818_v29 = vadd.f32 %v814_v11, %v810_v38  ;;  %v774_v45 = vsub.f32 %v766_v39, %v770_v14  ;;  %v799_v46 = vmul.f32 %v3877_v9, %v736_v48  ;;  %3499 = vmatprep.subr.bf16.mxu0 %v3791_v26 }
 0x253   :  { %3337 = vmatprep.mubr.msk.f32.mxu0 %vm5143_vm0, %v785_v13  ;;  %3349 = vmatprep.mubr.msk.f32.mxu1 %vm5143_vm0, %v849_v24  ;;  %v800_v25 = vmul.f32 %v3936_v40, %v3866_v5  ;;  %v797_v36 = vmul.f32 %v789_v10, %v3922_v32  ;;  %v801_v37 = vmul.f32 %v3918_v30, %v746_v2 }
 0x254   :  { %3338 = vmatmul.mubr.msk.f32.gmra.mrb[14].mxu0 %vm5143_vm0, %v786_v12  ;;  %3350 = vmatmul.mubr.msk.f32.gmra.mrb[10].mxu1 %vm5143_vm0, %v3984_v18  ;;  %v803_v9 = vsub.f32 %v3920_v31, %v799_v46  ;;  %v798_v38 = vmul.f32 %v790_v1, %v3904_v23  ;;  %v802_v39 = vmul.f32 %v3329_v59, %v3902_v22 }
 0x255   :  { %3340 = vmatprep.mubr.msk.f32.mxu0 %vm5143_vm0, %v3963_v63  ;;  %3356 = vmatprep.mubr.msk.f32.mxu1 %vm5143_vm0, %v3965_v0  ;;  %v804_v5 = vsub.f32 %v3924_v33, %v800_v25  ;;  %v805_v30 = vsub.f32 %v797_v36, %v801_v37  ;;  %v831_v41 = vmul.f32 %v3861_v4, %v736_v48 }
 0x256   :  { %v806_v42 = vsub.f32 %v798_v38, %v802_v39  ;;  %v832_v43 = vmul.f32 %v3936_v40, %v3847_v61  ;;  %v829_v31 = vmul.f32 %v821_v6, %v3922_v32  ;;  %v833_v44 = vmul.f32 %v3912_v27, %v746_v2  ;;  %3503 = vmatprep.subr.bf16.mxu1 %v3791_v26 }
 0x257   :  { %v835_v22 = vsub.f32 %v3926_v34, %v831_v41  ;;  %v830_v47 = vmul.f32 %v822_v62, %v3904_v23  ;;  %v834_v49 = vmul.f32 %v3329_v59, %v3896_v20 }
 0x258   :  { %3341 = vmatmul.mubr.msk.f32.gmra.mrb[16].mxu0 %vm5143_vm0, %v3954_v57  ;;  %3357 = vmatmul.mubr.msk.f32.vlgmr.msra.gmra.mrb[12].mxu1 %vm5143_vm0, %v3948_v54  ;;  %v836_v61 = vsub.f32 %v3928_v35, %v832_v43  ;;  %v837_v4 = vsub.f32 %v829_v31, %v833_v44 }
 0x259   :  { %3343 = vmatprep.mubr.msk.f32.mxu0 %vm5143_vm0, %v817_v28  ;;  %3359 = vmatprep.mubr.msk.f32.mxu1 %vm5143_vm0, %v773_v19  ;;  %v838_v27 = vsub.f32 %v830_v47, %v834_v49 }
 0x25a   :  { %3505 = vmatpush3.bf16.msra.mxu1 %v3791_v26 }
 0x25b   :  { %3507 = vmatprep.subr.bf16.mxu1 %v3741_v3 }
 0x25c   :  { %3344 = vmatmul.mubr.msk.f32.gmra.mrb[18].mxu0 %vm5143_vm0, %v818_v29  ;;  %3360 = vmatmul.mubr.msk.f32.gmra.mrb[14].mxu1 %vm5143_vm0, %v774_v45 }
 0x25d   :  { %3362 = vmatprep.mubr.msk.f32.mxu1 %vm5143_vm0, %v803_v9  ;;  %3378 = vmatprep.mubr.msk.f32.mxu0 %vm5143_vm0, %v3956_v60 }
 0x260   :  { %3363 = vmatmul.mubr.msk.f32.gmra.mrb[16].mxu1 %vm5143_vm0, %v804_v5  ;;  %3379 = vmatmul.mubr.msk.f32.vlgmr.msra.gmra.mrb[20].mxu0 %vm5143_vm0, %v3950_v55 }
 0x261   :  { %3501 = vmatpush3.bf16.msra.mxu0 %v3791_v26  ;;  %3365 = vmatprep.mubr.msk.f32.mxu1 %vm5143_vm0, %v805_v30 }
 0x262   :  { %3381 = vmatprep.mubr.msk.f32.mxu0 %vm5143_vm0, %v785_v13 }
 0x264   :  { %3366 = vmatmul.mubr.msk.f32.gmra.mrb[18].mxu1 %vm5143_vm0, %v806_v42  ;;  %3382 = vmatmul.mubr.msk.f32.gmra.mrb[22].mxu0 %vm5143_vm0, %v786_v12 }
 0x265   :  { %3368 = vmatprep.mubr.msk.f32.mxu1 %vm5143_vm0, %v835_v22  ;;  %3384 = vmatprep.mubr.msk.f32.mxu0 %vm5143_vm0, %v3963_v63 }
 0x268   :  { %3369 = vmatmul.mubr.msk.f32.gmra.mrb[8].mxu1 %vm5143_vm0, %v836_v61  ;;  %3385 = vmatmul.mubr.msk.f32.gmra.mrb[24].mxu0 %vm5143_vm0, %v3954_v57 }
 0x269   :  { %3371 = vmatprep.mubr.msk.f32.mxu1 %vm5143_vm0, %v837_v4  ;;  %3387 = vmatprep.mubr.msk.f32.mxu0 %vm5143_vm0, %v817_v28 }
 0x26c   :  { %3372 = vmatmul.mubr.msk.f32.gmra.mrb[10].mxu1 %vm5143_vm0, %v838_v27  ;;  %3388 = vmatmul.mubr.msk.f32.gmra.mrb[26].mxu0 %vm5143_vm0, %v818_v29 }
 0x26d   :  { %3390 = vmatprep.mubr.msk.f32.mxu0 %vm5143_vm0, %v3958_v58 }
 0x270   :  { %3391 = vmatmul.mubr.msk.f32.gmra.mrb[28].mxu0 %vm5143_vm0, %v3952_v56 }
 0x271   :  { %3393 = vmatprep.mubr.msk.f32.mxu0 %vm5143_vm0, %v849_v24 }
 0x274   :  { %3394 = vmatmul.mubr.msk.f32.gmra.mrb[30].mxu0 %vm5143_vm0, %v3984_v18 }
 0x275   :  { %3400 = vmatprep.mubr.msk.f32.mxu0 %vm5143_vm0, %v3965_v0 }
 0x278   :  { %3401 = vmatmul.mubr.msk.f32.vlgmr.msra.gmra.mrb[32].mxu0 %vm5143_vm0, %v3948_v54 }
 0x279   :  { %3403 = vmatprep.mubr.msk.f32.mxu0 %vm5143_vm0, %v773_v19 }
 0x27c   :  { %3404 = vmatmul.mubr.msk.f32.gmra.mrb[34].mxu0 %vm5143_vm0, %v774_v45 }
 0x27d   :  { %3406 = vmatprep.mubr.msk.f32.mxu0 %vm5143_vm0, %v803_v9 }
 0x280   :  { %3407 = vmatmul.mubr.msk.f32.gmra.mrb[36].mxu0 %vm5143_vm0, %v804_v5 }
 0x281   :  { %3409 = vmatprep.mubr.msk.f32.mxu0 %vm5143_vm0, %v805_v30 }
 0x284   :  { %3410 = vmatmul.mubr.msk.f32.gmra.mrb[38].mxu0 %vm5143_vm0, %v806_v42 }
 0x285   :  { %3412 = vmatprep.mubr.msk.f32.mxu0 %vm5143_vm0, %v835_v22 }
 0x288   :  { %3413 = vmatmul.mubr.msk.f32.gmra.mrb[40].mxu0 %vm5143_vm0, %v836_v61 }
 0x289   :  { %3415 = vmatprep.mubr.msk.f32.mxu0 %vm5143_vm0, %v837_v4 }
 0x28c   :  { %3416 = vmatmul.mubr.msk.f32.gmra.mrb[42].mxu0 %vm5143_vm0, %v838_v27 }
 0x323   :  { %v3336_v26 = vpop.f32.mrb[12].mxu0 }
 0x324   :  { %v953_v20 = vpop.f32.mrb[13].mxu0 }
 0x327   :  { %v3339_v23 = vpop.f32.mrb[14].mxu0 }
 0x328   :  { %v963_v32 = vpop.f32.mrb[15].mxu0 }
 0x32b   :  { %v3342_v33 = vpop.f32.mrb[16].mxu0  ;;  %v3358_v34 = vpop.f32.mrb[12].mxu1 }
 0x32c   :  { %v4069_v35 = vadd.f32 %v3358_v34, %v3336_v26  ;;  %v973_v40 = vpop.f32.mrb[17].mxu0  ;;  %v1114_v48 = vpop.f32.mrb[13].mxu1 }
 0x32d   :  { %v4071_v50 = vadd.f32 %v1114_v48, %v953_v20 }
 0x32f   :  { %v3345_v51 = vpop.f32.mrb[18].mxu0  ;;  %v3361_v52 = vpop.f32.mrb[14].mxu1 }
 0x330   :  { %v4073_v53 = vadd.f32 %v3361_v52, %v3339_v23  ;;  %v983_v54 = vpop.f32.mrb[19].mxu0  ;;  %v1124_v55 = vpop.f32.mrb[15].mxu1 }
 0x331   :  { %v1125_v56 = vadd.f32 %v1124_v55, %v963_v32 }
 0x333   :  { %v3364_v57 = vpop.f32.mrb[16].mxu1  ;;  %v3380_v59 = vpop.f32.mrb[20].mxu0 }
 0x334   :  { %v1140_v60 = vadd.f32 %v3364_v57, %v3342_v33  ;;  %v1134_v58 = vpop.f32.mrb[17].mxu1  ;;  %v1239_v62 = vpop.f32.mrb[21].mxu0 }
 0x335   :  { %v1135_v63 = vadd.f32 %v1134_v58, %v973_v40 }
 0x337   :  { %v3367_v0 = vpop.f32.mrb[18].mxu1  ;;  %v3383_v1 = vpop.f32.mrb[22].mxu0 }
 0x338   :  { %v1150_v2 = vadd.f32 %v3367_v0, %v3345_v51  ;;  %v1144_v6 = vpop.f32.mrb[19].mxu1  ;;  %v1249_v7 = vpop.f32.mrb[23].mxu0 }
 0x339   :  { %v1145_v8 = vadd.f32 %v1144_v6, %v983_v54 }
 0x33b   :  { %v3370_v10 = vpop.f32.mrb[8].mxu1  ;;  %v3386_v11 = vpop.f32.mrb[24].mxu0 }
 0x33c   :  { %v1154_v14 = vpop.f32.mrb[9].mxu1  ;;  %v1259_v15 = vpop.f32.mrb[25].mxu0 }
 0x33f   :  { %v3373_v16 = vpop.f32.mrb[10].mxu1  ;;  %v3389_v17 = vpop.f32.mrb[26].mxu0 }
 0x340   :  { %v1164_v12 = vpop.f32.mrb[11].mxu1  ;;  %v1269_v18 = vpop.f32.mrb[27].mxu0 }
 0x343   :  { %v3392_v21 = vpop.f32.mrb[28].mxu0 }
 0x344   :  { %v1279_v13 = vpop.f32.mrb[29].mxu0 }
 0x347   :  { %v3395_v24 = vpop.f32.mrb[30].mxu0 }
 0x348   :  { %v1289_v28 = vpop.f32.mrb[31].mxu0 }
 0x34b   :  { %v3402_v19 = vpop.f32.mrb[32].mxu0 }
 0x34c   :  { %v1424_v29 = vsub.f32 %v3380_v59, %v3402_v19  ;;  %v1364_v45 = vpop.f32.mrb[33].mxu0 }
 0x34d   :  { %v1423_v46 = vsub.f32 %v1239_v62, %v1364_v45 }
 0x34f   :  { %1627 = vxpose.xlu0.b32.start [1/2] (short) (narrow) %v1423_v46, 16  ;;  %v3405_v25 = vpop.f32.mrb[34].mxu0 }
 0x350   :  { %v1426_v36 = vsub.f32 %v3383_v1, %v3405_v25  ;;  %v1374_v37 = vpop.f32.mrb[35].mxu0 }
 0x351   :  { %v1425_v9 = vsub.f32 %v1249_v7, %v1374_v37 }
 0x353   :  { %1628 = vxpose.xlu0.b32.end [2/2] (short) (narrow) %v1424_v29, 16  ;;  %1659 = vxpose.xlu1.b32.start [1/2] (short) (narrow) %v1425_v9, 16  ;;  %v3408_v38 = vpop.f32.mrb[36].mxu0 }
 0x354   :  { %v1428_v39 = vsub.f32 %v3386_v11, %v3408_v38  ;;  %v1384_v5 = vpop.f32.mrb[37].mxu0 }
 0x355   :  { %v1427_v30 = vsub.f32 %v1259_v15, %v1384_v5 }
 0x357   :  { %1660 = vxpose.xlu1.b32.end [2/2] (short) (narrow) %v1426_v36, 16  ;;  %1691 = vxpose.xlu0.b32.start [1/2] (short) (narrow) %v1427_v30, 16  ;;  %v3411_v41 = vpop.f32.mrb[38].mxu0 }
 0x358   :  { %v1430_v42 = vsub.f32 %v3389_v17, %v3411_v41  ;;  %v1394_v43 = vpop.f32.mrb[39].mxu0 }
 0x359   :  { %v1429_v31 = vsub.f32 %v1269_v18, %v1394_v43 }
 0x35b   :  { %1692 = vxpose.xlu0.b32.end [2/2] (short) (narrow) %v1428_v39, 16  ;;  %1723 = vxpose.xlu1.b32.start [1/2] (short) (narrow) %v1429_v31, 16  ;;  %v3414_v44 = vpop.f32.mrb[40].mxu0 }
 0x35c   :  { %v1432_v22 = vsub.f32 %v3392_v21, %v3414_v44  ;;  %v1404_v47 = vpop.f32.mrb[41].mxu0 }
 0x35d   :  { %v1431_v49 = vsub.f32 %v1279_v13, %v1404_v47 }
 0x35f   :  { %1724 = vxpose.xlu1.b32.end [2/2] (short) (narrow) %v1430_v42, 16  ;;  %1755 = vxpose.xlu0.b32.start [1/2] (short) (narrow) %v1431_v49, 16  ;;  %v3417_v61 = vpop.f32.mrb[42].mxu0 }
 0x360   :  { %v1434_v4 = vsub.f32 %v3395_v24, %v3417_v61  ;;  %v1414_v27 = vpop.f32.mrb[43].mxu0 }
 0x361   :  { %v1433_v26 = vsub.f32 %v1289_v28, %v1414_v27 }
 0x363   :  { %1756 = vxpose.xlu0.b32.end [2/2] (short) (narrow) %v1432_v22, 16  ;;  %1787 = vxpose.xlu1.b32.start [1/2] (short) (narrow) %v1433_v26, 16 }
 0x367   :  { %1435 = vxpose.xlu0.b32.start [1/2] (short) (narrow) %v4071_v50, 16  ;;  %1788 = vxpose.xlu1.b32.end [2/2] (short) (narrow) %v1434_v4, 16 }
 0x36b   :  { %1436 = vxpose.xlu0.b32.end [2/2] (short) (narrow) %v4069_v35, 16  ;;  %1467 = vxpose.xlu1.b32.start [1/2] (short) (narrow) %v1125_v56, 16 }
 0x36f   :  { %1499 = vxpose.xlu0.b32.start [1/2] (short) (narrow) %v1135_v63, 16  ;;  %1468 = vxpose.xlu1.b32.end [2/2] (short) (narrow) %v4073_v53, 16 }
 0x373   :  { %1500 = vxpose.xlu0.b32.end [2/2] (short) (narrow) %v1140_v60, 16  ;;  %1531 = vxpose.xlu1.b32.start [1/2] (short) (narrow) %v1145_v8, 16 }
 0x377   :  { %1563 = vxpose.xlu0.b32.start [1/2] (short) (narrow) %v1154_v14, 16  ;;  %1532 = vxpose.xlu1.b32.end [2/2] (short) (narrow) %v1150_v2, 16 }
 0x37b   :  { %1564 = vxpose.xlu0.b32.end [2/2] (short) (narrow) %v3370_v10, 16  ;;  %1595 = vxpose.xlu1.b32.start [1/2] (short) (narrow) %v1164_v12, 16 }
 0x37f   :  { %1596 = vxpose.xlu1.b32.end [2/2] (short) (narrow) %v3373_v16, 16 }
 0x3cf   :  { %v1643_v20 = vpop.trf.xlu0 }
 0x3d0   :  { %3422 = vmatprep.mubr.msk.f32.mxu1 %vm5143_vm0, %v1643_v20 }
 0x3d3   :  { %v1644_v23 = vpop.trf.xlu0  ;;  %v1675_v32 = vpop.trf.xlu1 }
 0x3d4   :  { %3423 = vmatmul.mubr.msk.f32.vlgmr.msra.gmra.mrb[20].mxu1 %vm5143_vm0, %v1644_v23 }
 0x3d5   :  { %3509 = vmatpush3.bf16.msra.mxu1 %v3741_v3  ;;  %3425 = vmatprep.mubr.msk.f32.mxu1 %vm5143_vm0, %v1675_v32 }
 0x3d7   :  { %v1676_v33 = vpop.trf.xlu1  ;;  %v1707_v34 = vpop.trf.xlu0 }
 0x3d8   :  { %3426 = vmatmul.mubr.msk.f32.gmra.mrb[22].mxu1 %vm5143_vm0, %v1676_v33 }
 0x3d9   :  { %3428 = vmatprep.mubr.msk.f32.mxu1 %vm5143_vm0, %v1707_v34 }
 0x3db   :  { %v1708_v35 = vpop.trf.xlu0  ;;  %v1739_v40 = vpop.trf.xlu1 }
 0x3dc   :  { %3429 = vmatmul.mubr.msk.f32.gmra.mrb[24].mxu1 %vm5143_vm0, %v1708_v35 }
 0x3dd   :  { %3431 = vmatprep.mubr.msk.f32.mxu1 %vm5143_vm0, %v1739_v40 }
 0x3df   :  { %v1740_v48 = vpop.trf.xlu1  ;;  %v1771_v50 = vpop.trf.xlu0 }
 0x3e0   :  { %3432 = vmatmul.mubr.msk.f32.gmra.mrb[26].mxu1 %vm5143_vm0, %v1740_v48 }
 0x3e1   :  { %3434 = vmatprep.mubr.msk.f32.mxu1 %vm5143_vm0, %v1771_v50 }
 0x3e3   :  { %v1772_v3 = vpop.trf.xlu0  ;;  %v1803_v51 = vpop.trf.xlu1 }
 0x3e4   :  { %3435 = vmatmul.mubr.msk.f32.gmra.mrb[28].mxu1 %vm5143_vm0, %v1772_v3 }
 0x3e5   :  { %3437 = vmatprep.mubr.msk.f32.mxu1 %vm5143_vm0, %v1803_v51 }
 0x3e7   :  { %v1451_v52 = vpop.trf.xlu0  ;;  %v1804_v53 = vpop.trf.xlu1 }
 0x3e8   :  { %3438 = vmatmul.mubr.msk.f32.gmra.mrb[30].mxu1 %vm5143_vm0, %v1804_v53 }
 0x3e9   :  { %3444 = vmatprep.mubr.msk.f32.mxu1 %vm5143_vm0, %v1451_v52 }
 0x3eb   :  { %v1452_v54 = vpop.trf.xlu0  ;;  %v1483_v55 = vpop.trf.xlu1 }
 0x3ec   :  { %3445 = vmatmul.mubr.msk.f32.vlgmr.msra.gmra.mrb[20].mxu1 %vm5143_vm0, %v1452_v54 }
 0x3ed   :  { %3447 = vmatprep.mubr.msk.f32.mxu1 %vm5143_vm0, %v1483_v55 }
 0x3ef   :  { %v1515_v56 = vpop.trf.xlu0  ;;  %v1484_v57 = vpop.trf.xlu1 }
 0x3f0   :  { %3448 = vmatmul.mubr.msk.f32.gmra.mrb[22].mxu1 %vm5143_vm0, %v1484_v57 }
 0x3f1   :  { %3450 = vmatprep.mubr.msk.f32.mxu1 %vm5143_vm0, %v1515_v56 }
 0x3f3   :  { %v1516_v59 = vpop.trf.xlu0  ;;  %v1547_v60 = vpop.trf.xlu1 }
 0x3f4   :  { %3451 = vmatmul.mubr.msk.f32.gmra.mrb[24].mxu1 %vm5143_vm0, %v1516_v59 }
 0x3f5   :  { %3453 = vmatprep.mubr.msk.f32.mxu1 %vm5143_vm0, %v1547_v60 }
 0x3f7   :  { %v1579_v58 = vpop.trf.xlu0  ;;  %v1548_v62 = vpop.trf.xlu1 }
 0x3f8   :  { %3454 = vmatmul.mubr.msk.f32.gmra.mrb[26].mxu1 %vm5143_vm0, %v1548_v62 }
 0x3f9   :  { %3456 = vmatprep.mubr.msk.f32.mxu1 %vm5143_vm0, %v1579_v58 }
 0x3fb   :  { %v1580_v63 = vpop.trf.xlu0  ;;  %v1611_v0 = vpop.trf.xlu1 }
 0x3fc   :  { %3457 = vmatmul.mubr.msk.f32.gmra.mrb[28].mxu1 %vm5143_vm0, %v1580_v63 }
 0x3fd   :  { %3459 = vmatprep.mubr.msk.f32.mxu1 %vm5143_vm0, %v1611_v0 }
 0x3ff   :  { %v1612_v1 = vpop.trf.xlu1 }
 0x400   :  { %3460 = vmatmul.mubr.msk.f32.gmra.mrb[30].mxu1 %vm5143_vm0, %v1612_v1 }
 0x4bf   :  { %v4103_v2 = vpop.f32.mrb[20].mxu1 }
 0x4c0   :  { %v4105_v6 = vpop.f32.mrb[21].mxu1 }
 0x4c3   :  { %v4107_v7 = vpop.f32.mrb[22].mxu1 }
 0x4c4   :  { %v4109_v8 = vpop.f32.mrb[23].mxu1 }
 0x4c7   :  { %v3452_v10 = vpop.f32.mrb[24].mxu1 }
 0x4c8   :  { %v2144_v11 = vadd.f32 1e-06, %v3452_v10  ;;  %v2102_v14 = vpop.f32.mrb[25].mxu1  ;;  %v2208_v13 = vmul.f32 %v3452_v10, %v3452_v10 }
 0x4c9   :  { %v2143_v15 = vadd.f32 1e-06, %v2102_v14  ;;  %v2207_v19 = vmul.f32 %v2102_v14, %v2102_v14 }
 0x4ca   :  { %3585 = vrcp.f32 %v2144_v11 }
 0x4cb   :  { %3587 = vrcp.f32 %v2143_v15  ;;  %v3455_v16 = vpop.f32.mrb[26].mxu1 }
 0x4cc   :  { %v2569_v17 = vadd.f32 1e-06, %v3455_v16  ;;  %v2112_v12 = vpop.f32.mrb[27].mxu1  ;;  %v2633_v9 = vmul.f32 %v3455_v16, %v3455_v16 }
 0x4cd   :  { %v2568_v18 = vadd.f32 1e-06, %v2112_v12  ;;  %v2632_v41 = vmul.f32 %v2112_v12, %v2112_v12 }
 0x4ce   :  { %3589 = vrcp.f32 %v2569_v17 }
 0x4cf   :  { %3591 = vrcp.f32 %v2568_v18  ;;  %v3458_v21 = vpop.f32.mrb[28].mxu1 }
 0x4d0   :  { %v2210_v24 = vmul.f32 %v3458_v21, %v3458_v21  ;;  %v2122_v28 = vpop.f32.mrb[29].mxu1  ;;  %v2142_v46 = vsub.f32 0.0, %v3458_v21 }
 0x4d1   :  { %v2209_v29 = vmul.f32 %v2122_v28, %v2122_v28  ;;  %v2141_v38 = vsub.f32 0.0, %v2122_v28 }
 0x4d2   :  { %v2212_v45 = vadd.f32 %v2210_v24, %v2208_v13 }
 0x4d3   :  { %v4111_v25 = vadd.f32 %v2209_v29, %v2207_v19  ;;  %v3461_v36 = vpop.f32.mrb[30].mxu1 }
 0x4d4   :  { %v3586_v37 = vpop.eup %3585  ;;  %3593 = vrsqrt.f32 %v2212_v45  ;;  %v2635_v39 = vmul.f32 %v3461_v36, %v3461_v36  ;;  %v2132_v5 = vpop.f32.mrb[31].mxu1  ;;  %v2567_v47 = vsub.f32 0.0, %v3461_v36  ;;  %vm2222_vm1 = vcmp.eq.f32.partialorder %v2212_v45, inf }
 0x4d5   :  { %v3588_v30 = vpop.eup %3587  ;;  %v4113_v42 = vmul.f32 %v3586_v37, %v2142_v46  ;;  %3595 = vrsqrt.f32 %v4111_v25  ;;  %v2634_v43 = vmul.f32 %v2132_v5, %v2132_v5  ;;  %v2566_v27 = vsub.f32 0.0, %v2132_v5 }
 0x4d6   :  { %v4116_v31 = vmul.f32 %v3588_v30, %v2141_v38  ;;  %v4118_v44 = vadd.f32 %v2635_v39, %v2633_v9  ;;  %vm2215_vm2 = vcmp.eq.f32.partialorder %v4111_v25, inf  ;;  %vm2217_vm3 = vcmp.eq.f32.partialorder %v4111_v25, 0.0 }
 0x4d7   :  { %v4121_v22 = vand.u32 2147483647, %v4113_v42  ;;  %v4123_v49 = vadd.f32 %v2634_v43, %v2632_v41  ;;  %v2218_v40 = vand.u32 2147483648, %v4111_v25  ;;  %vm2224_vm4 = vcmp.eq.f32.partialorder %v2212_v45, 0.0 }
 0x4d8   :  { %v3590_v61 = vpop.eup %3589  ;;  %v4126_v4 = vand.u32 2147483647, %v4116_v31  ;;  %3597 = vrsqrt.f32 %v4118_v44  ;;  %v2225_v50 = vand.u32 2147483648, %v2212_v45  ;;  %vm2647_vm7 = vcmp.eq.f32.partialorder %v4118_v44, inf }
 0x4d9   :  { %v3592_v26 = vpop.eup %3591  ;;  %v2166_v20 = vadd.f32 1.0, %v4121_v22  ;;  %v4130_v23 = vmul.f32 %v3590_v61, %v2567_v47  ;;  %3599 = vrsqrt.f32 %v4123_v49  ;;  %vm2640_vm5 = vcmp.eq.f32.partialorder %v4123_v49, inf }
 0x4da   :  { %v2165_v32 = vadd.f32 1.0, %v4126_v4  ;;  %v4134_v33 = vmul.f32 %v3592_v26, %v2566_v27  ;;  %vm2642_vm6 = vcmp.eq.f32.partialorder %v4123_v49, 0.0  ;;  %v2643_v53 = vand.u32 2147483648, %v4123_v49 }
 0x4db   :  { %3601 = vrcp.f32 %v2166_v20  ;;  %v4137_v34 = vand.u32 2147483647, %v4130_v23  ;;  %vm2649_vm8 = vcmp.eq.f32.partialorder %v4118_v44, 0.0  ;;  %v2650_v55 = vand.u32 2147483648, %v4118_v44 }
 0x4dc   :  { %3603 = vrcp.f32 %v2165_v32  ;;  %v4140_v35 = vand.u32 2147483647, %v4134_v33  ;;  %vm2151_vm9 = vcmp.gt.f32.partialorder %v4126_v4, 2.4142137  ;;  %vm2152_vm10 = vcmp.gt.f32.partialorder %v4121_v22, 2.4142137 }
 0x4dd   :  { %3605 = vrcp.f32 %v4126_v4  ;;  %v2591_v51 = vadd.f32 1.0, %v4137_v34  ;;  %vm2153_vm11 = vcmp.gt.f32.partialorder %v4126_v4, 0.41421357  ;;  %v3118_v14 = vadd.f32 -1.0, %v4126_v4  ;;  %vm2155_vm14 = vmxor %vm2151_vm9, %vm3677_vm13 }
 0x4de   :  { %v3594_v48 = vpop.eup %3593  ;;  %v2590_v56 = vadd.f32 1.0, %v4140_v35  ;;  %3607 = vrcp.f32 %v4121_v22  ;;  %v3119_v15 = vadd.f32 -1.0, %v4121_v22  ;;  %vm2154_vm12 = vcmp.gt.f32.partialorder %v4121_v22, 0.41421357  ;;  %vm4205_vm15 = vmxor %vm2152_vm10, %vm3677_vm13 }
 0x4df   :  { %v3596_v3 = vpop.eup %3595  ;;  %v2221_v52 = vmul.f32 %v3594_v48, %v2212_v45  ;;  %3609 = vrcp.f32 %v2591_v51 }
 0x4e0   :  { %v2214_v54 = vmul.f32 %v3596_v3, %v4111_v25 }
 0x4e1   :  { %v2223_v57 = vsel %vm2222_vm1, %v2212_v45, %v2221_v52  ;;  %vm4216_vm1 = vmand %vm2153_vm11, %vm2155_vm14 }
 0x4e2   :  { %v3598_v59 = vpop.eup %3597  ;;  %v2216_v60 = vsel %vm2215_vm2, %v4111_v25, %v2214_v54  ;;  %v2226_v58 = vsel %vm2224_vm4, %v2225_v50, %v2223_v57  ;;  %vm4227_vm2 = vmand %vm2154_vm12, %vm4205_vm15  ;;  %vm5141_vm4 = vcmp.gt.f32.partialorder %v4137_v34, 2.4142137 }
 0x4e3   :  { %v3600_v62 = vpop.eup %3599  ;;  %v2219_v63 = vsel %vm2217_vm3, %v2218_v40, %v2216_v60  ;;  %v4166_v0 = vadd.f32 1e-06, %v2226_v58  ;;  %v2646_v1 = vmul.f32 %v3598_v59, %v4118_v44  ;;  %vm5142_vm3 = vcmp.gt.f32.partialorder %v4140_v35, 2.4142137 }
 0x4e4   :  { %v4169_v10 = vadd.f32 1e-06, %v2219_v63  ;;  %v2639_v11 = vmul.f32 %v3600_v62, %v4123_v49  ;;  %v3678_v63 = vmov 0.0  }
 0x4e5   :  { %v3602_v16 = vpop.eup %3601  ;;  %3611 = vrcp.f32 %v4166_v0  ;;  %v2336_v17 = vsel %vm5143_vm0, %v4166_v0, inf  ;;  %v2349_v12 = vsel %vm5143_vm0, %v4166_v0, -inf  ;;  %v2648_v18 = vsel %vm2647_vm7, %v4118_v44, %v2646_v1 }
 0x4e6   :  { %v3604_v21 = vpop.eup %3603  ;;  %v2335_v13 = vsel %vm5143_vm0, %v4169_v10, inf  ;;  %3613 = vrcp.f32 %v4169_v10  ;;  %v2348_v24 = vsel %vm5143_vm0, %v4169_v10, -inf  ;;  %v2641_v28 = vsel %vm2640_vm5, %v4123_v49, %v2639_v11 }
 0x4e7   :  { %v2337_v19 = vmin.f32 %v2335_v13, %v2336_v17  ;;  %v2644_v29 = vsel %vm2642_vm6, %v2643_v53, %v2641_v28  ;;  %v2651_v45 = vsel %vm2649_vm8, %v2650_v55, %v2648_v18  ;;  %v3606_v46 = vpop.eup %3605  ;;  %v2169_v9 = vmul.f32 %v3604_v21, %v3118_v14  ;;  %vm4280_vm6 = vmxor %vm5142_vm3, %vm3677_vm13 }
 0x4e8   :  { %v4198_v25 = vadd.f32 1e-06, %v2644_v29  ;;  %v4200_v36 = vadd.f32 1e-06, %v2651_v45  ;;  %v2170_v38 = vmul.f32 %v3602_v16, %v3119_v15  ;;  %3615 = vrcp.f32 %v2590_v56  ;;  %v3608_v44 = vpop.eup %3607  ;;  %vm2581_vm8 = vmxor %vm5141_vm4, %vm3677_vm13 }
 0x4e9   :  { %2338 = vmin.xlane.f32.xlu1 %v2337_v19  ;;  %v2350_v39 = vmax.f32 %v2348_v24, %v2349_v12  ;;  %v2161_v43 = vsub.f32 0.0, %v3606_v46  ;;  %v2171_v27 = vsel %vm4216_vm1, %v2169_v9, %v4126_v4  ;;  %v2162_v20 = vsub.f32 0.0, %v3608_v44  ;;  %v3610_v48 = vpop.eup %3609 }
 0x4ea   :  { %3617 = vrcp.f32 %v4200_v36  ;;  %v2760_v5 = vsel %vm5143_vm0, %v4198_v25, inf  ;;  %v2761_v30 = vsel %vm5143_vm0, %v4200_v36, inf  ;;  %v2773_v49 = vsel %vm5143_vm0, %v4198_v25, -inf }
 0x4eb   :  { %v2762_v47 = vmin.f32 %v2760_v5, %v2761_v30  ;;  %3619 = vrcp.f32 %v4198_v25  ;;  %v2774_v26 = vsel %vm5143_vm0, %v4200_v36, -inf  ;;  %v2172_v32 = vsel %vm4227_vm2, %v2170_v38, %v4121_v22 }
 0x4ec   :  { %v4241_v40 = vsel %vm2151_vm9, %v2161_v43, %v2171_v27  ;;  %v4247_v3 = vsel %vm2152_vm10, %v2162_v20, %v2172_v32  ;;  %3621 = vrcp.f32 %v4140_v35  ;;  %v2775_v52 = vmax.f32 %v2773_v49, %v2774_v26 }
 0x4ed   :  { %2351 = vmax.xlane.f32.xlu1 %v2350_v39  ;;  %2763 = vmin.xlane.f32.xlu0 %v2762_v47  ;;  %v2179_v50 = vmul.f32 %v4241_v40, %v4241_v40  ;;  %v2180_v53 = vmul.f32 %v4247_v3, %v4247_v3  ;;  %3623 = vrcp.f32 %v4137_v34  ;;  %vm2578_vm5 = vcmp.gt.f32.partialorder %v4140_v35, 0.41421357 }
 0x4ee   :  { %v3134_v15 = vadd.f32 -1.0, %v4140_v35  ;;  %v3135_v18 = vadd.f32 -1.0, %v4137_v34  ;;  %vm2579_vm7 = vcmp.gt.f32.partialorder %v4137_v34, 0.41421357  ;;  %v2176_v38 = vsel %vm4227_vm2, 0.7853982, %v3678_v63  ;;  %vm4301_vm11 = vmand %vm2578_vm5, %vm4280_vm6 }
 0x4ef   :  { %v3612_v51 = vpop.eup %3611  ;;  %v2181_v54 = vmul.f32 0.080537446, %v2179_v50  ;;  %v2182_v57 = vmul.f32 0.080537446, %v2180_v53  ;;  %vm4318_vm12 = vmand %vm2579_vm7, %vm2581_vm8  ;;  %v2178_v27 = vsel %vm2152_vm10, 1.5707964, %v2176_v38 }
 0x4f0   :  { %v3614_v55 = vpop.eup %3613  ;;  %v4253_v56 = vmul.f32 %v3612_v51, %v4103_v2  ;;  %v2175_v2 = vsel %vm4216_vm1, 0.7853982, %v3678_v63  ;;  %v2595_v9 = vmul.f32 %v3610_v48, %v3135_v18  ;;  %vm2202_vm2 = vcmp.lt.f32.partialorder %v4113_v42, 0.0 }
 0x4f1   :  { %2776 = vmax.xlane.f32.xlu1 %v2775_v52  ;;  %v3120_v59 = vadd.f32 -0.13877685, %v2181_v54  ;;  %v4256_v60 = vmul.f32 %v3614_v55, %v4105_v6  ;;  %v3121_v1 = vadd.f32 -0.13877685, %v2182_v57 }
 0x4f2   :  { %v4260_v58 = vand.u32 2147483647, %v4253_v56  ;;  %v3616_v62 = vpop.eup %3615  ;;  %v2597_v26 = vsel %vm4318_vm12, %v2595_v9, %v4137_v34 }
 0x4f3   :  { %v2185_v11 = vmul.f32 %v3120_v59, %v2179_v50  ;;  %v4267_v14 = vand.u32 2147483647, %v4256_v60  ;;  %v2186_v17 = vmul.f32 %v3121_v1, %v2180_v53  ;;  %v2594_v28 = vmul.f32 %v3616_v62, %v3134_v15 }
 0x4f4   :  { %v3618_v6 = vpop.eup %3617  ;;  %3625 = vrcp.f32 %v4260_v58  ;;  %v2250_v13 = vadd.f32 1.0, %v4260_v58  ;;  %vm2236_vm14 = vcmp.gt.f32.partialorder %v4260_v58, 2.4142137  ;;  %vm2238_vm15 = vcmp.gt.f32.partialorder %v4260_v58, 0.41421357 }
 0x4f5   :  { %v3620_v16 = vpop.eup %3619  ;;  %v2187_v12 = vadd.f32 0.19977711, %v2185_v11  ;;  %3627 = vrcp.f32 %v4267_v14  ;;  %v2249_v21 = vadd.f32 1.0, %v4267_v14  ;;  %v2188_v19 = vadd.f32 0.19977711, %v2186_v17  ;;  %vm4360_vm6 = vmxor %vm2236_vm14, %vm3677_vm13 }
 0x4f6   :  { %v4285_v45 = vmul.f32 %v3620_v16, %v4109_v8  ;;  %v4288_v46 = vmul.f32 %v3618_v6, %v4107_v7  ;;  %v3622_v37 = vpop.eup %3621  ;;  %v2177_v8 = vsel %vm2151_vm9, 1.5707964, %v2175_v2  ;;  %v2596_v41 = vsel %vm4301_vm11, %v2594_v28, %v4140_v35 }
 0x4f7   :  { %v2189_v29 = vmul.f32 %v2187_v12, %v2179_v50  ;;  %3629 = vrcp.f32 %v2249_v21  ;;  %v2190_v39 = vmul.f32 %v2188_v19, %v2180_v53  ;;  %v3624_v43 = vpop.eup %3623  ;;  %v2586_v4 = vsub.f32 0.0, %v3622_v37 }
 0x4f8   :  { %3631 = vrcp.f32 %v2250_v13  ;;  %v4308_v30 = vand.u32 2147483647, %v4285_v45  ;;  %v4314_v49 = vand.u32 2147483647, %v4288_v46  ;;  %vm2201_vm9 = vcmp.lt.f32.partialorder %v4116_v31, 0.0 }
 0x4f9   :  { %v3122_v5 = vadd.f32 -0.3333295, %v2189_v29  ;;  %v3123_v44 = vadd.f32 -0.3333295, %v2190_v39  ;;  %vm2235_vm1 = vcmp.gt.f32.partialorder %v4267_v14, 2.4142137  ;;  %v4334_v48 = vsel %vm5142_vm3, %v2586_v4, %v2596_v41  ;;  %vm4388_vm3 = vmand %vm2238_vm15, %vm4360_vm6 }
 0x4fa   :  { %3633 = vrcp.f32 %v4308_v30  ;;  %v2674_v22 = vadd.f32 1.0, %v4308_v30  ;;  %v2587_v51 = vsub.f32 0.0, %v3624_v43  ;;  %v3125_v55 = vadd.f32 -1.0, %v4260_v58  ;;  %vm2239_vm5 = vmxor %vm2235_vm1, %vm3677_vm13 }
 0x4fb   :  { %v2193_v47 = vmul.f32 %v3122_v5, %v2179_v50  ;;  %v2194_v20 = vmul.f32 %v3123_v44, %v2180_v53  ;;  %v2675_v50 = vadd.f32 1.0, %v4314_v49  ;;  %3635 = vrcp.f32 %v4314_v49 }
 0x4fc   :  { %vm2237_vm10 = vcmp.gt.f32.partialorder %v4267_v14, 0.41421357  ;;  %3637 = vrcp.f32 %v2674_v22  ;;  %v4346_v59 = vsel %vm5141_vm4, %v2587_v51, %v2597_v26  ;;  %v4350_v62 = vmul.f32 %v4334_v48, %v4334_v48 }
 0x4fd   :  { %v2195_v32 = vmul.f32 %v2193_v47, %v4241_v40  ;;  %v2196_v53 = vmul.f32 %v2194_v20, %v4247_v3  ;;  %v3124_v11 = vadd.f32 -1.0, %v4267_v14  ;;  %3639 = vrcp.f32 %v2675_v50  ;;  %vm4375_vm4 = vmand %vm2237_vm10, %vm2239_vm5 }
 0x4fe   :  { %v3626_v52 = vpop.eup %3625  ;;  %vm2660_vm7 = vcmp.gt.f32.partialorder %v4308_v30, 2.4142137  ;;  %vm2662_vm8 = vcmp.gt.f32.partialorder %v4308_v30, 0.41421357  ;;  %v2606_v16 = vmul.f32 0.080537446, %v4350_v62 }
 0x4ff   :  { %v2197_v54 = vadd.f32 %v2195_v32, %v2177_v8  ;;  %v3628_v57 = vpop.eup %3627  ;;  %v2198_v2 = vadd.f32 %v2196_v53, %v2178_v27  ;;  %v3140_v13 = vadd.f32 -1.0, %v4308_v30  ;;  %v2246_v19 = vsub.f32 0.0, %v3626_v52 }
 0x500   :  { %v2245_v28 = vsub.f32 0.0, %v3628_v57  ;;  %v3136_v5 = vadd.f32 -0.13877685, %v2606_v16  ;;  %vm2663_vm15 = vcmp.gt.f32.partialorder %v4314_v49, 0.41421357  ;;  %v3141_v57 = vadd.f32 -1.0, %v4314_v49 }
 0x501   :  { %v2199_v1 = vadd.f32 %v2197_v54, %v4241_v40  ;;  %v3630_v6 = vpop.eup %3629  ;;  %v4368_v40 = vmul.f32 %v4346_v59, %v4346_v59  ;;  %v2200_v12 = vadd.f32 %v2198_v2, %v4247_v3  ;;  %vm2627_vm6 = vcmp.lt.f32.partialorder %v4130_v23, 0.0 }
 0x502   :  { %v3632_v17 = vpop.eup %3631  ;;  %v2253_v21 = vmul.f32 %v3630_v6, %v3124_v11  ;;  %v2610_v2 = vmul.f32 %v3136_v5, %v4350_v62 }
 0x503   :  { %v2203_v18 = vsub.f32 0.0, %v2199_v1  ;;  %v2254_v29 = vmul.f32 %v3632_v17, %v3125_v55  ;;  %v2607_v37 = vmul.f32 0.080537446, %v4368_v40  ;;  %v2204_v9 = vsub.f32 0.0, %v2200_v12 }
 0x504   :  { %v2255_v39 = vsel %vm4375_vm4, %v2253_v21, %v4267_v14  ;;  %v3634_v27 = vpop.eup %3633  ;;  %v2612_v21 = vadd.f32 0.19977711, %v2610_v2 }
 0x505   :  { %v4382_v38 = vsel %vm2201_vm9, %v2203_v18, %v2199_v1  ;;  %v2256_v41 = vsel %vm4388_vm3, %v2254_v29, %v4260_v58  ;;  %v4404_v43 = vsel %vm2235_vm1, %v2245_v28, %v2255_v39  ;;  %v4408_v44 = vsel %vm2202_vm2, %v2204_v9, %v2200_v12  ;;  %v3636_v22 = vpop.eup %3635  ;;  %vm2664_vm2 = vmxor %vm2660_vm7, %vm3677_vm13 }
 0x506   :  { %v2392_v8 = vsel %vm5143_vm0, %v4382_v38, -inf  ;;  %v2379_v31 = vsel %vm5143_vm0, %v4382_v38, inf  ;;  %v4412_v47 = vsel %vm2236_vm14, %v2246_v19, %v2256_v41  ;;  %v2263_v4 = vmul.f32 %v4404_v43, %v4404_v43  ;;  %v3638_v53 = vpop.eup %3637  ;;  %vm4439_vm5 = vmand %vm2662_vm8, %vm2664_vm2 }
 0x507   :  { %vm2661_vm9 = vcmp.gt.f32.partialorder %v4314_v49, 2.4142137  ;;  %v2393_v26 = vsel %vm5143_vm0, %v4408_v44, -inf  ;;  %v2380_v20 = vsel %vm5143_vm0, %v4408_v44, inf  ;;  %v2264_v42 = vmul.f32 %v4412_v47, %v4412_v47  ;;  %v3640_v11 = vpop.eup %3639 }
 0x508   :  { %v3137_v32 = vadd.f32 -0.13877685, %v2607_v37  ;;  %v2394_v50 = vmax.f32 %v2392_v8, %v2393_v26  ;;  %v2381_v51 = vmin.f32 %v2379_v31, %v2380_v20  ;;  %v2265_v52 = vmul.f32 0.080537446, %v2263_v4  ;;  %vm4430_vm10 = vmxor %vm2661_vm9, %vm3677_vm13 }
 0x509   :  { %v2266_v54 = vmul.f32 0.080537446, %v2264_v42  ;;  %v2670_v15 = vsub.f32 0.0, %v3634_v27  ;;  %v2678_v16 = vmul.f32 %v3638_v53, %v3140_v13  ;;  %v2679_v18 = vmul.f32 %v3640_v11, %v3141_v57  ;;  %vm4447_vm13 = vmand %vm2663_vm15, %vm4430_vm10 }
 0x50a   :  { %v2611_v1 = vmul.f32 %v3137_v32, %v4368_v40  ;;  %2395 = vmax.xlane.f32.xlu1 %v2394_v50  ;;  %2382 = vmin.xlane.f32.xlu0 %v2381_v51  ;;  %v3126_v6 = vadd.f32 -0.13877685, %v2265_v52  ;;  %v2671_v13 = vsub.f32 0.0, %v3636_v22  ;;  %v2614_v8 = vmul.f32 %v2612_v21, %v4350_v62 }
 0x50b   :  { %v3127_v17 = vadd.f32 -0.13877685, %v2266_v54  ;;  %v2680_v37 = vsel %vm4439_vm5, %v2678_v16, %v4308_v30  ;;  %v2681_v39 = vsel %vm4447_vm13, %v2679_v18, %v4314_v49  ;;  %v2600_v18 = vsel %vm4301_vm11, 0.7853982, %v3678_v63 }
 0x50c   :  { %v2613_v28 = vadd.f32 0.19977711, %v2611_v1  ;;  %v2269_v19 = vmul.f32 %v3126_v6, %v2263_v4  ;;  %v4459_v5 = vsel %vm2660_vm7, %v2670_v15, %v2680_v37  ;;  %v4464_v41 = vsel %vm2661_vm9, %v2671_v13, %v2681_v39 }
 0x50d   :  { %v2270_v9 = vmul.f32 %v3127_v17, %v2264_v42  ;;  %v2688_v27 = vmul.f32 %v4459_v5, %v4459_v5  ;;  %v2689_v32 = vmul.f32 %v4464_v41, %v4464_v41  ;;  %v3138_v22 = vadd.f32 -0.3333295, %v2614_v8 }
 0x50e   :  { %v2271_v31 = vadd.f32 0.19977711, %v2269_v19  ;;  %v2615_v26 = vmul.f32 %v2613_v28, %v4368_v40  ;;  %v2259_v15 = vsel %vm4375_vm4, 0.7853982, %v3678_v63  ;;  %v2260_v21 = vsel %vm4388_vm3, 0.7853982, %v3678_v63 }
 0x50f   :  { %v2272_v20 = vadd.f32 0.19977711, %v2270_v9  ;;  %v2690_v51 = vmul.f32 0.080537446, %v2688_v27  ;;  %v2691_v54 = vmul.f32 0.080537446, %v2689_v32  ;;  %v2618_v2 = vmul.f32 %v3138_v22, %v4350_v62 }
 0x510   :  { %v2273_v50 = vmul.f32 %v2271_v31, %v2263_v4  ;;  %v3139_v52 = vadd.f32 -0.3333295, %v2615_v26  ;;  %v2261_v7 = vsel %vm2235_vm1, 1.5707964, %v2259_v15  ;;  %vm5185_vm3 = vcmp.gt.f32.partialorder %v4140_v35, 2.4142137 }
 0x511   :  { %v2274_v53 = vmul.f32 %v2272_v20, %v2264_v42  ;;  %v3142_v57 = vadd.f32 -0.13877685, %v2690_v51  ;;  %v3143_v6 = vadd.f32 -0.13877685, %v2691_v54  ;;  %v2602_v61 = vsel %vm5185_vm3, 1.5707964, %v2600_v18 }
 0x512   :  { %v3128_v55 = vadd.f32 -0.3333295, %v2273_v50  ;;  %v2619_v1 = vmul.f32 %v3139_v52, %v4368_v40  ;;  %v2601_v40 = vsel %vm4318_vm12, 0.7853982, %v3678_v63  ;;  %v2684_v31 = vsel %vm4439_vm5, 0.7853982, %v3678_v63 }
 0x513   :  { %v3129_v11 = vadd.f32 -0.3333295, %v2274_v53  ;;  %v2694_v17 = vmul.f32 %v3142_v57, %v2688_v27  ;;  %v2695_v62 = vmul.f32 %v3143_v6, %v2689_v32  ;;  %vm5186_vm4 = vcmp.gt.f32.partialorder %v4137_v34, 2.4142137 }
 0x514   :  { %v2277_v16 = vmul.f32 %v3128_v55, %v2263_v4  ;;  %v2620_v4 = vmul.f32 %v2618_v2, %v4334_v48  ;;  %v2621_v13 = vmul.f32 %v2619_v1, %v4346_v59  ;;  %v2603_v14 = vsel %vm5186_vm4, 1.5707964, %v2601_v40 }
 0x515   :  { %v2278_v28 = vmul.f32 %v3129_v11, %v2264_v42  ;;  %v2696_v24 = vadd.f32 0.19977711, %v2694_v17  ;;  %v2697_v3 = vadd.f32 0.19977711, %v2695_v62  ;;  %v2262_v42 = vsel %vm2236_vm14, 1.5707964, %v2260_v21 }
 0x516   :  { %v2279_v19 = vmul.f32 %v2277_v16, %v4404_v43  ;;  %v2622_v50 = vadd.f32 %v2620_v4, %v2602_v61  ;;  %v2623_v58 = vadd.f32 %v2621_v13, %v2603_v14  ;;  %vm2285_vm11 = vcmp.lt.f32.partialorder %v4256_v60, 0.0 }
 0x517   :  { %v2280_v37 = vmul.f32 %v2278_v28, %v4412_v47  ;;  %v2698_v39 = vmul.f32 %v2696_v24, %v2688_v27  ;;  %v2699_v26 = vmul.f32 %v2697_v3, %v2689_v32  ;;  %vm2286_vm12 = vcmp.lt.f32.partialorder %v4253_v56, 0.0 }
 0x518   :  { %v2281_v9 = vadd.f32 %v2279_v19, %v2261_v7  ;;  %v2685_v34 = vsel %vm4447_vm13, 0.7853982, %v3678_v63  ;;  %v2624_v57 = vadd.f32 %v2622_v50, %v4334_v48  ;;  %v2625_v60 = vadd.f32 %v2623_v58, %v4346_v59 }
 0x519   :  { %v2282_v8 = vadd.f32 %v2280_v37, %v2262_v42  ;;  %v3144_v22 = vadd.f32 -0.3333295, %v2698_v39  ;;  %v3145_v52 = vadd.f32 -0.3333295, %v2699_v26  ;;  %v2687_v48 = vsel %vm2661_vm9, 1.5707964, %v2685_v34 }
 0x51a   :  { %v2283_v20 = vadd.f32 %v2281_v9, %v4404_v43  ;;  %v2686_v43 = vsel %vm2660_vm7, 1.5707964, %v2684_v31  ;;  %v2628_v15 = vsub.f32 0.0, %v2624_v57  ;;  %v2629_v17 = vsub.f32 0.0, %v2625_v60 }
 0x51b   :  { %v2284_v51 = vadd.f32 %v2282_v8, %v4412_v47  ;;  %v2702_v53 = vmul.f32 %v3144_v22, %v2688_v27  ;;  %v2703_v54 = vmul.f32 %v3145_v52, %v2689_v32  ;;  %vm2626_vm14 = vcmp.lt.f32.partialorder %v4134_v33, 0.0 }
 0x51c   :  { %v2287_v35 = vsub.f32 0.0, %v2283_v20  ;;  %vm2710_vm1 = vcmp.lt.f32.partialorder %v4285_v45, 0.0  ;;  %vm2711_vm7 = vcmp.lt.f32.partialorder %v4288_v46, 0.0  ;;  %v4535_v28 = vsel %vm2626_vm14, %v2628_v15, %v2624_v57 }
 0x51d   :  { %v2288_v12 = vsub.f32 0.0, %v2284_v51  ;;  %v2704_v47 = vmul.f32 %v2702_v53, %v4459_v5  ;;  %v2705_v30 = vmul.f32 %v2703_v54, %v4464_v41  ;;  %v4543_v33 = vsel %vm2627_vm6, %v2629_v17, %v2625_v60 }
 0x51e   :  { %v4509_v55 = vsel %vm2285_vm11, %v2287_v35, %v2283_v20  ;;  %v2817_v19 = vsel %vm5143_vm0, %v4535_v28, -inf  ;;  %v2818_v24 = vsel %vm5143_vm0, %v4543_v33, -inf  ;;  %v2804_v4 = vsel %vm5143_vm0, %v4535_v28, inf }
 0x51f   :  { %v4514_v56 = vsel %vm2286_vm12, %v2288_v12, %v2284_v51  ;;  %v2304_v27 = vsel %vm5143_vm0, %v4509_v55, -inf  ;;  %v2291_v63 = vsel %vm5143_vm0, %v4509_v55, inf  ;;  %v2706_v59 = vadd.f32 %v2704_v47, %v2686_v43 }
 0x520   :  { %v2305_v29 = vsel %vm5143_vm0, %v4514_v56, -inf  ;;  %v2292_v32 = vsel %vm5143_vm0, %v4514_v56, inf  ;;  %v2707_v11 = vadd.f32 %v2705_v30, %v2687_v48  ;;  %v2805_v13 = vsel %vm5143_vm0, %v4543_v33, inf }
 0x521   :  { %v2306_v2 = vmax.f32 %v2304_v27, %v2305_v29  ;;  %v2293_v1 = vmin.f32 %v2291_v63, %v2292_v32  ;;  %v2708_v6 = vadd.f32 %v2706_v59, %v4459_v5  ;;  %v2819_v7 = vmax.f32 %v2817_v19, %v2818_v24 }
 0x522   :  { %v2709_v16 = vadd.f32 %v2707_v11, %v4464_v41  ;;  %v2806_v37 = vmin.f32 %v2804_v4, %v2805_v13 }
 0x523   :  { %2307 = vmax.xlane.f32.xlu1 %v2306_v2  ;;  %2294 = vmin.xlane.f32.xlu0 %v2293_v1  ;;  %v2712_v18 = vsub.f32 0.0, %v2708_v6 }
 0x524   :  { %v2713_v21 = vsub.f32 0.0, %v2709_v16 }
 0x525   :  { %v4533_v49 = vsel %vm2710_vm1, %v2712_v18, %v2708_v6 }
 0x526   :  { %v4537_v5 = vsel %vm2711_vm7, %v2713_v21, %v2709_v16  ;;  %v2729_v41 = vsel %vm5143_vm0, %v4533_v49, -inf  ;;  %v2716_v62 = vsel %vm5143_vm0, %v4533_v49, inf }
 0x527   :  { %v2730_v45 = vsel %vm5143_vm0, %v4537_v5, -inf  ;;  %v2717_v23 = vsel %vm5143_vm0, %v4537_v5, inf }
 0x528   :  { %v2731_v46 = vmax.f32 %v2729_v41, %v2730_v45  ;;  %v2718_v40 = vmin.f32 %v2716_v62, %v2717_v23 }
 0x52a   :  { %2732 = vmax.xlane.f32.xlu1 %v2731_v46  ;;  %2719 = vmin.xlane.f32.xlu0 %v2718_v40 }
 0x52e   :  { %2820 = vmax.xlane.f32.xlu1 %v2819_v7  ;;  %2807 = vmin.xlane.f32.xlu0 %v2806_v37 }
 0x576   :  { %v2339_v3 = vpop.xlane.xlu1 %2338 }
 0x577   :  { %v2340_v8 = vrot.slane %v2339_v3, 4 }
 0x579   :  { %v2341_v20 = vmin.f32 %v2339_v3, %v2340_v8 }
 0x57a   :  { %v2352_v42 = vpop.xlane.xlu1 %2351  ;;  %v2764_v9 = vpop.xlane.xlu0 %2763 }
 0x57b   :  { %v2353_v26 = vrot.slane %v2352_v42, 4  ;;  %v2342_v51 = vrot.slane %v2341_v20, 2  ;;  %v2765_v52 = vrot.slane %v2764_v9, 4 }
 0x57d   :  { %v2354_v50 = vmax.f32 %v2352_v42, %v2353_v26  ;;  %v2766_v63 = vmin.f32 %v2764_v9, %v2765_v52  ;;  %v2343_v29 = vmin.f32 %v2341_v20, %v2342_v51 }
 0x57e   :  { %v2777_v39 = vpop.xlane.xlu1 %2776 }
 0x57f   :  { %v2355_v54 = vrot.slane %v2354_v50, 2  ;;  %v2778_v47 = vrot.slane %v2777_v39, 4  ;;  %v2767_v15 = vrot.slane %v2766_v63, 2  ;;  %v2344_v18 = vrot.slane %v2343_v29, 1 }
 0x581   :  { %v2779_v59 = vmax.f32 %v2777_v39, %v2778_v47  ;;  %v2356_v2 = vmax.f32 %v2354_v50, %v2355_v54  ;;  %v2345_v42 = vmin.f32 %v2343_v29, %v2344_v18  ;;  %v2768_v39 = vmin.f32 %v2766_v63, %v2767_v15 }
 0x583   :  { %v2780_v46 = vrot.slane %v2779_v59, 2  ;;  %v2357_v40 = vrot.slane %v2356_v2, 1 }
 0x597   :  { %v2383_v61 = vpop.xlane.xlu0 %2382  ;;  %v2396_v31 = vpop.xlane.xlu1 %2395 }
 0x598   :  { %v2384_v14 = vrot.slane %v2383_v61, 4  ;;  %v2397_v22 = vrot.slane %v2396_v31, 4 }
 0x59a   :  { %v2385_v58 = vmin.f32 %v2383_v61, %v2384_v14  ;;  %v2398_v35 = vmax.f32 %v2396_v31, %v2397_v22  ;;  %v2358_v14 = vmax.f32 %v2356_v2, %v2357_v40  ;;  %v2781_v22 = vmax.f32 %v2779_v59, %v2780_v46 }
 0x59c   :  { %v2386_v57 = vrot.slane %v2385_v58, 2  ;;  %v2399_v30 = vrot.slane %v2398_v35, 2  ;;  %v2782_v47 = vrot.slane %v2781_v22, 1 }
 0x59e   :  { %v2387_v1 = vmin.f32 %v2385_v58, %v2386_v57  ;;  %v2400_v21 = vmax.f32 %v2398_v35, %v2399_v30 }
 0x5a0   :  { %v2388_v19 = vrot.slane %v2387_v1, 1  ;;  %v2401_v9 = vrot.slane %v2400_v21, 1 }
 0x5a2   :  { %v2389_v20 = vmin.f32 %v2387_v1, %v2388_v19  ;;  %v2402_v35 = vmax.f32 %v2400_v21, %v2401_v9 }
 0x5b0   :  { %v2295_v53 = vpop.xlane.xlu0 %2294  ;;  %v2308_v12 = vpop.xlane.xlu1 %2307 }
 0x5b1   :  { %v2296_v34 = vrot.slane %v2295_v53, 4  ;;  %v2309_v43 = vrot.slane %v2308_v12, 4 }
 0x5b3   :  { %v2297_v60 = vmin.f32 %v2295_v53, %v2296_v34  ;;  %v2310_v27 = vmax.f32 %v2308_v12, %v2309_v43  ;;  %v2769_v53 = vrot.slane %v2768_v39, 1 }
 0x5b5   :  { %v2298_v32 = vrot.slane %v2297_v60, 2  ;;  %v2311_v48 = vrot.slane %v2310_v27, 2  ;;  %v2770_v30 = vmin.f32 %v2768_v39, %v2769_v53 }
 0x5b7   :  { %v2299_v11 = vmin.f32 %v2297_v60, %v2298_v32  ;;  %v2312_v6 = vmax.f32 %v2310_v27, %v2311_v48  ;;  %v2720_v16 = vpop.xlane.xlu0 %2719  ;;  %v2733_v17 = vpop.xlane.xlu1 %2732  ;;  %v2783_v48 = vmax.f32 %v2781_v22, %v2782_v47 }
 0x5b8   :  { %v2721_v41 = vrot.slane %v2720_v16, 4  ;;  %v2734_v62 = vrot.slane %v2733_v17, 4 }
 0x5b9   :  { %v2300_v45 = vrot.slane %v2299_v11, 1  ;;  %v2313_v23 = vrot.slane %v2312_v6, 1 }
 0x5ba   :  { %v2722_v24 = vmin.f32 %v2720_v16, %v2721_v41  ;;  %v2735_v4 = vmax.f32 %v2733_v17, %v2734_v62 }
 0x5bb   :  { %v2301_v13 = vmin.f32 %v2299_v11, %v2300_v45  ;;  %v2314_v7 = vmax.f32 %v2312_v6, %v2313_v23  ;;  %v2808_v37 = vpop.xlane.xlu0 %2807  ;;  %v2821_v3 = vpop.xlane.xlu1 %2820 }
 0x5bc   :  { %v2723_v61 = vrot.slane %v2722_v24, 2  ;;  %v2736_v8 = vrot.slane %v2735_v4, 2  ;;  %v2809_v31 = vrot.slane %v2808_v37, 4  ;;  %v2822_v26 = vrot.slane %v2821_v3, 4 }
 0x5bd   :  { %3540 = vpush %v2301_v13 }
 0x5be   :  { %3542 = vpush %v2314_v7  ;;  %v2810_v50 = vmin.f32 %v2808_v37, %v2809_v31  ;;  %v2823_v58 = vmax.f32 %v2821_v3, %v2822_v26  ;;  %v2724_v51 = vmin.f32 %v2722_v24, %v2723_v61  ;;  %v2737_v52 = vmax.f32 %v2735_v4, %v2736_v8 }
 0x5bf   :  { %3544 = vpush %v2345_v42 }
 0x5c0   :  { %3546 = vpush %v2358_v14  ;;  %v2811_v12 = vrot.slane %v2810_v50, 2  ;;  %v2824_v34 = vrot.slane %v2823_v58, 2  ;;  %v2725_v43 = vrot.slane %v2724_v51, 1  ;;  %v2738_v54 = vrot.slane %v2737_v52, 1 }
 0x5c1   :  { %3548 = vpush %v2389_v20 }
 0x5c2   :  { %3550 = vpush %v2402_v35  ;;  %v2812_v57 = vmin.f32 %v2810_v50, %v2811_v12  ;;  %v2825_v60 = vmax.f32 %v2823_v58, %v2824_v34  ;;  %v2726_v27 = vmin.f32 %v2724_v51, %v2725_v43  ;;  %v2739_v63 = vmax.f32 %v2737_v52, %v2738_v54 }
 0x5c4   :  { %3560 = vpush %v2726_v27  ;;  %v2813_v29 = vrot.slane %v2812_v57, 1  ;;  %v2826_v32 = vrot.slane %v2825_v60, 1 }
 0x5c5   :  { %3562 = vpush %v2739_v63 }
 0x5c6   :  { %3564 = vpush %v2770_v30  ;;  %v2814_v59 = vmin.f32 %v2812_v57, %v2813_v29  ;;  %v2827_v2 = vmax.f32 %v2825_v60, %v2826_v32 }
 0x5c7   :  { %3566 = vpush %v2783_v48 }
 0x5c8   :  { %3568 = vpush %v2814_v59 }
 0x5c9   :  { %3570 = vpush %v2827_v2 }
 0x5ee   :  { %s3541_s5 = spop %3540 }
 0x5ef   :  { %v2303_v1 = vstv %s3541_s5  ;;  %s3543_s7 = spop %3542 }
 0x5f0   :  { %v2316_v11 = vstv %s3543_s7  ;;  %s3545_s22 = spop %3544  ;;  %v2317_v19 = vsub.f32 %v4509_v55, %v2303_v1  ;;  %v2318_v24 = vsub.f32 %v4514_v56, %v2303_v1 }
 0x5f1   :  { %v2319_v6 = vsub.f32 %v2316_v11, %v2303_v1  ;;  %v2347_v15 = vstv %s3545_s22  ;;  %s3547_s23 = spop %3546 }
 0x5f2   :  { %v2360_v16 = vstv %s3547_s23  ;;  %s3549_s2 = spop %3548  ;;  %v2361_v4 = vsub.f32 %v4169_v10, %v2347_v15  ;;  %v2362_v13 = vsub.f32 %v4166_v0, %v2347_v15 }
 0x5f3   :  { %3641 = vrcp.f32 %v2319_v6  ;;  %v2363_v17 = vsub.f32 %v2360_v16, %v2347_v15  ;;  %v2391_v18 = vstv %s3549_s2  ;;  %s3551_s24 = spop %3550 }
 0x5f4   :  { %v2404_v21 = vstv %s3551_s24  ;;  %v2405_v37 = vsub.f32 %v4382_v38, %v2391_v18  ;;  %v2406_v3 = vsub.f32 %v4408_v44, %v2391_v18 }
 0x5f5   :  { %3643 = vrcp.f32 %v2363_v17  ;;  %v2407_v41 = vsub.f32 %v2404_v21, %v2391_v18  ;;  %s3561_s0 = spop %3560 }
 0x5f6   :  { %v4557_v62 = vstv %s3561_s0  ;;  %s3563_s25 = spop %3562 }
 0x5f7   :  { %3645 = vrcp.f32 %v2407_v41  ;;  %v2741_v45 = vstv %s3563_s25  ;;  %s3565_s26 = spop %3564  ;;  %v2742_v56 = vsub.f32 %v4533_v49, %v4557_v62  ;;  %v2743_v0 = vsub.f32 %v4537_v5, %v4557_v62 }
 0x5f8   :  { %v2744_v23 = vsub.f32 %v2741_v45, %v4557_v62  ;;  %s3567_s27 = spop %3566  ;;  %v4560_v46 = vstv %s3565_s26 }
 0x5f9   :  { %v2785_v40 = vstv %s3567_s27  ;;  %s3569_s28 = spop %3568  ;;  %v2786_v10 = vsub.f32 %v4198_v25, %v4560_v46  ;;  %v2787_v38 = vsub.f32 %v4200_v36, %v4560_v46 }
 0x5fa   :  { %s3571_s29 = spop %3570  ;;  %3647 = vrcp.f32 %v2744_v23  ;;  %v2788_v42 = vsub.f32 %v2785_v40, %v4560_v46  ;;  %v4569_v61 = vstv %s3569_s28 }
 0x5fb   :  { %v2829_v8 = vstv %s3571_s29 }
 0x5fc   :  { %3649 = vrcp.f32 %v2788_v42  ;;  %v2832_v22 = vsub.f32 %v2829_v8, %v4569_v61 }
 0x5fd   :  { %v3642_v7 = vpop.eup %3641 }
 0x5fe   :  { %v2321_v9 = vmul.f32 %v3642_v7, %v2317_v19  ;;  %v2322_v39 = vmul.f32 %v3642_v7, %v2318_v24  ;;  %3651 = vrcp.f32 %v2832_v22 }
 0x5ff   :  { %v3644_v55 = vpop.eup %3643 }
 0x600   :  { %vm2323_vm8 = vcmp.ne.f32.partialorder %v2321_v9, %v2321_v9  ;;  %vm2324_vm9 = vcmp.ne.f32.partialorder %v2322_v39, %v2322_v39  ;;  %v2365_v44 = vmul.f32 %v3644_v55, %v2361_v4  ;;  %v2366_v31 = vmul.f32 %v3644_v55, %v2362_v13 }
 0x601   :  { %v3646_v26 = vpop.eup %3645  ;;  %v2325_v14 = vsel %vm2323_vm8, 1e-05, %v2321_v9  ;;  %v2326_v20 = vsel %vm2324_vm9, 1e-05, %v2322_v39 }
 0x602   :  { %vm2327_vm15 = vcmp.eq.f32.partialorder %v2325_v14, inf  ;;  %vm2328_vm2 = vcmp.eq.f32.partialorder %v2326_v20, inf  ;;  %vm2367_vm10 = vcmp.ne.f32.partialorder %v2365_v44, %v2365_v44  ;;  %vm2368_vm5 = vcmp.ne.f32.partialorder %v2366_v31, %v2366_v31 }
 0x603   :  { %v2329_v49 = vsel %vm2327_vm15, 3.4028235e+38, %v2325_v14  ;;  %v2330_v50 = vsel %vm2328_vm2, 3.4028235e+38, %v2326_v20  ;;  %v2369_v58 = vsel %vm2367_vm10, 1e-05, %v2365_v44  ;;  %v2409_v51 = vmul.f32 %v3646_v26, %v2405_v37 }
 0x604   :  { %vm2331_vm13 = vcmp.eq.f32.partialorder %v2329_v49, -inf  ;;  %vm2332_vm3 = vcmp.eq.f32.partialorder %v2330_v50, -inf  ;;  %v2370_v52 = vsel %vm2368_vm5, 1e-05, %v2366_v31  ;;  %vm2371_vm4 = vcmp.eq.f32.partialorder %v2369_v58, inf  ;;  %v3648_v57 = vpop.eup %3647 }
 0x605   :  { %v2333_v35 = vsel %vm2331_vm13, -3.4028235e+38, %v2329_v49  ;;  %v2334_v53 = vsel %vm2332_vm3, -3.4028235e+38, %v2330_v50  ;;  %vm2372_vm11 = vcmp.eq.f32.partialorder %v2370_v52, inf  ;;  %v2410_v12 = vmul.f32 %v3646_v26, %v2406_v3 }
 0x606   :  { %v2487_v34 = vmul.f32 6.0, %v2333_v35  ;;  %v2488_v43 = vmul.f32 6.0, %v2334_v53  ;;  %v2373_v54 = vsel %vm2371_vm4, 3.4028235e+38, %v2369_v58  ;;  %v2374_v47 = vsel %vm2372_vm11, 3.4028235e+38, %v2370_v52  ;;  %v3650_v6 = vpop.eup %3649 }
 0x607   :  { %vm2375_vm12 = vcmp.eq.f32.partialorder %v2373_v54, -inf  ;;  %vm2376_vm14 = vcmp.eq.f32.partialorder %v2374_v47, -inf  ;;  %vm2411_vm1 = vcmp.ne.f32.partialorder %v2409_v51, %v2409_v51  ;;  %vm2412_vm6 = vcmp.ne.f32.partialorder %v2410_v12, %v2410_v12 }
 0x608   :  { %v3556_v60 = vtrunc.f32 %v2487_v34  ;;  %v3558_v27 = vtrunc.f32 %v2488_v43  ;;  %v2491_v63 = vmul.f32 0.5, %v2487_v34  ;;  %v2492_v30 = vmul.f32 0.5, %v2488_v43  ;;  %v4636_v39 = vpop.eup %3651 }
 0x609   :  { %v4580_v29 = vsel %vm2375_vm12, -3.4028235e+38, %v2373_v54  ;;  %v4582_v32 = vsel %vm2376_vm14, -3.4028235e+38, %v2374_v47  ;;  %v2413_v48 = vsel %vm2411_vm1, 1e-05, %v2409_v51  ;;  %v2746_v17 = vmul.f32 %v3648_v57, %v2742_v56 }
 0x60a   :  { %v4584_v59 = vcvt.f32.s32 %v3556_v60  ;;  %v4586_v2 = vcvt.f32.s32 %v3558_v27  ;;  %v2493_v1 = vfloor.f32 %v2491_v63  ;;  %v2494_v11 = vfloor.f32 %v2492_v30 }
 0x60b   :  { %v4589_v15 = vsub.f32 1.0, %v4580_v29  ;;  %v2414_v16 = vsel %vm2412_vm6, 1e-05, %v2410_v12  ;;  %vm2415_vm7 = vcmp.eq.f32.partialorder %v2413_v48, inf  ;;  %v2747_v7 = vmul.f32 %v3648_v57, %v2743_v0 }
 0x60c   :  { %v2495_v18 = vmul.f32 2.0, %v2493_v1  ;;  %v2496_v21 = vmul.f32 2.0, %v2494_v11  ;;  %vm5147_vm8 = vcmp.eq.s32.totalorder %v4584_v59, 0  ;;  %vm2508_vm9 = vcmp.eq.s32.totalorder %v4586_v2, 0 }
 0x60d   :  { %vm2509_vm15 = vcmp.eq.s32.totalorder %v4584_v59, 1  ;;  %vm2510_vm2 = vcmp.eq.s32.totalorder %v4586_v2, 1  ;;  %vm5144_vm10 = vcmp.eq.s32.totalorder %v4584_v59, 2  ;;  %vm5145_vm5 = vcmp.eq.s32.totalorder %v4586_v2, 2 }
 0x60e   :  { %v2497_v41 = vsub.f32 %v2487_v34, %v2495_v18  ;;  %v2498_v45 = vsub.f32 %v2488_v43, %v2496_v21  ;;  %vm2513_vm13 = vcmp.eq.s32.totalorder %v4584_v59, 3  ;;  %vm2515_vm4 = vcmp.eq.s32.totalorder %v4584_v59, 4  ;;  %vm4607_vm1 = vmor %vm2509_vm15, %vm5144_vm10 }
 0x60f   :  { %vm5148_vm11 = vcmp.eq.s32.totalorder %v4586_v2, 4  ;;  %vm5146_vm12 = vcmp.eq.s32.totalorder %v4584_v59, 5  ;;  %vm2518_vm14 = vcmp.eq.s32.totalorder %v4586_v2, 5  ;;  %vm2416_vm6 = vcmp.eq.f32.partialorder %v2414_v16, inf  ;;  %vm4616_vm0 = vmor %vm2510_vm2, %vm5145_vm5 }
 0x610   :  { %v3132_v23 = vadd.f32 -1.0, %v2497_v41  ;;  %v3133_v40 = vadd.f32 -1.0, %v2498_v45  ;;  %v2417_v24 = vsel %vm2415_vm7, 3.4028235e+38, %v2413_v48  ;;  %v2418_v13 = vsel %vm2416_vm6, 3.4028235e+38, %v2414_v16  ;;  %vm4627_vm7 = vmor %vm5147_vm8, %vm5146_vm12 }
 0x611   :  { %vm2419_vm3 = vcmp.eq.f32.partialorder %v2417_v24, -inf  ;;  %vm2748_vm10 = vcmp.ne.f32.partialorder %v2746_v17, %v2746_v17  ;;  %vm2420_vm5 = vcmp.eq.f32.partialorder %v2418_v13, -inf  ;;  %v4634_v9 = vmul.f32 %v3650_v6, %v2786_v10  ;;  %vm4642_vm6 = vmor %vm2508_vm9, %vm2518_vm14 }
 0x612   :  { %v2501_v37 = vand.u32 2147483647, %v3132_v23  ;;  %v2502_v3 = vand.u32 2147483647, %v3133_v40  ;;  %v2421_v62 = vsel %vm2419_vm3, -3.4028235e+38, %v2417_v24  ;;  %vm2749_vm12 = vcmp.ne.f32.partialorder %v2747_v7, %v2747_v7  ;;  %vm4650_vm8 = vmor %vm2509_vm15, %vm2515_vm4 }
 0x613   :  { %v2422_v8 = vsel %vm2420_vm5, -3.4028235e+38, %v2418_v13  ;;  %v2750_v55 = vsel %vm2748_vm10, 1e-05, %v2746_v17  ;;  %v4654_v10 = vmul.f32 6.0, %v2421_v62  ;;  %v4659_v31 = vsub.f32 1.0, %v4582_v32  ;;  %vm4665_vm10 = vmor %vm2510_vm2, %vm5148_vm11 }
 0x614   :  { %v2503_v56 = vsub.f32 1.0, %v2501_v37  ;;  %v2504_v0 = vsub.f32 1.0, %v2502_v3  ;;  %v4656_v44 = vmul.f32 6.0, %v2422_v8  ;;  %v2751_v14 = vsel %vm2749_vm12, 1e-05, %v2747_v7 }
 0x615   :  { %vm2752_vm15 = vcmp.eq.f32.partialorder %v2750_v55, inf  ;;  %v4672_v20 = vmul.f32 %v3650_v6, %v2787_v38  ;;  %vm5199_vm5 = vcmp.eq.s32.totalorder %v4584_v59, 0  ;;  %v3552_v58 = vtrunc.f32 %v4654_v10 }
 0x616   :  { %v2505_v22 = vmul.f32 %v2503_v56, %v4580_v29  ;;  %v2506_v49 = vmul.f32 %v2504_v0, %v4582_v32  ;;  %vm4680_vm3 = vmor %vm5199_vm5, %vm2513_vm13  ;;  %v3554_v51 = vtrunc.f32 %v4656_v44  ;;  %vm5202_vm2 = vcmp.eq.s32.totalorder %v4586_v2, 3 }
 0x617   :  { %vm2532_vm12 = vmor %vm2508_vm9, %vm5202_vm2  ;;  %v2429_v36 = vmul.f32 0.5, %v4654_v10  ;;  %v2430_v46 = vmul.f32 0.5, %v4656_v44  ;;  %vm2753_vm11 = vcmp.eq.f32.partialorder %v2751_v14, inf  ;;  %v2754_v38 = vsel %vm2752_vm15, 3.4028235e+38, %v2750_v55 }
 0x618   :  { %v2523_v52 = vsel %vm4650_vm8, %v2505_v22, 0.0  ;;  %v2524_v35 = vsel %vm4665_vm10, %v2506_v49, 0.0  ;;  %v2533_v53 = vsel %vm4680_vm3, %v2505_v22, 0.0  ;;  %v2534_v12 = vsel %vm2532_vm12, %v2506_v49, 0.0  ;;  %vm4702_vm9 = vmor %vm2513_vm13, %vm2515_vm4 }
 0x619   :  { %vm2792_vm15 = vcmp.ne.f32.partialorder %v4634_v9, %v4634_v9  ;;  %v2525_v43 = vsel %vm4627_vm7, %v4580_v29, %v2523_v52  ;;  %v2526_v54 = vsel %vm4642_vm6, %v4582_v32, %v2524_v35  ;;  %v2535_v47 = vsel %vm4607_vm1, %v4580_v29, %v2533_v53  ;;  %vm5209_vm6 = vmmov %vm5202_vm2 }
 0x61a   :  { %v2536_v57 = vsel %vm4616_vm0, %v4582_v32, %v2534_v12  ;;  %vm5205_vm8 = vcmp.eq.s32.totalorder %v4584_v59, 5  ;;  %vm5206_vm13 = vcmp.eq.s32.totalorder %v4584_v59, 2  ;;  %v2527_v60 = vadd.f32 %v2525_v43, %v4589_v15 }
 0x61b   :  { %vm2541_vm4 = vmor %vm5206_vm13, %vm5205_vm8  ;;  %v2528_v27 = vadd.f32 %v2526_v54, %v4659_v31  ;;  %v2537_v63 = vadd.f32 %v2535_v47, %v4589_v15  ;;  %v2538_v30 = vadd.f32 %v2536_v57, %v4659_v31  ;;  %vm5207_vm1 = vcmp.eq.s32.totalorder %v4586_v2, 2 }
 0x61c   :  { %vm2542_vm7 = vmor %vm5207_vm1, %vm2518_vm14  ;;  %vm5208_vm0 = vcmp.eq.s32.totalorder %v4586_v2, 4  ;;  %v2543_v48 = vsel %vm2541_vm4, %v2505_v22, 0.0  ;;  %v4736_v1 = vcvt.f32.s32 %v3552_v58  ;;  %v4738_v11 = vcvt.f32.s32 %v3554_v51 }
 0x61d   :  { %vm2540_vm10 = vmor %vm5209_vm6, %vm5208_vm0  ;;  %v2544_v59 = vsel %vm2542_vm7, %v2506_v49, 0.0  ;;  %v2545_v6 = vsel %vm4702_vm9, %v4580_v29, %v2543_v48  ;;  %vm5210_vm5 = vcmask 130048   ;;  %v2431_v2 = vfloor.f32 %v2429_v36 }
 0x61e   :  { %v2546_v16 = vsel %vm2540_vm10, %v4582_v32, %v2544_v59  ;;  %2558 = vst.msk [vmem:[#allocation2 + $0x30] sm:$0xff] %vm5210_vm5, %v2527_v60  ;;  %vm5211_vm14 = vmmov %vm5210_vm5  ;;  %v2432_v17 = vfloor.f32 %v2430_v46  ;;  %v2547_v18 = vadd.f32 %v2545_v6, %v4589_v15  ;;  %vm2445_vm12 = vcmp.eq.s32.totalorder %v4736_v1, 0 }
 0x61f   :  { %2559 = vst.msk [vmem:[#allocation2 + $0x38] sm:$0xff] %vm5211_vm14, %v2528_v27  ;;  %vm5212_vm3 = vmmov %vm5210_vm5  ;;  %v2548_v21 = vadd.f32 %v2546_v16, %v4659_v31  ;;  %vm2446_vm9 = vcmp.eq.s32.totalorder %v4738_v11, 0  ;;  %v2433_v41 = vmul.f32 2.0, %v2431_v2  ;;  %vm2447_vm8 = vcmp.eq.s32.totalorder %v4736_v1, 1 }
 0x620   :  { %2561 = vst.msk [vmem:[#allocation2 + $0x40] sm:$0xff] %vm5212_vm3, %v2537_v63  ;;  %vm5213_vm2 = vmmov %vm5212_vm3  ;;  %v2434_v45 = vmul.f32 2.0, %v2432_v17  ;;  %vm2448_vm13 = vcmp.eq.s32.totalorder %v4738_v11, 1  ;;  %vm5152_vm7 = vcmp.eq.s32.totalorder %v4736_v1, 2  ;;  %vm5150_vm0 = vcmp.eq.s32.totalorder %v4738_v11, 2 }
 0x621   :  { %2562 = vst.msk [vmem:[#allocation2 + $0x48] sm:$0xff] %vm5213_vm2, %v2538_v30  ;;  %vm5214_vm4 = vmmov %vm5213_vm2  ;;  %v2435_v23 = vsub.f32 %v4654_v10, %v2433_v41  ;;  %vm2453_vm5 = vcmp.eq.s32.totalorder %v4736_v1, 4  ;;  %vm5149_vm14 = vcmp.eq.s32.totalorder %v4738_v11, 4  ;;  %vm2455_vm3 = vcmp.eq.s32.totalorder %v4736_v1, 5 }
 0x622   :  { %2564 = vst.msk [vmem:[#allocation2 + $0x50] sm:$0xff] %vm5214_vm4, %v2547_v18  ;;  %vm5215_vm1 = vmmov %vm5213_vm2  ;;  %v2436_v40 = vsub.f32 %v4656_v44, %v2434_v45  ;;  %vm5151_vm2 = vcmp.eq.s32.totalorder %v4738_v11, 5  ;;  %v2755_v19 = vsel %vm2753_vm11, 3.4028235e+38, %v2751_v14  ;;  %vm2756_vm4 = vcmp.eq.f32.partialorder %v2754_v38, -inf }
 0x623   :  { %2565 = vst.msk [vmem:[#allocation2 + $0x58] sm:$0xff] %vm5215_vm1, %v2548_v21  ;;  %v3130_v24 = vadd.f32 -1.0, %v2435_v23  ;;  %vm4771_vm1 = vmor %vm2447_vm8, %vm5152_vm7  ;;  %vm2757_vm10 = vcmp.eq.f32.partialorder %v2755_v19, -inf  ;;  %v2758_v7 = vsel %vm2756_vm4, -3.4028235e+38, %v2754_v38  ;;  %vm2793_vm11 = vcmp.ne.f32.partialorder %v4672_v20, %v4672_v20 }
 0x624   :  { %v3131_v4 = vadd.f32 -1.0, %v2436_v40  ;;  %vm4779_vm6 = vmor %vm2447_vm8, %vm2453_vm5  ;;  %v2759_v3 = vsel %vm2757_vm10, -3.4028235e+38, %v2755_v19  ;;  %v4783_v42 = vmul.f32 6.0, %v2758_v7  ;;  %v2794_v5 = vsel %vm2792_vm15, 1e-05, %v4634_v9 }
 0x625   :  { %v2439_v62 = vand.u32 2147483647, %v3130_v24  ;;  %vm4795_vm8 = vmor %vm2445_vm12, %vm2455_vm3  ;;  %v4799_v56 = vmul.f32 6.0, %v2759_v3  ;;  %vm2796_vm10 = vcmp.eq.f32.partialorder %v2794_v5, inf  ;;  %v4812_v10 = vsel %vm2793_vm11, 1e-05, %v4672_v20 }
 0x626   :  { %v2440_v8 = vand.u32 2147483647, %v3131_v4  ;;  %vm4805_vm4 = vmor %vm2446_vm9, %vm5151_vm2  ;;  %v3576_v9 = vtrunc.f32 %v4783_v42  ;;  %v2916_v25 = vmul.f32 0.5, %v4783_v42  ;;  %v4814_v44 = vsel %vm2796_vm10, 3.4028235e+38, %v2794_v5 }
 0x627   :  { %v2441_v26 = vsub.f32 1.0, %v2439_v62  ;;  %vm4820_vm15 = vmor %vm2448_vm13, %vm5149_vm14  ;;  %v3578_v49 = vtrunc.f32 %v4799_v56  ;;  %v2917_v50 = vmul.f32 0.5, %v4799_v56  ;;  %v2830_v51 = vsub.f32 %v4535_v28, %v4569_v61 }
 0x628   :  { %v2442_v14 = vsub.f32 1.0, %v2440_v8  ;;  %vm4830_vm11 = vmor %vm2448_vm13, %vm5150_vm0  ;;  %v2918_v58 = vfloor.f32 %v2916_v25  ;;  %v2831_v36 = vsub.f32 %v4543_v33, %v4569_v61  ;;  %vm5228_vm10 = vcmp.eq.s32.totalorder %v4736_v1, 3 }
 0x629   :  { %v2443_v46 = vmul.f32 %v2441_v26, %v4580_v29  ;;  %vm4844_vm14 = vmor %vm2445_vm12, %vm5228_vm10  ;;  %v4848_v35 = vcvt.f32.s32 %v3576_v9  ;;  %vm2797_vm13 = vcmp.eq.f32.partialorder %v4812_v10, inf  ;;  %vm5231_vm0 = vcmp.eq.s32.totalorder %v4738_v11, 3 }
 0x62a   :  { %v2444_v38 = vmul.f32 %v2442_v14, %v4582_v32  ;;  %vm2470_vm2 = vmor %vm2446_vm9, %vm5231_vm0  ;;  %v4855_v28 = vcvt.f32.s32 %v3578_v49  ;;  %v2919_v53 = vfloor.f32 %v2917_v50  ;;  %v2920_v12 = vmul.f32 2.0, %v2918_v58 }
 0x62b   :  { %vm2800_vm7 = vcmp.eq.f32.partialorder %v4814_v44, -inf  ;;  %v2461_v34 = vsel %vm4779_vm6, %v2443_v46, 0.0  ;;  %v2471_v54 = vsel %vm4844_vm14, %v2443_v46, 0.0  ;;  %vm5232_vm12 = vmmov %vm5228_vm10  ;;  %vm5235_vm0 = vcmp.eq.s32.totalorder %v4736_v1, 2 }
 0x62c   :  { %v2462_v43 = vsel %vm4820_vm15, %v2444_v38, 0.0  ;;  %v2472_v47 = vsel %vm2470_vm2, %v2444_v38, 0.0  ;;  %vm4868_vm9 = vmor %vm5232_vm12, %vm2453_vm5  ;;  %v2463_v60 = vsel %vm4795_vm8, %v4580_v29, %v2461_v34  ;;  %v2473_v63 = vsel %vm4771_vm1, %v4580_v29, %v2471_v54 }
 0x62d   :  { %v2464_v27 = vsel %vm4805_vm4, %v4582_v32, %v2462_v43  ;;  %v2474_v30 = vsel %vm4830_vm11, %v4582_v32, %v2472_v47  ;;  %vm2479_vm6 = vmor %vm5235_vm0, %vm2455_vm3  ;;  %v2465_v48 = vadd.f32 %v2463_v60, %v4589_v15  ;;  %v2475_v6 = vadd.f32 %v2473_v63, %v4589_v15 }
 0x62e   :  { %v2466_v59 = vadd.f32 %v2464_v27, %v4659_v31  ;;  %v2476_v16 = vadd.f32 %v2474_v30, %v4659_v31  ;;  %vm5236_vm5 = vcmp.eq.s32.totalorder %v4738_v11, 5  ;;  %vm5237_vm14 = vcmp.eq.s32.totalorder %v4738_v11, 2 }
 0x62f   :  { %vm2480_vm2 = vmor %vm5237_vm14, %vm5236_vm5  ;;  %vm5238_vm1 = vcmp.eq.s32.totalorder %v4738_v11, 4  ;;  %vm5239_vm8 = vcmp.eq.s32.totalorder %v4738_v11, 3  ;;  %v2481_v1 = vsel %vm2479_vm6, %v2443_v46, 0.0  ;;  %v2921_v17 = vmul.f32 2.0, %v2919_v53 }
 0x630   :  { %vm2478_vm4 = vmor %vm5239_vm8, %vm5238_vm1  ;;  %v2482_v2 = vsel %vm2480_vm2, %v2444_v38, 0.0  ;;  %v2922_v18 = vsub.f32 %v4783_v42, %v2920_v12  ;;  %v2483_v21 = vsel %vm4868_vm9, %v4580_v29, %v2481_v1  ;;  %vm5240_vm3 = vcmask 130048  }
 0x631   :  { %v2484_v41 = vsel %vm2478_vm4, %v4582_v32, %v2482_v2  ;;  %2549 = vst.msk [vmem:[#allocation2] sm:$0xff] %vm5240_vm3, %v2465_v48  ;;  %vm5241_vm15 = vmmov %vm5240_vm3  ;;  %vm2934_vm12 = vcmp.eq.s32.totalorder %v4848_v35, 1  ;;  %vm5153_vm0 = vcmp.eq.s32.totalorder %v4848_v35, 2  ;;  %v2485_v11 = vadd.f32 %v2483_v21, %v4589_v15 }
 0x632   :  { %2550 = vst.msk [vmem:[#allocation2 + $0x8] sm:$0xff] %vm5241_vm15, %v2466_v59  ;;  %vm5242_vm11 = vmmov %vm5240_vm3  ;;  %v2486_v45 = vadd.f32 %v2484_v41, %v4659_v31  ;;  %v2923_v29 = vsub.f32 %v4799_v56, %v2921_v17  ;;  %v3148_v23 = vadd.f32 -1.0, %v2922_v18  ;;  %vm2932_vm9 = vcmp.eq.s32.totalorder %v4848_v35, 0 }
 0x633   :  { %2552 = vst.msk [vmem:[#allocation2 + $0x10] sm:$0xff] %vm5242_vm11, %v2475_v6  ;;  %vm5243_vm10 = vmmov %vm5240_vm3  ;;  %vm2933_vm6 = vcmp.eq.s32.totalorder %v4855_v28, 0  ;;  %vm2935_vm5 = vcmp.eq.s32.totalorder %v4855_v28, 1  ;;  %vm5156_vm14 = vcmp.eq.s32.totalorder %v4848_v35, 4  ;;  %vm2938_vm8 = vcmp.eq.s32.totalorder %v4848_v35, 3 }
 0x634   :  { %2553 = vst.msk [vmem:[#allocation2 + $0x18] sm:$0xff] %vm5243_vm10, %v2476_v16  ;;  %vm5244_vm2 = vmmov %vm5240_vm3  ;;  %v3149_v32 = vadd.f32 -1.0, %v2923_v29  ;;  %v2926_v40 = vand.u32 2147483647, %v3148_v23  ;;  %vm5155_vm4 = vcmp.eq.s32.totalorder %v4848_v35, 5  ;;  %vm2941_vm15 = vcmp.eq.s32.totalorder %v4855_v28, 4 }
 0x635   :  { %2555 = vst.msk [vmem:[#allocation2 + $0x20] sm:$0xff] %vm5244_vm2, %v2485_v11  ;;  %vm5245_vm1 = vmmov %vm5244_vm2  ;;  %vm5154_vm11 = vcmp.eq.s32.totalorder %v4855_v28, 5  ;;  %v2799_v31 = vsel %vm2797_vm13, 3.4028235e+38, %v4812_v10  ;;  %v2834_v24 = vmul.f32 %v4636_v39, %v2830_v51  ;;  %v4947_v7 = vsel %vm2800_vm7, -3.4028235e+38, %v4814_v44 }
 0x636   :  { %2556 = vst.msk [vmem:[#allocation2 + $0x28] sm:$0xff] %vm5245_vm1, %v2486_v45  ;;  %vm4926_vm3 = vmor %vm2934_vm12, %vm5153_vm0  ;;  %v2927_v4 = vand.u32 2147483647, %v3149_v32  ;;  %v2928_v13 = vsub.f32 1.0, %v2926_v40  ;;  %vm2801_vm2 = vcmp.eq.f32.partialorder %v2799_v31, -inf  ;;  %v2835_v5 = vmul.f32 %v4636_v39, %v2831_v36 }
 0x637   :  { %vm4939_vm10 = vmor %vm2934_vm12, %vm5156_vm14  ;;  %vm2937_vm12 = vcmp.eq.s32.totalorder %v4855_v28, 2  ;;  %v4958_v3 = vsel %vm2801_vm2, -3.4028235e+38, %v2799_v31  ;;  %vm2836_vm7 = vcmp.ne.f32.partialorder %v2834_v24, %v2834_v24  ;;  %vm2939_vm0 = vcmp.eq.s32.totalorder %v4855_v28, 3 }
 0x638   :  { %vm4953_vm13 = vmor %vm2932_vm9, %vm5155_vm4  ;;  %v2929_v62 = vsub.f32 1.0, %v2927_v4  ;;  %v2930_v8 = vmul.f32 %v2928_v13, %v4947_v7  ;;  %v2838_v56 = vsel %vm2836_vm7, 1e-05, %v2834_v24  ;;  %v4983_v0 = vsub.f32 1.0, %v4947_v7 }
 0x639   :  { %vm4964_vm1 = vmor %vm2933_vm6, %vm5154_vm11  ;;  %v4986_v33 = vsub.f32 1.0, %v4958_v3  ;;  %vm2837_vm4 = vcmp.ne.f32.partialorder %v2835_v5, %v2835_v5  ;;  %vm2840_vm14 = vcmp.eq.f32.partialorder %v2838_v56, inf }
 0x63a   :  { %vm4978_vm2 = vmor %vm2935_vm5, %vm2941_vm15  ;;  %v2931_v61 = vmul.f32 %v2929_v62, %v4958_v3  ;;  %v2948_v39 = vsel %vm4939_vm10, %v2930_v8, 0.0  ;;  %v2839_v25 = vsel %vm2837_vm4, 1e-05, %v2835_v5  ;;  %v2842_v26 = vsel %vm2840_vm14, 3.4028235e+38, %v2838_v56 }
 0x63b   :  { %vm2956_vm11 = vmor %vm2932_vm9, %vm2938_vm8  ;;  %v2950_v10 = vsel %vm4953_vm13, %v4947_v7, %v2948_v39  ;;  %vm2841_vm10 = vcmp.eq.f32.partialorder %v2839_v25, inf  ;;  %vm5258_vm14 = vcmp.eq.s32.totalorder %v4848_v35, 2  ;;  %vm5259_vm13 = vcmp.eq.s32.totalorder %v4855_v28, 5 }
 0x63c   :  { %vm2955_vm7 = vmor %vm2935_vm5, %vm2937_vm12  ;;  %v2958_v9 = vsel %vm2956_vm11, %v2930_v8, 0.0  ;;  %v2949_v14 = vsel %vm4978_vm2, %v2931_v61, 0.0  ;;  %v2952_v22 = vadd.f32 %v2950_v10, %v4983_v0  ;;  %vm5256_vm5 = vcmp.eq.s32.totalorder %v4848_v35, 4 }
 0x63d   :  { %vm2957_vm9 = vmor %vm2933_vm6, %vm2939_vm0  ;;  %v2960_v44 = vsel %vm4926_vm3, %v4947_v7, %v2958_v9  ;;  %v2951_v20 = vsel %vm4964_vm1, %v4958_v3, %v2949_v14  ;;  %vm5257_vm6 = vcmp.eq.s32.totalorder %v4848_v35, 5  ;;  %v2843_v51 = vsel %vm2841_vm10, 3.4028235e+38, %v2839_v25 }
 0x63e   :  { %v2959_v49 = vsel %vm2957_vm9, %v2931_v61, 0.0  ;;  %v2962_v50 = vadd.f32 %v2960_v44, %v4983_v0  ;;  %vm2964_vm4 = vmor %vm2938_vm8, %vm5256_vm5  ;;  %vm2844_vm11 = vcmp.eq.f32.partialorder %v2842_v26, -inf  ;;  %v2953_v36 = vadd.f32 %v2951_v20, %v4986_v33 }
 0x63f   :  { %v2961_v58 = vsel %vm2955_vm7, %v4958_v3, %v2959_v49  ;;  %vm2966_vm3 = vmor %vm5258_vm14, %vm5257_vm6  ;;  %vm5260_vm1 = vcmask 130048   ;;  %vm2845_vm7 = vcmp.eq.f32.partialorder %v2843_v51, -inf  ;;  %v2846_v53 = vsel %vm2844_vm11, -3.4028235e+38, %v2842_v26 }
 0x640   :  { %v2963_v46 = vadd.f32 %v2961_v58, %v4986_v33  ;;  %vm2967_vm8 = vmor %vm2937_vm12, %vm5259_vm13  ;;  %v2968_v38 = vsel %vm2966_vm3, %v2930_v8, 0.0  ;;  %2984 = vst.msk [vmem:[#allocation2 + $0x90] sm:$0xff] %vm5260_vm1, %v2952_v22  ;;  %v2847_v12 = vsel %vm2845_vm7, -3.4028235e+38, %v2843_v51  ;;  %v2850_v54 = vmul.f32 6.0, %v2846_v53 }
 0x641   :  { %vm5261_vm2 = vmmov %vm5260_vm1  ;;  %v2969_v52 = vsel %vm2967_vm8, %v2931_v61, 0.0  ;;  %v2970_v35 = vsel %vm2964_vm4, %v4947_v7, %v2968_v38  ;;  %v2851_v47 = vmul.f32 6.0, %v2847_v12 }
 0x642   :  { %2987 = vst.msk [vmem:[#allocation2 + $0xa0] sm:$0xff] %vm5261_vm2, %v2962_v50  ;;  %vm2965_vm9 = vmor %vm2939_vm0, %vm2941_vm15  ;;  %v2972_v43 = vadd.f32 %v2970_v35, %v4983_v0  ;;  %v3572_v28 = vtrunc.f32 %v2850_v54  ;;  %v2854_v27 = vmul.f32 0.5, %v2850_v54 }
 0x643   :  { %v2971_v34 = vsel %vm2965_vm9, %v4958_v3, %v2969_v52  ;;  %vm5262_vm12 = vmmov %vm5260_vm1  ;;  %v3574_v60 = vtrunc.f32 %v2851_v47  ;;  %v2855_v63 = vmul.f32 0.5, %v2851_v47 }
 0x644   :  { %2985 = vst.msk [vmem:[#allocation2 + $0x98] sm:$0xff] %vm5262_vm12, %v2953_v36  ;;  %vm5263_vm10 = vmmov %vm5260_vm1  ;;  %v2973_v57 = vadd.f32 %v2971_v34, %v4986_v33  ;;  %v3573_v30 = vcvt.f32.s32 %v3572_v28  ;;  %v2856_v59 = vfloor.f32 %v2854_v27 }
 0x645   :  { %2988 = vst.msk [vmem:[#allocation2 + $0xa8] sm:$0xff] %vm5263_vm10, %v2963_v46  ;;  %vm5264_vm5 = vmmov %vm5260_vm1  ;;  %v3575_v48 = vcvt.f32.s32 %v3574_v60  ;;  %v2857_v6 = vfloor.f32 %v2855_v63 }
 0x646   :  { %2990 = vst.msk [vmem:[#allocation2 + $0xb0] sm:$0xff] %vm5264_vm5, %v2972_v43  ;;  %vm5265_vm0 = vmmov %vm5260_vm1  ;;  %v2858_v16 = vmul.f32 2.0, %v2856_v59  ;;  %vm2872_vm15 = vcmp.eq.s32.totalorder %v3573_v30, 1  ;;  %vm5158_vm4 = vcmp.eq.s32.totalorder %v3573_v30, 2  ;;  %vm2870_vm3 = vcmp.eq.s32.totalorder %v3573_v30, 0 }
 0x647   :  { %2991 = vst.msk [vmem:[#allocation2 + $0xb8] sm:$0xff] %vm5265_vm0, %v2973_v57  ;;  %v2859_v1 = vmul.f32 2.0, %v2857_v6  ;;  %vm2873_vm6 = vcmp.eq.s32.totalorder %v3575_v48, 1  ;;  %vm5157_vm14 = vcmp.eq.s32.totalorder %v3575_v48, 2  ;;  %vm5159_vm11 = vcmp.eq.s32.totalorder %v3573_v30, 5  ;;  %vm5047_vm1 = vmor %vm2872_vm15, %vm5158_vm4 }
 0x648   :  { %v2860_v2 = vsub.f32 %v2850_v54, %v2858_v16  ;;  %vm2871_vm13 = vcmp.eq.s32.totalorder %v3575_v48, 0  ;;  %vm5160_vm8 = vcmp.eq.s32.totalorder %v3575_v48, 5  ;;  %vm2878_vm2 = vcmp.eq.s32.totalorder %v3573_v30, 4  ;;  %vm5053_vm7 = vmor %vm2873_vm6, %vm5157_vm14 }
 0x649   :  { %v2861_v17 = vsub.f32 %v2851_v47, %v2859_v1  ;;  %vm2879_vm9 = vcmp.eq.s32.totalorder %v3575_v48, 4  ;;  %vm5059_vm12 = vmor %vm2870_vm3, %vm5159_vm11  ;;  %vm2876_vm10 = vcmp.eq.s32.totalorder %v3573_v30, 3  ;;  %vm2877_vm0 = vcmp.eq.s32.totalorder %v3575_v48, 3 }
 0x64a   :  { %v3146_v18 = vadd.f32 -1.0, %v2860_v2  ;;  %vm5065_vm5 = vmor %vm2871_vm13, %vm5160_vm8 }
 0x64b   :  { %v3147_v21 = vadd.f32 -1.0, %v2861_v17  ;;  %vm2884_vm14 = vmor %vm2872_vm15, %vm2878_vm2 }
 0x64c   :  { %v2864_v45 = vand.u32 2147483647, %v3146_v18  ;;  %vm2885_vm4 = vmor %vm2873_vm6, %vm2879_vm9  ;;  %vm5277_vm6 = vcmp.eq.s32.totalorder %v3573_v30, 2 }
 0x64d   :  { %v2865_v29 = vand.u32 2147483647, %v3147_v21  ;;  %vm2894_vm11 = vmor %vm2870_vm3, %vm2876_vm10  ;;  %vm5278_vm3 = vcmp.eq.s32.totalorder %v3575_v48, 5 }
 0x64e   :  { %v2866_v40 = vsub.f32 1.0, %v2864_v45  ;;  %vm2895_vm8 = vmor %vm2871_vm13, %vm2877_vm0 }
 0x64f   :  { %v2867_v15 = vsub.f32 1.0, %v2865_v29  ;;  %vm5081_vm15 = vmor %vm2876_vm10, %vm2878_vm2 }
 0x650   :  { %v2868_v31 = vmul.f32 %v2866_v40, %v4947_v7 }
 0x651   :  { %v2869_v19 = vmul.f32 %v2867_v15, %v4958_v3 }
 0x652   :  { %v2886_v24 = vsel %vm2884_vm14, %v2868_v31, 0.0  ;;  %v2896_v13 = vsel %vm2894_vm11, %v2868_v31, 0.0  ;;  %vm5279_vm11 = vcmp.eq.s32.totalorder %v3575_v48, 2 }
 0x653   :  { %v2887_v4 = vsel %vm2885_vm4, %v2869_v19, 0.0  ;;  %v2897_v37 = vsel %vm2895_vm8, %v2869_v19, 0.0  ;;  %v2888_v5 = vsel %vm5059_vm12, %v4947_v7, %v2886_v24  ;;  %v2898_v8 = vsel %vm5047_vm1, %v4947_v7, %v2896_v13  ;;  %vm2905_vm13 = vmor %vm5279_vm11, %vm5278_vm3 }
 0x654   :  { %v2889_v62 = vsel %vm5065_vm5, %v4958_v3, %v2887_v4  ;;  %v2899_v55 = vsel %vm5053_vm7, %v4958_v3, %v2897_v37  ;;  %vm5276_vm4 = vcmp.eq.s32.totalorder %v3573_v30, 5  ;;  %v2890_v56 = vadd.f32 %v2888_v5, %v4983_v0  ;;  %vm2903_vm8 = vmor %vm2877_vm0, %vm2879_vm9 }
 0x655   :  { %vm2904_vm14 = vmor %vm5277_vm6, %vm5276_vm4  ;;  %v2891_v61 = vadd.f32 %v2889_v62, %v4986_v33  ;;  %v2900_v39 = vadd.f32 %v2898_v8, %v4983_v0  ;;  %v2901_v9 = vadd.f32 %v2899_v55, %v4986_v33  ;;  %v2907_v10 = vsel %vm2905_vm13, %v2869_v19, 0.0 }
 0x656   :  { %v2906_v25 = vsel %vm2904_vm14, %v2868_v31, 0.0  ;;  %v2909_v26 = vsel %vm2903_vm8, %v4958_v3, %v2907_v10  ;;  %vm5280_vm1 = vcmask 130048  }
 0x657   :  { %v2908_v44 = vsel %vm5081_vm15, %v4947_v7, %v2906_v25  ;;  %2975 = vst.msk [vmem:[#allocation2 + $0x60] sm:$0xff] %vm5280_vm1, %v2890_v56  ;;  %vm5281_vm2 = vmmov %vm5280_vm1  ;;  %v2911_v22 = vadd.f32 %v2909_v26, %v4986_v33 }
 0x658   :  { %2976 = vst.msk [vmem:[#allocation2 + $0x68] sm:$0xff] %vm5281_vm2, %v2891_v61  ;;  %vm5282_vm7 = vmmov %vm5280_vm1  ;;  %v2910_v14 = vadd.f32 %v2908_v44, %v4983_v0 }
 0x659   :  { %2978 = vst.msk [vmem:[#allocation2 + $0x70] sm:$0xff] %vm5282_vm7, %v2900_v39  ;;  %vm5283_vm12 = vmmov %vm5280_vm1 }
 0x65a   :  { %2979 = vst.msk [vmem:[#allocation2 + $0x78] sm:$0xff] %vm5283_vm12, %v2901_v9  ;;  %vm5284_vm9 = vmmov %vm5280_vm1 }
 0x65b   :  { %2981 = vst.msk [vmem:[#allocation2 + $0x80] sm:$0xff] %vm5284_vm9, %v2910_v14  ;;  %vm5285_vm10 = vmmov %vm5280_vm1 }
 0x65c   :  { %2982 = vst.msk [vmem:[#allocation2 + $0x88] sm:$0xff] %vm5285_vm10, %v2911_v22 }
 0x65d   :  { %3664 = shalt.err (!%p3661_p4)
}
 0x65e   :  { %s3665_s14 = scalar_lea.hbm %s5140_s9, 3072 }
 0x65f   :  { %p3666_p5 = scmp.ne.s32.totalorder %s5140_s9, %s3665_s14  ;;  %p3669_p6 = scmp.lt.u32.totalorder %s3665_s14, %s5140_s9 }
 0x661   :  { %p3671_p7 = pnand %p3669_p6, %p3666_p5 }
 0x663   :  { %3674 = shalt.err (!%p3671_p7)
}
 0x664   :  { %s3680_s4 = smov 128   ;;  %s3681_s6 = smov 8  }
 0x665   :  { %3003 = dma.vmem_to_hbm [thread:$0]  %s2998_s10, 3072, %s5140_s9, [#allocation3], %s3680_s4, %s3680_s4, %s3681_s6  }
 0x666   :  { %3675 = dma.done.wait [#allocation3], 3072  }
 0x667   :  { %3676 = vsyncadd [#allocation3], 4294964224 }
 0x668   :  { %3007 = vsyncpa [#allocation3], 1 }

</bundles_post_ra>
